<compile_context>
chip_gen: v7x
topology: tpu7x:2x2x1
jax: 0.10.0
libtpu: 0.0.40
codegen_flags: <defaults>
</compile_context>

<pallas_src>
import itertools
from functools import partial

import numpy as np
import jax
import jax.numpy as jnp
from jax.experimental import pallas as pl
from jax.experimental.pallas import tpu as pltpu


def _round_up(x, m):
    return (x + m - 1) // m * m


# -----------------------------------------------------------------------------
# Tiled GEMM kernel:  out = epilogue( x @ w )
# epilogue (last K step only): + bias -> act -> + residual -> tanh -> cast
# -----------------------------------------------------------------------------
def _mm_kernel(x_ref, w_ref, b_ref, *rest, act, post_act, has_res):
    if has_res:
        res_ref, o_ref, acc_ref = rest
    else:
        o_ref, acc_ref = rest
        res_ref = None

    k = pl.program_id(2)

    @pl.when(k == 0)
    def _():
        acc_ref[...] = jnp.zeros_like(acc_ref)

    acc_ref[...] += jnp.dot(x_ref[...], w_ref[...],
                            preferred_element_type=jnp.float32)

    @pl.when(k == pl.num_programs(2) - 1)
    def _():
        acc = acc_ref[...] + b_ref[...].astype(jnp.float32)
        if act == "relu":
            acc = jnp.maximum(acc, 0.0)
        elif act == "leaky":
            acc = jnp.where(acc > 0, acc, 0.2 * acc)
        if has_res:
            acc = acc + res_ref[...].astype(jnp.float32)
        if post_act == "tanh":
            acc = jnp.tanh(acc)
        o_ref[...] = acc.astype(o_ref.dtype)


def pallas_matmul(x, w, b, act="none", res=None, post_act="none",
                  out_dtype=jnp.float32):
    """x:(M,K) @ w:(K,N) + b:(N,), optional ReLU / residual / tanh epilogue."""
    M, K = x.shape
    N = w.shape[1]

    tm = min(256, _round_up(M, 16))                 # bf16 sublane packing
    n128 = _round_up(N, 128)
    tn = 256 if n128 % 256 == 0 else 128            # v6e/v7x 256-wide MXU panels
    tk = min(512, _round_up(K, 128))

    Mp, Kp, Np = _round_up(M, tm), _round_up(K, tk), _round_up(N, tn)

    xp = jnp.pad(x.astype(jnp.bfloat16), ((0, Mp - M), (0, Kp - K)))
    wp = jnp.pad(w.astype(jnp.bfloat16), ((0, Kp - K), (0, Np - N)))
    bp = jnp.pad(b.astype(jnp.float32), (0, Np - N)).reshape(1, Np)

    inputs = [xp, wp, bp]
    in_specs = [
        pl.BlockSpec((tm, tk), lambda i, j, k: (i, k)),
        pl.BlockSpec((tk, tn), lambda i, j, k: (k, j)),
        pl.BlockSpec((1, tn), lambda i, j, k: (0, j)),
    ]
    if res is not None:
        rp = jnp.pad(res.astype(jnp.float32), ((0, Mp - M), (0, Np - N)))
        inputs.append(rp)
        in_specs.append(pl.BlockSpec((tm, tn), lambda i, j, k: (i, j)))

    kern = partial(_mm_kernel, act=act, post_act=post_act,
                   has_res=res is not None)

    out = pl.pallas_call(
        kern,
        out_shape=jax.ShapeDtypeStruct((Mp, Np), out_dtype),
        grid_spec=pltpu.PrefetchScalarGridSpec(
            num_scalar_prefetch=0,
            grid=(Mp // tm, Np // tn, Kp // tk),
            in_specs=in_specs,
            out_specs=pl.BlockSpec((tm, tn), lambda i, j, k: (i, j)),
            scratch_shapes=[pltpu.VMEM((tm, tn), jnp.float32)],
        ),
        compiler_params=pltpu.CompilerParams(
            dimension_semantics=("parallel", "parallel", "arbitrary"),
            vmem_limit_bytes=32 * 1024 * 1024,
        ),
    )(*inputs)

    if (Mp, Np) != (M, N):
        out = out[:M, :N]
    return out


# -----------------------------------------------------------------------------
# Fused GRU scan kernel: hidden state lives in VMEM across the T grid axis,
# PyTorch gate ordering (r, z, n) and equations.
# -----------------------------------------------------------------------------
def _gru_scan_kernel(gx_ref, whh_ref, bhh_ref, hout_ref, h_ref):
    t = pl.program_id(0)

    @pl.when(t == 0)
    def _():
        h_ref[...] = jnp.zeros_like(h_ref)          # h0 = 0

    cp = h_ref.shape[-1]                            # 128-aligned gate width
    h = h_ref[...]
    gh = jnp.dot(h, whh_ref[...], preferred_element_type=jnp.float32)
    gh = gh + bhh_ref[...]
    gx = gx_ref[0]                                  # (Nb, 3*cp), bias already added
    r = jax.nn.sigmoid(gx[:, :cp] + gh[:, :cp])
    z = jax.nn.sigmoid(gx[:, cp:2 * cp] + gh[:, cp:2 * cp])
    n = jnp.tanh(gx[:, 2 * cp:] + r * gh[:, 2 * cp:])
    h_new = (1.0 - z) * n + z * h
    h_ref[...] = h_new
    hout_ref[0] = h_new.astype(hout_ref.dtype)


def gru_forward(code, w_ih, w_hh, b_ih, b_hh):
    """Single-layer batch_first GRU (PyTorch convention), h0=0.
       code: (N, T, C)  ->  all hidden states (N, T, C)."""
    N, T, C = code.shape
    Cp = _round_up(C, 128)
    C3p = 3 * Cp
    Nb = _round_up(N, 8)

    def gate_pad_w(w_t):            # (K, 3C) -> (K, 3*Cp), per-gate lane aligned
        out = jnp.zeros((w_t.shape[0], C3p), jnp.float32)
        for g in range(3):
            out = out.at[:, g * Cp:g * Cp + C].set(w_t[:, g * C:(g + 1) * C])
        return out

    def gate_pad_b(v):
        out = jnp.zeros((C3p,), jnp.float32)
        for g in range(3):
            out = out.at[g * Cp:g * Cp + C].set(v[g * C:(g + 1) * C])
        return out

    wih_p = gate_pad_w(w_ih.T)                                   # (C,  3*Cp)
    whh_p = jnp.pad(gate_pad_w(w_hh.T), ((0, Cp - C), (0, 0)))   # (Cp, 3*Cp)
    bih_p = gate_pad_b(b_ih)
    bhh_p = gate_pad_b(b_hh).reshape(1, C3p)

    # Input projection for every timestep: one batched tiled GEMM (bias folded).
    gx = pallas_matmul(code.reshape(N * T, C), wih_p, bih_p)     # (N*T, 3*Cp)
    gx = jnp.transpose(gx.reshape(N, T, C3p), (1, 0, 2))         # (T, N, 3*Cp)
    gx = jnp.pad(gx, ((0, 0), (0, Nb - N), (0, 0)))              # (T, Nb, 3*Cp)

    hout = pl.pallas_call(
        _gru_scan_kernel,
        out_shape=jax.ShapeDtypeStruct((T, Nb, Cp), jnp.float32),
        grid_spec=pltpu.PrefetchScalarGridSpec(
            num_scalar_prefetch=0,
            grid=(T,),
            in_specs=[pl.BlockSpec((1, Nb, C3p), lambda t: (t, 0, 0)),
                      pl.BlockSpec((Cp, C3p), lambda t: (0, 0)),
                      pl.BlockSpec((1, C3p), lambda t: (0, 0))],
            out_specs=pl.BlockSpec((1, Nb, Cp), lambda t: (t, 0, 0)),
            scratch_shapes=[pltpu.VMEM((Nb, Cp), jnp.float32)],
        ),
        compiler_params=pltpu.CompilerParams(
            dimension_semantics=("arbitrary",),   # sequential: state carried in VMEM
            vmem_limit_bytes=32 * 1024 * 1024,
        ),
    )(gx, whh_p, bhh_p)

    return jnp.transpose(hout[:, :N, :C], (1, 0, 2))             # (N, T, C)


# -----------------------------------------------------------------------------
# Convolution = im2col (bf16, stride 1) + tiled Pallas GEMM
# -----------------------------------------------------------------------------
def _im2col(x, k, pad):
    nd = x.ndim - 2
    xp = jnp.pad(x.astype(jnp.bfloat16),
                 [(0, 0)] + [(pad, pad)] * nd + [(0, 0)])
    out_sizes = tuple(x.shape[1 + d] + 2 * pad - k + 1 for d in range(nd))
    patches = []
    for offs in itertools.product(range(k), repeat=nd):
        idx = [slice(None)]
        for d, o in enumerate(offs):
            idx.append(slice(o, o + out_sizes[d]))
        idx.append(slice(None))
        patches.append(xp[tuple(idx)])
    return jnp.concatenate(patches, axis=-1), out_sizes


def conv(x, w, b, pad, act="none", res=None, post_act="none",
         out_dtype=jnp.float32):
    """Stride-1 N-D conv, channels-last.  w: (k,..,k, Cin, Cout)."""
    k = w.shape[0]
    cout = w.shape[-1]
    if k == 1:
        cols, out_sizes = x, x.shape[1:-1]
    else:
        cols, out_sizes = _im2col(x, k, pad)
    M = x.shape[0] * int(np.prod(out_sizes))
    xmat = cols.reshape(M, -1)
    wmat = w.reshape(-1, cout)
    rmat = None if res is None else res.reshape(M, cout)
    y = pallas_matmul(xmat, wmat, b, act=act, res=rmat, post_act=post_act,
                      out_dtype=out_dtype)
    return y.reshape((x.shape[0],) + tuple(out_sizes) + (cout,))


def upsample_nearest(x, scale):
    for ax, s in enumerate(scale, start=1):
        if s > 1:
            x = jnp.repeat(x, s, axis=ax)
    return x


# TODO(synk): GBlock source not provided — reconstructed as the standard
#             generator residual up-block: nearest-upsample(stride) ->
#             conv3x3x3 (ReLU) -> conv3x3x3, plus conv1x1x1 shortcut;
#             spectral_norm is a weight re-parameterisation (no-op for the
#             synthetic weights used here).
def gblock(x, p, scale, final_tanh=False, out_dtype=jnp.bfloat16):
    u = upsample_nearest(x, scale)
    h = conv(u, p["w1"], p["b1"], pad=1, act="relu", out_dtype=jnp.bfloat16)
    sc = conv(u, p["ws"], p["bs"], pad=0, out_dtype=jnp.float32)
    return conv(h, p["w2"], p["b2"], pad=1, res=sc,
                post_act="tanh" if final_tanh else "none",
                out_dtype=out_dtype)


# -----------------------------------------------------------------------------
# Parameters (deterministic synthetic init)
# -----------------------------------------------------------------------------
def init_params(key, dim_Z, cond_size, n_colors, base_width):
    code = dim_Z + cond_size
    keys = iter(jax.random.split(key, 32))

    def w(shape, scale=0.08):
        return scale * jax.random.normal(next(keys), shape, jnp.float32)

    def b(n):
        return jnp.zeros((n,), jnp.float32)

    def gblock_params(cin, cout):
        return dict(w1=w((3, 3, 3, cin, cout)), b1=b(cout),
                    w2=w((3, 3, 3, cout, cout)), b2=b(cout),
                    ws=w((1, 1, 1, cin, cout)), bs=b(cout))

    return dict(
        gru_w_ih=w((3 * code, code)), gru_b_ih=b(3 * code),
        gru_w_hh=w((3 * code, code)), gru_b_hh=b(3 * code),
        g1=gblock_params(code, base_width * 8),
        g2=gblock_params(base_width * 8, base_width * 4),
        g3=gblock_params(base_width * 4, base_width * 2),
        g4=gblock_params(base_width * 2, base_width),
        g5=gblock_params(base_width, n_colors),
    )


# -----------------------------------------------------------------------------
# Forward pass
# -----------------------------------------------------------------------------
def simple_video_generator(c, noise, P):
    """c: (N, cond_size) condition; noise: (N, T, dim_Z) ~ N(0,1).
       Returns video (N, n_colors, T, 32, 32) in [-1, 1]."""
    N, cond_size = c.shape
    T = noise.shape[1]

    # code[..., :dim_Z] = noise ; code[..., dim_Z:] = c  (broadcast over time)
    code = jnp.concatenate(
        [noise, jnp.broadcast_to(c[:, None, :], (N, T, cond_size))],
        axis=-1).astype(jnp.float32)

    # H, _ = gru(code);  H.permute(0,2,1)[..., None, None]  ==  (N, T, 1, 1, C)
    # in the channels-last layout used here.
    H = gru_forward(code, P["gru_w_ih"], P["gru_w_hh"],
                    P["gru_b_ih"], P["gru_b_hh"])            # (N, T, C)
    x = H.reshape(N, T, 1, 1, -1)

    # main: 5 GBlocks, each upsampling H,W by 2, followed by Tanh (fused into
    # the last conv's epilogue).
    x = gblock(x, P["g1"], (1, 2, 2))
    x = gblock(x, P["g2"], (1, 2, 2))
    x = gblock(x, P["g3"], (1, 2, 2))
    x = gblock(x, P["g4"], (1, 2, 2))
    x = gblock(x, P["g5"], (1, 2, 2), final_tanh=True, out_dtype=jnp.float32)

    # channels-last -> NCDHW
    return jnp.transpose(x, (0, 4, 1, 2, 3))


# -----------------------------------------------------------------------------
if __name__ == "__main__":
    dim_Z, cond_size, n_colors, base_width, vlen = 16, 16, 3, 8, 4
    N = 2

    key = jax.random.PRNGKey(0)
    kp, kc, kz = jax.random.split(key, 3)
    params = init_params(kp, dim_Z, cond_size, n_colors, base_width)

    c = jax.random.normal(kc, (N, cond_size), jnp.float32)
    noise = jax.random.normal(kz, (N, vlen, dim_Z), jnp.float32)

    out = jax.jit(simple_video_generator)(c, noise, params)
    out = jax.block_until_ready(out)

    assert out.shape == (N, n_colors, vlen, 32, 32), out.shape
    assert bool(jnp.all(jnp.isfinite(out)))
    assert bool(jnp.all(jnp.abs(out) <= 1.0))
    print("KERNEL_OK")
</pallas_src>

<mosaic_0001>
module attributes {stable_mosaic.version = 11 : i64} {
  func.func @_mm_kernel(%arg0: i32, %arg1: i32, %arg2: i32, %arg3: memref<16x128xbf16, #tpu.memory_space<vmem>>, %arg4: memref<128x128xbf16, #tpu.memory_space<vmem>>, %arg5: memref<1x128xf32, #tpu.memory_space<vmem>>, %arg6: memref<16x128xf32, #tpu.memory_space<vmem>>, %arg7: memref<16x128xf32, #tpu.memory_space<vmem>>) attributes {dimension_semantics = [#tpu.dimension_semantics<parallel>, #tpu.dimension_semantics<parallel>, #tpu.dimension_semantics<arbitrary>], iteration_bounds = array<i64: 1, 3, 1>, scalar_prefetch = 0 : i64, scratch_operands = 1 : i64, tpu.core_type = #tpu.core_type<tc>, window_params = [{transform_indices = @transform_0, window_bounds = array<i64: 16, 128>}, {transform_indices = @transform_1, window_bounds = array<i64: 128, 128>}, {transform_indices = @transform_2, window_bounds = array<i64: 1, 128>}, {transform_indices = @transform_3, window_bounds = array<i64: 16, 128>}]} {
    %c0_i32 = arith.constant 0 : i32
    %0 = arith.cmpi eq, %arg2, %c0_i32 : i32
    %1 = arith.extui %0 : i1 to i32
    %c0_i32_0 = arith.constant 0 : i32
    %2 = arith.cmpi ne, %1, %c0_i32_0 : i32
    scf.if %2 {
      %cst_10 = arith.constant 0.000000e+00 : f32
      %12 = vector.broadcast %cst_10 : f32 to vector<16x128xf32>
      %c0_11 = arith.constant 0 : index
      %c0_12 = arith.constant 0 : index
      %13 = vector.load %arg7[%c0_11, %c0_12] : memref<16x128xf32, #tpu.memory_space<vmem>>, vector<16x128xf32>
      tpu.vector_store %arg7[%c0_11, %c0_12], %12 {strides = array<i32>} : memref<16x128xf32, #tpu.memory_space<vmem>>, vector<16x128xf32>,
    } else {
    }
    %c0 = arith.constant 0 : index
    %c0_1 = arith.constant 0 : index
    %3 = vector.load %arg7[%c0, %c0_1] : memref<16x128xf32, #tpu.memory_space<vmem>>, vector<16x128xf32>
    %c0_2 = arith.constant 0 : index
    %c0_3 = arith.constant 0 : index
    %4 = vector.load %arg3[%c0_2, %c0_3] : memref<16x128xbf16, #tpu.memory_space<vmem>>, vector<16x128xbf16>
    %c0_4 = arith.constant 0 : index
    %c0_5 = arith.constant 0 : index
    %5 = vector.load %arg4[%c0_4, %c0_5] : memref<128x128xbf16, #tpu.memory_space<vmem>>, vector<128x128xbf16>
    %cst = arith.constant dense<0.000000e+00> : vector<16x128xf32>
    %6 = tpu.matmul %4, %5, %cst {dimension_numbers = #tpu.dot_dimension_numbers<[1], [0], [0], [1], [0, 0, 1, 1], [], []>} : vector<16x128xbf16>, vector<128x128xbf16>, vector<16x128xf32> -> vector<16x128xf32>
    %7 = arith.addf %3, %6 : vector<16x128xf32>
    %c0_6 = arith.constant 0 : index
    %c0_7 = arith.constant 0 : index
    %8 = vector.load %arg7[%c0_6, %c0_7] : memref<16x128xf32, #tpu.memory_space<vmem>>, vector<16x128xf32>
    tpu.vector_store %arg7[%c0_6, %c0_7], %7 {strides = array<i32>} : memref<16x128xf32, #tpu.memory_space<vmem>>, vector<16x128xf32>,
    %c0_i32_8 = arith.constant 0 : i32
    %9 = arith.cmpi eq, %arg2, %c0_i32_8 : i32
    %10 = arith.extui %9 : i1 to i32
    %c0_i32_9 = arith.constant 0 : i32
    %11 = arith.cmpi ne, %10, %c0_i32_9 : i32
    scf.if %11 {
      %c0_10 = arith.constant 0 : index
      %c0_11 = arith.constant 0 : index
      %12 = vector.load %arg7[%c0_10, %c0_11] : memref<16x128xf32, #tpu.memory_space<vmem>>, vector<16x128xf32>
      %c0_12 = arith.constant 0 : index
      %c0_13 = arith.constant 0 : index
      %13 = vector.load %arg5[%c0_12, %c0_13] : memref<1x128xf32, #tpu.memory_space<vmem>>, vector<1x128xf32>
      %14 = vector.broadcast %13 : vector<1x128xf32> to vector<16x128xf32>
      %15 = arith.addf %12, %14 : vector<16x128xf32>
      %c0_14 = arith.constant 0 : index
      %c0_15 = arith.constant 0 : index
      %16 = vector.load %arg6[%c0_14, %c0_15] : memref<16x128xf32, #tpu.memory_space<vmem>>, vector<16x128xf32>
      tpu.vector_store %arg6[%c0_14, %c0_15], %15 {strides = array<i32>} : memref<16x128xf32, #tpu.memory_space<vmem>>, vector<16x128xf32>,
    } else {
    }
    return
  }
  func.func @transform_0(%arg0: i32, %arg1: i32, %arg2: i32) -> (i32, i32) {
    %c0_i32 = arith.constant 0 : i32
    return %arg0, %arg2 : i32, i32
  }
  func.func @transform_1(%arg0: i32, %arg1: i32, %arg2: i32) -> (i32, i32) {
    %c0_i32 = arith.constant 0 : i32
    return %arg2, %arg1 : i32, i32
  }
  func.func @transform_2(%arg0: i32, %arg1: i32, %arg2: i32) -> (i32, i32) {
    %c0_i32 = arith.constant 0 : i32
    %c0_i32_0 = arith.constant 0 : i32
    return %c0_i32, %arg1 : i32, i32
  }
  func.func @transform_3(%arg0: i32, %arg1: i32, %arg2: i32) -> (i32, i32) {
    %c0_i32 = arith.constant 0 : i32
    return %arg0, %arg1 : i32, i32
  }
}

module attributes {stable_mosaic.version = 11 : i64} {
  func.func @_gru_scan_kernel(%arg0: i32, %arg1: memref<1x8x384xf32, #tpu.memory_space<vmem>>, %arg2: memref<128x384xf32, #tpu.memory_space<vmem>>, %arg3: memref<1x384xf32, #tpu.memory_space<vmem>>, %arg4: memref<1x8x128xf32, #tpu.memory_space<vmem>>, %arg5: memref<8x128xf32, #tpu.memory_space<vmem>>) attributes {dimension_semantics = [#tpu.dimension_semantics<arbitrary>], iteration_bounds = array<i64: 4>, scalar_prefetch = 0 : i64, scratch_operands = 1 : i64, tpu.core_type = #tpu.core_type<tc>, window_params = [{transform_indices = @transform_0, window_bounds = array<i64: 1, 8, 384>}, {pipeline_mode = #tpu.pipeline_mode<synchronous>, transform_indices = @transform_1, window_bounds = array<i64: 128, 384>}, {pipeline_mode = #tpu.pipeline_mode<synchronous>, transform_indices = @transform_2, window_bounds = array<i64: 1, 384>}, {transform_indices = @transform_3, window_bounds = array<i64: 1, 8, 128>}]} {
    %c0_i32 = arith.constant 0 : i32
    %0 = arith.cmpi eq, %arg0, %c0_i32 : i32
    %1 = arith.extui %0 : i1 to i32
    %c0_i32_0 = arith.constant 0 : i32
    %2 = arith.cmpi ne, %1, %c0_i32_0 : i32
    scf.if %2 {
      %cst_17 = arith.constant 0.000000e+00 : f32
      %41 = vector.broadcast %cst_17 : f32 to vector<8x128xf32>
      %c0_18 = arith.constant 0 : index
      %c0_19 = arith.constant 0 : index
      %42 = vector.load %arg5[%c0_18, %c0_19] : memref<8x128xf32, #tpu.memory_space<vmem>>, vector<8x128xf32>
      tpu.vector_store %arg5[%c0_18, %c0_19], %41 {strides = array<i32>} : memref<8x128xf32, #tpu.memory_space<vmem>>, vector<8x128xf32>,
    } else {
    }
    %c0 = arith.constant 0 : index
    %c0_1 = arith.constant 0 : index
    %3 = vector.load %arg5[%c0, %c0_1] : memref<8x128xf32, #tpu.memory_space<vmem>>, vector<8x128xf32>
    %c0_2 = arith.constant 0 : index
    %c0_3 = arith.constant 0 : index
    %4 = vector.load %arg2[%c0_2, %c0_3] : memref<128x384xf32, #tpu.memory_space<vmem>>, vector<128x384xf32>
    %cst = arith.constant dense<0.000000e+00> : vector<8x384xf32>
    %5 = tpu.matmul %3, %4, %cst {dimension_numbers = #tpu.dot_dimension_numbers<[1], [0], [0], [1], [0, 0, 1, 1], [], []>} : vector<8x128xf32>, vector<128x384xf32>, vector<8x384xf32> -> vector<8x384xf32>
    %c0_4 = arith.constant 0 : index
    %c0_5 = arith.constant 0 : index
    %6 = vector.load %arg3[%c0_4, %c0_5] : memref<1x384xf32, #tpu.memory_space<vmem>>, vector<1x384xf32>
    %7 = vector.broadcast %6 : vector<1x384xf32> to vector<8x384xf32>
    %8 = arith.addf %5, %7 : vector<8x384xf32>
    %c0_6 = arith.constant 0 : index
    %c0_7 = arith.constant 0 : index
    %c0_8 = arith.constant 0 : index
    %9 = vector.load %arg1[%c0_6, %c0_7, %c0_8] : memref<1x8x384xf32, #tpu.memory_space<vmem>>, vector<1x8x384xf32>
    %10 = vector.shape_cast %9 : vector<1x8x384xf32> to vector<8x384xf32>
    %11 = vector.extract_strided_slice %10 {offsets = [0, 0], sizes = [8, 128], strides = [1, 1]} : vector<8x384xf32> to vector<8x128xf32>
    %12 = vector.extract_strided_slice %8 {offsets = [0, 0], sizes = [8, 128], strides = [1, 1]} : vector<8x384xf32> to vector<8x128xf32>
    %13 = arith.addf %11, %12 : vector<8x128xf32>
    %14 = arith.negf %13 : vector<8x128xf32>
    %15 = math.exp %14 : vector<8x128xf32>
    %cst_9 = arith.constant 1.000000e+00 : f32
    %16 = vector.broadcast %cst_9 : f32 to vector<8x128xf32>
    %17 = arith.addf %16, %15 : vector<8x128xf32>
    %18 = arith.divf %16, %17 : vector<8x128xf32>
    %19 = vector.extract_strided_slice %10 {offsets = [0, 128], sizes = [8, 128], strides = [1, 1]} : vector<8x384xf32> to vector<8x128xf32>
    %20 = vector.extract_strided_slice %8 {offsets = [0, 128], sizes = [8, 128], strides = [1, 1]} : vector<8x384xf32> to vector<8x128xf32>
    %21 = arith.addf %19, %20 : vector<8x128xf32>
    %22 = arith.negf %21 : vector<8x128xf32>
    %23 = math.exp %22 : vector<8x128xf32>
    %cst_10 = arith.constant 1.000000e+00 : f32
    %24 = vector.broadcast %cst_10 : f32 to vector<8x128xf32>
    %25 = arith.addf %24, %23 : vector<8x128xf32>
    %26 = arith.divf %24, %25 : vector<8x128xf32>
    %27 = vector.extract_strided_slice %10 {offsets = [0, 256], sizes = [8, 128], strides = [1, 1]} : vector<8x384xf32> to vector<8x128xf32>
    %28 = vector.extract_strided_slice %8 {offsets = [0, 256], sizes = [8, 128], strides = [1, 1]} : vector<8x384xf32> to vector<8x128xf32>
    %29 = arith.mulf %18, %28 : vector<8x128xf32>
    %30 = arith.addf %27, %29 : vector<8x128xf32>
    %31 = math.tanh %30 : vector<8x128xf32>
    %cst_11 = arith.constant 1.000000e+00 : f32
    %32 = vector.broadcast %cst_11 : f32 to vector<8x128xf32>
    %33 = arith.subf %32, %26 : vector<8x128xf32>
    %34 = arith.mulf %33, %31 : vector<8x128xf32>
    %35 = arith.mulf %26, %3 : vector<8x128xf32>
    %36 = arith.addf %34, %35 : vector<8x128xf32>
    %c0_12 = arith.constant 0 : index
    %c0_13 = arith.constant 0 : index
    %37 = vector.load %arg5[%c0_12, %c0_13] : memref<8x128xf32, #tpu.memory_space<vmem>>, vector<8x128xf32>
    tpu.vector_store %arg5[%c0_12, %c0_13], %36 {strides = array<i32>} : memref<8x128xf32, #tpu.memory_space<vmem>>, vector<8x128xf32>,
    %c0_14 = arith.constant 0 : index
    %c0_15 = arith.constant 0 : index
    %c0_16 = arith.constant 0 : index
    %38 = vector.load %arg4[%c0_14, %c0_15, %c0_16] : memref<1x8x128xf32, #tpu.memory_space<vmem>>, vector<1x8x128xf32>
    %39 = vector.shape_cast %38 : vector<1x8x128xf32> to vector<8x128xf32>
    %40 = vector.shape_cast %36 : vector<8x128xf32> to vector<1x8x128xf32>
    tpu.vector_store %arg4[%c0_14, %c0_15, %c0_16], %40 {strides = array<i32>} : memref<1x8x128xf32, #tpu.memory_space<vmem>>, vector<1x8x128xf32>,
    return
  }
  func.func @transform_0(%arg0: i32) -> (i32, i32, i32) {
    %c0_i32 = arith.constant 0 : i32
    %c0_i32_0 = arith.constant 0 : i32
    %c0_i32_1 = arith.constant 0 : i32
    return %arg0, %c0_i32, %c0_i32_0 : i32, i32, i32
  }
  func.func @transform_1(%arg0: i32) -> (i32, i32) {
    %c0_i32 = arith.constant 0 : i32
    %c0_i32_0 = arith.constant 0 : i32
    %c0_i32_1 = arith.constant 0 : i32
    return %c0_i32, %c0_i32_0 : i32, i32
  }
  func.func @transform_2(%arg0: i32) -> (i32, i32) {
    %c0_i32 = arith.constant 0 : i32
    %c0_i32_0 = arith.constant 0 : i32
    %c0_i32_1 = arith.constant 0 : i32
    return %c0_i32, %c0_i32_0 : i32, i32
  }
  func.func @transform_3(%arg0: i32) -> (i32, i32, i32) {
    %c0_i32 = arith.constant 0 : i32
    %c0_i32_0 = arith.constant 0 : i32
    %c0_i32_1 = arith.constant 0 : i32
    return %arg0, %c0_i32, %c0_i32_0 : i32, i32, i32
  }
}

module attributes {stable_mosaic.version = 11 : i64} {
  func.func @_mm_kernel(%arg0: i32, %arg1: i32, %arg2: i32, %arg3: memref<32x512xbf16, #tpu.memory_space<vmem>>, %arg4: memref<512x128xbf16, #tpu.memory_space<vmem>>, %arg5: memref<1x128xf32, #tpu.memory_space<vmem>>, %arg6: memref<32x128xbf16, #tpu.memory_space<vmem>>, %arg7: memref<32x128xf32, #tpu.memory_space<vmem>>) attributes {dimension_semantics = [#tpu.dimension_semantics<parallel>, #tpu.dimension_semantics<parallel>, #tpu.dimension_semantics<arbitrary>], iteration_bounds = array<i64: 1, 1, 2>, scalar_prefetch = 0 : i64, scratch_operands = 1 : i64, tpu.core_type = #tpu.core_type<tc>, window_params = [{transform_indices = @transform_0, window_bounds = array<i64: 32, 512>}, {transform_indices = @transform_1, window_bounds = array<i64: 512, 128>}, {transform_indices = @transform_2, window_bounds = array<i64: 1, 128>}, {transform_indices = @transform_3, window_bounds = array<i64: 32, 128>}]} {
    %c0_i32 = arith.constant 0 : i32
    %0 = arith.cmpi eq, %arg2, %c0_i32 : i32
    %1 = arith.extui %0 : i1 to i32
    %c0_i32_0 = arith.constant 0 : i32
    %2 = arith.cmpi ne, %1, %c0_i32_0 : i32
    scf.if %2 {
      %cst_9 = arith.constant 0.000000e+00 : f32
      %12 = vector.broadcast %cst_9 : f32 to vector<32x128xf32>
      %c0_10 = arith.constant 0 : index
      %c0_11 = arith.constant 0 : index
      %13 = vector.load %arg7[%c0_10, %c0_11] : memref<32x128xf32, #tpu.memory_space<vmem>>, vector<32x128xf32>
      tpu.vector_store %arg7[%c0_10, %c0_11], %12 {strides = array<i32>} : memref<32x128xf32, #tpu.memory_space<vmem>>, vector<32x128xf32>,
    } else {
    }
    %c0 = arith.constant 0 : index
    %c0_1 = arith.constant 0 : index
    %3 = vector.load %arg7[%c0, %c0_1] : memref<32x128xf32, #tpu.memory_space<vmem>>, vector<32x128xf32>
    %c0_2 = arith.constant 0 : index
    %c0_3 = arith.constant 0 : index
    %4 = vector.load %arg3[%c0_2, %c0_3] : memref<32x512xbf16, #tpu.memory_space<vmem>>, vector<32x512xbf16>
    %c0_4 = arith.constant 0 : index
    %c0_5 = arith.constant 0 : index
    %5 = vector.load %arg4[%c0_4, %c0_5] : memref<512x128xbf16, #tpu.memory_space<vmem>>, vector<512x128xbf16>
    %cst = arith.constant dense<0.000000e+00> : vector<32x128xf32>
    %6 = tpu.matmul %4, %5, %cst {dimension_numbers = #tpu.dot_dimension_numbers<[1], [0], [0], [1], [0, 0, 1, 1], [], []>} : vector<32x512xbf16>, vector<512x128xbf16>, vector<32x128xf32> -> vector<32x128xf32>
    %7 = arith.addf %3, %6 : vector<32x128xf32>
    %c0_6 = arith.constant 0 : index
    %c0_7 = arith.constant 0 : index
    %8 = vector.load %arg7[%c0_6, %c0_7] : memref<32x128xf32, #tpu.memory_space<vmem>>, vector<32x128xf32>
    tpu.vector_store %arg7[%c0_6, %c0_7], %7 {strides = array<i32>} : memref<32x128xf32, #tpu.memory_space<vmem>>, vector<32x128xf32>,
    %c1_i32 = arith.constant 1 : i32
    %9 = arith.cmpi eq, %arg2, %c1_i32 : i32
    %10 = arith.extui %9 : i1 to i32
    %c0_i32_8 = arith.constant 0 : i32
    %11 = arith.cmpi ne, %10, %c0_i32_8 : i32
    scf.if %11 {
      %c0_9 = arith.constant 0 : index
      %c0_10 = arith.constant 0 : index
      %12 = vector.load %arg7[%c0_9, %c0_10] : memref<32x128xf32, #tpu.memory_space<vmem>>, vector<32x128xf32>
      %c0_11 = arith.constant 0 : index
      %c0_12 = arith.constant 0 : index
      %13 = vector.load %arg5[%c0_11, %c0_12] : memref<1x128xf32, #tpu.memory_space<vmem>>, vector<1x128xf32>
      %14 = vector.broadcast %13 : vector<1x128xf32> to vector<32x128xf32>
      %15 = arith.addf %12, %14 : vector<32x128xf32>
      %cst_13 = arith.constant 0.000000e+00 : f32
      %16 = vector.broadcast %cst_13 : f32 to vector<32x128xf32>
      %17 = arith.maximumf %15, %16 : vector<32x128xf32>
      %18 = arith.truncf %17 : vector<32x128xf32> to vector<32x128xbf16>
      %c0_14 = arith.constant 0 : index
      %c0_15 = arith.constant 0 : index
      %19 = vector.load %arg6[%c0_14, %c0_15] : memref<32x128xbf16, #tpu.memory_space<vmem>>, vector<32x128xbf16>
      tpu.vector_store %arg6[%c0_14, %c0_15], %18 {strides = array<i32>} : memref<32x128xbf16, #tpu.memory_space<vmem>>, vector<32x128xbf16>,
    } else {
    }
    return
  }
  func.func @transform_0(%arg0: i32, %arg1: i32, %arg2: i32) -> (i32, i32) {
    %c0_i32 = arith.constant 0 : i32
    return %arg0, %arg2 : i32, i32
  }
  func.func @transform_1(%arg0: i32, %arg1: i32, %arg2: i32) -> (i32, i32) {
    %c0_i32 = arith.constant 0 : i32
    return %arg2, %arg1 : i32, i32
  }
  func.func @transform_2(%arg0: i32, %arg1: i32, %arg2: i32) -> (i32, i32) {
    %c0_i32 = arith.constant 0 : i32
    %c0_i32_0 = arith.constant 0 : i32
    return %c0_i32, %arg1 : i32, i32
  }
  func.func @transform_3(%arg0: i32, %arg1: i32, %arg2: i32) -> (i32, i32) {
    %c0_i32 = arith.constant 0 : i32
    return %arg0, %arg1 : i32, i32
  }
}

module attributes {stable_mosaic.version = 11 : i64} {
  func.func @_mm_kernel(%arg0: i32, %arg1: i32, %arg2: i32, %arg3: memref<32x128xbf16, #tpu.memory_space<vmem>>, %arg4: memref<128x128xbf16, #tpu.memory_space<vmem>>, %arg5: memref<1x128xf32, #tpu.memory_space<vmem>>, %arg6: memref<32x128xf32, #tpu.memory_space<vmem>>, %arg7: memref<32x128xf32, #tpu.memory_space<vmem>>) attributes {dimension_semantics = [#tpu.dimension_semantics<parallel>, #tpu.dimension_semantics<parallel>, #tpu.dimension_semantics<arbitrary>], iteration_bounds = array<i64: 1, 1, 1>, scalar_prefetch = 0 : i64, scratch_operands = 1 : i64, tpu.core_type = #tpu.core_type<tc>, window_params = [{transform_indices = @transform_0, window_bounds = array<i64: 32, 128>}, {transform_indices = @transform_1, window_bounds = array<i64: 128, 128>}, {transform_indices = @transform_2, window_bounds = array<i64: 1, 128>}, {transform_indices = @transform_3, window_bounds = array<i64: 32, 128>}]} {
    %c0_i32 = arith.constant 0 : i32
    %0 = arith.cmpi eq, %arg2, %c0_i32 : i32
    %1 = arith.extui %0 : i1 to i32
    %c0_i32_0 = arith.constant 0 : i32
    %2 = arith.cmpi ne, %1, %c0_i32_0 : i32
    scf.if %2 {
      %cst_10 = arith.constant 0.000000e+00 : f32
      %12 = vector.broadcast %cst_10 : f32 to vector<32x128xf32>
      %c0_11 = arith.constant 0 : index
      %c0_12 = arith.constant 0 : index
      %13 = vector.load %arg7[%c0_11, %c0_12] : memref<32x128xf32, #tpu.memory_space<vmem>>, vector<32x128xf32>
      tpu.vector_store %arg7[%c0_11, %c0_12], %12 {strides = array<i32>} : memref<32x128xf32, #tpu.memory_space<vmem>>, vector<32x128xf32>,
    } else {
    }
    %c0 = arith.constant 0 : index
    %c0_1 = arith.constant 0 : index
    %3 = vector.load %arg7[%c0, %c0_1] : memref<32x128xf32, #tpu.memory_space<vmem>>, vector<32x128xf32>
    %c0_2 = arith.constant 0 : index
    %c0_3 = arith.constant 0 : index
    %4 = vector.load %arg3[%c0_2, %c0_3] : memref<32x128xbf16, #tpu.memory_space<vmem>>, vector<32x128xbf16>
    %c0_4 = arith.constant 0 : index
    %c0_5 = arith.constant 0 : index
    %5 = vector.load %arg4[%c0_4, %c0_5] : memref<128x128xbf16, #tpu.memory_space<vmem>>, vector<128x128xbf16>
    %cst = arith.constant dense<0.000000e+00> : vector<32x128xf32>
    %6 = tpu.matmul %4, %5, %cst {dimension_numbers = #tpu.dot_dimension_numbers<[1], [0], [0], [1], [0, 0, 1, 1], [], []>} : vector<32x128xbf16>, vector<128x128xbf16>, vector<32x128xf32> -> vector<32x128xf32>
    %7 = arith.addf %3, %6 : vector<32x128xf32>
    %c0_6 = arith.constant 0 : index
    %c0_7 = arith.constant 0 : index
    %8 = vector.load %arg7[%c0_6, %c0_7] : memref<32x128xf32, #tpu.memory_space<vmem>>, vector<32x128xf32>
    tpu.vector_store %arg7[%c0_6, %c0_7], %7 {strides = array<i32>} : memref<32x128xf32, #tpu.memory_space<vmem>>, vector<32x128xf32>,
    %c0_i32_8 = arith.constant 0 : i32
    %9 = arith.cmpi eq, %arg2, %c0_i32_8 : i32
    %10 = arith.extui %9 : i1 to i32
    %c0_i32_9 = arith.constant 0 : i32
    %11 = arith.cmpi ne, %10, %c0_i32_9 : i32
    scf.if %11 {
      %c0_10 = arith.constant 0 : index
      %c0_11 = arith.constant 0 : index
      %12 = vector.load %arg7[%c0_10, %c0_11] : memref<32x128xf32, #tpu.memory_space<vmem>>, vector<32x128xf32>
      %c0_12 = arith.constant 0 : index
      %c0_13 = arith.constant 0 : index
      %13 = vector.load %arg5[%c0_12, %c0_13] : memref<1x128xf32, #tpu.memory_space<vmem>>, vector<1x128xf32>
      %14 = vector.broadcast %13 : vector<1x128xf32> to vector<32x128xf32>
      %15 = arith.addf %12, %14 : vector<32x128xf32>
      %c0_14 = arith.constant 0 : index
      %c0_15 = arith.constant 0 : index
      %16 = vector.load %arg6[%c0_14, %c0_15] : memref<32x128xf32, #tpu.memory_space<vmem>>, vector<32x128xf32>
      tpu.vector_store %arg6[%c0_14, %c0_15], %15 {strides = array<i32>} : memref<32x128xf32, #tpu.memory_space<vmem>>, vector<32x128xf32>,
    } else {
    }
    return
  }
  func.func @transform_0(%arg0: i32, %arg1: i32, %arg2: i32) -> (i32, i32) {
    %c0_i32 = arith.constant 0 : i32
    return %arg0, %arg2 : i32, i32
  }
  func.func @transform_1(%arg0: i32, %arg1: i32, %arg2: i32) -> (i32, i32) {
    %c0_i32 = arith.constant 0 : i32
    return %arg2, %arg1 : i32, i32
  }
  func.func @transform_2(%arg0: i32, %arg1: i32, %arg2: i32) -> (i32, i32) {
    %c0_i32 = arith.constant 0 : i32
    %c0_i32_0 = arith.constant 0 : i32
    return %c0_i32, %arg1 : i32, i32
  }
  func.func @transform_3(%arg0: i32, %arg1: i32, %arg2: i32) -> (i32, i32) {
    %c0_i32 = arith.constant 0 : i32
    return %arg0, %arg1 : i32, i32
  }
}

module attributes {stable_mosaic.version = 11 : i64} {
  func.func @_mm_kernel(%arg0: i32, %arg1: i32, %arg2: i32, %arg3: memref<32x512xbf16, #tpu.memory_space<vmem>>, %arg4: memref<512x128xbf16, #tpu.memory_space<vmem>>, %arg5: memref<1x128xf32, #tpu.memory_space<vmem>>, %arg6: memref<32x128xf32, #tpu.memory_space<vmem>>, %arg7: memref<32x128xbf16, #tpu.memory_space<vmem>>, %arg8: memref<32x128xf32, #tpu.memory_space<vmem>>) attributes {dimension_semantics = [#tpu.dimension_semantics<parallel>, #tpu.dimension_semantics<parallel>, #tpu.dimension_semantics<arbitrary>], iteration_bounds = array<i64: 1, 1, 4>, scalar_prefetch = 0 : i64, scratch_operands = 1 : i64, tpu.core_type = #tpu.core_type<tc>, window_params = [{transform_indices = @transform_0, window_bounds = array<i64: 32, 512>}, {transform_indices = @transform_1, window_bounds = array<i64: 512, 128>}, {transform_indices = @transform_2, window_bounds = array<i64: 1, 128>}, {transform_indices = @transform_3, window_bounds = array<i64: 32, 128>}, {transform_indices = @transform_4, window_bounds = array<i64: 32, 128>}]} {
    %c0_i32 = arith.constant 0 : i32
    %0 = arith.cmpi eq, %arg2, %c0_i32 : i32
    %1 = arith.extui %0 : i1 to i32
    %c0_i32_0 = arith.constant 0 : i32
    %2 = arith.cmpi ne, %1, %c0_i32_0 : i32
    scf.if %2 {
      %cst_9 = arith.constant 0.000000e+00 : f32
      %12 = vector.broadcast %cst_9 : f32 to vector<32x128xf32>
      %c0_10 = arith.constant 0 : index
      %c0_11 = arith.constant 0 : index
      %13 = vector.load %arg8[%c0_10, %c0_11] : memref<32x128xf32, #tpu.memory_space<vmem>>, vector<32x128xf32>
      tpu.vector_store %arg8[%c0_10, %c0_11], %12 {strides = array<i32>} : memref<32x128xf32, #tpu.memory_space<vmem>>, vector<32x128xf32>,
    } else {
    }
    %c0 = arith.constant 0 : index
    %c0_1 = arith.constant 0 : index
    %3 = vector.load %arg8[%c0, %c0_1] : memref<32x128xf32, #tpu.memory_space<vmem>>, vector<32x128xf32>
    %c0_2 = arith.constant 0 : index
    %c0_3 = arith.constant 0 : index
    %4 = vector.load %arg3[%c0_2, %c0_3] : memref<32x512xbf16, #tpu.memory_space<vmem>>, vector<32x512xbf16>
    %c0_4 = arith.constant 0 : index
    %c0_5 = arith.constant 0 : index
    %5 = vector.load %arg4[%c0_4, %c0_5] : memref<512x128xbf16, #tpu.memory_space<vmem>>, vector<512x128xbf16>
    %cst = arith.constant dense<0.000000e+00> : vector<32x128xf32>
    %6 = tpu.matmul %4, %5, %cst {dimension_numbers = #tpu.dot_dimension_numbers<[1], [0], [0], [1], [0, 0, 1, 1], [], []>} : vector<32x512xbf16>, vector<512x128xbf16>, vector<32x128xf32> -> vector<32x128xf32>
    %7 = arith.addf %3, %6 : vector<32x128xf32>
    %c0_6 = arith.constant 0 : index
    %c0_7 = arith.constant 0 : index
    %8 = vector.load %arg8[%c0_6, %c0_7] : memref<32x128xf32, #tpu.memory_space<vmem>>, vector<32x128xf32>
    tpu.vector_store %arg8[%c0_6, %c0_7], %7 {strides = array<i32>} : memref<32x128xf32, #tpu.memory_space<vmem>>, vector<32x128xf32>,
    %c3_i32 = arith.constant 3 : i32
    %9 = arith.cmpi eq, %arg2, %c3_i32 : i32
    %10 = arith.extui %9 : i1 to i32
    %c0_i32_8 = arith.constant 0 : i32
    %11 = arith.cmpi ne, %10, %c0_i32_8 : i32
    scf.if %11 {
      %c0_9 = arith.constant 0 : index
      %c0_10 = arith.constant 0 : index
      %12 = vector.load %arg8[%c0_9, %c0_10] : memref<32x128xf32, #tpu.memory_space<vmem>>, vector<32x128xf32>
      %c0_11 = arith.constant 0 : index
      %c0_12 = arith.constant 0 : index
      %13 = vector.load %arg5[%c0_11, %c0_12] : memref<1x128xf32, #tpu.memory_space<vmem>>, vector<1x128xf32>
      %14 = vector.broadcast %13 : vector<1x128xf32> to vector<32x128xf32>
      %15 = arith.addf %12, %14 : vector<32x128xf32>
      %c0_13 = arith.constant 0 : index
      %c0_14 = arith.constant 0 : index
      %16 = vector.load %arg6[%c0_13, %c0_14] : memref<32x128xf32, #tpu.memory_space<vmem>>, vector<32x128xf32>
      %17 = arith.addf %15, %16 : vector<32x128xf32>
      %18 = arith.truncf %17 : vector<32x128xf32> to vector<32x128xbf16>
      %c0_15 = arith.constant 0 : index
      %c0_16 = arith.constant 0 : index
      %19 = vector.load %arg7[%c0_15, %c0_16] : memref<32x128xbf16, #tpu.memory_space<vmem>>, vector<32x128xbf16>
      tpu.vector_store %arg7[%c0_15, %c0_16], %18 {strides = array<i32>} : memref<32x128xbf16, #tpu.memory_space<vmem>>, vector<32x128xbf16>,
    } else {
    }
    return
  }
  func.func @transform_0(%arg0: i32, %arg1: i32, %arg2: i32) -> (i32, i32) {
    %c0_i32 = arith.constant 0 : i32
    return %arg0, %arg2 : i32, i32
  }
  func.func @transform_1(%arg0: i32, %arg1: i32, %arg2: i32) -> (i32, i32) {
    %c0_i32 = arith.constant 0 : i32
    return %arg2, %arg1 : i32, i32
  }
  func.func @transform_2(%arg0: i32, %arg1: i32, %arg2: i32) -> (i32, i32) {
    %c0_i32 = arith.constant 0 : i32
    %c0_i32_0 = arith.constant 0 : i32
    return %c0_i32, %arg1 : i32, i32
  }
  func.func @transform_3(%arg0: i32, %arg1: i32, %arg2: i32) -> (i32, i32) {
    %c0_i32 = arith.constant 0 : i32
    return %arg0, %arg1 : i32, i32
  }
  func.func @transform_4(%arg0: i32, %arg1: i32, %arg2: i32) -> (i32, i32) {
    %c0_i32 = arith.constant 0 : i32
    return %arg0, %arg1 : i32, i32
  }
}

module attributes {stable_mosaic.version = 11 : i64} {
  func.func @_mm_kernel(%arg0: i32, %arg1: i32, %arg2: i32, %arg3: memref<128x512xbf16, #tpu.memory_space<vmem>>, %arg4: memref<512x128xbf16, #tpu.memory_space<vmem>>, %arg5: memref<1x128xf32, #tpu.memory_space<vmem>>, %arg6: memref<128x128xbf16, #tpu.memory_space<vmem>>, %arg7: memref<128x128xf32, #tpu.memory_space<vmem>>) attributes {dimension_semantics = [#tpu.dimension_semantics<parallel>, #tpu.dimension_semantics<parallel>, #tpu.dimension_semantics<arbitrary>], iteration_bounds = array<i64: 1, 1, 4>, scalar_prefetch = 0 : i64, scratch_operands = 1 : i64, tpu.core_type = #tpu.core_type<tc>, window_params = [{transform_indices = @transform_0, window_bounds = array<i64: 128, 512>}, {transform_indices = @transform_1, window_bounds = array<i64: 512, 128>}, {transform_indices = @transform_2, window_bounds = array<i64: 1, 128>}, {transform_indices = @transform_3, window_bounds = array<i64: 128, 128>}]} {
    %c0_i32 = arith.constant 0 : i32
    %0 = arith.cmpi eq, %arg2, %c0_i32 : i32
    %1 = arith.extui %0 : i1 to i32
    %c0_i32_0 = arith.constant 0 : i32
    %2 = arith.cmpi ne, %1, %c0_i32_0 : i32
    scf.if %2 {
      %cst_9 = arith.constant 0.000000e+00 : f32
      %12 = vector.broadcast %cst_9 : f32 to vector<128x128xf32>
      %c0_10 = arith.constant 0 : index
      %c0_11 = arith.constant 0 : index
      %13 = vector.load %arg7[%c0_10, %c0_11] : memref<128x128xf32, #tpu.memory_space<vmem>>, vector<128x128xf32>
      tpu.vector_store %arg7[%c0_10, %c0_11], %12 {strides = array<i32>} : memref<128x128xf32, #tpu.memory_space<vmem>>, vector<128x128xf32>,
    } else {
    }
    %c0 = arith.constant 0 : index
    %c0_1 = arith.constant 0 : index
    %3 = vector.load %arg7[%c0, %c0_1] : memref<128x128xf32, #tpu.memory_space<vmem>>, vector<128x128xf32>
    %c0_2 = arith.constant 0 : index
    %c0_3 = arith.constant 0 : index
    %4 = vector.load %arg3[%c0_2, %c0_3] : memref<128x512xbf16, #tpu.memory_space<vmem>>, vector<128x512xbf16>
    %c0_4 = arith.constant 0 : index
    %c0_5 = arith.constant 0 : index
    %5 = vector.load %arg4[%c0_4, %c0_5] : memref<512x128xbf16, #tpu.memory_space<vmem>>, vector<512x128xbf16>
    %cst = arith.constant dense<0.000000e+00> : vector<128x128xf32>
    %6 = tpu.matmul %4, %5, %cst {dimension_numbers = #tpu.dot_dimension_numbers<[1], [0], [0], [1], [0, 0, 1, 1], [], []>} : vector<128x512xbf16>, vector<512x128xbf16>, vector<128x128xf32> -> vector<128x128xf32>
    %7 = arith.addf %3, %6 : vector<128x128xf32>
    %c0_6 = arith.constant 0 : index
    %c0_7 = arith.constant 0 : index
    %8 = vector.load %arg7[%c0_6, %c0_7] : memref<128x128xf32, #tpu.memory_space<vmem>>, vector<128x128xf32>
    tpu.vector_store %arg7[%c0_6, %c0_7], %7 {strides = array<i32>} : memref<128x128xf32, #tpu.memory_space<vmem>>, vector<128x128xf32>,
    %c3_i32 = arith.constant 3 : i32
    %9 = arith.cmpi eq, %arg2, %c3_i32 : i32
    %10 = arith.extui %9 : i1 to i32
    %c0_i32_8 = arith.constant 0 : i32
    %11 = arith.cmpi ne, %10, %c0_i32_8 : i32
    scf.if %11 {
      %c0_9 = arith.constant 0 : index
      %c0_10 = arith.constant 0 : index
      %12 = vector.load %arg7[%c0_9, %c0_10] : memref<128x128xf32, #tpu.memory_space<vmem>>, vector<128x128xf32>
      %c0_11 = arith.constant 0 : index
      %c0_12 = arith.constant 0 : index
      %13 = vector.load %arg5[%c0_11, %c0_12] : memref<1x128xf32, #tpu.memory_space<vmem>>, vector<1x128xf32>
      %14 = vector.broadcast %13 : vector<1x128xf32> to vector<128x128xf32>
      %15 = arith.addf %12, %14 : vector<128x128xf32>
      %cst_13 = arith.constant 0.000000e+00 : f32
      %16 = vector.broadcast %cst_13 : f32 to vector<128x128xf32>
      %17 = arith.maximumf %15, %16 : vector<128x128xf32>
      %18 = arith.truncf %17 : vector<128x128xf32> to vector<128x128xbf16>
      %c0_14 = arith.constant 0 : index
      %c0_15 = arith.constant 0 : index
      %19 = vector.load %arg6[%c0_14, %c0_15] : memref<128x128xbf16, #tpu.memory_space<vmem>>, vector<128x128xbf16>
      tpu.vector_store %arg6[%c0_14, %c0_15], %18 {strides = array<i32>} : memref<128x128xbf16, #tpu.memory_space<vmem>>, vector<128x128xbf16>,
    } else {
    }
    return
  }
  func.func @transform_0(%arg0: i32, %arg1: i32, %arg2: i32) -> (i32, i32) {
    %c0_i32 = arith.constant 0 : i32
    return %arg0, %arg2 : i32, i32
  }
  func.func @transform_1(%arg0: i32, %arg1: i32, %arg2: i32) -> (i32, i32) {
    %c0_i32 = arith.constant 0 : i32
    return %arg2, %arg1 : i32, i32
  }
  func.func @transform_2(%arg0: i32, %arg1: i32, %arg2: i32) -> (i32, i32) {
    %c0_i32 = arith.constant 0 : i32
    %c0_i32_0 = arith.constant 0 : i32
    return %c0_i32, %arg1 : i32, i32
  }
  func.func @transform_3(%arg0: i32, %arg1: i32, %arg2: i32) -> (i32, i32) {
    %c0_i32 = arith.constant 0 : i32
    return %arg0, %arg1 : i32, i32
  }
}

module attributes {stable_mosaic.version = 11 : i64} {
  func.func @_mm_kernel(%arg0: i32, %arg1: i32, %arg2: i32, %arg3: memref<128x128xbf16, #tpu.memory_space<vmem>>, %arg4: memref<128x128xbf16, #tpu.memory_space<vmem>>, %arg5: memref<1x128xf32, #tpu.memory_space<vmem>>, %arg6: memref<128x128xf32, #tpu.memory_space<vmem>>, %arg7: memref<128x128xf32, #tpu.memory_space<vmem>>) attributes {dimension_semantics = [#tpu.dimension_semantics<parallel>, #tpu.dimension_semantics<parallel>, #tpu.dimension_semantics<arbitrary>], iteration_bounds = array<i64: 1, 1, 1>, scalar_prefetch = 0 : i64, scratch_operands = 1 : i64, tpu.core_type = #tpu.core_type<tc>, window_params = [{transform_indices = @transform_0, window_bounds = array<i64: 128, 128>}, {transform_indices = @transform_1, window_bounds = array<i64: 128, 128>}, {transform_indices = @transform_2, window_bounds = array<i64: 1, 128>}, {transform_indices = @transform_3, window_bounds = array<i64: 128, 128>}]} {
    %c0_i32 = arith.constant 0 : i32
    %0 = arith.cmpi eq, %arg2, %c0_i32 : i32
    %1 = arith.extui %0 : i1 to i32
    %c0_i32_0 = arith.constant 0 : i32
    %2 = arith.cmpi ne, %1, %c0_i32_0 : i32
    scf.if %2 {
      %cst_10 = arith.constant 0.000000e+00 : f32
      %12 = vector.broadcast %cst_10 : f32 to vector<128x128xf32>
      %c0_11 = arith.constant 0 : index
      %c0_12 = arith.constant 0 : index
      %13 = vector.load %arg7[%c0_11, %c0_12] : memref<128x128xf32, #tpu.memory_space<vmem>>, vector<128x128xf32>
      tpu.vector_store %arg7[%c0_11, %c0_12], %12 {strides = array<i32>} : memref<128x128xf32, #tpu.memory_space<vmem>>, vector<128x128xf32>,
    } else {
    }
    %c0 = arith.constant 0 : index
    %c0_1 = arith.constant 0 : index
    %3 = vector.load %arg7[%c0, %c0_1] : memref<128x128xf32, #tpu.memory_space<vmem>>, vector<128x128xf32>
    %c0_2 = arith.constant 0 : index
    %c0_3 = arith.constant 0 : index
    %4 = vector.load %arg3[%c0_2, %c0_3] : memref<128x128xbf16, #tpu.memory_space<vmem>>, vector<128x128xbf16>
    %c0_4 = arith.constant 0 : index
    %c0_5 = arith.constant 0 : index
    %5 = vector.load %arg4[%c0_4, %c0_5] : memref<128x128xbf16, #tpu.memory_space<vmem>>, vector<128x128xbf16>
    %cst = arith.constant dense<0.000000e+00> : vector<128x128xf32>
    %6 = tpu.matmul %4, %5, %cst {dimension_numbers = #tpu.dot_dimension_numbers<[1], [0], [0], [1], [0, 0, 1, 1], [], []>} : vector<128x128xbf16>, vector<128x128xbf16>, vector<128x128xf32> -> vector<128x128xf32>
    %7 = arith.addf %3, %6 : vector<128x128xf32>
    %c0_6 = arith.constant 0 : index
    %c0_7 = arith.constant 0 : index
    %8 = vector.load %arg7[%c0_6, %c0_7] : memref<128x128xf32, #tpu.memory_space<vmem>>, vector<128x128xf32>
    tpu.vector_store %arg7[%c0_6, %c0_7], %7 {strides = array<i32>} : memref<128x128xf32, #tpu.memory_space<vmem>>, vector<128x128xf32>,
    %c0_i32_8 = arith.constant 0 : i32
    %9 = arith.cmpi eq, %arg2, %c0_i32_8 : i32
    %10 = arith.extui %9 : i1 to i32
    %c0_i32_9 = arith.constant 0 : i32
    %11 = arith.cmpi ne, %10, %c0_i32_9 : i32
    scf.if %11 {
      %c0_10 = arith.constant 0 : index
      %c0_11 = arith.constant 0 : index
      %12 = vector.load %arg7[%c0_10, %c0_11] : memref<128x128xf32, #tpu.memory_space<vmem>>, vector<128x128xf32>
      %c0_12 = arith.constant 0 : index
      %c0_13 = arith.constant 0 : index
      %13 = vector.load %arg5[%c0_12, %c0_13] : memref<1x128xf32, #tpu.memory_space<vmem>>, vector<1x128xf32>
      %14 = vector.broadcast %13 : vector<1x128xf32> to vector<128x128xf32>
      %15 = arith.addf %12, %14 : vector<128x128xf32>
      %c0_14 = arith.constant 0 : index
      %c0_15 = arith.constant 0 : index
      %16 = vector.load %arg6[%c0_14, %c0_15] : memref<128x128xf32, #tpu.memory_space<vmem>>, vector<128x128xf32>
      tpu.vector_store %arg6[%c0_14, %c0_15], %15 {strides = array<i32>} : memref<128x128xf32, #tpu.memory_space<vmem>>, vector<128x128xf32>,
    } else {
    }
    return
  }
  func.func @transform_0(%arg0: i32, %arg1: i32, %arg2: i32) -> (i32, i32) {
    %c0_i32 = arith.constant 0 : i32
    return %arg0, %arg2 : i32, i32
  }
  func.func @transform_1(%arg0: i32, %arg1: i32, %arg2: i32) -> (i32, i32) {
    %c0_i32 = arith.constant 0 : i32
    return %arg2, %arg1 : i32, i32
  }
  func.func @transform_2(%arg0: i32, %arg1: i32, %arg2: i32) -> (i32, i32) {
    %c0_i32 = arith.constant 0 : i32
    %c0_i32_0 = arith.constant 0 : i32
    return %c0_i32, %arg1 : i32, i32
  }
  func.func @transform_3(%arg0: i32, %arg1: i32, %arg2: i32) -> (i32, i32) {
    %c0_i32 = arith.constant 0 : i32
    return %arg0, %arg1 : i32, i32
  }
}

module attributes {stable_mosaic.version = 11 : i64} {
  func.func @_mm_kernel(%arg0: i32, %arg1: i32, %arg2: i32, %arg3: memref<128x512xbf16, #tpu.memory_space<vmem>>, %arg4: memref<512x128xbf16, #tpu.memory_space<vmem>>, %arg5: memref<1x128xf32, #tpu.memory_space<vmem>>, %arg6: memref<128x128xf32, #tpu.memory_space<vmem>>, %arg7: memref<128x128xbf16, #tpu.memory_space<vmem>>, %arg8: memref<128x128xf32, #tpu.memory_space<vmem>>) attributes {dimension_semantics = [#tpu.dimension_semantics<parallel>, #tpu.dimension_semantics<parallel>, #tpu.dimension_semantics<arbitrary>], iteration_bounds = array<i64: 1, 1, 2>, scalar_prefetch = 0 : i64, scratch_operands = 1 : i64, tpu.core_type = #tpu.core_type<tc>, window_params = [{transform_indices = @transform_0, window_bounds = array<i64: 128, 512>}, {transform_indices = @transform_1, window_bounds = array<i64: 512, 128>}, {transform_indices = @transform_2, window_bounds = array<i64: 1, 128>}, {transform_indices = @transform_3, window_bounds = array<i64: 128, 128>}, {transform_indices = @transform_4, window_bounds = array<i64: 128, 128>}]} {
    %c0_i32 = arith.constant 0 : i32
    %0 = arith.cmpi eq, %arg2, %c0_i32 : i32
    %1 = arith.extui %0 : i1 to i32
    %c0_i32_0 = arith.constant 0 : i32
    %2 = arith.cmpi ne, %1, %c0_i32_0 : i32
    scf.if %2 {
      %cst_9 = arith.constant 0.000000e+00 : f32
      %12 = vector.broadcast %cst_9 : f32 to vector<128x128xf32>
      %c0_10 = arith.constant 0 : index
      %c0_11 = arith.constant 0 : index
      %13 = vector.load %arg8[%c0_10, %c0_11] : memref<128x128xf32, #tpu.memory_space<vmem>>, vector<128x128xf32>
      tpu.vector_store %arg8[%c0_10, %c0_11], %12 {strides = array<i32>} : memref<128x128xf32, #tpu.memory_space<vmem>>, vector<128x128xf32>,
    } else {
    }
    %c0 = arith.constant 0 : index
    %c0_1 = arith.constant 0 : index
    %3 = vector.load %arg8[%c0, %c0_1] : memref<128x128xf32, #tpu.memory_space<vmem>>, vector<128x128xf32>
    %c0_2 = arith.constant 0 : index
    %c0_3 = arith.constant 0 : index
    %4 = vector.load %arg3[%c0_2, %c0_3] : memref<128x512xbf16, #tpu.memory_space<vmem>>, vector<128x512xbf16>
    %c0_4 = arith.constant 0 : index
    %c0_5 = arith.constant 0 : index
    %5 = vector.load %arg4[%c0_4, %c0_5] : memref<512x128xbf16, #tpu.memory_space<vmem>>, vector<512x128xbf16>
    %cst = arith.constant dense<0.000000e+00> : vector<128x128xf32>
    %6 = tpu.matmul %4, %5, %cst {dimension_numbers = #tpu.dot_dimension_numbers<[1], [0], [0], [1], [0, 0, 1, 1], [], []>} : vector<128x512xbf16>, vector<512x128xbf16>, vector<128x128xf32> -> vector<128x128xf32>
    %7 = arith.addf %3, %6 : vector<128x128xf32>
    %c0_6 = arith.constant 0 : index
    %c0_7 = arith.constant 0 : index
    %8 = vector.load %arg8[%c0_6, %c0_7] : memref<128x128xf32, #tpu.memory_space<vmem>>, vector<128x128xf32>
    tpu.vector_store %arg8[%c0_6, %c0_7], %7 {strides = array<i32>} : memref<128x128xf32, #tpu.memory_space<vmem>>, vector<128x128xf32>,
    %c1_i32 = arith.constant 1 : i32
    %9 = arith.cmpi eq, %arg2, %c1_i32 : i32
    %10 = arith.extui %9 : i1 to i32
    %c0_i32_8 = arith.constant 0 : i32
    %11 = arith.cmpi ne, %10, %c0_i32_8 : i32
    scf.if %11 {
      %c0_9 = arith.constant 0 : index
      %c0_10 = arith.constant 0 : index
      %12 = vector.load %arg8[%c0_9, %c0_10] : memref<128x128xf32, #tpu.memory_space<vmem>>, vector<128x128xf32>
      %c0_11 = arith.constant 0 : index
      %c0_12 = arith.constant 0 : index
      %13 = vector.load %arg5[%c0_11, %c0_12] : memref<1x128xf32, #tpu.memory_space<vmem>>, vector<1x128xf32>
      %14 = vector.broadcast %13 : vector<1x128xf32> to vector<128x128xf32>
      %15 = arith.addf %12, %14 : vector<128x128xf32>
      %c0_13 = arith.constant 0 : index
      %c0_14 = arith.constant 0 : index
      %16 = vector.load %arg6[%c0_13, %c0_14] : memref<128x128xf32, #tpu.memory_space<vmem>>, vector<128x128xf32>
      %17 = arith.addf %15, %16 : vector<128x128xf32>
      %18 = arith.truncf %17 : vector<128x128xf32> to vector<128x128xbf16>
      %c0_15 = arith.constant 0 : index
      %c0_16 = arith.constant 0 : index
      %19 = vector.load %arg7[%c0_15, %c0_16] : memref<128x128xbf16, #tpu.memory_space<vmem>>, vector<128x128xbf16>
      tpu.vector_store %arg7[%c0_15, %c0_16], %18 {strides = array<i32>} : memref<128x128xbf16, #tpu.memory_space<vmem>>, vector<128x128xbf16>,
    } else {
    }
    return
  }
  func.func @transform_0(%arg0: i32, %arg1: i32, %arg2: i32) -> (i32, i32) {
    %c0_i32 = arith.constant 0 : i32
    return %arg0, %arg2 : i32, i32
  }
  func.func @transform_1(%arg0: i32, %arg1: i32, %arg2: i32) -> (i32, i32) {
    %c0_i32 = arith.constant 0 : i32
    return %arg2, %arg1 : i32, i32
  }
  func.func @transform_2(%arg0: i32, %arg1: i32, %arg2: i32) -> (i32, i32) {
    %c0_i32 = arith.constant 0 : i32
    %c0_i32_0 = arith.constant 0 : i32
    return %c0_i32, %arg1 : i32, i32
  }
  func.func @transform_3(%arg0: i32, %arg1: i32, %arg2: i32) -> (i32, i32) {
    %c0_i32 = arith.constant 0 : i32
    return %arg0, %arg1 : i32, i32
  }
  func.func @transform_4(%arg0: i32, %arg1: i32, %arg2: i32) -> (i32, i32) {
    %c0_i32 = arith.constant 0 : i32
    return %arg0, %arg1 : i32, i32
  }
}

module attributes {stable_mosaic.version = 11 : i64} {
  func.func @_mm_kernel(%arg0: i32, %arg1: i32, %arg2: i32, %arg3: memref<256x512xbf16, #tpu.memory_space<vmem>>, %arg4: memref<512x128xbf16, #tpu.memory_space<vmem>>, %arg5: memref<1x128xf32, #tpu.memory_space<vmem>>, %arg6: memref<256x128xbf16, #tpu.memory_space<vmem>>, %arg7: memref<256x128xf32, #tpu.memory_space<vmem>>) attributes {dimension_semantics = [#tpu.dimension_semantics<parallel>, #tpu.dimension_semantics<parallel>, #tpu.dimension_semantics<arbitrary>], iteration_bounds = array<i64: 2, 1, 2>, scalar_prefetch = 0 : i64, scratch_operands = 1 : i64, tpu.core_type = #tpu.core_type<tc>, window_params = [{transform_indices = @transform_0, window_bounds = array<i64: 256, 512>}, {transform_indices = @transform_1, window_bounds = array<i64: 512, 128>}, {transform_indices = @transform_2, window_bounds = array<i64: 1, 128>}, {transform_indices = @transform_3, window_bounds = array<i64: 256, 128>}]} {
    %c0_i32 = arith.constant 0 : i32
    %0 = arith.cmpi eq, %arg2, %c0_i32 : i32
    %1 = arith.extui %0 : i1 to i32
    %c0_i32_0 = arith.constant 0 : i32
    %2 = arith.cmpi ne, %1, %c0_i32_0 : i32
    scf.if %2 {
      %cst_9 = arith.constant 0.000000e+00 : f32
      %12 = vector.broadcast %cst_9 : f32 to vector<256x128xf32>
      %c0_10 = arith.constant 0 : index
      %c0_11 = arith.constant 0 : index
      %13 = vector.load %arg7[%c0_10, %c0_11] : memref<256x128xf32, #tpu.memory_space<vmem>>, vector<256x128xf32>
      tpu.vector_store %arg7[%c0_10, %c0_11], %12 {strides = array<i32>} : memref<256x128xf32, #tpu.memory_space<vmem>>, vector<256x128xf32>,
    } else {
    }
    %c0 = arith.constant 0 : index
    %c0_1 = arith.constant 0 : index
    %3 = vector.load %arg7[%c0, %c0_1] : memref<256x128xf32, #tpu.memory_space<vmem>>, vector<256x128xf32>
    %c0_2 = arith.constant 0 : index
    %c0_3 = arith.constant 0 : index
    %4 = vector.load %arg3[%c0_2, %c0_3] : memref<256x512xbf16, #tpu.memory_space<vmem>>, vector<256x512xbf16>
    %c0_4 = arith.constant 0 : index
    %c0_5 = arith.constant 0 : index
    %5 = vector.load %arg4[%c0_4, %c0_5] : memref<512x128xbf16, #tpu.memory_space<vmem>>, vector<512x128xbf16>
    %cst = arith.constant dense<0.000000e+00> : vector<256x128xf32>
    %6 = tpu.matmul %4, %5, %cst {dimension_numbers = #tpu.dot_dimension_numbers<[1], [0], [0], [1], [0, 0, 1, 1], [], []>} : vector<256x512xbf16>, vector<512x128xbf16>, vector<256x128xf32> -> vector<256x128xf32>
    %7 = arith.addf %3, %6 : vector<256x128xf32>
    %c0_6 = arith.constant 0 : index
    %c0_7 = arith.constant 0 : index
    %8 = vector.load %arg7[%c0_6, %c0_7] : memref<256x128xf32, #tpu.memory_space<vmem>>, vector<256x128xf32>
    tpu.vector_store %arg7[%c0_6, %c0_7], %7 {strides = array<i32>} : memref<256x128xf32, #tpu.memory_space<vmem>>, vector<256x128xf32>,
    %c1_i32 = arith.constant 1 : i32
    %9 = arith.cmpi eq, %arg2, %c1_i32 : i32
    %10 = arith.extui %9 : i1 to i32
    %c0_i32_8 = arith.constant 0 : i32
    %11 = arith.cmpi ne, %10, %c0_i32_8 : i32
    scf.if %11 {
      %c0_9 = arith.constant 0 : index
      %c0_10 = arith.constant 0 : index
      %12 = vector.load %arg7[%c0_9, %c0_10] : memref<256x128xf32, #tpu.memory_space<vmem>>, vector<256x128xf32>
      %c0_11 = arith.constant 0 : index
      %c0_12 = arith.constant 0 : index
      %13 = vector.load %arg5[%c0_11, %c0_12] : memref<1x128xf32, #tpu.memory_space<vmem>>, vector<1x128xf32>
      %14 = vector.broadcast %13 : vector<1x128xf32> to vector<256x128xf32>
      %15 = arith.addf %12, %14 : vector<256x128xf32>
      %cst_13 = arith.constant 0.000000e+00 : f32
      %16 = vector.broadcast %cst_13 : f32 to vector<256x128xf32>
      %17 = arith.maximumf %15, %16 : vector<256x128xf32>
      %18 = arith.truncf %17 : vector<256x128xf32> to vector<256x128xbf16>
      %c0_14 = arith.constant 0 : index
      %c0_15 = arith.constant 0 : index
      %19 = vector.load %arg6[%c0_14, %c0_15] : memref<256x128xbf16, #tpu.memory_space<vmem>>, vector<256x128xbf16>
      tpu.vector_store %arg6[%c0_14, %c0_15], %18 {strides = array<i32>} : memref<256x128xbf16, #tpu.memory_space<vmem>>, vector<256x128xbf16>,
    } else {
    }
    return
  }
  func.func @transform_0(%arg0: i32, %arg1: i32, %arg2: i32) -> (i32, i32) {
    %c0_i32 = arith.constant 0 : i32
    return %arg0, %arg2 : i32, i32
  }
  func.func @transform_1(%arg0: i32, %arg1: i32, %arg2: i32) -> (i32, i32) {
    %c0_i32 = arith.constant 0 : i32
    return %arg2, %arg1 : i32, i32
  }
  func.func @transform_2(%arg0: i32, %arg1: i32, %arg2: i32) -> (i32, i32) {
    %c0_i32 = arith.constant 0 : i32
    %c0_i32_0 = arith.constant 0 : i32
    return %c0_i32, %arg1 : i32, i32
  }
  func.func @transform_3(%arg0: i32, %arg1: i32, %arg2: i32) -> (i32, i32) {
    %c0_i32 = arith.constant 0 : i32
    return %arg0, %arg1 : i32, i32
  }
}

module attributes {stable_mosaic.version = 11 : i64} {
  func.func @_mm_kernel(%arg0: i32, %arg1: i32, %arg2: i32, %arg3: memref<256x128xbf16, #tpu.memory_space<vmem>>, %arg4: memref<128x128xbf16, #tpu.memory_space<vmem>>, %arg5: memref<1x128xf32, #tpu.memory_space<vmem>>, %arg6: memref<256x128xf32, #tpu.memory_space<vmem>>, %arg7: memref<256x128xf32, #tpu.memory_space<vmem>>) attributes {dimension_semantics = [#tpu.dimension_semantics<parallel>, #tpu.dimension_semantics<parallel>, #tpu.dimension_semantics<arbitrary>], iteration_bounds = array<i64: 2, 1, 1>, scalar_prefetch = 0 : i64, scratch_operands = 1 : i64, tpu.core_type = #tpu.core_type<tc>, window_params = [{transform_indices = @transform_0, window_bounds = array<i64: 256, 128>}, {transform_indices = @transform_1, window_bounds = array<i64: 128, 128>}, {transform_indices = @transform_2, window_bounds = array<i64: 1, 128>}, {transform_indices = @transform_3, window_bounds = array<i64: 256, 128>}]} {
    %c0_i32 = arith.constant 0 : i32
    %0 = arith.cmpi eq, %arg2, %c0_i32 : i32
    %1 = arith.extui %0 : i1 to i32
    %c0_i32_0 = arith.constant 0 : i32
    %2 = arith.cmpi ne, %1, %c0_i32_0 : i32
    scf.if %2 {
      %cst_10 = arith.constant 0.000000e+00 : f32
      %12 = vector.broadcast %cst_10 : f32 to vector<256x128xf32>
      %c0_11 = arith.constant 0 : index
      %c0_12 = arith.constant 0 : index
      %13 = vector.load %arg7[%c0_11, %c0_12] : memref<256x128xf32, #tpu.memory_space<vmem>>, vector<256x128xf32>
      tpu.vector_store %arg7[%c0_11, %c0_12], %12 {strides = array<i32>} : memref<256x128xf32, #tpu.memory_space<vmem>>, vector<256x128xf32>,
    } else {
    }
    %c0 = arith.constant 0 : index
    %c0_1 = arith.constant 0 : index
    %3 = vector.load %arg7[%c0, %c0_1] : memref<256x128xf32, #tpu.memory_space<vmem>>, vector<256x128xf32>
    %c0_2 = arith.constant 0 : index
    %c0_3 = arith.constant 0 : index
    %4 = vector.load %arg3[%c0_2, %c0_3] : memref<256x128xbf16, #tpu.memory_space<vmem>>, vector<256x128xbf16>
    %c0_4 = arith.constant 0 : index
    %c0_5 = arith.constant 0 : index
    %5 = vector.load %arg4[%c0_4, %c0_5] : memref<128x128xbf16, #tpu.memory_space<vmem>>, vector<128x128xbf16>
    %cst = arith.constant dense<0.000000e+00> : vector<256x128xf32>
    %6 = tpu.matmul %4, %5, %cst {dimension_numbers = #tpu.dot_dimension_numbers<[1], [0], [0], [1], [0, 0, 1, 1], [], []>} : vector<256x128xbf16>, vector<128x128xbf16>, vector<256x128xf32> -> vector<256x128xf32>
    %7 = arith.addf %3, %6 : vector<256x128xf32>
    %c0_6 = arith.constant 0 : index
    %c0_7 = arith.constant 0 : index
    %8 = vector.load %arg7[%c0_6, %c0_7] : memref<256x128xf32, #tpu.memory_space<vmem>>, vector<256x128xf32>
    tpu.vector_store %arg7[%c0_6, %c0_7], %7 {strides = array<i32>} : memref<256x128xf32, #tpu.memory_space<vmem>>, vector<256x128xf32>,
    %c0_i32_8 = arith.constant 0 : i32
    %9 = arith.cmpi eq, %arg2, %c0_i32_8 : i32
    %10 = arith.extui %9 : i1 to i32
    %c0_i32_9 = arith.constant 0 : i32
    %11 = arith.cmpi ne, %10, %c0_i32_9 : i32
    scf.if %11 {
      %c0_10 = arith.constant 0 : index
      %c0_11 = arith.constant 0 : index
      %12 = vector.load %arg7[%c0_10, %c0_11] : memref<256x128xf32, #tpu.memory_space<vmem>>, vector<256x128xf32>
      %c0_12 = arith.constant 0 : index
      %c0_13 = arith.constant 0 : index
      %13 = vector.load %arg5[%c0_12, %c0_13] : memref<1x128xf32, #tpu.memory_space<vmem>>, vector<1x128xf32>
      %14 = vector.broadcast %13 : vector<1x128xf32> to vector<256x128xf32>
      %15 = arith.addf %12, %14 : vector<256x128xf32>
      %c0_14 = arith.constant 0 : index
      %c0_15 = arith.constant 0 : index
      %16 = vector.load %arg6[%c0_14, %c0_15] : memref<256x128xf32, #tpu.memory_space<vmem>>, vector<256x128xf32>
      tpu.vector_store %arg6[%c0_14, %c0_15], %15 {strides = array<i32>} : memref<256x128xf32, #tpu.memory_space<vmem>>, vector<256x128xf32>,
    } else {
    }
    return
  }
  func.func @transform_0(%arg0: i32, %arg1: i32, %arg2: i32) -> (i32, i32) {
    %c0_i32 = arith.constant 0 : i32
    return %arg0, %arg2 : i32, i32
  }
  func.func @transform_1(%arg0: i32, %arg1: i32, %arg2: i32) -> (i32, i32) {
    %c0_i32 = arith.constant 0 : i32
    return %arg2, %arg1 : i32, i32
  }
  func.func @transform_2(%arg0: i32, %arg1: i32, %arg2: i32) -> (i32, i32) {
    %c0_i32 = arith.constant 0 : i32
    %c0_i32_0 = arith.constant 0 : i32
    return %c0_i32, %arg1 : i32, i32
  }
  func.func @transform_3(%arg0: i32, %arg1: i32, %arg2: i32) -> (i32, i32) {
    %c0_i32 = arith.constant 0 : i32
    return %arg0, %arg1 : i32, i32
  }
}

module attributes {stable_mosaic.version = 11 : i64} {
  func.func @_mm_kernel(%arg0: i32, %arg1: i32, %arg2: i32, %arg3: memref<256x512xbf16, #tpu.memory_space<vmem>>, %arg4: memref<512x128xbf16, #tpu.memory_space<vmem>>, %arg5: memref<1x128xf32, #tpu.memory_space<vmem>>, %arg6: memref<256x128xf32, #tpu.memory_space<vmem>>, %arg7: memref<256x128xbf16, #tpu.memory_space<vmem>>, %arg8: memref<256x128xf32, #tpu.memory_space<vmem>>) attributes {dimension_semantics = [#tpu.dimension_semantics<parallel>, #tpu.dimension_semantics<parallel>, #tpu.dimension_semantics<arbitrary>], iteration_bounds = array<i64: 2, 1, 1>, scalar_prefetch = 0 : i64, scratch_operands = 1 : i64, tpu.core_type = #tpu.core_type<tc>, window_params = [{transform_indices = @transform_0, window_bounds = array<i64: 256, 512>}, {transform_indices = @transform_1, window_bounds = array<i64: 512, 128>}, {transform_indices = @transform_2, window_bounds = array<i64: 1, 128>}, {transform_indices = @transform_3, window_bounds = array<i64: 256, 128>}, {transform_indices = @transform_4, window_bounds = array<i64: 256, 128>}]} {
    %c0_i32 = arith.constant 0 : i32
    %0 = arith.cmpi eq, %arg2, %c0_i32 : i32
    %1 = arith.extui %0 : i1 to i32
    %c0_i32_0 = arith.constant 0 : i32
    %2 = arith.cmpi ne, %1, %c0_i32_0 : i32
    scf.if %2 {
      %cst_10 = arith.constant 0.000000e+00 : f32
      %12 = vector.broadcast %cst_10 : f32 to vector<256x128xf32>
      %c0_11 = arith.constant 0 : index
      %c0_12 = arith.constant 0 : index
      %13 = vector.load %arg8[%c0_11, %c0_12] : memref<256x128xf32, #tpu.memory_space<vmem>>, vector<256x128xf32>
      tpu.vector_store %arg8[%c0_11, %c0_12], %12 {strides = array<i32>} : memref<256x128xf32, #tpu.memory_space<vmem>>, vector<256x128xf32>,
    } else {
    }
    %c0 = arith.constant 0 : index
    %c0_1 = arith.constant 0 : index
    %3 = vector.load %arg8[%c0, %c0_1] : memref<256x128xf32, #tpu.memory_space<vmem>>, vector<256x128xf32>
    %c0_2 = arith.constant 0 : index
    %c0_3 = arith.constant 0 : index
    %4 = vector.load %arg3[%c0_2, %c0_3] : memref<256x512xbf16, #tpu.memory_space<vmem>>, vector<256x512xbf16>
    %c0_4 = arith.constant 0 : index
    %c0_5 = arith.constant 0 : index
    %5 = vector.load %arg4[%c0_4, %c0_5] : memref<512x128xbf16, #tpu.memory_space<vmem>>, vector<512x128xbf16>
    %cst = arith.constant dense<0.000000e+00> : vector<256x128xf32>
    %6 = tpu.matmul %4, %5, %cst {dimension_numbers = #tpu.dot_dimension_numbers<[1], [0], [0], [1], [0, 0, 1, 1], [], []>} : vector<256x512xbf16>, vector<512x128xbf16>, vector<256x128xf32> -> vector<256x128xf32>
    %7 = arith.addf %3, %6 : vector<256x128xf32>
    %c0_6 = arith.constant 0 : index
    %c0_7 = arith.constant 0 : index
    %8 = vector.load %arg8[%c0_6, %c0_7] : memref<256x128xf32, #tpu.memory_space<vmem>>, vector<256x128xf32>
    tpu.vector_store %arg8[%c0_6, %c0_7], %7 {strides = array<i32>} : memref<256x128xf32, #tpu.memory_space<vmem>>, vector<256x128xf32>,
    %c0_i32_8 = arith.constant 0 : i32
    %9 = arith.cmpi eq, %arg2, %c0_i32_8 : i32
    %10 = arith.extui %9 : i1 to i32
    %c0_i32_9 = arith.constant 0 : i32
    %11 = arith.cmpi ne, %10, %c0_i32_9 : i32
    scf.if %11 {
      %c0_10 = arith.constant 0 : index
      %c0_11 = arith.constant 0 : index
      %12 = vector.load %arg8[%c0_10, %c0_11] : memref<256x128xf32, #tpu.memory_space<vmem>>, vector<256x128xf32>
      %c0_12 = arith.constant 0 : index
      %c0_13 = arith.constant 0 : index
      %13 = vector.load %arg5[%c0_12, %c0_13] : memref<1x128xf32, #tpu.memory_space<vmem>>, vector<1x128xf32>
      %14 = vector.broadcast %13 : vector<1x128xf32> to vector<256x128xf32>
      %15 = arith.addf %12, %14 : vector<256x128xf32>
      %c0_14 = arith.constant 0 : index
      %c0_15 = arith.constant 0 : index
      %16 = vector.load %arg6[%c0_14, %c0_15] : memref<256x128xf32, #tpu.memory_space<vmem>>, vector<256x128xf32>
      %17 = arith.addf %15, %16 : vector<256x128xf32>
      %18 = arith.truncf %17 : vector<256x128xf32> to vector<256x128xbf16>
      %c0_16 = arith.constant 0 : index
      %c0_17 = arith.constant 0 : index
      %19 = vector.load %arg7[%c0_16, %c0_17] : memref<256x128xbf16, #tpu.memory_space<vmem>>, vector<256x128xbf16>
      tpu.vector_store %arg7[%c0_16, %c0_17], %18 {strides = array<i32>} : memref<256x128xbf16, #tpu.memory_space<vmem>>, vector<256x128xbf16>,
    } else {
    }
    return
  }
  func.func @transform_0(%arg0: i32, %arg1: i32, %arg2: i32) -> (i32, i32) {
    %c0_i32 = arith.constant 0 : i32
    return %arg0, %arg2 : i32, i32
  }
  func.func @transform_1(%arg0: i32, %arg1: i32, %arg2: i32) -> (i32, i32) {
    %c0_i32 = arith.constant 0 : i32
    return %arg2, %arg1 : i32, i32
  }
  func.func @transform_2(%arg0: i32, %arg1: i32, %arg2: i32) -> (i32, i32) {
    %c0_i32 = arith.constant 0 : i32
    %c0_i32_0 = arith.constant 0 : i32
    return %c0_i32, %arg1 : i32, i32
  }
  func.func @transform_3(%arg0: i32, %arg1: i32, %arg2: i32) -> (i32, i32) {
    %c0_i32 = arith.constant 0 : i32
    return %arg0, %arg1 : i32, i32
  }
  func.func @transform_4(%arg0: i32, %arg1: i32, %arg2: i32) -> (i32, i32) {
    %c0_i32 = arith.constant 0 : i32
    return %arg0, %arg1 : i32, i32
  }
}

module attributes {stable_mosaic.version = 11 : i64} {
  func.func @_mm_kernel(%arg0: i32, %arg1: i32, %arg2: i32, %arg3: memref<256x512xbf16, #tpu.memory_space<vmem>>, %arg4: memref<512x128xbf16, #tpu.memory_space<vmem>>, %arg5: memref<1x128xf32, #tpu.memory_space<vmem>>, %arg6: memref<256x128xbf16, #tpu.memory_space<vmem>>, %arg7: memref<256x128xf32, #tpu.memory_space<vmem>>) attributes {dimension_semantics = [#tpu.dimension_semantics<parallel>, #tpu.dimension_semantics<parallel>, #tpu.dimension_semantics<arbitrary>], iteration_bounds = array<i64: 8, 1, 1>, scalar_prefetch = 0 : i64, scratch_operands = 1 : i64, tpu.core_type = #tpu.core_type<tc>, window_params = [{transform_indices = @transform_0, window_bounds = array<i64: 256, 512>}, {transform_indices = @transform_1, window_bounds = array<i64: 512, 128>}, {transform_indices = @transform_2, window_bounds = array<i64: 1, 128>}, {transform_indices = @transform_3, window_bounds = array<i64: 256, 128>}]} {
    %c0_i32 = arith.constant 0 : i32
    %0 = arith.cmpi eq, %arg2, %c0_i32 : i32
    %1 = arith.extui %0 : i1 to i32
    %c0_i32_0 = arith.constant 0 : i32
    %2 = arith.cmpi ne, %1, %c0_i32_0 : i32
    scf.if %2 {
      %cst_10 = arith.constant 0.000000e+00 : f32
      %12 = vector.broadcast %cst_10 : f32 to vector<256x128xf32>
      %c0_11 = arith.constant 0 : index
      %c0_12 = arith.constant 0 : index
      %13 = vector.load %arg7[%c0_11, %c0_12] : memref<256x128xf32, #tpu.memory_space<vmem>>, vector<256x128xf32>
      tpu.vector_store %arg7[%c0_11, %c0_12], %12 {strides = array<i32>} : memref<256x128xf32, #tpu.memory_space<vmem>>, vector<256x128xf32>,
    } else {
    }
    %c0 = arith.constant 0 : index
    %c0_1 = arith.constant 0 : index
    %3 = vector.load %arg7[%c0, %c0_1] : memref<256x128xf32, #tpu.memory_space<vmem>>, vector<256x128xf32>
    %c0_2 = arith.constant 0 : index
    %c0_3 = arith.constant 0 : index
    %4 = vector.load %arg3[%c0_2, %c0_3] : memref<256x512xbf16, #tpu.memory_space<vmem>>, vector<256x512xbf16>
    %c0_4 = arith.constant 0 : index
    %c0_5 = arith.constant 0 : index
    %5 = vector.load %arg4[%c0_4, %c0_5] : memref<512x128xbf16, #tpu.memory_space<vmem>>, vector<512x128xbf16>
    %cst = arith.constant dense<0.000000e+00> : vector<256x128xf32>
    %6 = tpu.matmul %4, %5, %cst {dimension_numbers = #tpu.dot_dimension_numbers<[1], [0], [0], [1], [0, 0, 1, 1], [], []>} : vector<256x512xbf16>, vector<512x128xbf16>, vector<256x128xf32> -> vector<256x128xf32>
    %7 = arith.addf %3, %6 : vector<256x128xf32>
    %c0_6 = arith.constant 0 : index
    %c0_7 = arith.constant 0 : index
    %8 = vector.load %arg7[%c0_6, %c0_7] : memref<256x128xf32, #tpu.memory_space<vmem>>, vector<256x128xf32>
    tpu.vector_store %arg7[%c0_6, %c0_7], %7 {strides = array<i32>} : memref<256x128xf32, #tpu.memory_space<vmem>>, vector<256x128xf32>,
    %c0_i32_8 = arith.constant 0 : i32
    %9 = arith.cmpi eq, %arg2, %c0_i32_8 : i32
    %10 = arith.extui %9 : i1 to i32
    %c0_i32_9 = arith.constant 0 : i32
    %11 = arith.cmpi ne, %10, %c0_i32_9 : i32
    scf.if %11 {
      %c0_10 = arith.constant 0 : index
      %c0_11 = arith.constant 0 : index
      %12 = vector.load %arg7[%c0_10, %c0_11] : memref<256x128xf32, #tpu.memory_space<vmem>>, vector<256x128xf32>
      %c0_12 = arith.constant 0 : index
      %c0_13 = arith.constant 0 : index
      %13 = vector.load %arg5[%c0_12, %c0_13] : memref<1x128xf32, #tpu.memory_space<vmem>>, vector<1x128xf32>
      %14 = vector.broadcast %13 : vector<1x128xf32> to vector<256x128xf32>
      %15 = arith.addf %12, %14 : vector<256x128xf32>
      %cst_14 = arith.constant 0.000000e+00 : f32
      %16 = vector.broadcast %cst_14 : f32 to vector<256x128xf32>
      %17 = arith.maximumf %15, %16 : vector<256x128xf32>
      %18 = arith.truncf %17 : vector<256x128xf32> to vector<256x128xbf16>
      %c0_15 = arith.constant 0 : index
      %c0_16 = arith.constant 0 : index
      %19 = vector.load %arg6[%c0_15, %c0_16] : memref<256x128xbf16, #tpu.memory_space<vmem>>, vector<256x128xbf16>
      tpu.vector_store %arg6[%c0_15, %c0_16], %18 {strides = array<i32>} : memref<256x128xbf16, #tpu.memory_space<vmem>>, vector<256x128xbf16>,
    } else {
    }
    return
  }
  func.func @transform_0(%arg0: i32, %arg1: i32, %arg2: i32) -> (i32, i32) {
    %c0_i32 = arith.constant 0 : i32
    return %arg0, %arg2 : i32, i32
  }
  func.func @transform_1(%arg0: i32, %arg1: i32, %arg2: i32) -> (i32, i32) {
    %c0_i32 = arith.constant 0 : i32
    return %arg2, %arg1 : i32, i32
  }
  func.func @transform_2(%arg0: i32, %arg1: i32, %arg2: i32) -> (i32, i32) {
    %c0_i32 = arith.constant 0 : i32
    %c0_i32_0 = arith.constant 0 : i32
    return %c0_i32, %arg1 : i32, i32
  }
  func.func @transform_3(%arg0: i32, %arg1: i32, %arg2: i32) -> (i32, i32) {
    %c0_i32 = arith.constant 0 : i32
    return %arg0, %arg1 : i32, i32
  }
}

module attributes {stable_mosaic.version = 11 : i64} {
  func.func @_mm_kernel(%arg0: i32, %arg1: i32, %arg2: i32, %arg3: memref<256x128xbf16, #tpu.memory_space<vmem>>, %arg4: memref<128x128xbf16, #tpu.memory_space<vmem>>, %arg5: memref<1x128xf32, #tpu.memory_space<vmem>>, %arg6: memref<256x128xf32, #tpu.memory_space<vmem>>, %arg7: memref<256x128xf32, #tpu.memory_space<vmem>>) attributes {dimension_semantics = [#tpu.dimension_semantics<parallel>, #tpu.dimension_semantics<parallel>, #tpu.dimension_semantics<arbitrary>], iteration_bounds = array<i64: 8, 1, 1>, scalar_prefetch = 0 : i64, scratch_operands = 1 : i64, tpu.core_type = #tpu.core_type<tc>, window_params = [{transform_indices = @transform_0, window_bounds = array<i64: 256, 128>}, {transform_indices = @transform_1, window_bounds = array<i64: 128, 128>}, {transform_indices = @transform_2, window_bounds = array<i64: 1, 128>}, {transform_indices = @transform_3, window_bounds = array<i64: 256, 128>}]} {
    %c0_i32 = arith.constant 0 : i32
    %0 = arith.cmpi eq, %arg2, %c0_i32 : i32
    %1 = arith.extui %0 : i1 to i32
    %c0_i32_0 = arith.constant 0 : i32
    %2 = arith.cmpi ne, %1, %c0_i32_0 : i32
    scf.if %2 {
      %cst_10 = arith.constant 0.000000e+00 : f32
      %12 = vector.broadcast %cst_10 : f32 to vector<256x128xf32>
      %c0_11 = arith.constant 0 : index
      %c0_12 = arith.constant 0 : index
      %13 = vector.load %arg7[%c0_11, %c0_12] : memref<256x128xf32, #tpu.memory_space<vmem>>, vector<256x128xf32>
      tpu.vector_store %arg7[%c0_11, %c0_12], %12 {strides = array<i32>} : memref<256x128xf32, #tpu.memory_space<vmem>>, vector<256x128xf32>,
    } else {
    }
    %c0 = arith.constant 0 : index
    %c0_1 = arith.constant 0 : index
    %3 = vector.load %arg7[%c0, %c0_1] : memref<256x128xf32, #tpu.memory_space<vmem>>, vector<256x128xf32>
    %c0_2 = arith.constant 0 : index
    %c0_3 = arith.constant 0 : index
    %4 = vector.load %arg3[%c0_2, %c0_3] : memref<256x128xbf16, #tpu.memory_space<vmem>>, vector<256x128xbf16>
    %c0_4 = arith.constant 0 : index
    %c0_5 = arith.constant 0 : index
    %5 = vector.load %arg4[%c0_4, %c0_5] : memref<128x128xbf16, #tpu.memory_space<vmem>>, vector<128x128xbf16>
    %cst = arith.constant dense<0.000000e+00> : vector<256x128xf32>
    %6 = tpu.matmul %4, %5, %cst {dimension_numbers = #tpu.dot_dimension_numbers<[1], [0], [0], [1], [0, 0, 1, 1], [], []>} : vector<256x128xbf16>, vector<128x128xbf16>, vector<256x128xf32> -> vector<256x128xf32>
    %7 = arith.addf %3, %6 : vector<256x128xf32>
    %c0_6 = arith.constant 0 : index
    %c0_7 = arith.constant 0 : index
    %8 = vector.load %arg7[%c0_6, %c0_7] : memref<256x128xf32, #tpu.memory_space<vmem>>, vector<256x128xf32>
    tpu.vector_store %arg7[%c0_6, %c0_7], %7 {strides = array<i32>} : memref<256x128xf32, #tpu.memory_space<vmem>>, vector<256x128xf32>,
    %c0_i32_8 = arith.constant 0 : i32
    %9 = arith.cmpi eq, %arg2, %c0_i32_8 : i32
    %10 = arith.extui %9 : i1 to i32
    %c0_i32_9 = arith.constant 0 : i32
    %11 = arith.cmpi ne, %10, %c0_i32_9 : i32
    scf.if %11 {
      %c0_10 = arith.constant 0 : index
      %c0_11 = arith.constant 0 : index
      %12 = vector.load %arg7[%c0_10, %c0_11] : memref<256x128xf32, #tpu.memory_space<vmem>>, vector<256x128xf32>
      %c0_12 = arith.constant 0 : index
      %c0_13 = arith.constant 0 : index
      %13 = vector.load %arg5[%c0_12, %c0_13] : memref<1x128xf32, #tpu.memory_space<vmem>>, vector<1x128xf32>
      %14 = vector.broadcast %13 : vector<1x128xf32> to vector<256x128xf32>
      %15 = arith.addf %12, %14 : vector<256x128xf32>
      %c0_14 = arith.constant 0 : index
      %c0_15 = arith.constant 0 : index
      %16 = vector.load %arg6[%c0_14, %c0_15] : memref<256x128xf32, #tpu.memory_space<vmem>>, vector<256x128xf32>
      tpu.vector_store %arg6[%c0_14, %c0_15], %15 {strides = array<i32>} : memref<256x128xf32, #tpu.memory_space<vmem>>, vector<256x128xf32>,
    } else {
    }
    return
  }
  func.func @transform_0(%arg0: i32, %arg1: i32, %arg2: i32) -> (i32, i32) {
    %c0_i32 = arith.constant 0 : i32
    return %arg0, %arg2 : i32, i32
  }
  func.func @transform_1(%arg0: i32, %arg1: i32, %arg2: i32) -> (i32, i32) {
    %c0_i32 = arith.constant 0 : i32
    return %arg2, %arg1 : i32, i32
  }
  func.func @transform_2(%arg0: i32, %arg1: i32, %arg2: i32) -> (i32, i32) {
    %c0_i32 = arith.constant 0 : i32
    %c0_i32_0 = arith.constant 0 : i32
    return %c0_i32, %arg1 : i32, i32
  }
  func.func @transform_3(%arg0: i32, %arg1: i32, %arg2: i32) -> (i32, i32) {
    %c0_i32 = arith.constant 0 : i32
    return %arg0, %arg1 : i32, i32
  }
}

module attributes {stable_mosaic.version = 11 : i64} {
  func.func @_mm_kernel(%arg0: i32, %arg1: i32, %arg2: i32, %arg3: memref<256x256xbf16, #tpu.memory_space<vmem>>, %arg4: memref<256x128xbf16, #tpu.memory_space<vmem>>, %arg5: memref<1x128xf32, #tpu.memory_space<vmem>>, %arg6: memref<256x128xf32, #tpu.memory_space<vmem>>, %arg7: memref<256x128xbf16, #tpu.memory_space<vmem>>, %arg8: memref<256x128xf32, #tpu.memory_space<vmem>>) attributes {dimension_semantics = [#tpu.dimension_semantics<parallel>, #tpu.dimension_semantics<parallel>, #tpu.dimension_semantics<arbitrary>], iteration_bounds = array<i64: 8, 1, 1>, scalar_prefetch = 0 : i64, scratch_operands = 1 : i64, tpu.core_type = #tpu.core_type<tc>, window_params = [{transform_indices = @transform_0, window_bounds = array<i64: 256, 256>}, {transform_indices = @transform_1, window_bounds = array<i64: 256, 128>}, {transform_indices = @transform_2, window_bounds = array<i64: 1, 128>}, {transform_indices = @transform_3, window_bounds = array<i64: 256, 128>}, {transform_indices = @transform_4, window_bounds = array<i64: 256, 128>}]} {
    %c0_i32 = arith.constant 0 : i32
    %0 = arith.cmpi eq, %arg2, %c0_i32 : i32
    %1 = arith.extui %0 : i1 to i32
    %c0_i32_0 = arith.constant 0 : i32
    %2 = arith.cmpi ne, %1, %c0_i32_0 : i32
    scf.if %2 {
      %cst_10 = arith.constant 0.000000e+00 : f32
      %12 = vector.broadcast %cst_10 : f32 to vector<256x128xf32>
      %c0_11 = arith.constant 0 : index
      %c0_12 = arith.constant 0 : index
      %13 = vector.load %arg8[%c0_11, %c0_12] : memref<256x128xf32, #tpu.memory_space<vmem>>, vector<256x128xf32>
      tpu.vector_store %arg8[%c0_11, %c0_12], %12 {strides = array<i32>} : memref<256x128xf32, #tpu.memory_space<vmem>>, vector<256x128xf32>,
    } else {
    }
    %c0 = arith.constant 0 : index
    %c0_1 = arith.constant 0 : index
    %3 = vector.load %arg8[%c0, %c0_1] : memref<256x128xf32, #tpu.memory_space<vmem>>, vector<256x128xf32>
    %c0_2 = arith.constant 0 : index
    %c0_3 = arith.constant 0 : index
    %4 = vector.load %arg3[%c0_2, %c0_3] : memref<256x256xbf16, #tpu.memory_space<vmem>>, vector<256x256xbf16>
    %c0_4 = arith.constant 0 : index
    %c0_5 = arith.constant 0 : index
    %5 = vector.load %arg4[%c0_4, %c0_5] : memref<256x128xbf16, #tpu.memory_space<vmem>>, vector<256x128xbf16>
    %cst = arith.constant dense<0.000000e+00> : vector<256x128xf32>
    %6 = tpu.matmul %4, %5, %cst {dimension_numbers = #tpu.dot_dimension_numbers<[1], [0], [0], [1], [0, 0, 1, 1], [], []>} : vector<256x256xbf16>, vector<256x128xbf16>, vector<256x128xf32> -> vector<256x128xf32>
    %7 = arith.addf %3, %6 : vector<256x128xf32>
    %c0_6 = arith.constant 0 : index
    %c0_7 = arith.constant 0 : index
    %8 = vector.load %arg8[%c0_6, %c0_7] : memref<256x128xf32, #tpu.memory_space<vmem>>, vector<256x128xf32>
    tpu.vector_store %arg8[%c0_6, %c0_7], %7 {strides = array<i32>} : memref<256x128xf32, #tpu.memory_space<vmem>>, vector<256x128xf32>,
    %c0_i32_8 = arith.constant 0 : i32
    %9 = arith.cmpi eq, %arg2, %c0_i32_8 : i32
    %10 = arith.extui %9 : i1 to i32
    %c0_i32_9 = arith.constant 0 : i32
    %11 = arith.cmpi ne, %10, %c0_i32_9 : i32
    scf.if %11 {
      %c0_10 = arith.constant 0 : index
      %c0_11 = arith.constant 0 : index
      %12 = vector.load %arg8[%c0_10, %c0_11] : memref<256x128xf32, #tpu.memory_space<vmem>>, vector<256x128xf32>
      %c0_12 = arith.constant 0 : index
      %c0_13 = arith.constant 0 : index
      %13 = vector.load %arg5[%c0_12, %c0_13] : memref<1x128xf32, #tpu.memory_space<vmem>>, vector<1x128xf32>
      %14 = vector.broadcast %13 : vector<1x128xf32> to vector<256x128xf32>
      %15 = arith.addf %12, %14 : vector<256x128xf32>
      %c0_14 = arith.constant 0 : index
      %c0_15 = arith.constant 0 : index
      %16 = vector.load %arg6[%c0_14, %c0_15] : memref<256x128xf32, #tpu.memory_space<vmem>>, vector<256x128xf32>
      %17 = arith.addf %15, %16 : vector<256x128xf32>
      %18 = arith.truncf %17 : vector<256x128xf32> to vector<256x128xbf16>
      %c0_16 = arith.constant 0 : index
      %c0_17 = arith.constant 0 : index
      %19 = vector.load %arg7[%c0_16, %c0_17] : memref<256x128xbf16, #tpu.memory_space<vmem>>, vector<256x128xbf16>
      tpu.vector_store %arg7[%c0_16, %c0_17], %18 {strides = array<i32>} : memref<256x128xbf16, #tpu.memory_space<vmem>>, vector<256x128xbf16>,
    } else {
    }
    return
  }
  func.func @transform_0(%arg0: i32, %arg1: i32, %arg2: i32) -> (i32, i32) {
    %c0_i32 = arith.constant 0 : i32
    return %arg0, %arg2 : i32, i32
  }
  func.func @transform_1(%arg0: i32, %arg1: i32, %arg2: i32) -> (i32, i32) {
    %c0_i32 = arith.constant 0 : i32
    return %arg2, %arg1 : i32, i32
  }
  func.func @transform_2(%arg0: i32, %arg1: i32, %arg2: i32) -> (i32, i32) {
    %c0_i32 = arith.constant 0 : i32
    %c0_i32_0 = arith.constant 0 : i32
    return %c0_i32, %arg1 : i32, i32
  }
  func.func @transform_3(%arg0: i32, %arg1: i32, %arg2: i32) -> (i32, i32) {
    %c0_i32 = arith.constant 0 : i32
    return %arg0, %arg1 : i32, i32
  }
  func.func @transform_4(%arg0: i32, %arg1: i32, %arg2: i32) -> (i32, i32) {
    %c0_i32 = arith.constant 0 : i32
    return %arg0, %arg1 : i32, i32
  }
}

module attributes {stable_mosaic.version = 11 : i64} {
  func.func @_mm_kernel(%arg0: i32, %arg1: i32, %arg2: i32, %arg3: memref<256x256xbf16, #tpu.memory_space<vmem>>, %arg4: memref<256x128xbf16, #tpu.memory_space<vmem>>, %arg5: memref<1x128xf32, #tpu.memory_space<vmem>>, %arg6: memref<256x128xbf16, #tpu.memory_space<vmem>>, %arg7: memref<256x128xf32, #tpu.memory_space<vmem>>) attributes {dimension_semantics = [#tpu.dimension_semantics<parallel>, #tpu.dimension_semantics<parallel>, #tpu.dimension_semantics<arbitrary>], iteration_bounds = array<i64: 32, 1, 1>, scalar_prefetch = 0 : i64, scratch_operands = 1 : i64, tpu.core_type = #tpu.core_type<tc>, window_params = [{transform_indices = @transform_0, window_bounds = array<i64: 256, 256>}, {transform_indices = @transform_1, window_bounds = array<i64: 256, 128>}, {transform_indices = @transform_2, window_bounds = array<i64: 1, 128>}, {transform_indices = @transform_3, window_bounds = array<i64: 256, 128>}]} {
    %c0_i32 = arith.constant 0 : i32
    %0 = arith.cmpi eq, %arg2, %c0_i32 : i32
    %1 = arith.extui %0 : i1 to i32
    %c0_i32_0 = arith.constant 0 : i32
    %2 = arith.cmpi ne, %1, %c0_i32_0 : i32
    scf.if %2 {
      %cst_10 = arith.constant 0.000000e+00 : f32
      %12 = vector.broadcast %cst_10 : f32 to vector<256x128xf32>
      %c0_11 = arith.constant 0 : index
      %c0_12 = arith.constant 0 : index
      %13 = vector.load %arg7[%c0_11, %c0_12] : memref<256x128xf32, #tpu.memory_space<vmem>>, vector<256x128xf32>
      tpu.vector_store %arg7[%c0_11, %c0_12], %12 {strides = array<i32>} : memref<256x128xf32, #tpu.memory_space<vmem>>, vector<256x128xf32>,
    } else {
    }
    %c0 = arith.constant 0 : index
    %c0_1 = arith.constant 0 : index
    %3 = vector.load %arg7[%c0, %c0_1] : memref<256x128xf32, #tpu.memory_space<vmem>>, vector<256x128xf32>
    %c0_2 = arith.constant 0 : index
    %c0_3 = arith.constant 0 : index
    %4 = vector.load %arg3[%c0_2, %c0_3] : memref<256x256xbf16, #tpu.memory_space<vmem>>, vector<256x256xbf16>
    %c0_4 = arith.constant 0 : index
    %c0_5 = arith.constant 0 : index
    %5 = vector.load %arg4[%c0_4, %c0_5] : memref<256x128xbf16, #tpu.memory_space<vmem>>, vector<256x128xbf16>
    %cst = arith.constant dense<0.000000e+00> : vector<256x128xf32>
    %6 = tpu.matmul %4, %5, %cst {dimension_numbers = #tpu.dot_dimension_numbers<[1], [0], [0], [1], [0, 0, 1, 1], [], []>} : vector<256x256xbf16>, vector<256x128xbf16>, vector<256x128xf32> -> vector<256x128xf32>
    %7 = arith.addf %3, %6 : vector<256x128xf32>
    %c0_6 = arith.constant 0 : index
    %c0_7 = arith.constant 0 : index
    %8 = vector.load %arg7[%c0_6, %c0_7] : memref<256x128xf32, #tpu.memory_space<vmem>>, vector<256x128xf32>
    tpu.vector_store %arg7[%c0_6, %c0_7], %7 {strides = array<i32>} : memref<256x128xf32, #tpu.memory_space<vmem>>, vector<256x128xf32>,
    %c0_i32_8 = arith.constant 0 : i32
    %9 = arith.cmpi eq, %arg2, %c0_i32_8 : i32
    %10 = arith.extui %9 : i1 to i32
    %c0_i32_9 = arith.constant 0 : i32
    %11 = arith.cmpi ne, %10, %c0_i32_9 : i32
    scf.if %11 {
      %c0_10 = arith.constant 0 : index
      %c0_11 = arith.constant 0 : index
      %12 = vector.load %arg7[%c0_10, %c0_11] : memref<256x128xf32, #tpu.memory_space<vmem>>, vector<256x128xf32>
      %c0_12 = arith.constant 0 : index
      %c0_13 = arith.constant 0 : index
      %13 = vector.load %arg5[%c0_12, %c0_13] : memref<1x128xf32, #tpu.memory_space<vmem>>, vector<1x128xf32>
      %14 = vector.broadcast %13 : vector<1x128xf32> to vector<256x128xf32>
      %15 = arith.addf %12, %14 : vector<256x128xf32>
      %cst_14 = arith.constant 0.000000e+00 : f32
      %16 = vector.broadcast %cst_14 : f32 to vector<256x128xf32>
      %17 = arith.maximumf %15, %16 : vector<256x128xf32>
      %18 = arith.truncf %17 : vector<256x128xf32> to vector<256x128xbf16>
      %c0_15 = arith.constant 0 : index
      %c0_16 = arith.constant 0 : index
      %19 = vector.load %arg6[%c0_15, %c0_16] : memref<256x128xbf16, #tpu.memory_space<vmem>>, vector<256x128xbf16>
      tpu.vector_store %arg6[%c0_15, %c0_16], %18 {strides = array<i32>} : memref<256x128xbf16, #tpu.memory_space<vmem>>, vector<256x128xbf16>,
    } else {
    }
    return
  }
  func.func @transform_0(%arg0: i32, %arg1: i32, %arg2: i32) -> (i32, i32) {
    %c0_i32 = arith.constant 0 : i32
    return %arg0, %arg2 : i32, i32
  }
  func.func @transform_1(%arg0: i32, %arg1: i32, %arg2: i32) -> (i32, i32) {
    %c0_i32 = arith.constant 0 : i32
    return %arg2, %arg1 : i32, i32
  }
  func.func @transform_2(%arg0: i32, %arg1: i32, %arg2: i32) -> (i32, i32) {
    %c0_i32 = arith.constant 0 : i32
    %c0_i32_0 = arith.constant 0 : i32
    return %c0_i32, %arg1 : i32, i32
  }
  func.func @transform_3(%arg0: i32, %arg1: i32, %arg2: i32) -> (i32, i32) {
    %c0_i32 = arith.constant 0 : i32
    return %arg0, %arg1 : i32, i32
  }
}

module attributes {stable_mosaic.version = 11 : i64} {
  func.func @_mm_kernel(%arg0: i32, %arg1: i32, %arg2: i32, %arg3: memref<256x128xbf16, #tpu.memory_space<vmem>>, %arg4: memref<128x128xbf16, #tpu.memory_space<vmem>>, %arg5: memref<1x128xf32, #tpu.memory_space<vmem>>, %arg6: memref<256x128xf32, #tpu.memory_space<vmem>>, %arg7: memref<256x128xf32, #tpu.memory_space<vmem>>) attributes {dimension_semantics = [#tpu.dimension_semantics<parallel>, #tpu.dimension_semantics<parallel>, #tpu.dimension_semantics<arbitrary>], iteration_bounds = array<i64: 32, 1, 1>, scalar_prefetch = 0 : i64, scratch_operands = 1 : i64, tpu.core_type = #tpu.core_type<tc>, window_params = [{transform_indices = @transform_0, window_bounds = array<i64: 256, 128>}, {transform_indices = @transform_1, window_bounds = array<i64: 128, 128>}, {transform_indices = @transform_2, window_bounds = array<i64: 1, 128>}, {transform_indices = @transform_3, window_bounds = array<i64: 256, 128>}]} {
    %c0_i32 = arith.constant 0 : i32
    %0 = arith.cmpi eq, %arg2, %c0_i32 : i32
    %1 = arith.extui %0 : i1 to i32
    %c0_i32_0 = arith.constant 0 : i32
    %2 = arith.cmpi ne, %1, %c0_i32_0 : i32
    scf.if %2 {
      %cst_10 = arith.constant 0.000000e+00 : f32
      %12 = vector.broadcast %cst_10 : f32 to vector<256x128xf32>
      %c0_11 = arith.constant 0 : index
      %c0_12 = arith.constant 0 : index
      %13 = vector.load %arg7[%c0_11, %c0_12] : memref<256x128xf32, #tpu.memory_space<vmem>>, vector<256x128xf32>
      tpu.vector_store %arg7[%c0_11, %c0_12], %12 {strides = array<i32>} : memref<256x128xf32, #tpu.memory_space<vmem>>, vector<256x128xf32>,
    } else {
    }
    %c0 = arith.constant 0 : index
    %c0_1 = arith.constant 0 : index
    %3 = vector.load %arg7[%c0, %c0_1] : memref<256x128xf32, #tpu.memory_space<vmem>>, vector<256x128xf32>
    %c0_2 = arith.constant 0 : index
    %c0_3 = arith.constant 0 : index
    %4 = vector.load %arg3[%c0_2, %c0_3] : memref<256x128xbf16, #tpu.memory_space<vmem>>, vector<256x128xbf16>
    %c0_4 = arith.constant 0 : index
    %c0_5 = arith.constant 0 : index
    %5 = vector.load %arg4[%c0_4, %c0_5] : memref<128x128xbf16, #tpu.memory_space<vmem>>, vector<128x128xbf16>
    %cst = arith.constant dense<0.000000e+00> : vector<256x128xf32>
    %6 = tpu.matmul %4, %5, %cst {dimension_numbers = #tpu.dot_dimension_numbers<[1], [0], [0], [1], [0, 0, 1, 1], [], []>} : vector<256x128xbf16>, vector<128x128xbf16>, vector<256x128xf32> -> vector<256x128xf32>
    %7 = arith.addf %3, %6 : vector<256x128xf32>
    %c0_6 = arith.constant 0 : index
    %c0_7 = arith.constant 0 : index
    %8 = vector.load %arg7[%c0_6, %c0_7] : memref<256x128xf32, #tpu.memory_space<vmem>>, vector<256x128xf32>
    tpu.vector_store %arg7[%c0_6, %c0_7], %7 {strides = array<i32>} : memref<256x128xf32, #tpu.memory_space<vmem>>, vector<256x128xf32>,
    %c0_i32_8 = arith.constant 0 : i32
    %9 = arith.cmpi eq, %arg2, %c0_i32_8 : i32
    %10 = arith.extui %9 : i1 to i32
    %c0_i32_9 = arith.constant 0 : i32
    %11 = arith.cmpi ne, %10, %c0_i32_9 : i32
    scf.if %11 {
      %c0_10 = arith.constant 0 : index
      %c0_11 = arith.constant 0 : index
      %12 = vector.load %arg7[%c0_10, %c0_11] : memref<256x128xf32, #tpu.memory_space<vmem>>, vector<256x128xf32>
      %c0_12 = arith.constant 0 : index
      %c0_13 = arith.constant 0 : index
      %13 = vector.load %arg5[%c0_12, %c0_13] : memref<1x128xf32, #tpu.memory_space<vmem>>, vector<1x128xf32>
      %14 = vector.broadcast %13 : vector<1x128xf32> to vector<256x128xf32>
      %15 = arith.addf %12, %14 : vector<256x128xf32>
      %c0_14 = arith.constant 0 : index
      %c0_15 = arith.constant 0 : index
      %16 = vector.load %arg6[%c0_14, %c0_15] : memref<256x128xf32, #tpu.memory_space<vmem>>, vector<256x128xf32>
      tpu.vector_store %arg6[%c0_14, %c0_15], %15 {strides = array<i32>} : memref<256x128xf32, #tpu.memory_space<vmem>>, vector<256x128xf32>,
    } else {
    }
    return
  }
  func.func @transform_0(%arg0: i32, %arg1: i32, %arg2: i32) -> (i32, i32) {
    %c0_i32 = arith.constant 0 : i32
    return %arg0, %arg2 : i32, i32
  }
  func.func @transform_1(%arg0: i32, %arg1: i32, %arg2: i32) -> (i32, i32) {
    %c0_i32 = arith.constant 0 : i32
    return %arg2, %arg1 : i32, i32
  }
  func.func @transform_2(%arg0: i32, %arg1: i32, %arg2: i32) -> (i32, i32) {
    %c0_i32 = arith.constant 0 : i32
    %c0_i32_0 = arith.constant 0 : i32
    return %c0_i32, %arg1 : i32, i32
  }
  func.func @transform_3(%arg0: i32, %arg1: i32, %arg2: i32) -> (i32, i32) {
    %c0_i32 = arith.constant 0 : i32
    return %arg0, %arg1 : i32, i32
  }
}

module attributes {stable_mosaic.version = 11 : i64} {
  func.func @_mm_kernel(%arg0: i32, %arg1: i32, %arg2: i32, %arg3: memref<256x128xbf16, #tpu.memory_space<vmem>>, %arg4: memref<128x128xbf16, #tpu.memory_space<vmem>>, %arg5: memref<1x128xf32, #tpu.memory_space<vmem>>, %arg6: memref<256x128xf32, #tpu.memory_space<vmem>>, %arg7: memref<256x128xf32, #tpu.memory_space<vmem>>, %arg8: memref<256x128xf32, #tpu.memory_space<vmem>>) attributes {dimension_semantics = [#tpu.dimension_semantics<parallel>, #tpu.dimension_semantics<parallel>, #tpu.dimension_semantics<arbitrary>], iteration_bounds = array<i64: 32, 1, 1>, scalar_prefetch = 0 : i64, scratch_operands = 1 : i64, tpu.core_type = #tpu.core_type<tc>, window_params = [{transform_indices = @transform_0, window_bounds = array<i64: 256, 128>}, {transform_indices = @transform_1, window_bounds = array<i64: 128, 128>}, {transform_indices = @transform_2, window_bounds = array<i64: 1, 128>}, {transform_indices = @transform_3, window_bounds = array<i64: 256, 128>}, {transform_indices = @transform_4, window_bounds = array<i64: 256, 128>}]} {
    %c0_i32 = arith.constant 0 : i32
    %0 = arith.cmpi eq, %arg2, %c0_i32 : i32
    %1 = arith.extui %0 : i1 to i32
    %c0_i32_0 = arith.constant 0 : i32
    %2 = arith.cmpi ne, %1, %c0_i32_0 : i32
    scf.if %2 {
      %cst_10 = arith.constant 0.000000e+00 : f32
      %12 = vector.broadcast %cst_10 : f32 to vector<256x128xf32>
      %c0_11 = arith.constant 0 : index
      %c0_12 = arith.constant 0 : index
      %13 = vector.load %arg8[%c0_11, %c0_12] : memref<256x128xf32, #tpu.memory_space<vmem>>, vector<256x128xf32>
      tpu.vector_store %arg8[%c0_11, %c0_12], %12 {strides = array<i32>} : memref<256x128xf32, #tpu.memory_space<vmem>>, vector<256x128xf32>,
    } else {
    }
    %c0 = arith.constant 0 : index
    %c0_1 = arith.constant 0 : index
    %3 = vector.load %arg8[%c0, %c0_1] : memref<256x128xf32, #tpu.memory_space<vmem>>, vector<256x128xf32>
    %c0_2 = arith.constant 0 : index
    %c0_3 = arith.constant 0 : index
    %4 = vector.load %arg3[%c0_2, %c0_3] : memref<256x128xbf16, #tpu.memory_space<vmem>>, vector<256x128xbf16>
    %c0_4 = arith.constant 0 : index
    %c0_5 = arith.constant 0 : index
    %5 = vector.load %arg4[%c0_4, %c0_5] : memref<128x128xbf16, #tpu.memory_space<vmem>>, vector<128x128xbf16>
    %cst = arith.constant dense<0.000000e+00> : vector<256x128xf32>
    %6 = tpu.matmul %4, %5, %cst {dimension_numbers = #tpu.dot_dimension_numbers<[1], [0], [0], [1], [0, 0, 1, 1], [], []>} : vector<256x128xbf16>, vector<128x128xbf16>, vector<256x128xf32> -> vector<256x128xf32>
    %7 = arith.addf %3, %6 : vector<256x128xf32>
    %c0_6 = arith.constant 0 : index
    %c0_7 = arith.constant 0 : index
    %8 = vector.load %arg8[%c0_6, %c0_7] : memref<256x128xf32, #tpu.memory_space<vmem>>, vector<256x128xf32>
    tpu.vector_store %arg8[%c0_6, %c0_7], %7 {strides = array<i32>} : memref<256x128xf32, #tpu.memory_space<vmem>>, vector<256x128xf32>,
    %c0_i32_8 = arith.constant 0 : i32
    %9 = arith.cmpi eq, %arg2, %c0_i32_8 : i32
    %10 = arith.extui %9 : i1 to i32
    %c0_i32_9 = arith.constant 0 : i32
    %11 = arith.cmpi ne, %10, %c0_i32_9 : i32
    scf.if %11 {
      %c0_10 = arith.constant 0 : index
      %c0_11 = arith.constant 0 : index
      %12 = vector.load %arg8[%c0_10, %c0_11] : memref<256x128xf32, #tpu.memory_space<vmem>>, vector<256x128xf32>
      %c0_12 = arith.constant 0 : index
      %c0_13 = arith.constant 0 : index
      %13 = vector.load %arg5[%c0_12, %c0_13] : memref<1x128xf32, #tpu.memory_space<vmem>>, vector<1x128xf32>
      %14 = vector.broadcast %13 : vector<1x128xf32> to vector<256x128xf32>
      %15 = arith.addf %12, %14 : vector<256x128xf32>
      %c0_14 = arith.constant 0 : index
      %c0_15 = arith.constant 0 : index
      %16 = vector.load %arg6[%c0_14, %c0_15] : memref<256x128xf32, #tpu.memory_space<vmem>>, vector<256x128xf32>
      %17 = arith.addf %15, %16 : vector<256x128xf32>
      %18 = math.tanh %17 : vector<256x128xf32>
      %c0_16 = arith.constant 0 : index
      %c0_17 = arith.constant 0 : index
      %19 = vector.load %arg7[%c0_16, %c0_17] : memref<256x128xf32, #tpu.memory_space<vmem>>, vector<256x128xf32>
      tpu.vector_store %arg7[%c0_16, %c0_17], %18 {strides = array<i32>} : memref<256x128xf32, #tpu.memory_space<vmem>>, vector<256x128xf32>,
    } else {
    }
    return
  }
  func.func @transform_0(%arg0: i32, %arg1: i32, %arg2: i32) -> (i32, i32) {
    %c0_i32 = arith.constant 0 : i32
    return %arg0, %arg2 : i32, i32
  }
  func.func @transform_1(%arg0: i32, %arg1: i32, %arg2: i32) -> (i32, i32) {
    %c0_i32 = arith.constant 0 : i32
    return %arg2, %arg1 : i32, i32
  }
  func.func @transform_2(%arg0: i32, %arg1: i32, %arg2: i32) -> (i32, i32) {
    %c0_i32 = arith.constant 0 : i32
    %c0_i32_0 = arith.constant 0 : i32
    return %c0_i32, %arg1 : i32, i32
  }
  func.func @transform_3(%arg0: i32, %arg1: i32, %arg2: i32) -> (i32, i32) {
    %c0_i32 = arith.constant 0 : i32
    return %arg0, %arg1 : i32, i32
  }
  func.func @transform_4(%arg0: i32, %arg1: i32, %arg2: i32) -> (i32, i32) {
    %c0_i32 = arith.constant 0 : i32
    return %arg0, %arg1 : i32, i32
  }
}

</mosaic_0001>

<bundles_post_ra>
// kernel: simple_video_generator.17
= control target key start
LH: loop header
LB: loop body
LE: loop exit
PB: predicated region body
PF: predicated region fallthrough
CT: control target
= control target key end

     0   :  { %s796_s12 = smov 0   ;;  %s798_s13 = smov 0   ;;  %s898_s0 = inlined_call_operand.vmem [shape: bf16[16,128], index: 0, kind: input, shape index: {}]   ;;  %s899_s1 = inlined_call_operand.vmem [shape: bf16[128,384], index: 1, kind: input, shape index: {}]   ;;  %s900_s2 = inlined_call_operand.vmem [shape: f32[1,384], index: 2, kind: input, shape index: {}]   ;;  %s901_s3 = inlined_call_operand.vmem [shape: f32[16,384], index: 3, kind: output, shape index: {}]  }
   0x1   :  { %s800_s14 = smov 0   ;;  %s802_s15 = smov 0  }
   0x2   :  { %s804_s16 = smov 0  }
   0x3 LB: > { %s28_s17 = sadd.s32 1, %s768_s15  ;;  %s630_s18 = sadd.s32 4294967295, %s772_s16   ;;  %s772_s16 = sphi %s804_s16, %s13_s16   ;;  %s768_s15 = sphi %s802_s15, %s906_s15   ;;  %s764_s14 = sphi %s800_s14, %s905_s14   ;;  %s760_s13 = sphi %s798_s13, %s904_s13   ;;  %s756_s12 = sphi %s796_s12, %s903_s12  }
   0x4   : > { %p30_p0 = scmp.ge.s32.totalorder %s28_s17, 3  ;;  %p76_p1 = scmp.ne.s32.totalorder %s760_s13, %s756_s12 }
   0x5   : > { %p77_p2 = scmp.eq.s32.totalorder %s772_s16, 0  ;;  %p134_p4 = scmp.eq.s32.totalorder %s630_s18, 2 }
   0x6   : > { %s908_s17 = smov (%p30_p0, %s28_s17), 0  ;;  %s69_s20 = sadd.s32 1, %s760_s13 }
   0x7   : > { %p78_p3 = por %p77_p2, %p76_p1  ;;  %s65_s19 = ssub.s32 %s768_s15, %s908_s17 }
   0x8   : > { %p67_p5 = scmp.eq.s32.totalorder %s65_s19, 0  ;;  %p831_p6 = por %p134_p4, %p76_p1 }
   0x9   : > { %p634_p7 = scmp.ge.s32.totalorder %s772_s16, 3 }
   0xa   : > { %s836_s22 = scalar_select %p67_p5, %s760_s13, %s69_s20  }
   0xb   : > { %168 = sbr.rel (%p634_p7) target bundleno = 32 (0x20), region = 20 }
  0x12   : > { %171 = sbr.rel (!%p78_p3) target bundleno = 32 (0x20), region = 24  ;;  %s173_s23 = sand.u32 (%p78_p3), 1, %s760_s13  }
  0x13   : > { %s636_s24 = sshll.u32 (%p78_p3), %s768_s15, 2  ;;  %s635_s25 = sshll.u32 (%p78_p3), %s173_s23, 6 }
  0x14   : > { %s844_s28 = scalar_lea.vmem (%p78_p3), %s899_s1, %s636_s24  ;;  %s175_s29 = scalar_lea.vmem (%p78_p3), [#allocation3], %s635_s25 }
  0x15   : > { %v196_v0 = vld [vmem:[%s844_s28] sm:$0xf] (%p78_p3)  ;;  %v198_v1 = vld [vmem:[%s844_s28 + $0xc] sm:$0xf] (%p78_p3)  ;;  %v200_v2 = vld [vmem:[%s844_s28 + $0x18] sm:$0xf] (%p78_p3) }
  0x16   : > { %197 = vst [vmem:[%s175_s29] sm:$0xf] (%p78_p3), %v196_v0  ;;  %199 = vst [vmem:[%s175_s29 + $0x4] sm:$0xf] (%p78_p3), %v198_v1  ;;  %v202_v3 = vld [vmem:[%s844_s28 + $0x24] sm:$0xf] (%p78_p3) }
  0x17   : > { %v204_v4 = vld [vmem:[%s844_s28 + $0x30] sm:$0xf] (%p78_p3)  ;;  %201 = vst [vmem:[%s175_s29 + $0x8] sm:$0xf] (%p78_p3), %v200_v2  ;;  %203 = vst [vmem:[%s175_s29 + $0xc] sm:$0xf] (%p78_p3), %v202_v3 }
  0x18   : > { %205 = vst [vmem:[%s175_s29 + $0x10] sm:$0xf] (%p78_p3), %v204_v4  ;;  %v206_v5 = vld [vmem:[%s844_s28 + $0x3c] sm:$0xf] (%p78_p3)  ;;  %v208_v6 = vld [vmem:[%s844_s28 + $0x48] sm:$0xf] (%p78_p3) }
  0x19   : > { %v210_v7 = vld [vmem:[%s844_s28 + $0x54] sm:$0xf]  ;;  %207 = vst [vmem:[%s175_s29 + $0x14] sm:$0xf] %v206_v5  ;;  %209 = vst [vmem:[%s175_s29 + $0x18] sm:$0xf] %v208_v6 }
  0x1a   : > { %211 = vst [vmem:[%s175_s29 + $0x1c] sm:$0xf] %v210_v7  ;;  %v212_v8 = vld [vmem:[%s844_s28 + $0x60] sm:$0xf]  ;;  %v214_v9 = vld [vmem:[%s844_s28 + $0x6c] sm:$0xf] }
  0x1b   : > { %v216_v10 = vld [vmem:[%s844_s28 + $0x78] sm:$0xf]  ;;  %213 = vst [vmem:[%s175_s29 + $0x20] sm:$0xf] %v212_v8  ;;  %215 = vst [vmem:[%s175_s29 + $0x24] sm:$0xf] %v214_v9 }
  0x1c   : > { %217 = vst [vmem:[%s175_s29 + $0x28] sm:$0xf] %v216_v10  ;;  %v218_v11 = vld [vmem:[%s844_s28 + $0x84] sm:$0xf]  ;;  %v220_v12 = vld [vmem:[%s844_s28 + $0x90] sm:$0xf] }
  0x1d   : > { %v222_v13 = vld [vmem:[%s844_s28 + $0x9c] sm:$0xf]  ;;  %219 = vst [vmem:[%s175_s29 + $0x2c] sm:$0xf] %v218_v11  ;;  %221 = vst [vmem:[%s175_s29 + $0x30] sm:$0xf] %v220_v12 }
  0x1e   : > { %223 = vst [vmem:[%s175_s29 + $0x34] sm:$0xf] %v222_v13  ;;  %v224_v14 = vld [vmem:[%s844_s28 + $0xa8] sm:$0xf]  ;;  %v226_v15 = vld [vmem:[%s844_s28 + $0xb4] sm:$0xf] }
  0x1f   : > { %225 = vst [vmem:[%s175_s29 + $0x38] sm:$0xf] %v224_v14  ;;  %227 = vst [vmem:[%s175_s29 + $0x3c] sm:$0xf] %v226_v15 }
  0x20 PF: > { %p637_p8 = scmp.ge.s32.totalorder %s772_s16, 1  ;;  %p287_p9 = scmp.lt.s32.totalorder %s772_s16, 4 }
  0x22   : > { %p288_p10 = pnand %p637_p8, %p287_p9 }
  0x23   : > { %s294_s30 = sand.u32 (!%p288_p10), 1, %s756_s12   ;;  %v774_v16 = vmov (!%p288_p10), 0.0   ;;  %vm775_vm0 = vmmov (!%p288_p10), 0   ;;  %v733_v25 = vld [vmem:[%s898_s0] sm:$0xff] (!%p288_p10)   ;;  %p337_p11 = scmp.lt.s32.totalorder (!%p288_p10), %s764_s14, 2 }
  0x24   : > { %291 = sbr.rel (%p288_p10) target bundleno = 295 (0x127), region = 69  ;;  %663 = vmatprep.subr.bf16.mxu0 (!%p288_p10), %v774_v16  ;;  %s638_s4 = sshll.u32 (!%p288_p10), %s294_s30, 6  ;;  %679 = vmatprep.mubr.msk.bf16.mxu0 (!%p288_p10), %vm775_vm0, %v774_v16 }
  0x25   : > { %s296_s5 = scalar_lea.vmem (!%p288_p10), [#allocation3], %s638_s4  ;;  %s639_s18 = sshll.u32 (!%p288_p10), %s294_s30, 4 }
  0x26   : > { %v725_v17 = vld [vmem:[%s296_s5] sm:$0xff] (!%p288_p10)   ;;  %v726_v18 = vld [vmem:[%s296_s5 + $0x8] sm:$0xff] (!%p288_p10)   ;;  %v727_v19 = vld [vmem:[%s296_s5 + $0x10] sm:$0xff] (!%p288_p10)   ;;  %s326_s19 = scalar_lea.vmem (!%p288_p10), [#allocation4], %s639_s18 }
  0x27   : > { %664 = vmatpush3.bf16.msra.mxu0 (!%p288_p10), %v725_v17  ;;  %v728_v20 = vld [vmem:[%s296_s5 + $0x18] sm:$0xff] (!%p288_p10)   ;;  %v729_v21 = vld [vmem:[%s296_s5 + $0x20] sm:$0xff] (!%p288_p10)   ;;  %v730_v22 = vld [vmem:[%s296_s5 + $0x28] sm:$0xff] (!%p288_p10)  }
  0x28   : > { %665 = vmatprep.subr.bf16.mxu0 (!%p288_p10), %v774_v16  ;;  %v731_v23 = vld [vmem:[%s296_s5 + $0x30] sm:$0xff] (!%p288_p10)   ;;  %v732_v24 = vld [vmem:[%s296_s5 + $0x38] sm:$0xff] (!%p288_p10)  }
  0x2b   : > { %666 = vmatpush3.bf16.msra.mxu0 %v726_v18  ;;  %s338_s8 = scalar_select %p337_p11, %s764_s14, 2 }
  0x2c   : > { %667 = vmatprep.subr.bf16.mxu0 %v774_v16  ;;  %s651_s20 = sshll.u32 (%p831_p6), %s764_s14, 3 }
  0x2d   : > { %s339_s11 = scalar_lea.vmem %s900_s2, %s338_s8  ;;  %s494_s24 = scalar_lea.vmem (%p831_p6), %s901_s3, %s651_s20 }
  0x2e   : > { %v649_v26 = vld [vmem:[%s339_s11] ss:$0 sm:$0xff] }
  0x2f   : > { %668 = vmatpush3.bf16.msra.mxu0 %v727_v19 }
  0x30   : > { %669 = vmatprep.subr.bf16.mxu0 %v774_v16 }
  0x33   : > { %670 = vmatpush3.bf16.msra.mxu0 %v728_v20 }
  0x34   : > { %671 = vmatprep.subr.bf16.mxu0 %v774_v16 }
  0x37   : > { %672 = vmatpush3.bf16.msra.mxu0 %v729_v21 }
  0x38   : > { %673 = vmatprep.subr.bf16.mxu0 %v774_v16 }
  0x3b   : > { %674 = vmatpush3.bf16.msra.mxu0 %v730_v22 }
  0x3c   : > { %675 = vmatprep.subr.bf16.mxu0 %v774_v16 }
  0x3f   : > { %676 = vmatpush3.bf16.msra.mxu0 %v731_v23 }
  0x40   : > { %677 = vmatprep.subr.bf16.mxu0 %v774_v16 }
  0x43   : > { %678 = vmatpush3.bf16.msra.mxu0 %v732_v24 }
  0x46   : > { %680 = vmatmul.mubr.bf16.vlgmr.msra.gmra.mrb[0].mxu0 %v733_v25 }
 0x118   : > { %489 = sbr.rel (!%p831_p6) target bundleno = 295 (0x127), region = 85 }
 0x119   : > { %v456_v27 = vpop.f32.mrb[0].mxu0 }
 0x11a   : > { %v479_v28 = vadd.f32 %v649_v26, %v456_v27  ;;  %v681_v29 = vpop.f32.mrb[1].mxu0 }
 0x11b   : > { %v459_v30 = vpop.f32.mrb[2].mxu0 }
 0x11c   : > { %481 = vst [vmem:[%s326_s19] sm:$0xff] %v479_v28  ;;  %v480_v31 = vadd.f32 %v649_v26, %v459_v30  ;;  %v682_v32 = vpop.f32.mrb[3].mxu0 }
 0x11e   : > { %482 = vst [vmem:[%s326_s19 + $0x8] sm:$0xff] %v480_v31 }
 0x123   : > { %v524_v33 = vld [vmem:[%s326_s19] sm:$0xff] }
 0x124   : > { %525 = vst [vmem:[%s494_s24] sm:$0xff] %v524_v33 }
 0x125   : > { %v526_v34 = vld [vmem:[%s326_s19 + $0x8] sm:$0xff] }
 0x126   : > { %527 = vst [vmem:[%s494_s24 + $0x18] sm:$0xff] %v526_v34 }
 0x127 PF: > { %s13_s16 = sadd.s32 1, %s772_s16   ;;  %s903_s12 = smov %s760_s13 }
 0x128   : > { %p10_p12 = scmp.ge.s32.totalorder %s13_s16, 5   ;;  %s904_s13 = smov %s836_s22 }
 0x129   : > { %s905_s14 = smov %s768_s15  ;;  %s906_s15 = smov %s908_s17 }
 0x12a   :  { %12 = sbr.rel (!%p10_p12) target bundleno = 3 (0x3), region = 160 }

// kernel: simple_video_generator.18
= control target key start
LH: loop header
LB: loop body
LE: loop exit
PB: predicated region body
PF: predicated region fallthrough
CT: control target
= control target key end

     0   :  { %s635_s12 = smov 0   ;;  %s815_s0 = inlined_call_operand.vmem [shape: f32[4,8,384], index: 0, kind: input, shape index: {}]   ;;  %s816_s1 = inlined_call_operand.vmem [shape: f32[128,384], index: 1, kind: input, shape index: {}]   ;;  %s817_s2 = inlined_call_operand.vmem [shape: f32[1,384], index: 2, kind: input, shape index: {}]   ;;  %s818_s3 = inlined_call_operand.vmem [shape: f32[4,8,128], index: 3, kind: output, shape index: {}]  }
   0x1 LB: > { %s460_s13 = sadd.s32 4294967295, %s609_s12   ;;  %p464_p0 = scmp.ge.s32.totalorder %s609_s12, 1  ;;  %s609_s12 = sphi %s635_s12, %s13_s12  }
   0x2   : > { %p137_p1 = scmp.lt.s32.totalorder %s609_s12, 5 }
   0x4   : > { %p138_p2 = pnand %p464_p0, %p137_p1 }
   0x5   : > { %p160_p3 = scmp.lt.s32.totalorder (!%p138_p2), %s460_s13, 3  ;;  %p467_p4 = scmp.ne.s32.totalorder (!%p138_p2), %s460_s13, 0 }
   0x6   : > { %141 = sbr.rel (%p138_p2) target bundleno = 318 (0x13e), region = 32 }
   0xd   : > { %s161_s14 = scalar_select %p160_p3, %s460_s13, 3 }
   0xe   : > { %172 = sbr.rel (%p467_p4) target bundleno = 21 (0x15), region = 36  ;;  %v611_v0 = vmov (!%p467_p4), 0.0  }
   0xf   : > { %s580_s15 = smul.u32 24, %s161_s14  ;;  %s466_s16 = sshll.u32 %s161_s14, 3  ;;  %173 = vst [vmem:[#allocation2] sm:$0xff] (!%p467_p4), %v611_v0 }
  0x10   : > { %s646_s19 = scalar_lea.vmem %s818_s3, %s466_s16 }
  0x11   : > { %s651_s22 = scalar_lea.vmem %s815_s0, %s580_s15 }
  0x15 PF: > { %v176_v1 = vld [vmem:[%s816_s1 + $0x8] sm:$0xff]  ;;  %v179_v2 = vld [vmem:[%s816_s1 + $0x20] sm:$0xff]  ;;  %v178_v5 = vld [vmem:[%s816_s1 + $0x18] sm:$0xff]  ;;  %v612_v8 = vmov 0.0|0.0   ;;  %v613_v9 = vmov 0.0   ;;  %vm614_vm0 = vmmov 0  }
  0x16   : > { %v175_v3 = vld [vmem:[%s816_s1] sm:$0xff]  ;;  %v524_v4 = vpack.c.bf16 %v179_v2, %v176_v1  ;;  %v182_v6 = vld [vmem:[%s816_s1 + $0x38] sm:$0xff]  ;;  %v185_v7 = vld [vmem:[%s816_s1 + $0x50] sm:$0xff]  ;;  %556 = vmatprep.subr.bf16.mxu1 %v612_v8  ;;  %304 = vmatprep.mubr.f32.mxu0 %v613_v9 }
  0x17   : > { %v526_v10 = vpack.c.bf16 %v178_v5, %v175_v3  ;;  %v528_v11 = vpack.c.bf16 %v185_v7, %v182_v6  ;;  %v181_v12 = vld [vmem:[%s816_s1 + $0x30] sm:$0xff]  ;;  %v184_v13 = vld [vmem:[%s816_s1 + $0x48] sm:$0xff]  ;;  %521 = vmatprep.mubr.msk.f32.mxu1 %vm614_vm0, %v613_v9  ;;  %v191_v15 = vld [vmem:[%s816_s1 + $0x80] sm:$0xff] }
  0x18   : > { %v188_v14 = vld [vmem:[%s816_s1 + $0x68] sm:$0xff]  ;;  %525 = vmatprep.subr.bf16.mxu0 %v524_v4  ;;  %v530_v16 = vpack.c.bf16 %v184_v13, %v181_v12  ;;  %v187_v18 = vld [vmem:[%s816_s1 + $0x60] sm:$0xff]  ;;  %v190_v19 = vld [vmem:[%s816_s1 + $0x78] sm:$0xff]  ;;  %v225_v13 = vlaneseq }
  0x19   : > { %527 = vmatpush1.bf16.msra.mxu0 %v526_v10  ;;  %v532_v17 = vpack.c.bf16 %v191_v15, %v188_v14  ;;  %v194_v20 = vld [vmem:[%s816_s1 + $0x98] sm:$0xff]  ;;  %v197_v21 = vld [vmem:[%s816_s1 + $0xb0] sm:$0xff]  ;;  %v534_v22 = vpack.c.bf16 %v190_v19, %v187_v18  ;;  %v196_v25 = vld [vmem:[%s816_s1 + $0xa8] sm:$0xff] }
  0x1a   : > { %529 = vmatprep.subr.bf16.mxu0 %v528_v11  ;;  %v536_v23 = vpack.c.bf16 %v197_v21, %v194_v20  ;;  %v193_v24 = vld [vmem:[%s816_s1 + $0x90] sm:$0xff]  ;;  %v200_v26 = vld [vmem:[%s816_s1 + $0xc8] sm:$0xff]  ;;  %v203_v27 = vld [vmem:[%s816_s1 + $0xe0] sm:$0xff]  ;;  %v226_v14 = vshrl.u32 %v225_v13, 7 }
  0x1b   : > { %v177_v28 = vld [vmem:[%s816_s1 + $0x10] sm:$0xff]  ;;  %v180_v29 = vld [vmem:[%s816_s1 + $0x28] sm:$0xff]  ;;  %v183_v31 = vld [vmem:[%s816_s1 + $0x40] sm:$0xff]  ;;  %v538_v32 = vpack.c.bf16 %v196_v25, %v193_v24  ;;  %v540_v34 = vpack.c.bf16 %v203_v27, %v200_v26 }
  0x1c   : > { %v557_v30 = vpack.c.bf16 %v180_v29, %v177_v28  ;;  %v186_v33 = vld [vmem:[%s816_s1 + $0x58] sm:$0xff]  ;;  %v199_v35 = vld [vmem:[%s816_s1 + $0xc0] sm:$0xff]  ;;  %v209_v39 = vld [vmem:[%s816_s1 + $0x110] sm:$0xff]  ;;  %v227_v15 = vsub.s32 0, %v226_v14 }
  0x1d   : > { %531 = vmatpush1.bf16.msra.mxu0 %v530_v16  ;;  %v202_v36 = vld [vmem:[%s816_s1 + $0xd8] sm:$0xff]  ;;  %v560_v38 = vpack.c.bf16 %v186_v33, %v183_v31  ;;  %v189_v40 = vld [vmem:[%s816_s1 + $0x70] sm:$0xff]  ;;  %v192_v41 = vld [vmem:[%s816_s1 + $0x88] sm:$0xff]  ;;  %v235_v33 = vsub.s32 2, %v226_v14 }
  0x1e   : > { %533 = vmatprep.subr.bf16.mxu0 %v532_v17  ;;  %v206_v37 = vld [vmem:[%s816_s1 + $0xf8] sm:$0xff]  ;;  %558 = vmatpush3.bf16.msra.mxu1 %v557_v30  ;;  %v542_v42 = vpack.c.bf16 %v202_v36, %v199_v35  ;;  %v205_v44 = vld [vmem:[%s816_s1 + $0xf0] sm:$0xff]  ;;  %v208_v45 = vld [vmem:[%s816_s1 + $0x108] sm:$0xff]  ;;  %v563_v47 = vpack.c.bf16 %v192_v41, %v189_v40  ;;  %v231_v17 = vsub.s32 1, %v226_v14 }
  0x1f   : > { %559 = vmatprep.subr.bf16.mxu1 %v612_v8  ;;  %v544_v43 = vpack.c.bf16 %v209_v39, %v206_v37  ;;  %v212_v46 = vld [vmem:[%s816_s1 + $0x128] sm:$0xff]  ;;  %v215_v48 = vld [vmem:[%s816_s1 + $0x140] sm:$0xff]  ;;  %v198_v50 = vld [vmem:[%s816_s1 + $0xb8] sm:$0xff]  ;;  %v546_v51 = vpack.c.bf16 %v208_v45, %v205_v44 }
  0x20   : > { %v195_v49 = vld [vmem:[%s816_s1 + $0xa0] sm:$0xff]  ;;  %v548_v52 = vpack.c.bf16 %v215_v48, %v212_v46  ;;  %v214_v54 = vld [vmem:[%s816_s1 + $0x138] sm:$0xff]  ;;  %v221_v57 = vld [vmem:[%s816_s1 + $0x170] sm:$0xff] }
  0x21   : > { %535 = vmatpush1.bf16.msra.mxu0 %v534_v22  ;;  %v211_v53 = vld [vmem:[%s816_s1 + $0x120] sm:$0xff]  ;;  %v218_v55 = vld [vmem:[%s816_s1 + $0x158] sm:$0xff]  ;;  %v566_v56 = vpack.c.bf16 %v198_v50, %v195_v49  ;;  %v201_v58 = vld [vmem:[%s816_s1 + $0xd0] sm:$0xff] }
  0x22   : > { %537 = vmatprep.subr.bf16.mxu0 %v536_v23  ;;  %561 = vmatpush3.bf16.msra.mxu1 %v560_v38  ;;  %v204_v59 = vld [vmem:[%s816_s1 + $0xe8] sm:$0xff]  ;;  %v550_v60 = vpack.c.bf16 %v214_v54, %v211_v53  ;;  %v552_v61 = vpack.c.bf16 %v221_v57, %v218_v55  ;;  %v217_v62 = vld [vmem:[%s816_s1 + $0x150] sm:$0xff]  ;;  %v207_v1 = vld [vmem:[%s816_s1 + $0x100] sm:$0xff] }
  0x23   : > { %562 = vmatprep.subr.bf16.mxu1 %v612_v8  ;;  %v220_v63 = vld [vmem:[%s816_s1 + $0x168] sm:$0xff]  ;;  %v569_v0 = vpack.c.bf16 %v204_v59, %v201_v58  ;;  %v210_v2 = vld [vmem:[%s816_s1 + $0x118] sm:$0xff]  ;;  %v213_v5 = vld [vmem:[%s816_s1 + $0x130] sm:$0xff] }
  0x24   : > { %v554_v3 = vpack.c.bf16 %v220_v63, %v217_v62  ;;  %v572_v4 = vpack.c.bf16 %v210_v2, %v207_v1  ;;  %v216_v6 = vld [vmem:[%s816_s1 + $0x148] sm:$0xff]  ;;  %v174_v7 = vld [vmem:[#allocation2] sm:$0xff]  ;;  %v222_v11 = vld [vmem:[%s816_s1 + $0x178] sm:$0xff] }
  0x25   : > { %539 = vmatpush1.bf16.msra.mxu0 %v538_v32  ;;  %v575_v9 = vpack.c.bf16 %v216_v6, %v213_v5  ;;  %v219_v10 = vld [vmem:[%s816_s1 + $0x160] sm:$0xff]  ;;  %v383_v39 = vld [vmem:[%s651_s22 + $0x10] sm:$0xff] }
  0x26   : > { %541 = vmatprep.subr.bf16.mxu0 %v540_v34  ;;  %564 = vmatpush3.bf16.msra.mxu1 %v563_v47  ;;  %v578_v12 = vpack.c.bf16 %v222_v11, %v219_v10  ;;  %v223_v16 = vld [vmem:[%s817_s2] sm:$0x7] }
  0x27   : > { %565 = vmatprep.subr.bf16.mxu1 %v612_v8  ;;  %v228_v18 = vrot.slane %v223_v16, %v227_v15  ;;  %v232_v19 = vrot.slane %v223_v16, %v231_v17  ;;  %v381_v21 = vld [vmem:[%s651_s22] sm:$0xff]  ;;  %v236_v34 = vrot.slane %v223_v16, %v235_v33 }
  0x29   : > { %543 = vmatpush1.bf16.msra.mxu0 %v542_v42 }
  0x2a   : > { %545 = vmatprep.subr.bf16.mxu0 %v544_v43  ;;  %567 = vmatpush3.bf16.msra.mxu1 %v566_v56 }
  0x2b   : > { %568 = vmatprep.subr.bf16.mxu1 %v612_v8 }
  0x2d   : > { %547 = vmatpush1.bf16.msra.mxu0 %v546_v51 }
  0x2e   : > { %549 = vmatprep.subr.bf16.mxu0 %v548_v52  ;;  %570 = vmatpush3.bf16.msra.mxu1 %v569_v0 }
  0x2f   : > { %571 = vmatprep.subr.bf16.mxu1 %v612_v8 }
  0x31   : > { %551 = vmatpush1.bf16.msra.mxu0 %v550_v60 }
  0x32   : > { %553 = vmatprep.subr.bf16.mxu0 %v552_v61  ;;  %573 = vmatpush3.bf16.msra.mxu1 %v572_v4 }
  0x33   : > { %574 = vmatprep.subr.bf16.mxu1 %v612_v8 }
  0x35   : > { %555 = vmatpush1.bf16.msra.mxu0 %v554_v3 }
  0x36   : > { %576 = vmatpush3.bf16.msra.mxu1 %v575_v9 }
  0x37   : > { %577 = vmatprep.subr.bf16.mxu1 %v612_v8  ;;  %v382_v8 = vld [vmem:[%s651_s22 + $0x8] sm:$0xff] }
  0x38   : > { %305 = vmatmul.mubr.f32.vlgmr.msra.gmra.mrb[0].mxu0 %v174_v7 }
  0x3a   : > { %579 = vmatpush3.bf16.msra.mxu1 %v578_v12 }
  0x3d   : > { %522 = vmatmul.mubr.f32.vlgmr.msra.gmra.mrb[0].mxu1 %v174_v7 }
 0x10b   : > { %v306_v20 = vpop.f32.mrb[0].mxu0 }
 0x10c   : > { %v307_v22 = vadd.f32 %v306_v20, %v228_v18  ;;  %v308_v23 = vpop.f32.mrb[1].mxu0 }
 0x10d   : > { %v309_v24 = vadd.f32 %v308_v23, %v232_v19 }
 0x10e   : > { %v384_v25 = vadd.f32 %v381_v21, %v307_v22 }
 0x10f   : > { %v391_v27 = vadd.f32 %v382_v8, %v309_v24 }
 0x110   : > { %v468_v26 = vmul.f32 -1.442695, %v384_v25  ;;  %v377_v28 = vpop.f32.mrb[0].mxu1 }
 0x111   : > { %v469_v29 = vmul.f32 -1.442695, %v391_v27  ;;  %v523_v30 = vpop.f32.mrb[1].mxu1  ;;  %v378_v37 = vadd.f32 %v377_v28, %v236_v34 }
 0x112   : > { %593 = vpow2.f32 %v468_v26 }
 0x113   : > { %595 = vpow2.f32 %v469_v29 }
 0x11c   : > { %v594_v31 = vpop.eup %593 }
 0x11d   : > { %v388_v32 = vadd.f32 1.0, %v594_v31  ;;  %v596_v35 = vpop.eup %595 }
 0x11e   : > { %v395_v36 = vadd.f32 1.0, %v596_v35 }
 0x11f   : > { %597 = vrcp.f32 %v388_v32 }
 0x120   : > { %599 = vrcp.f32 %v395_v36 }
 0x129   : > { %v598_v38 = vpop.eup %597 }
 0x12a   : > { %v398_v40 = vmul.f32 %v598_v38, %v378_v37  ;;  %v600_v42 = vpop.eup %599 }
 0x12b   : > { %v401_v43 = vsub.f32 1.0, %v600_v42  ;;  %v403_v45 = vmul.f32 %v600_v42, %v174_v7 }
 0x12c   : > { %v399_v41 = vadd.f32 %v398_v40, %v383_v39 }
 0x12e   : > { %601 = vtanh.f32 %v399_v41 }
 0x138   : > { %v602_v44 = vpop.eup %601 }
 0x139   : > { %v402_v46 = vmul.f32 %v602_v44, %v401_v43 }
 0x13b   : > { %v404_v47 = vadd.f32 %v403_v45, %v402_v46 }
 0x13d   : > { %405 = vst [vmem:[#allocation2] sm:$0xff] %v404_v47  ;;  %406 = vst [vmem:[%s646_s19] sm:$0xff] %v404_v47 }
 0x13e PF: > { %s13_s12 = sadd.s32 1, %s609_s12  }
 0x13f   : > { %p10_p5 = scmp.ge.s32.totalorder %s13_s12, 6  }
 0x141   :  { %12 = sbr.rel (!%p10_p5) target bundleno = 1 (0x1), region = 66 }

// kernel: simple_video_generator.19
= control target key start
LH: loop header
LB: loop body
LE: loop exit
PB: predicated region body
PF: predicated region fallthrough
CT: control target
= control target key end

     0   :  { %s1144_s12 = smov 0   ;;  %s1146_s13 = smov 0   ;;  %s1264_s0 = inlined_call_operand.vmem [shape: bf16[32,1024], index: 0, kind: input, shape index: {}]   ;;  %s1265_s1 = inlined_call_operand.vmem [shape: bf16[1024,128], index: 1, kind: input, shape index: {}]   ;;  %s1266_s2 = inlined_call_operand.vmem [shape: f32[1,128], index: 2, kind: input, shape index: {}]   ;;  %s1267_s3 = inlined_call_operand.vmem [shape: bf16[32,128], index: 3, kind: output, shape index: {}]  }
   0x1   :  { %s1148_s14 = smov 0   ;;  %s1150_s15 = smov 0  }
   0x2   :  { %s1152_s16 = smov 0  }
   0x3 LB: > { %s25_s17 = sadd.s32 1, %s1117_s15  ;;  %p48_p1 = scmp.ne.s32.totalorder %s1109_s13, %s1105_s12  ;;  %s1121_s16 = sphi %s1152_s16, %s13_s16   ;;  %s1117_s15 = sphi %s1150_s15, %s1271_s15   ;;  %s1113_s14 = sphi %s1148_s14, %s1270_s14   ;;  %s1109_s13 = sphi %s1146_s13, %s1269_s13   ;;  %s1105_s12 = sphi %s1144_s12, %s1268_s12  }
   0x4   : > { %p26_p0 = scmp.ge.s32.totalorder %s25_s17, 2  ;;  %p49_p2 = scmp.eq.s32.totalorder %s1121_s16, 0 }
   0x5   : > { %s41_s19 = sadd.s32 1, %s1109_s13  ;;  %p867_p5 = scmp.ge.s32.totalorder %s1121_s16, 2 }
   0x6   : > { %s1273_s17 = smov (%p26_p0, %s25_s17), 0  ;;  %p50_p3 = por %p49_p2, %p48_p1 }
   0x7   : > { %s37_s18 = ssub.s32 %s1117_s15, %s1273_s17  ;;  %162 = sbr.rel (%p867_p5) target bundleno = 22 (0x16), region = 20 }
   0x8   : > { %p39_p4 = scmp.eq.s32.totalorder %s37_s18, 0 }
   0xa   : > { %s1179_s20 = scalar_select %p39_p4, %s1109_s13, %s41_s19  }
   0xe   : > { %165 = sbr.rel (!%p50_p3) target bundleno = 22 (0x16), region = 24  ;;  %s167_s21 = sand.u32 (%p50_p3), 1, %s1109_s13  }
   0xf   : > { %s926_s22 = sshll.u32 (%p50_p3), %s1117_s15, 4  ;;  %s868_s23 = sshll.u32 (%p50_p3), %s167_s21, 6 }
  0x10   : > { %s175_s26 = scalar_lea.vmem (%p50_p3), %s1264_s0, %s926_s22  ;;  %s169_s27 = scalar_lea.vmem (%p50_p3), [#allocation3], %s868_s23 }
  0x11   : > { %v188_v0 = vld [vmem:[%s175_s26] sm:$0xff] (%p50_p3)  ;;  %v190_v1 = vld [vmem:[%s175_s26 + $0x8] sm:$0xff] (%p50_p3) }
  0x12   : > { %v192_v2 = vld [vmem:[%s175_s26 + $0x20] sm:$0xff] (%p50_p3)  ;;  %189 = vst [vmem:[%s169_s27] sm:$0xff] (%p50_p3), %v188_v0  ;;  %191 = vst [vmem:[%s169_s27 + $0x8] sm:$0xff] (%p50_p3), %v190_v1  ;;  %v194_v3 = vld [vmem:[%s175_s26 + $0x28] sm:$0xff] (%p50_p3) }
  0x13   : > { %193 = vst [vmem:[%s169_s27 + $0x10] sm:$0xff] (%p50_p3), %v192_v2  ;;  %v196_v4 = vld [vmem:[%s175_s26 + $0x40] sm:$0xff] (%p50_p3)  ;;  %v198_v5 = vld [vmem:[%s175_s26 + $0x48] sm:$0xff] (%p50_p3)  ;;  %195 = vst [vmem:[%s169_s27 + $0x18] sm:$0xff] (%p50_p3), %v194_v3 }
  0x14   : > { %197 = vst [vmem:[%s169_s27 + $0x20] sm:$0xff] (%p50_p3), %v196_v4  ;;  %199 = vst [vmem:[%s169_s27 + $0x28] sm:$0xff] (%p50_p3), %v198_v5  ;;  %v200_v6 = vld [vmem:[%s175_s26 + $0x60] sm:$0xff] (%p50_p3)  ;;  %v202_v7 = vld [vmem:[%s175_s26 + $0x68] sm:$0xff] (%p50_p3) }
  0x15   : > { %201 = vst [vmem:[%s169_s27 + $0x30] sm:$0xff] %v200_v6  ;;  %203 = vst [vmem:[%s169_s27 + $0x38] sm:$0xff] %v202_v7 }
  0x16 PF: > { %p871_p6 = scmp.ge.s32.totalorder %s1121_s16, 1  ;;  %p220_p7 = scmp.lt.s32.totalorder %s1121_s16, 3 }
  0x18   : > { %p221_p8 = pnand %p871_p6, %p220_p7 }
  0x19   : > { %s227_s28 = sand.u32 (!%p221_p8), 1, %s1105_s12   ;;  %s873_s29 = sshll.u32 (!%p221_p8), %s1113_s14, 6 }
  0x1a   : > { %224 = sbr.rel (%p221_p8) target bundleno = 319 (0x13f), region = 51  ;;  %s872_s30 = sshll.u32 (!%p221_p8), %s227_s28, 6 }
  0x1b   : > { %p267_p9 = scmp.lt.s32.totalorder (!%p221_p8), %s873_s29, 127  ;;  %s1196_s8 = scalar_lea.vmem (!%p221_p8), [#allocation3], %s872_s30 }
  0x1c   : > { %p875_p10 = scmp.ne.s32.totalorder (!%p221_p8), %s1113_s14, 0 }
  0x21   : > { %s1275_s29 = smov (!%p267_p9, %s873_s29), 127  ;;  %291 = sbr.rel (%p875_p10) target bundleno = 40 (0x28), region = 59 }
  0x22   : > { %s874_s4 = sshll.u32 %s1275_s29, 2  ;;  %v1123_v8 = vmov (!%p875_p10), 0.0  }
  0x23   : > { %s1194_s7 = scalar_lea.vmem %s1265_s1, %s874_s4  ;;  %292 = vst [vmem:[#allocation2] sm:$0xff] (!%p875_p10), %v1123_v8  ;;  %293 = vst [vmem:[#allocation2 + $0x8] sm:$0xff] (!%p875_p10), %v1123_v8 }
  0x24   : > { %294 = vst [vmem:[#allocation2 + $0x10] sm:$0xff] (!%p875_p10), %v1123_v8  ;;  %295 = vst [vmem:[#allocation2 + $0x18] sm:$0xff] (!%p875_p10), %v1123_v8 }
  0x28 PF: > { %v1039_v9 = vld [vmem:[%s1194_s7 + $0x40] sm:$0xff]   ;;  %v1043_v13 = vld [vmem:[%s1194_s7 + $0x48] sm:$0xff]   ;;  %v1047_v17 = vld [vmem:[%s1194_s7 + $0x50] sm:$0xff]   ;;  %p916_p11 = scmp.ne.s32.totalorder %s1113_s14, 1 }
  0x29   : > { %v1040_v10 = vld [vmem:[%s1194_s7 + $0xc0] sm:$0xff]   ;;  %942 = vmatprep.subr.bf16.mxu0 %v1039_v9  ;;  %v1044_v14 = vld [vmem:[%s1194_s7 + $0xc8] sm:$0xff]   ;;  %v1048_v18 = vld [vmem:[%s1194_s7 + $0xd0] sm:$0xff]  }
  0x2a   : > { %v1041_v11 = vld [vmem:[%s1194_s7] sm:$0xff]   ;;  %970 = vmatprep.subr.bf16.mxu1 %v1040_v10  ;;  %v1045_v15 = vld [vmem:[%s1194_s7 + $0x8] sm:$0xff]   ;;  %v1049_v19 = vld [vmem:[%s1194_s7 + $0x10] sm:$0xff]  }
  0x2b   : > { %v1042_v12 = vld [vmem:[%s1194_s7 + $0x80] sm:$0xff]   ;;  %943 = vmatpush3.bf16.msra.mxu0 %v1041_v11  ;;  %v1046_v16 = vld [vmem:[%s1194_s7 + $0x88] sm:$0xff]   ;;  %v1050_v20 = vld [vmem:[%s1194_s7 + $0x90] sm:$0xff]  }
  0x2c   : > { %971 = vmatpush3.bf16.msra.mxu1 %v1042_v12  ;;  %944 = vmatprep.subr.bf16.mxu0 %v1043_v13  ;;  %v1051_v21 = vld [vmem:[%s1194_s7 + $0x58] sm:$0xff]   ;;  %v1055_v25 = vld [vmem:[%s1194_s7 + $0x60] sm:$0xff]   ;;  %v1059_v29 = vld [vmem:[%s1194_s7 + $0x68] sm:$0xff]  }
  0x2d   : > { %972 = vmatprep.subr.bf16.mxu1 %v1044_v14  ;;  %v1052_v22 = vld [vmem:[%s1194_s7 + $0xd8] sm:$0xff]   ;;  %v1056_v26 = vld [vmem:[%s1194_s7 + $0xe0] sm:$0xff]   ;;  %v1060_v30 = vld [vmem:[%s1194_s7 + $0xe8] sm:$0xff]  }
  0x2e   : > { %v1053_v23 = vld [vmem:[%s1194_s7 + $0x18] sm:$0xff]   ;;  %v1057_v27 = vld [vmem:[%s1194_s7 + $0x20] sm:$0xff]   ;;  %v1061_v31 = vld [vmem:[%s1194_s7 + $0x28] sm:$0xff]  }
  0x2f   : > { %945 = vmatpush3.bf16.msra.mxu0 %v1045_v15  ;;  %v1054_v24 = vld [vmem:[%s1194_s7 + $0x98] sm:$0xff]   ;;  %v1058_v28 = vld [vmem:[%s1194_s7 + $0xa0] sm:$0xff]   ;;  %v1062_v32 = vld [vmem:[%s1194_s7 + $0xa8] sm:$0xff]  }
  0x30   : > { %973 = vmatpush3.bf16.msra.mxu1 %v1046_v16  ;;  %946 = vmatprep.subr.bf16.mxu0 %v1047_v17  ;;  %v1063_v33 = vld [vmem:[%s1194_s7 + $0x70] sm:$0xff]   ;;  %v1067_v37 = vld [vmem:[%s1194_s7 + $0x78] sm:$0xff]   ;;  %v296_v58 = vld [vmem:[#allocation2] sm:$0xff] }
  0x31   : > { %974 = vmatprep.subr.bf16.mxu1 %v1048_v18  ;;  %v1064_v34 = vld [vmem:[%s1194_s7 + $0xf0] sm:$0xff]   ;;  %v1068_v38 = vld [vmem:[%s1194_s7 + $0xf8] sm:$0xff]   ;;  %v297_v63 = vld [vmem:[#allocation2 + $0x8] sm:$0xff] }
  0x32   : > { %v1065_v35 = vld [vmem:[%s1194_s7 + $0x30] sm:$0xff]   ;;  %v1069_v39 = vld [vmem:[%s1194_s7 + $0x38] sm:$0xff]  }
  0x33   : > { %947 = vmatpush3.bf16.msra.mxu0 %v1049_v19  ;;  %v1066_v36 = vld [vmem:[%s1194_s7 + $0xb0] sm:$0xff]   ;;  %v1070_v40 = vld [vmem:[%s1194_s7 + $0xb8] sm:$0xff]  }
  0x34   : > { %975 = vmatpush3.bf16.msra.mxu1 %v1050_v20  ;;  %948 = vmatprep.subr.bf16.mxu0 %v1051_v21  ;;  %v1071_v41 = vld [vmem:[%s1196_s8] ss:$16 sps:$4 sm:$0xff]   ;;  %v1073_v42 = vld [vmem:[%s1196_s8 + $0x4] ss:$16 sps:$4 sm:$0xff]   ;;  %v1074_v43 = vld [vmem:[%s1196_s8 + $0x8] ss:$16 sps:$4 sm:$0xff]  }
  0x35   : > { %976 = vmatprep.subr.bf16.mxu1 %v1052_v22  ;;  %v1076_v44 = vld [vmem:[%s1196_s8 + $0xc] ss:$16 sps:$4 sm:$0xff]   ;;  %636 = vmatprep.mubr.bf16.mxu0 %v1073_v42  ;;  %v1077_v45 = vld [vmem:[%s1196_s8 + $0x24] ss:$16 sps:$4 sm:$0xff]   ;;  %v1081_v47 = vld [vmem:[%s1196_s8 + $0x20] ss:$16 sps:$4 sm:$0xff]  }
  0x36   : > { %685 = vmatprep.mubr.bf16.mxu1 %v1076_v44  ;;  %v1079_v46 = vld [vmem:[%s1196_s8 + $0x2c] ss:$16 sps:$4 sm:$0xff]   ;;  %v1082_v48 = vld [vmem:[%s1196_s8 + $0x28] ss:$16 sps:$4 sm:$0xff]   ;;  %v298_v12 = vld [vmem:[#allocation2 + $0x10] sm:$0xff] }
  0x37   : > { %949 = vmatpush3.bf16.msra.mxu0 %v1053_v23  ;;  %v299_v17 = vld [vmem:[#allocation2 + $0x18] sm:$0xff]  ;;  %v917_v23 = vld [vmem:[%s1266_s2] ss:$0 sm:$0xff] (!%p916_p11) }
  0x38   : > { %977 = vmatpush3.bf16.msra.mxu1 %v1054_v24  ;;  %950 = vmatprep.subr.bf16.mxu0 %v1055_v25 }
  0x39   : > { %978 = vmatprep.subr.bf16.mxu1 %v1056_v26 }
  0x3b   : > { %951 = vmatpush3.bf16.msra.mxu0 %v1057_v27 }
  0x3c   : > { %979 = vmatpush3.bf16.msra.mxu1 %v1058_v28  ;;  %952 = vmatprep.subr.bf16.mxu0 %v1059_v29 }
  0x3d   : > { %980 = vmatprep.subr.bf16.mxu1 %v1060_v30 }
  0x3f   : > { %953 = vmatpush3.bf16.msra.mxu0 %v1061_v31 }
  0x40   : > { %981 = vmatpush3.bf16.msra.mxu1 %v1062_v32  ;;  %954 = vmatprep.subr.bf16.mxu0 %v1063_v33 }
  0x41   : > { %982 = vmatprep.subr.bf16.mxu1 %v1064_v34 }
  0x43   : > { %955 = vmatpush3.bf16.msra.mxu0 %v1065_v35 }
  0x44   : > { %983 = vmatpush3.bf16.msra.mxu1 %v1066_v36  ;;  %956 = vmatprep.subr.bf16.mxu0 %v1067_v37 }
  0x45   : > { %984 = vmatprep.subr.bf16.mxu1 %v1068_v38 }
  0x47   : > { %957 = vmatpush3.bf16.msra.mxu0 %v1069_v39 }
  0x48   : > { %985 = vmatpush3.bf16.msra.mxu1 %v1070_v40 }
  0x4a   : > { %637 = vmatmul.mubr.bf16.vlgmr.msra.gmra.mrb[0].mxu0 %v1071_v41 }
  0x4b   : > { %686 = vmatmul.mubr.bf16.vlgmr.msra.gmra.mrb[0].mxu1 %v1074_v43  ;;  %644 = vmatprep.mubr.bf16.mxu0 %v1077_v45 }
  0x4c   : > { %693 = vmatprep.mubr.bf16.mxu1 %v1079_v46 }
  0x52   : > { %645 = vmatmul.mubr.bf16.gmra.mrb[4].mxu0 %v1081_v47 }
  0x53   : > { %694 = vmatmul.mubr.bf16.gmra.mrb[4].mxu1 %v1082_v48 }
 0x11d   : > { %v958_v49 = vpop.f32.mrb[0].mxu0 }
 0x11e   : > { %v986_v50 = vpop.f32.mrb[0].mxu1  ;;  %v959_v51 = vpop.f32.mrb[1].mxu0 }
 0x11f   : > { %v960_v52 = vadd.f32 %v959_v51, %v958_v49  ;;  %v987_v53 = vpop.f32.mrb[1].mxu1  ;;  %v961_v54 = vpop.f32.mrb[2].mxu0 }
 0x120   : > { %v988_v55 = vadd.f32 %v987_v53, %v986_v50  ;;  %v989_v56 = vpop.f32.mrb[2].mxu1  ;;  %v962_v57 = vpop.f32.mrb[3].mxu0 }
 0x121   : > { %v963_v59 = vadd.f32 %v962_v57, %v961_v54  ;;  %v990_v60 = vpop.f32.mrb[3].mxu1 }
 0x122   : > { %v688_v61 = vadd.f32 %v988_v55, %v960_v52  ;;  %v991_v62 = vadd.f32 %v990_v60, %v989_v56 }
 0x124   : > { %v702_v0 = vadd.f32 %v688_v61, %v296_v58  ;;  %v691_v1 = vadd.f32 %v991_v62, %v963_v59 }
 0x125   : > { %v964_v2 = vpop.f32.mrb[4].mxu0 }
 0x126   : > { %706 = vst [vmem:[#allocation2] sm:$0xff] %v702_v0  ;;  %v703_v3 = vadd.f32 %v691_v1, %v297_v63  ;;  %v992_v4 = vpop.f32.mrb[4].mxu1  ;;  %v965_v5 = vpop.f32.mrb[5].mxu0 }
 0x127   : > { %v966_v6 = vadd.f32 %v965_v5, %v964_v2  ;;  %v993_v7 = vpop.f32.mrb[5].mxu1  ;;  %v967_v8 = vpop.f32.mrb[6].mxu0 }
 0x128   : > { %707 = vst [vmem:[#allocation2 + $0x8] sm:$0xff] %v703_v3  ;;  %v994_v9 = vadd.f32 %v993_v7, %v992_v4  ;;  %v995_v10 = vpop.f32.mrb[6].mxu1  ;;  %v968_v11 = vpop.f32.mrb[7].mxu0 }
 0x129   : > { %v969_v13 = vadd.f32 %v968_v11, %v967_v8  ;;  %v996_v14 = vpop.f32.mrb[7].mxu1 }
 0x12a   : > { %v696_v15 = vadd.f32 %v994_v9, %v966_v6  ;;  %v997_v16 = vadd.f32 %v996_v14, %v995_v10  ;;  %713 = sbr.rel (%p916_p11) target bundleno = 319 (0x13f), region = 63 }
 0x12c   : > { %v704_v18 = vadd.f32 %v696_v15, %v298_v12  ;;  %v699_v19 = vadd.f32 %v997_v16, %v969_v13 }
 0x12d   : > { %v714_v21 = vld [vmem:[#allocation2] sm:$0xff] (!%p916_p11) }
 0x12e   : > { %708 = vst [vmem:[#allocation2 + $0x10] sm:$0xff] %v704_v18  ;;  %v705_v20 = vadd.f32 %v699_v19, %v299_v17  ;;  %v725_v24 = vadd.f32 (!%p916_p11), %v917_v23, %v714_v21 }
 0x12f   : > { %v715_v22 = vld [vmem:[#allocation2 + $0x8] sm:$0xff] (!%p916_p11) }
 0x130   : > { %709 = vst [vmem:[#allocation2 + $0x18] sm:$0xff] %v705_v20  ;;  %v726_v25 = vadd.f32 (!%p916_p11), %v917_v23, %v715_v22  ;;  %v729_v30 = vmax.f32 (!%p916_p11), %v725_v24, 0.0 }
 0x132   : > { %v730_v31 = vmax.f32 %v726_v25, 0.0 }
 0x134   : > { %v934_v34 = vpack.c.bf16 %v730_v31, %v729_v30 }
 0x135   : > { %v716_v26 = vld [vmem:[#allocation2 + $0x10] sm:$0xff] }
 0x136   : > { %v727_v28 = vadd.f32 %v917_v23, %v716_v26  ;;  %935 = vst [vmem:[%s1267_s3] sm:$0xff] %v934_v34  }
 0x137   : > { %v717_v27 = vld [vmem:[#allocation2 + $0x18] sm:$0xff] }
 0x138   : > { %v728_v29 = vadd.f32 %v917_v23, %v717_v27  ;;  %v731_v32 = vmax.f32 %v727_v28, 0.0 }
 0x13a   : > { %v732_v33 = vmax.f32 %v728_v29, 0.0 }
 0x13c   : > { %v939_v35 = vpack.c.bf16 %v732_v33, %v731_v32 }
 0x13e   : > { %941 = vst [vmem:[%s1267_s3 + $0x8] sm:$0xff] %v939_v35  }
 0x13f PF: > { %s13_s16 = sadd.s32 1, %s1121_s16   ;;  %s1268_s12 = smov %s1109_s13 }
 0x140   : > { %p10_p12 = scmp.ge.s32.totalorder %s13_s16, 4   ;;  %s1269_s13 = smov %s1179_s20 }
 0x141   : > { %s1270_s14 = smov %s1117_s15  ;;  %s1271_s15 = smov %s1273_s17 }
 0x142   :  { %12 = sbr.rel (!%p10_p12) target bundleno = 3 (0x3), region = 104 }

// kernel: simple_video_generator.20
= control target key start
LH: loop header
LB: loop body
LE: loop exit
PB: predicated region body
PF: predicated region fallthrough
CT: control target
= control target key end

     0   :  { %s306_s1 = inlined_call_operand.vmem [shape: bf16[128,128], index: 1, kind: input, shape index: {}]   ;;  %s307_s0 = inlined_call_operand.vmem [shape: bf16[32,128], index: 0, kind: input, shape index: {}]   ;;  %s308_s2 = inlined_call_operand.vmem [shape: f32[1,128], index: 2, kind: input, shape index: {}]   ;;  %s309_s3 = inlined_call_operand.vmem [shape: f32[32,128], index: 3, kind: output, shape index: {}]  }
   0x1   :  { %v231_v0 = vld [vmem:[%s306_s1] sm:$0xff]   ;;  %v232_v1 = vld [vmem:[%s306_s1 + $0x8] sm:$0xff]   ;;  %v233_v2 = vld [vmem:[%s306_s1 + $0x10] sm:$0xff]  }
   0x2   :  { %211 = vmatprep.subr.bf16.mxu0 %v231_v0  ;;  %v234_v3 = vld [vmem:[%s306_s1 + $0x18] sm:$0xff]   ;;  %v239_v4 = vld [vmem:[%s307_s0] sm:$0xff]   ;;  %v236_v6 = vld [vmem:[%s306_s1 + $0x28] sm:$0xff]  }
   0x3   :  { %212 = vmatpush3.bf16.msra.mxu0 %v231_v0  ;;  %227 = vmatprep.mubr.bf16.mxu0 %v239_v4  ;;  %v235_v5 = vld [vmem:[%s306_s1 + $0x20] sm:$0xff]   ;;  %v237_v7 = vld [vmem:[%s306_s1 + $0x30] sm:$0xff]   ;;  %v238_v8 = vld [vmem:[%s306_s1 + $0x38] sm:$0xff]  }
   0x4   :  { %213 = vmatprep.subr.bf16.mxu0 %v232_v1  ;;  %v240_v9 = vld [vmem:[%s307_s0 + $0x8] sm:$0xff]   ;;  %v200_v10 = vld [vmem:[%s308_s2] ss:$0 sm:$0xff] }
   0x7   :  { %214 = vmatpush3.bf16.msra.mxu0 %v232_v1 }
   0x8   :  { %215 = vmatprep.subr.bf16.mxu0 %v233_v2 }
   0xb   :  { %216 = vmatpush3.bf16.msra.mxu0 %v233_v2 }
   0xc   :  { %217 = vmatprep.subr.bf16.mxu0 %v234_v3 }
   0xf   :  { %218 = vmatpush3.bf16.msra.mxu0 %v234_v3 }
  0x10   :  { %219 = vmatprep.subr.bf16.mxu0 %v235_v5 }
  0x13   :  { %220 = vmatpush3.bf16.msra.mxu0 %v235_v5 }
  0x14   :  { %221 = vmatprep.subr.bf16.mxu0 %v236_v6 }
  0x17   :  { %222 = vmatpush3.bf16.msra.mxu0 %v236_v6 }
  0x18   :  { %223 = vmatprep.subr.bf16.mxu0 %v237_v7 }
  0x1b   :  { %224 = vmatpush3.bf16.msra.mxu0 %v237_v7 }
  0x1c   :  { %225 = vmatprep.subr.bf16.mxu0 %v238_v8 }
  0x1f   :  { %226 = vmatpush3.bf16.msra.mxu0 %v238_v8 }
  0x22   :  { %228 = vmatmul.mubr.bf16.vlgmr.msra.gmra.mrb[0].mxu0 %v240_v9 }
  0xf5   :  { %v229_v11 = vpop.f32.mrb[0].mxu0 }
  0xf6   :  { %v180_v12 = vadd.f32 %v229_v11, %v200_v10  ;;  %v141_v13 = vpop.f32.mrb[1].mxu0 }
  0xf7   :  { %v178_v14 = vadd.f32 %v200_v10, %v141_v13  ;;  %v230_v15 = vpop.f32.mrb[2].mxu0 }
  0xf8   :  { %184 = vst [vmem:[%s309_s3 + $0x10] sm:$0xff] %v180_v12  ;;  %v181_v16 = vadd.f32 %v230_v15, %v200_v10  ;;  %v144_v17 = vpop.f32.mrb[3].mxu0 }
  0xf9   :  { %182 = vst [vmem:[%s309_s3] sm:$0xff] %v178_v14  ;;  %v179_v18 = vadd.f32 %v200_v10, %v144_v17 }
  0xfa   :  { %185 = vst [vmem:[%s309_s3 + $0x18] sm:$0xff] %v181_v16 }
  0xfb   :  { %183 = vst [vmem:[%s309_s3 + $0x8] sm:$0xff] %v179_v18 }

// kernel: simple_video_generator.21
= control target key start
LH: loop header
LB: loop body
LE: loop exit
PB: predicated region body
PF: predicated region fallthrough
CT: control target
= control target key end

     0   :  { %s1232_s15 = smov 0   ;;  %s1234_s16 = smov 0   ;;  %s1364_s0 = inlined_call_operand.vmem [shape: bf16[32,2048], index: 0, kind: input, shape index: {}]   ;;  %s1365_s1 = inlined_call_operand.vmem [shape: bf16[2048,128], index: 1, kind: input, shape index: {}]   ;;  %s1366_s2 = inlined_call_operand.vmem [shape: f32[1,128], index: 2, kind: input, shape index: {}]   ;;  %s1367_s3 = inlined_call_operand.vmem [shape: f32[32,128], index: 3, kind: input, shape index: {}]   ;;  %s1368_s4 = inlined_call_operand.vmem [shape: bf16[32,128], index: 4, kind: output, shape index: {}]  }
   0x1   :  { %s1236_s17 = smov 0   ;;  %s1238_s18 = smov 0  }
   0x2   :  { %s1240_s19 = smov 0  }
   0x3 LB: > { %s26_s20 = sadd.s32 1, %s1200_s18  ;;  %p49_p1 = scmp.ne.s32.totalorder %s1192_s16, %s1188_s15  ;;  %s1204_s19 = sphi %s1240_s19, %s14_s19   ;;  %s1200_s18 = sphi %s1238_s18, %s1372_s18   ;;  %s1196_s17 = sphi %s1236_s17, %s1371_s17   ;;  %s1192_s16 = sphi %s1234_s16, %s1370_s16   ;;  %s1188_s15 = sphi %s1232_s15, %s1369_s15  }
   0x4   : > { %p27_p0 = scmp.ge.s32.totalorder %s26_s20, 4  ;;  %p50_p2 = scmp.eq.s32.totalorder %s1204_s19, 0 }
   0x5   : > { %s42_s22 = sadd.s32 1, %s1192_s16  ;;  %p950_p5 = scmp.ge.s32.totalorder %s1204_s19, 4 }
   0x6   : > { %s1374_s20 = smov (%p27_p0, %s26_s20), 0  ;;  %p51_p3 = por %p50_p2, %p49_p1 }
   0x7   : > { %s38_s21 = ssub.s32 %s1200_s18, %s1374_s20  ;;  %203 = sbr.rel (%p950_p5) target bundleno = 22 (0x16), region = 24 }
   0x8   : > { %p40_p4 = scmp.eq.s32.totalorder %s38_s21, 0 }
   0xa   : > { %s1267_s23 = scalar_select %p40_p4, %s1192_s16, %s42_s22  }
   0xe   : > { %206 = sbr.rel (!%p51_p3) target bundleno = 22 (0x16), region = 28  ;;  %s208_s24 = sand.u32 (%p51_p3), 1, %s1192_s16  }
   0xf   : > { %s1009_s25 = sshll.u32 (%p51_p3), %s1200_s18, 4  ;;  %s951_s26 = sshll.u32 (%p51_p3), %s208_s24, 6 }
  0x10   : > { %s216_s29 = scalar_lea.vmem (%p51_p3), %s1364_s0, %s1009_s25  ;;  %s210_s30 = scalar_lea.vmem (%p51_p3), [#allocation3], %s951_s26 }
  0x11   : > { %v229_v0 = vld [vmem:[%s216_s29] sm:$0xff] (%p51_p3)  ;;  %v231_v1 = vld [vmem:[%s216_s29 + $0x8] sm:$0xff] (%p51_p3) }
  0x12   : > { %v233_v2 = vld [vmem:[%s216_s29 + $0x40] sm:$0xff] (%p51_p3)  ;;  %230 = vst [vmem:[%s210_s30] sm:$0xff] (%p51_p3), %v229_v0  ;;  %232 = vst [vmem:[%s210_s30 + $0x8] sm:$0xff] (%p51_p3), %v231_v1  ;;  %v235_v3 = vld [vmem:[%s216_s29 + $0x48] sm:$0xff] (%p51_p3) }
  0x13   : > { %234 = vst [vmem:[%s210_s30 + $0x10] sm:$0xff] (%p51_p3), %v233_v2  ;;  %v237_v4 = vld [vmem:[%s216_s29 + $0x80] sm:$0xff] (%p51_p3)  ;;  %v239_v5 = vld [vmem:[%s216_s29 + $0x88] sm:$0xff] (%p51_p3)  ;;  %236 = vst [vmem:[%s210_s30 + $0x18] sm:$0xff] (%p51_p3), %v235_v3 }
  0x14   : > { %238 = vst [vmem:[%s210_s30 + $0x20] sm:$0xff] (%p51_p3), %v237_v4  ;;  %240 = vst [vmem:[%s210_s30 + $0x28] sm:$0xff] (%p51_p3), %v239_v5  ;;  %v241_v6 = vld [vmem:[%s216_s29 + $0xc0] sm:$0xff] (%p51_p3)  ;;  %v243_v7 = vld [vmem:[%s216_s29 + $0xc8] sm:$0xff] (%p51_p3) }
  0x15   : > { %242 = vst [vmem:[%s210_s30 + $0x30] sm:$0xff] %v241_v6  ;;  %244 = vst [vmem:[%s210_s30 + $0x38] sm:$0xff] %v243_v7 }
  0x16 PF: > { %p954_p6 = scmp.ge.s32.totalorder %s1204_s19, 1  ;;  %p261_p7 = scmp.lt.s32.totalorder %s1204_s19, 5 }
  0x18   : > { %p262_p8 = pnand %p954_p6, %p261_p7 }
  0x19   : > { %s268_s5 = sand.u32 (!%p262_p8), 1, %s1188_s15   ;;  %s956_s6 = sshll.u32 (!%p262_p8), %s1196_s17, 6 }
  0x1a   : > { %265 = sbr.rel (%p262_p8) target bundleno = 319 (0x13f), region = 55  ;;  %s955_s7 = sshll.u32 (!%p262_p8), %s268_s5, 6 }
  0x1b   : > { %p318_p9 = scmp.lt.s32.totalorder (!%p262_p8), %s956_s6, 255  ;;  %s1284_s12 = scalar_lea.vmem (!%p262_p8), [#allocation3], %s955_s7 }
  0x1c   : > { %p958_p10 = scmp.ne.s32.totalorder (!%p262_p8), %s1196_s17, 0 }
  0x21   : > { %s1376_s6 = smov (!%p318_p9, %s956_s6), 255  ;;  %351 = sbr.rel (%p958_p10) target bundleno = 40 (0x28), region = 63 }
  0x22   : > { %s957_s8 = sshll.u32 %s1376_s6, 2  ;;  %v1206_v8 = vmov (!%p958_p10), 0.0  }
  0x23   : > { %s1282_s11 = scalar_lea.vmem %s1365_s1, %s957_s8  ;;  %352 = vst [vmem:[#allocation2] sm:$0xff] (!%p958_p10), %v1206_v8  ;;  %353 = vst [vmem:[#allocation2 + $0x8] sm:$0xff] (!%p958_p10), %v1206_v8 }
  0x24   : > { %354 = vst [vmem:[#allocation2 + $0x10] sm:$0xff] (!%p958_p10), %v1206_v8  ;;  %355 = vst [vmem:[#allocation2 + $0x18] sm:$0xff] (!%p958_p10), %v1206_v8 }
  0x28 PF: > { %v1122_v9 = vld [vmem:[%s1282_s11 + $0x40] sm:$0xff]   ;;  %v1126_v13 = vld [vmem:[%s1282_s11 + $0x48] sm:$0xff]   ;;  %v1130_v17 = vld [vmem:[%s1282_s11 + $0x50] sm:$0xff]   ;;  %p999_p11 = scmp.ne.s32.totalorder %s1196_s17, 3 }
  0x29   : > { %v1123_v10 = vld [vmem:[%s1282_s11 + $0xc0] sm:$0xff]   ;;  %1025 = vmatprep.subr.bf16.mxu0 %v1122_v9  ;;  %v1127_v14 = vld [vmem:[%s1282_s11 + $0xc8] sm:$0xff]   ;;  %v1131_v18 = vld [vmem:[%s1282_s11 + $0xd0] sm:$0xff]  }
  0x2a   : > { %v1124_v11 = vld [vmem:[%s1282_s11] sm:$0xff]   ;;  %1053 = vmatprep.subr.bf16.mxu1 %v1123_v10  ;;  %v1128_v15 = vld [vmem:[%s1282_s11 + $0x8] sm:$0xff]   ;;  %v1132_v19 = vld [vmem:[%s1282_s11 + $0x10] sm:$0xff]  }
  0x2b   : > { %v1125_v12 = vld [vmem:[%s1282_s11 + $0x80] sm:$0xff]   ;;  %1026 = vmatpush3.bf16.msra.mxu0 %v1124_v11  ;;  %v1129_v16 = vld [vmem:[%s1282_s11 + $0x88] sm:$0xff]   ;;  %v1133_v20 = vld [vmem:[%s1282_s11 + $0x90] sm:$0xff]  }
  0x2c   : > { %1054 = vmatpush3.bf16.msra.mxu1 %v1125_v12  ;;  %1027 = vmatprep.subr.bf16.mxu0 %v1126_v13  ;;  %v1134_v21 = vld [vmem:[%s1282_s11 + $0x58] sm:$0xff]   ;;  %v1138_v25 = vld [vmem:[%s1282_s11 + $0x60] sm:$0xff]   ;;  %v1142_v29 = vld [vmem:[%s1282_s11 + $0x68] sm:$0xff]  }
  0x2d   : > { %1055 = vmatprep.subr.bf16.mxu1 %v1127_v14  ;;  %v1135_v22 = vld [vmem:[%s1282_s11 + $0xd8] sm:$0xff]   ;;  %v1139_v26 = vld [vmem:[%s1282_s11 + $0xe0] sm:$0xff]   ;;  %v1143_v30 = vld [vmem:[%s1282_s11 + $0xe8] sm:$0xff]  }
  0x2e   : > { %v1136_v23 = vld [vmem:[%s1282_s11 + $0x18] sm:$0xff]   ;;  %v1140_v27 = vld [vmem:[%s1282_s11 + $0x20] sm:$0xff]   ;;  %v1144_v31 = vld [vmem:[%s1282_s11 + $0x28] sm:$0xff]  }
  0x2f   : > { %1028 = vmatpush3.bf16.msra.mxu0 %v1128_v15  ;;  %v1137_v24 = vld [vmem:[%s1282_s11 + $0x98] sm:$0xff]   ;;  %v1141_v28 = vld [vmem:[%s1282_s11 + $0xa0] sm:$0xff]   ;;  %v1145_v32 = vld [vmem:[%s1282_s11 + $0xa8] sm:$0xff]  }
  0x30   : > { %1056 = vmatpush3.bf16.msra.mxu1 %v1129_v16  ;;  %1029 = vmatprep.subr.bf16.mxu0 %v1130_v17  ;;  %v1146_v33 = vld [vmem:[%s1282_s11 + $0x70] sm:$0xff]   ;;  %v1150_v37 = vld [vmem:[%s1282_s11 + $0x78] sm:$0xff]   ;;  %v356_v58 = vld [vmem:[#allocation2] sm:$0xff] }
  0x31   : > { %1057 = vmatprep.subr.bf16.mxu1 %v1131_v18  ;;  %v1147_v34 = vld [vmem:[%s1282_s11 + $0xf0] sm:$0xff]   ;;  %v1151_v38 = vld [vmem:[%s1282_s11 + $0xf8] sm:$0xff]   ;;  %v357_v63 = vld [vmem:[#allocation2 + $0x8] sm:$0xff] }
  0x32   : > { %v1148_v35 = vld [vmem:[%s1282_s11 + $0x30] sm:$0xff]   ;;  %v1152_v39 = vld [vmem:[%s1282_s11 + $0x38] sm:$0xff]  }
  0x33   : > { %1030 = vmatpush3.bf16.msra.mxu0 %v1132_v19  ;;  %v1149_v36 = vld [vmem:[%s1282_s11 + $0xb0] sm:$0xff]   ;;  %v1153_v40 = vld [vmem:[%s1282_s11 + $0xb8] sm:$0xff]  }
  0x34   : > { %1058 = vmatpush3.bf16.msra.mxu1 %v1133_v20  ;;  %1031 = vmatprep.subr.bf16.mxu0 %v1134_v21  ;;  %v1154_v41 = vld [vmem:[%s1284_s12] ss:$16 sps:$4 sm:$0xff]   ;;  %v1156_v42 = vld [vmem:[%s1284_s12 + $0x4] ss:$16 sps:$4 sm:$0xff]   ;;  %v1157_v43 = vld [vmem:[%s1284_s12 + $0x8] ss:$16 sps:$4 sm:$0xff]  }
  0x35   : > { %1059 = vmatprep.subr.bf16.mxu1 %v1135_v22  ;;  %v1159_v44 = vld [vmem:[%s1284_s12 + $0xc] ss:$16 sps:$4 sm:$0xff]   ;;  %696 = vmatprep.mubr.bf16.mxu0 %v1156_v42  ;;  %v1160_v45 = vld [vmem:[%s1284_s12 + $0x24] ss:$16 sps:$4 sm:$0xff]   ;;  %v1164_v47 = vld [vmem:[%s1284_s12 + $0x20] ss:$16 sps:$4 sm:$0xff]  }
  0x36   : > { %745 = vmatprep.mubr.bf16.mxu1 %v1159_v44  ;;  %v1162_v46 = vld [vmem:[%s1284_s12 + $0x2c] ss:$16 sps:$4 sm:$0xff]   ;;  %v1165_v48 = vld [vmem:[%s1284_s12 + $0x28] ss:$16 sps:$4 sm:$0xff]   ;;  %v358_v12 = vld [vmem:[#allocation2 + $0x10] sm:$0xff] }
  0x37   : > { %1032 = vmatpush3.bf16.msra.mxu0 %v1136_v23  ;;  %v359_v17 = vld [vmem:[#allocation2 + $0x18] sm:$0xff]  ;;  %v1000_v23 = vld [vmem:[%s1366_s2] ss:$0 sm:$0xff] (!%p999_p11) }
  0x38   : > { %1060 = vmatpush3.bf16.msra.mxu1 %v1137_v24  ;;  %1033 = vmatprep.subr.bf16.mxu0 %v1138_v25 }
  0x39   : > { %1061 = vmatprep.subr.bf16.mxu1 %v1139_v26  ;;  %v789_v26 = vld [vmem:[%s1367_s3] sm:$0xff] (!%p999_p11) }
  0x3b   : > { %1034 = vmatpush3.bf16.msra.mxu0 %v1140_v27  ;;  %v790_v27 = vld [vmem:[%s1367_s3 + $0x8] sm:$0xff] (!%p999_p11) }
  0x3c   : > { %1062 = vmatpush3.bf16.msra.mxu1 %v1141_v28  ;;  %1035 = vmatprep.subr.bf16.mxu0 %v1142_v29 }
  0x3d   : > { %1063 = vmatprep.subr.bf16.mxu1 %v1143_v30 }
  0x3f   : > { %1036 = vmatpush3.bf16.msra.mxu0 %v1144_v31  ;;  %v791_v31 = vld [vmem:[%s1367_s3 + $0x10] sm:$0xff] (!%p999_p11) }
  0x40   : > { %1064 = vmatpush3.bf16.msra.mxu1 %v1145_v32  ;;  %1037 = vmatprep.subr.bf16.mxu0 %v1146_v33  ;;  %v792_v32 = vld [vmem:[%s1367_s3 + $0x18] sm:$0xff] (!%p999_p11) }
  0x41   : > { %1065 = vmatprep.subr.bf16.mxu1 %v1147_v34 }
  0x43   : > { %1038 = vmatpush3.bf16.msra.mxu0 %v1148_v35 }
  0x44   : > { %1066 = vmatpush3.bf16.msra.mxu1 %v1149_v36  ;;  %1039 = vmatprep.subr.bf16.mxu0 %v1150_v37 }
  0x45   : > { %1067 = vmatprep.subr.bf16.mxu1 %v1151_v38 }
  0x47   : > { %1040 = vmatpush3.bf16.msra.mxu0 %v1152_v39 }
  0x48   : > { %1068 = vmatpush3.bf16.msra.mxu1 %v1153_v40 }
  0x4a   : > { %697 = vmatmul.mubr.bf16.vlgmr.msra.gmra.mrb[0].mxu0 %v1154_v41 }
  0x4b   : > { %746 = vmatmul.mubr.bf16.vlgmr.msra.gmra.mrb[0].mxu1 %v1157_v43  ;;  %704 = vmatprep.mubr.bf16.mxu0 %v1160_v45 }
  0x4c   : > { %753 = vmatprep.mubr.bf16.mxu1 %v1162_v46 }
  0x52   : > { %705 = vmatmul.mubr.bf16.gmra.mrb[4].mxu0 %v1164_v47 }
  0x53   : > { %754 = vmatmul.mubr.bf16.gmra.mrb[4].mxu1 %v1165_v48 }
 0x11d   : > { %v1041_v49 = vpop.f32.mrb[0].mxu0 }
 0x11e   : > { %v1069_v50 = vpop.f32.mrb[0].mxu1  ;;  %v1042_v51 = vpop.f32.mrb[1].mxu0 }
 0x11f   : > { %v1043_v52 = vadd.f32 %v1042_v51, %v1041_v49  ;;  %v1070_v53 = vpop.f32.mrb[1].mxu1  ;;  %v1044_v54 = vpop.f32.mrb[2].mxu0 }
 0x120   : > { %v1071_v55 = vadd.f32 %v1070_v53, %v1069_v50  ;;  %v1072_v56 = vpop.f32.mrb[2].mxu1  ;;  %v1045_v57 = vpop.f32.mrb[3].mxu0 }
 0x121   : > { %v1046_v59 = vadd.f32 %v1045_v57, %v1044_v54  ;;  %v1073_v60 = vpop.f32.mrb[3].mxu1 }
 0x122   : > { %v748_v61 = vadd.f32 %v1071_v55, %v1043_v52  ;;  %v1074_v62 = vadd.f32 %v1073_v60, %v1072_v56 }
 0x124   : > { %v762_v0 = vadd.f32 %v748_v61, %v356_v58  ;;  %v751_v1 = vadd.f32 %v1074_v62, %v1046_v59 }
 0x125   : > { %v1047_v2 = vpop.f32.mrb[4].mxu0 }
 0x126   : > { %766 = vst [vmem:[#allocation2] sm:$0xff] %v762_v0  ;;  %v763_v3 = vadd.f32 %v751_v1, %v357_v63  ;;  %v1075_v4 = vpop.f32.mrb[4].mxu1  ;;  %v1048_v5 = vpop.f32.mrb[5].mxu0 }
 0x127   : > { %v1049_v6 = vadd.f32 %v1048_v5, %v1047_v2  ;;  %v1076_v7 = vpop.f32.mrb[5].mxu1  ;;  %v1050_v8 = vpop.f32.mrb[6].mxu0 }
 0x128   : > { %767 = vst [vmem:[#allocation2 + $0x8] sm:$0xff] %v763_v3  ;;  %v1077_v9 = vadd.f32 %v1076_v7, %v1075_v4  ;;  %v1078_v10 = vpop.f32.mrb[6].mxu1  ;;  %v1051_v11 = vpop.f32.mrb[7].mxu0 }
 0x129   : > { %v1052_v13 = vadd.f32 %v1051_v11, %v1050_v8  ;;  %v1079_v14 = vpop.f32.mrb[7].mxu1 }
 0x12a   : > { %v756_v15 = vadd.f32 %v1077_v9, %v1049_v6  ;;  %v1080_v16 = vadd.f32 %v1079_v14, %v1078_v10  ;;  %773 = sbr.rel (%p999_p11) target bundleno = 319 (0x13f), region = 67 }
 0x12c   : > { %v764_v18 = vadd.f32 %v756_v15, %v358_v12  ;;  %v759_v19 = vadd.f32 %v1080_v16, %v1052_v13 }
 0x12d   : > { %v774_v21 = vld [vmem:[#allocation2] sm:$0xff] (!%p999_p11) }
 0x12e   : > { %768 = vst [vmem:[#allocation2 + $0x10] sm:$0xff] %v764_v18  ;;  %v765_v20 = vadd.f32 %v759_v19, %v359_v17  ;;  %v785_v24 = vadd.f32 (!%p999_p11), %v1000_v23, %v774_v21 }
 0x12f   : > { %v775_v22 = vld [vmem:[#allocation2 + $0x8] sm:$0xff] (!%p999_p11) }
 0x130   : > { %769 = vst [vmem:[#allocation2 + $0x18] sm:$0xff] %v765_v20  ;;  %v786_v25 = vadd.f32 (!%p999_p11), %v1000_v23, %v775_v22  ;;  %v793_v33 = vadd.f32 (!%p999_p11), %v789_v26, %v785_v24 }
 0x132   : > { %v794_v34 = vadd.f32 %v790_v27, %v786_v25 }
 0x134   : > { %v1017_v37 = vpack.c.bf16 %v794_v34, %v793_v33 }
 0x135   : > { %v776_v28 = vld [vmem:[#allocation2 + $0x10] sm:$0xff] }
 0x136   : > { %v787_v30 = vadd.f32 %v1000_v23, %v776_v28  ;;  %1018 = vst [vmem:[%s1368_s4] sm:$0xff] %v1017_v37  }
 0x137   : > { %v777_v29 = vld [vmem:[#allocation2 + $0x18] sm:$0xff] }
 0x138   : > { %v788_v35 = vadd.f32 %v1000_v23, %v777_v29  ;;  %v795_v36 = vadd.f32 %v791_v31, %v787_v30 }
 0x13a   : > { %v796_v38 = vadd.f32 %v792_v32, %v788_v35 }
 0x13c   : > { %v1022_v39 = vpack.c.bf16 %v796_v38, %v795_v36 }
 0x13e   : > { %1024 = vst [vmem:[%s1368_s4 + $0x8] sm:$0xff] %v1022_v39  }
 0x13f PF: > { %s14_s19 = sadd.s32 1, %s1204_s19   ;;  %s1369_s15 = smov %s1192_s16 }
 0x140   : > { %p11_p12 = scmp.ge.s32.totalorder %s14_s19, 6   ;;  %s1370_s16 = smov %s1267_s23 }
 0x141   : > { %s1371_s17 = smov %s1200_s18  ;;  %s1372_s18 = smov %s1374_s20 }
 0x142   :  { %13 = sbr.rel (!%p11_p12) target bundleno = 3 (0x3), region = 111 }

// kernel: simple_video_generator.22
= control target key start
LH: loop header
LB: loop body
LE: loop exit
PB: predicated region body
PF: predicated region fallthrough
CT: control target
= control target key end

     0   :  { %s1768_s12 = smov 0   ;;  %s1770_s13 = smov 0   ;;  %s1998_s0 = inlined_call_operand.vmem [shape: bf16[128,2048], index: 0, kind: input, shape index: {}]   ;;  %s1999_s1 = inlined_call_operand.vmem [shape: bf16[2048,128], index: 1, kind: input, shape index: {}]   ;;  %s2000_s2 = inlined_call_operand.vmem [shape: f32[1,128], index: 2, kind: input, shape index: {}]   ;;  %s2001_s3 = inlined_call_operand.vmem [shape: bf16[128,128], index: 3, kind: output, shape index: {}]  }
   0x1   :  { %s1772_s14 = smov 0   ;;  %s1774_s15 = smov 0  }
   0x2   :  { %s1776_s16 = smov 0  }
   0x3 LB: > { %s25_s17 = sadd.s32 1, %s1741_s15  ;;  %p48_p1 = scmp.ne.s32.totalorder %s1733_s13, %s1729_s12  ;;  %s1745_s16 = sphi %s1776_s16, %s13_s16   ;;  %s1741_s15 = sphi %s1774_s15, %s2005_s15   ;;  %s1737_s14 = sphi %s1772_s14, %s2004_s14   ;;  %s1733_s13 = sphi %s1770_s13, %s2003_s13   ;;  %s1729_s12 = sphi %s1768_s12, %s2002_s12  }
   0x4   : > { %p26_p0 = scmp.ge.s32.totalorder %s25_s17, 4  ;;  %p49_p2 = scmp.eq.s32.totalorder %s1745_s16, 0 }
   0x5   : > { %s41_s19 = sadd.s32 1, %s1733_s13  ;;  %p1299_p5 = scmp.ge.s32.totalorder %s1745_s16, 4 }
   0x6   : > { %s2007_s17 = smov (%p26_p0, %s25_s17), 0  ;;  %p50_p3 = por %p49_p2, %p48_p1 }
   0x7   : > { %s37_s18 = ssub.s32 %s1741_s15, %s2007_s17  ;;  %162 = sbr.rel (%p1299_p5) target bundleno = 34 (0x22), region = 20 }
   0x8   : > { %p39_p4 = scmp.eq.s32.totalorder %s37_s18, 0 }
   0xa   : > { %s1803_s20 = scalar_select %p39_p4, %s1733_s13, %s41_s19  }
   0xe   : > { %165 = sbr.rel (!%p50_p3) target bundleno = 34 (0x22), region = 24  ;;  %s167_s21 = sand.u32 (%p50_p3), 1, %s1733_s13  }
   0xf   : > { %s1394_s22 = sshll.u32 (%p50_p3), %s1741_s15, 4  ;;  %s1300_s23 = sshll.u32 (%p50_p3), %s167_s21, 8 }
  0x10   : > { %s1811_s26 = scalar_lea.vmem (%p50_p3), %s1998_s0, %s1394_s22  ;;  %s1816_s27 = scalar_lea.vmem (%p50_p3), [#allocation3], %s1300_s23 }
  0x11   : > { %v188_v0 = vld [vmem:[%s1811_s26] sm:$0xff] (%p50_p3)  ;;  %v190_v1 = vld [vmem:[%s1811_s26 + $0x8] sm:$0xff] (%p50_p3) }
  0x12   : > { %v192_v2 = vld [vmem:[%s1811_s26 + $0x40] sm:$0xff] (%p50_p3)  ;;  %189 = vst [vmem:[%s1816_s27] sm:$0xff] (%p50_p3), %v188_v0  ;;  %191 = vst [vmem:[%s1816_s27 + $0x8] sm:$0xff] (%p50_p3), %v190_v1  ;;  %v194_v3 = vld [vmem:[%s1811_s26 + $0x48] sm:$0xff] (%p50_p3) }
  0x13   : > { %193 = vst [vmem:[%s1816_s27 + $0x10] sm:$0xff] (%p50_p3), %v192_v2  ;;  %v196_v4 = vld [vmem:[%s1811_s26 + $0x80] sm:$0xff] (%p50_p3)  ;;  %v198_v5 = vld [vmem:[%s1811_s26 + $0x88] sm:$0xff] (%p50_p3)  ;;  %195 = vst [vmem:[%s1816_s27 + $0x18] sm:$0xff] (%p50_p3), %v194_v3 }
  0x14   : > { %197 = vst [vmem:[%s1816_s27 + $0x20] sm:$0xff] (%p50_p3), %v196_v4  ;;  %199 = vst [vmem:[%s1816_s27 + $0x28] sm:$0xff] (%p50_p3), %v198_v5  ;;  %v200_v6 = vld [vmem:[%s1811_s26 + $0xc0] sm:$0xff] (%p50_p3)  ;;  %v202_v7 = vld [vmem:[%s1811_s26 + $0xc8] sm:$0xff] (%p50_p3) }
  0x15   : > { %v204_v8 = vld [vmem:[%s1811_s26 + $0x100] sm:$0xff]  ;;  %201 = vst [vmem:[%s1816_s27 + $0x30] sm:$0xff] %v200_v6  ;;  %203 = vst [vmem:[%s1816_s27 + $0x38] sm:$0xff] %v202_v7  ;;  %v206_v9 = vld [vmem:[%s1811_s26 + $0x108] sm:$0xff] }
  0x16   : > { %205 = vst [vmem:[%s1816_s27 + $0x40] sm:$0xff] %v204_v8  ;;  %v208_v10 = vld [vmem:[%s1811_s26 + $0x140] sm:$0xff]  ;;  %v210_v11 = vld [vmem:[%s1811_s26 + $0x148] sm:$0xff]  ;;  %207 = vst [vmem:[%s1816_s27 + $0x48] sm:$0xff] %v206_v9 }
  0x17   : > { %209 = vst [vmem:[%s1816_s27 + $0x50] sm:$0xff] %v208_v10  ;;  %211 = vst [vmem:[%s1816_s27 + $0x58] sm:$0xff] %v210_v11  ;;  %v212_v12 = vld [vmem:[%s1811_s26 + $0x180] sm:$0xff]  ;;  %v214_v13 = vld [vmem:[%s1811_s26 + $0x188] sm:$0xff] }
  0x18   : > { %v216_v14 = vld [vmem:[%s1811_s26 + $0x1c0] sm:$0xff]  ;;  %213 = vst [vmem:[%s1816_s27 + $0x60] sm:$0xff] %v212_v12  ;;  %215 = vst [vmem:[%s1816_s27 + $0x68] sm:$0xff] %v214_v13  ;;  %v218_v15 = vld [vmem:[%s1811_s26 + $0x1c8] sm:$0xff] }
  0x19   : > { %217 = vst [vmem:[%s1816_s27 + $0x70] sm:$0xff] %v216_v14  ;;  %v220_v16 = vld [vmem:[%s1811_s26 + $0x200] sm:$0xff]  ;;  %v222_v17 = vld [vmem:[%s1811_s26 + $0x208] sm:$0xff]  ;;  %219 = vst [vmem:[%s1816_s27 + $0x78] sm:$0xff] %v218_v15 }
  0x1a   : > { %221 = vst [vmem:[%s1816_s27 + $0x80] sm:$0xff] %v220_v16  ;;  %223 = vst [vmem:[%s1816_s27 + $0x88] sm:$0xff] %v222_v17  ;;  %v224_v18 = vld [vmem:[%s1811_s26 + $0x240] sm:$0xff]  ;;  %v226_v19 = vld [vmem:[%s1811_s26 + $0x248] sm:$0xff] }
  0x1b   : > { %v228_v20 = vld [vmem:[%s1811_s26 + $0x280] sm:$0xff]  ;;  %225 = vst [vmem:[%s1816_s27 + $0x90] sm:$0xff] %v224_v18  ;;  %227 = vst [vmem:[%s1816_s27 + $0x98] sm:$0xff] %v226_v19  ;;  %v230_v21 = vld [vmem:[%s1811_s26 + $0x288] sm:$0xff] }
  0x1c   : > { %229 = vst [vmem:[%s1816_s27 + $0xa0] sm:$0xff] %v228_v20  ;;  %v232_v22 = vld [vmem:[%s1811_s26 + $0x2c0] sm:$0xff]  ;;  %v234_v23 = vld [vmem:[%s1811_s26 + $0x2c8] sm:$0xff]  ;;  %231 = vst [vmem:[%s1816_s27 + $0xa8] sm:$0xff] %v230_v21 }
  0x1d   : > { %233 = vst [vmem:[%s1816_s27 + $0xb0] sm:$0xff] %v232_v22  ;;  %235 = vst [vmem:[%s1816_s27 + $0xb8] sm:$0xff] %v234_v23  ;;  %v236_v24 = vld [vmem:[%s1811_s26 + $0x300] sm:$0xff]  ;;  %v238_v25 = vld [vmem:[%s1811_s26 + $0x308] sm:$0xff] }
  0x1e   : > { %v240_v26 = vld [vmem:[%s1811_s26 + $0x340] sm:$0xff]  ;;  %237 = vst [vmem:[%s1816_s27 + $0xc0] sm:$0xff] %v236_v24  ;;  %239 = vst [vmem:[%s1816_s27 + $0xc8] sm:$0xff] %v238_v25  ;;  %v242_v27 = vld [vmem:[%s1811_s26 + $0x348] sm:$0xff] }
  0x1f   : > { %241 = vst [vmem:[%s1816_s27 + $0xd0] sm:$0xff] %v240_v26  ;;  %v244_v28 = vld [vmem:[%s1811_s26 + $0x380] sm:$0xff]  ;;  %v246_v29 = vld [vmem:[%s1811_s26 + $0x388] sm:$0xff]  ;;  %243 = vst [vmem:[%s1816_s27 + $0xd8] sm:$0xff] %v242_v27 }
  0x20   : > { %245 = vst [vmem:[%s1816_s27 + $0xe0] sm:$0xff] %v244_v28  ;;  %247 = vst [vmem:[%s1816_s27 + $0xe8] sm:$0xff] %v246_v29  ;;  %v248_v30 = vld [vmem:[%s1811_s26 + $0x3c0] sm:$0xff]  ;;  %v250_v31 = vld [vmem:[%s1811_s26 + $0x3c8] sm:$0xff] }
  0x21   : > { %249 = vst [vmem:[%s1816_s27 + $0xf0] sm:$0xff] %v248_v30  ;;  %251 = vst [vmem:[%s1816_s27 + $0xf8] sm:$0xff] %v250_v31 }
  0x22 PF: > { %p1303_p6 = scmp.ge.s32.totalorder %s1745_s16, 1  ;;  %p268_p7 = scmp.lt.s32.totalorder %s1745_s16, 5 }
  0x24   : > { %p269_p8 = pnand %p1303_p6, %p268_p7 }
  0x25   : > { %s275_s28 = sand.u32 (!%p269_p8), 1, %s1729_s12   ;;  %s1305_s29 = sshll.u32 (!%p269_p8), %s1737_s14, 6 }
  0x26   : > { %272 = sbr.rel (%p269_p8) target bundleno = 382 (0x17e), region = 51  ;;  %s1304_s30 = sshll.u32 (!%p269_p8), %s275_s28, 8 }
  0x27   : > { %p315_p9 = scmp.lt.s32.totalorder (!%p269_p8), %s1305_s29, 255  ;;  %s1888_s8 = scalar_lea.vmem (!%p269_p8), [#allocation3], %s1304_s30 }
  0x28   : > { %p1307_p10 = scmp.ne.s32.totalorder (!%p269_p8), %s1737_s14, 0 }
  0x2d   : > { %s2009_s29 = smov (!%p315_p9, %s1305_s29), 255  ;;  %339 = sbr.rel (%p1307_p10) target bundleno = 55 (0x37), region = 59 }
  0x2e   : > { %s1306_s4 = sshll.u32 %s2009_s29, 2  ;;  %v1747_v32 = vmov (!%p1307_p10), 0.0  }
  0x2f   : > { %s1886_s7 = scalar_lea.vmem %s1999_s1, %s1306_s4  ;;  %340 = vst [vmem:[#allocation2] sm:$0xff] (!%p1307_p10), %v1747_v32  ;;  %341 = vst [vmem:[#allocation2 + $0x8] sm:$0xff] (!%p1307_p10), %v1747_v32 }
  0x30   : > { %342 = vst [vmem:[#allocation2 + $0x10] sm:$0xff] (!%p1307_p10), %v1747_v32  ;;  %343 = vst [vmem:[#allocation2 + $0x18] sm:$0xff] (!%p1307_p10), %v1747_v32 }
  0x31   : > { %344 = vst [vmem:[#allocation2 + $0x20] sm:$0xff] (!%p1307_p10), %v1747_v32  ;;  %345 = vst [vmem:[#allocation2 + $0x28] sm:$0xff] (!%p1307_p10), %v1747_v32 }
  0x32   : > { %346 = vst [vmem:[#allocation2 + $0x30] sm:$0xff] (!%p1307_p10), %v1747_v32  ;;  %347 = vst [vmem:[#allocation2 + $0x38] sm:$0xff] (!%p1307_p10), %v1747_v32 }
  0x33   : > { %348 = vst [vmem:[#allocation2 + $0x40] sm:$0xff] (!%p1307_p10), %v1747_v32  ;;  %349 = vst [vmem:[#allocation2 + $0x48] sm:$0xff] (!%p1307_p10), %v1747_v32 }
  0x34   : > { %350 = vst [vmem:[#allocation2 + $0x50] sm:$0xff] %v1747_v32  ;;  %351 = vst [vmem:[#allocation2 + $0x58] sm:$0xff] %v1747_v32 }
  0x35   : > { %352 = vst [vmem:[#allocation2 + $0x60] sm:$0xff] %v1747_v32  ;;  %353 = vst [vmem:[#allocation2 + $0x68] sm:$0xff] %v1747_v32 }
  0x36   : > { %354 = vst [vmem:[#allocation2 + $0x70] sm:$0xff] %v1747_v32  ;;  %355 = vst [vmem:[#allocation2 + $0x78] sm:$0xff] %v1747_v32 }
  0x37 PF: > { %v1627_v33 = vld [vmem:[%s1886_s7 + $0x40] sm:$0xff]   ;;  %v1631_v37 = vld [vmem:[%s1886_s7 + $0x48] sm:$0xff]   ;;  %v1635_v41 = vld [vmem:[%s1886_s7 + $0x50] sm:$0xff]   ;;  %p1372_p11 = scmp.ne.s32.totalorder %s1737_s14, 3 }
  0x38   : > { %v1628_v34 = vld [vmem:[%s1886_s7 + $0xc0] sm:$0xff]   ;;  %1458 = vmatprep.subr.bf16.mxu0 %v1627_v33  ;;  %v1632_v38 = vld [vmem:[%s1886_s7 + $0xc8] sm:$0xff]   ;;  %v1636_v42 = vld [vmem:[%s1886_s7 + $0xd0] sm:$0xff]  }
  0x39   : > { %v1629_v35 = vld [vmem:[%s1886_s7] sm:$0xff]   ;;  %1522 = vmatprep.subr.bf16.mxu1 %v1628_v34  ;;  %v1633_v39 = vld [vmem:[%s1886_s7 + $0x8] sm:$0xff]   ;;  %v1637_v43 = vld [vmem:[%s1886_s7 + $0x10] sm:$0xff]  }
  0x3a   : > { %v1630_v36 = vld [vmem:[%s1886_s7 + $0x80] sm:$0xff]   ;;  %1459 = vmatpush3.bf16.msra.mxu0 %v1629_v35  ;;  %v1634_v40 = vld [vmem:[%s1886_s7 + $0x88] sm:$0xff]   ;;  %v1638_v44 = vld [vmem:[%s1886_s7 + $0x90] sm:$0xff]  }
  0x3b   : > { %1523 = vmatpush3.bf16.msra.mxu1 %v1630_v36  ;;  %1460 = vmatprep.subr.bf16.mxu0 %v1631_v37  ;;  %v1639_v45 = vld [vmem:[%s1886_s7 + $0x58] sm:$0xff]   ;;  %v1643_v49 = vld [vmem:[%s1886_s7 + $0x60] sm:$0xff]   ;;  %v1647_v53 = vld [vmem:[%s1886_s7 + $0x68] sm:$0xff]  }
  0x3c   : > { %1524 = vmatprep.subr.bf16.mxu1 %v1632_v38  ;;  %v1640_v46 = vld [vmem:[%s1886_s7 + $0xd8] sm:$0xff]   ;;  %v1644_v50 = vld [vmem:[%s1886_s7 + $0xe0] sm:$0xff]   ;;  %v1648_v54 = vld [vmem:[%s1886_s7 + $0xe8] sm:$0xff]  }
  0x3d   : > { %v1641_v47 = vld [vmem:[%s1886_s7 + $0x18] sm:$0xff]   ;;  %v1645_v51 = vld [vmem:[%s1886_s7 + $0x20] sm:$0xff]   ;;  %v1649_v55 = vld [vmem:[%s1886_s7 + $0x28] sm:$0xff]  }
  0x3e   : > { %1461 = vmatpush3.bf16.msra.mxu0 %v1633_v39  ;;  %v1642_v48 = vld [vmem:[%s1886_s7 + $0x98] sm:$0xff]   ;;  %v1646_v52 = vld [vmem:[%s1886_s7 + $0xa0] sm:$0xff]   ;;  %v1650_v56 = vld [vmem:[%s1886_s7 + $0xa8] sm:$0xff]  }
  0x3f   : > { %1525 = vmatpush3.bf16.msra.mxu1 %v1634_v40  ;;  %1462 = vmatprep.subr.bf16.mxu0 %v1635_v41  ;;  %v1651_v57 = vld [vmem:[%s1886_s7 + $0x70] sm:$0xff]   ;;  %v1655_v61 = vld [vmem:[%s1886_s7 + $0x78] sm:$0xff]  }
  0x40   : > { %1526 = vmatprep.subr.bf16.mxu1 %v1636_v42  ;;  %v1652_v58 = vld [vmem:[%s1886_s7 + $0xf0] sm:$0xff]   ;;  %v1656_v62 = vld [vmem:[%s1886_s7 + $0xf8] sm:$0xff]   ;;  %v356_v42 = vld [vmem:[#allocation2] sm:$0xff] }
  0x41   : > { %v1653_v59 = vld [vmem:[%s1886_s7 + $0x30] sm:$0xff]   ;;  %v1657_v63 = vld [vmem:[%s1886_s7 + $0x38] sm:$0xff]  }
  0x42   : > { %1463 = vmatpush3.bf16.msra.mxu0 %v1637_v43  ;;  %v1654_v60 = vld [vmem:[%s1886_s7 + $0xb0] sm:$0xff]   ;;  %v1658_v0 = vld [vmem:[%s1886_s7 + $0xb8] sm:$0xff]  }
  0x43   : > { %1527 = vmatpush3.bf16.msra.mxu1 %v1638_v44  ;;  %1464 = vmatprep.subr.bf16.mxu0 %v1639_v45  ;;  %v1659_v1 = vld [vmem:[%s1888_s8] ss:$16 sps:$4 sm:$0xff]   ;;  %v1661_v2 = vld [vmem:[%s1888_s8 + $0x4] ss:$16 sps:$4 sm:$0xff]   ;;  %v1662_v3 = vld [vmem:[%s1888_s8 + $0x8] ss:$16 sps:$4 sm:$0xff]  }
  0x44   : > { %1528 = vmatprep.subr.bf16.mxu1 %v1640_v46  ;;  %v1664_v4 = vld [vmem:[%s1888_s8 + $0xc] ss:$16 sps:$4 sm:$0xff]   ;;  %852 = vmatprep.mubr.bf16.mxu0 %v1661_v2  ;;  %v1665_v5 = vld [vmem:[%s1888_s8 + $0x24] ss:$16 sps:$4 sm:$0xff]   ;;  %v1669_v7 = vld [vmem:[%s1888_s8 + $0x20] ss:$16 sps:$4 sm:$0xff]  }
  0x45   : > { %949 = vmatprep.mubr.bf16.mxu1 %v1664_v4  ;;  %v1667_v6 = vld [vmem:[%s1888_s8 + $0x2c] ss:$16 sps:$4 sm:$0xff]   ;;  %v1670_v8 = vld [vmem:[%s1888_s8 + $0x28] ss:$16 sps:$4 sm:$0xff]   ;;  %v1671_v9 = vld [vmem:[%s1888_s8 + $0x44] ss:$16 sps:$4 sm:$0xff]  }
  0x46   : > { %1465 = vmatpush3.bf16.msra.mxu0 %v1641_v47  ;;  %v1673_v10 = vld [vmem:[%s1888_s8 + $0x4c] ss:$16 sps:$4 sm:$0xff]   ;;  %v1675_v11 = vld [vmem:[%s1888_s8 + $0x40] ss:$16 sps:$4 sm:$0xff]   ;;  %v1676_v12 = vld [vmem:[%s1888_s8 + $0x48] ss:$16 sps:$4 sm:$0xff]  }
  0x47   : > { %1529 = vmatpush3.bf16.msra.mxu1 %v1642_v48  ;;  %1466 = vmatprep.subr.bf16.mxu0 %v1643_v49  ;;  %v1677_v13 = vld [vmem:[%s1888_s8 + $0x64] ss:$16 sps:$4 sm:$0xff]   ;;  %v1679_v14 = vld [vmem:[%s1888_s8 + $0x6c] ss:$16 sps:$4 sm:$0xff]   ;;  %v1681_v15 = vld [vmem:[%s1888_s8 + $0x60] ss:$16 sps:$4 sm:$0xff]  }
  0x48   : > { %1530 = vmatprep.subr.bf16.mxu1 %v1644_v50  ;;  %v1682_v16 = vld [vmem:[%s1888_s8 + $0x68] ss:$16 sps:$4 sm:$0xff]   ;;  %v1683_v17 = vld [vmem:[%s1888_s8 + $0x84] ss:$16 sps:$4 sm:$0xff]   ;;  %v1685_v18 = vld [vmem:[%s1888_s8 + $0x8c] ss:$16 sps:$4 sm:$0xff]  }
  0x49   : > { %v1687_v19 = vld [vmem:[%s1888_s8 + $0x80] ss:$16 sps:$4 sm:$0xff]   ;;  %v1688_v20 = vld [vmem:[%s1888_s8 + $0x88] ss:$16 sps:$4 sm:$0xff]   ;;  %v1689_v21 = vld [vmem:[%s1888_s8 + $0xa4] ss:$16 sps:$4 sm:$0xff]  }
  0x4a   : > { %1467 = vmatpush3.bf16.msra.mxu0 %v1645_v51  ;;  %v1691_v22 = vld [vmem:[%s1888_s8 + $0xac] ss:$16 sps:$4 sm:$0xff]   ;;  %v1693_v23 = vld [vmem:[%s1888_s8 + $0xa0] ss:$16 sps:$4 sm:$0xff]   ;;  %v1694_v24 = vld [vmem:[%s1888_s8 + $0xa8] ss:$16 sps:$4 sm:$0xff]  }
  0x4b   : > { %1531 = vmatpush3.bf16.msra.mxu1 %v1646_v52  ;;  %1468 = vmatprep.subr.bf16.mxu0 %v1647_v53  ;;  %v1695_v25 = vld [vmem:[%s1888_s8 + $0xc4] ss:$16 sps:$4 sm:$0xff]   ;;  %v1697_v26 = vld [vmem:[%s1888_s8 + $0xcc] ss:$16 sps:$4 sm:$0xff]   ;;  %v1699_v27 = vld [vmem:[%s1888_s8 + $0xc0] ss:$16 sps:$4 sm:$0xff]  }
  0x4c   : > { %1532 = vmatprep.subr.bf16.mxu1 %v1648_v54  ;;  %v1700_v28 = vld [vmem:[%s1888_s8 + $0xc8] ss:$16 sps:$4 sm:$0xff]   ;;  %v1701_v29 = vld [vmem:[%s1888_s8 + $0xe4] ss:$16 sps:$4 sm:$0xff]   ;;  %v1703_v30 = vld [vmem:[%s1888_s8 + $0xec] ss:$16 sps:$4 sm:$0xff]  }
  0x4d   : > { %v1705_v31 = vld [vmem:[%s1888_s8 + $0xe0] ss:$16 sps:$4 sm:$0xff]   ;;  %v1706_v32 = vld [vmem:[%s1888_s8 + $0xe8] ss:$16 sps:$4 sm:$0xff]  }
  0x4e   : > { %1469 = vmatpush3.bf16.msra.mxu0 %v1649_v55  ;;  %v357_v47 = vld [vmem:[#allocation2 + $0x8] sm:$0xff] }
  0x4f   : > { %1533 = vmatpush3.bf16.msra.mxu1 %v1650_v56  ;;  %1470 = vmatprep.subr.bf16.mxu0 %v1651_v57 }
  0x50   : > { %1534 = vmatprep.subr.bf16.mxu1 %v1652_v58 }
  0x52   : > { %1471 = vmatpush3.bf16.msra.mxu0 %v1653_v59 }
  0x53   : > { %1535 = vmatpush3.bf16.msra.mxu1 %v1654_v60  ;;  %1472 = vmatprep.subr.bf16.mxu0 %v1655_v61  ;;  %v358_v60 = vld [vmem:[#allocation2 + $0x10] sm:$0xff] }
  0x54   : > { %1536 = vmatprep.subr.bf16.mxu1 %v1656_v62 }
  0x56   : > { %1473 = vmatpush3.bf16.msra.mxu0 %v1657_v63 }
  0x57   : > { %1537 = vmatpush3.bf16.msra.mxu1 %v1658_v0 }
  0x59   : > { %853 = vmatmul.mubr.bf16.vlgmr.msra.gmra.mrb[0].mxu0 %v1659_v1  ;;  %v359_v1 = vld [vmem:[#allocation2 + $0x18] sm:$0xff] }
  0x5a   : > { %950 = vmatmul.mubr.bf16.vlgmr.msra.gmra.mrb[0].mxu1 %v1662_v3  ;;  %860 = vmatprep.mubr.bf16.mxu0 %v1665_v5 }
  0x5b   : > { %957 = vmatprep.mubr.bf16.mxu1 %v1667_v6 }
  0x61   : > { %861 = vmatmul.mubr.bf16.gmra.mrb[4].mxu0 %v1669_v7 }
  0x62   : > { %958 = vmatmul.mubr.bf16.gmra.mrb[4].mxu1 %v1670_v8  ;;  %868 = vmatprep.mubr.bf16.mxu0 %v1671_v9 }
  0x63   : > { %965 = vmatprep.mubr.bf16.mxu1 %v1673_v10 }
  0x69   : > { %869 = vmatmul.mubr.bf16.gmra.mrb[8].mxu0 %v1675_v11 }
  0x6a   : > { %966 = vmatmul.mubr.bf16.gmra.mrb[8].mxu1 %v1676_v12  ;;  %876 = vmatprep.mubr.bf16.mxu0 %v1677_v13 }
  0x6b   : > { %973 = vmatprep.mubr.bf16.mxu1 %v1679_v14  ;;  %v360_v14 = vld [vmem:[#allocation2 + $0x20] sm:$0xff] }
  0x71   : > { %877 = vmatmul.mubr.bf16.gmra.mrb[12].mxu0 %v1681_v15 }
  0x72   : > { %974 = vmatmul.mubr.bf16.gmra.mrb[12].mxu1 %v1682_v16  ;;  %884 = vmatprep.mubr.bf16.mxu0 %v1683_v17 }
  0x73   : > { %981 = vmatprep.mubr.bf16.mxu1 %v1685_v18 }
  0x79   : > { %885 = vmatmul.mubr.bf16.gmra.mrb[16].mxu0 %v1687_v19  ;;  %v361_v19 = vld [vmem:[#allocation2 + $0x28] sm:$0xff] }
  0x7a   : > { %982 = vmatmul.mubr.bf16.gmra.mrb[16].mxu1 %v1688_v20  ;;  %892 = vmatprep.mubr.bf16.mxu0 %v1689_v21 }
  0x7b   : > { %989 = vmatprep.mubr.bf16.mxu1 %v1691_v22 }
  0x81   : > { %893 = vmatmul.mubr.bf16.gmra.mrb[20].mxu0 %v1693_v23 }
  0x82   : > { %990 = vmatmul.mubr.bf16.gmra.mrb[20].mxu1 %v1694_v24  ;;  %900 = vmatprep.mubr.bf16.mxu0 %v1695_v25 }
  0x83   : > { %997 = vmatprep.mubr.bf16.mxu1 %v1697_v26 }
  0x89   : > { %901 = vmatmul.mubr.bf16.gmra.mrb[24].mxu0 %v1699_v27 }
  0x8a   : > { %998 = vmatmul.mubr.bf16.gmra.mrb[24].mxu1 %v1700_v28  ;;  %908 = vmatprep.mubr.bf16.mxu0 %v1701_v29 }
  0x8b   : > { %1005 = vmatprep.mubr.bf16.mxu1 %v1703_v30 }
  0x91   : > { %909 = vmatmul.mubr.bf16.gmra.mrb[28].mxu0 %v1705_v31 }
  0x92   : > { %1006 = vmatmul.mubr.bf16.gmra.mrb[28].mxu1 %v1706_v32  ;;  %v362_v32 = vld [vmem:[#allocation2 + $0x30] sm:$0xff] }
 0x12c   : > { %v1474_v33 = vpop.f32.mrb[0].mxu0 }
 0x12d   : > { %v1538_v34 = vpop.f32.mrb[0].mxu1  ;;  %v1475_v35 = vpop.f32.mrb[1].mxu0 }
 0x12e   : > { %v1476_v36 = vadd.f32 %v1475_v35, %v1474_v33  ;;  %v1539_v37 = vpop.f32.mrb[1].mxu1  ;;  %v1477_v38 = vpop.f32.mrb[2].mxu0 }
 0x12f   : > { %v1540_v39 = vadd.f32 %v1539_v37, %v1538_v34  ;;  %v1541_v40 = vpop.f32.mrb[2].mxu1  ;;  %v1478_v41 = vpop.f32.mrb[3].mxu0  ;;  %v363_v37 = vld [vmem:[#allocation2 + $0x38] sm:$0xff] }
 0x130   : > { %v1479_v43 = vadd.f32 %v1478_v41, %v1477_v38  ;;  %v1542_v44 = vpop.f32.mrb[3].mxu1 }
 0x131   : > { %v952_v45 = vadd.f32 %v1540_v39, %v1476_v36  ;;  %v1543_v46 = vadd.f32 %v1542_v44, %v1541_v40 }
 0x133   : > { %v1014_v48 = vadd.f32 %v952_v45, %v356_v42  ;;  %v955_v49 = vadd.f32 %v1543_v46, %v1479_v43 }
 0x134   : > { %v1480_v50 = vpop.f32.mrb[4].mxu0 }
 0x135   : > { %1030 = vst [vmem:[#allocation2] sm:$0xff] %v1014_v48  ;;  %v1015_v51 = vadd.f32 %v955_v49, %v357_v47  ;;  %v1544_v52 = vpop.f32.mrb[4].mxu1  ;;  %v1481_v53 = vpop.f32.mrb[5].mxu0 }
 0x136   : > { %v1482_v54 = vadd.f32 %v1481_v53, %v1480_v50  ;;  %v1545_v55 = vpop.f32.mrb[5].mxu1  ;;  %v1483_v56 = vpop.f32.mrb[6].mxu0  ;;  %v364_v50 = vld [vmem:[#allocation2 + $0x40] sm:$0xff] }
 0x137   : > { %1031 = vst [vmem:[#allocation2 + $0x8] sm:$0xff] %v1015_v51  ;;  %v1546_v57 = vadd.f32 %v1545_v55, %v1544_v52  ;;  %v1547_v58 = vpop.f32.mrb[6].mxu1  ;;  %v1484_v59 = vpop.f32.mrb[7].mxu0  ;;  %v365_v55 = vld [vmem:[#allocation2 + $0x48] sm:$0xff] }
 0x138   : > { %v1485_v61 = vadd.f32 %v1484_v59, %v1483_v56  ;;  %v1548_v62 = vpop.f32.mrb[7].mxu1 }
 0x139   : > { %v960_v63 = vadd.f32 %v1546_v57, %v1482_v54  ;;  %v1549_v0 = vadd.f32 %v1548_v62, %v1547_v58 }
 0x13b   : > { %v1016_v2 = vadd.f32 %v960_v63, %v358_v60  ;;  %v963_v3 = vadd.f32 %v1549_v0, %v1485_v61 }
 0x13c   : > { %v1486_v4 = vpop.f32.mrb[8].mxu0 }
 0x13d   : > { %1032 = vst [vmem:[#allocation2 + $0x10] sm:$0xff] %v1016_v2  ;;  %v1017_v5 = vadd.f32 %v963_v3, %v359_v1  ;;  %v1550_v6 = vpop.f32.mrb[8].mxu1  ;;  %v1487_v7 = vpop.f32.mrb[9].mxu0 }
 0x13e   : > { %v1488_v8 = vadd.f32 %v1487_v7, %v1486_v4  ;;  %v1551_v9 = vpop.f32.mrb[9].mxu1  ;;  %v1489_v10 = vpop.f32.mrb[10].mxu0  ;;  %v366_v4 = vld [vmem:[#allocation2 + $0x50] sm:$0xff] }
 0x13f   : > { %1033 = vst [vmem:[#allocation2 + $0x18] sm:$0xff] %v1017_v5  ;;  %v1552_v11 = vadd.f32 %v1551_v9, %v1550_v6  ;;  %v1553_v12 = vpop.f32.mrb[10].mxu1  ;;  %v1490_v13 = vpop.f32.mrb[11].mxu0  ;;  %v367_v9 = vld [vmem:[#allocation2 + $0x58] sm:$0xff] }
 0x140   : > { %v1491_v15 = vadd.f32 %v1490_v13, %v1489_v10  ;;  %v1554_v16 = vpop.f32.mrb[11].mxu1 }
 0x141   : > { %v968_v17 = vadd.f32 %v1552_v11, %v1488_v8  ;;  %v1555_v18 = vadd.f32 %v1554_v16, %v1553_v12 }
 0x143   : > { %v1018_v20 = vadd.f32 %v968_v17, %v360_v14  ;;  %v971_v21 = vadd.f32 %v1555_v18, %v1491_v15 }
 0x144   : > { %v1492_v22 = vpop.f32.mrb[12].mxu0 }
 0x145   : > { %1034 = vst [vmem:[#allocation2 + $0x20] sm:$0xff] %v1018_v20  ;;  %v1019_v23 = vadd.f32 %v971_v21, %v361_v19  ;;  %v1556_v24 = vpop.f32.mrb[12].mxu1  ;;  %v1493_v25 = vpop.f32.mrb[13].mxu0 }
 0x146   : > { %v1494_v26 = vadd.f32 %v1493_v25, %v1492_v22  ;;  %v1557_v27 = vpop.f32.mrb[13].mxu1  ;;  %v1495_v28 = vpop.f32.mrb[14].mxu0  ;;  %v368_v22 = vld [vmem:[#allocation2 + $0x60] sm:$0xff] }
 0x147   : > { %1035 = vst [vmem:[#allocation2 + $0x28] sm:$0xff] %v1019_v23  ;;  %v1558_v29 = vadd.f32 %v1557_v27, %v1556_v24  ;;  %v1559_v30 = vpop.f32.mrb[14].mxu1  ;;  %v1496_v31 = vpop.f32.mrb[15].mxu0  ;;  %v369_v27 = vld [vmem:[#allocation2 + $0x68] sm:$0xff] }
 0x148   : > { %v1497_v33 = vadd.f32 %v1496_v31, %v1495_v28  ;;  %v1560_v34 = vpop.f32.mrb[15].mxu1 }
 0x149   : > { %v976_v35 = vadd.f32 %v1558_v29, %v1494_v26  ;;  %v1561_v36 = vadd.f32 %v1560_v34, %v1559_v30 }
 0x14b   : > { %v1020_v38 = vadd.f32 %v976_v35, %v362_v32  ;;  %v979_v39 = vadd.f32 %v1561_v36, %v1497_v33 }
 0x14c   : > { %v1498_v40 = vpop.f32.mrb[16].mxu0 }
 0x14d   : > { %1036 = vst [vmem:[#allocation2 + $0x30] sm:$0xff] %v1020_v38  ;;  %v1021_v41 = vadd.f32 %v979_v39, %v363_v37  ;;  %v1562_v42 = vpop.f32.mrb[16].mxu1  ;;  %v1499_v43 = vpop.f32.mrb[17].mxu0 }
 0x14e   : > { %v1500_v44 = vadd.f32 %v1499_v43, %v1498_v40  ;;  %v1563_v45 = vpop.f32.mrb[17].mxu1  ;;  %v1501_v46 = vpop.f32.mrb[18].mxu0  ;;  %v370_v40 = vld [vmem:[#allocation2 + $0x70] sm:$0xff] }
 0x14f   : > { %1037 = vst [vmem:[#allocation2 + $0x38] sm:$0xff] %v1021_v41  ;;  %v1564_v47 = vadd.f32 %v1563_v45, %v1562_v42  ;;  %v1565_v48 = vpop.f32.mrb[18].mxu1  ;;  %v1502_v49 = vpop.f32.mrb[19].mxu0  ;;  %v371_v45 = vld [vmem:[#allocation2 + $0x78] sm:$0xff] }
 0x150   : > { %v1503_v51 = vadd.f32 %v1502_v49, %v1501_v46  ;;  %v1566_v52 = vpop.f32.mrb[19].mxu1  ;;  %v1050_v49 = vld [vmem:[#allocation2] sm:$0xff] (!%p1372_p11) }
 0x151   : > { %v984_v53 = vadd.f32 %v1564_v47, %v1500_v44  ;;  %v1567_v54 = vadd.f32 %v1566_v52, %v1565_v48 }
 0x153   : > { %v1022_v56 = vadd.f32 %v984_v53, %v364_v50  ;;  %v987_v57 = vadd.f32 %v1567_v54, %v1503_v51  ;;  %v1051_v50 = vld [vmem:[#allocation2 + $0x8] sm:$0xff] (!%p1372_p11)  ;;  %v1373_v51 = vld [vmem:[%s2000_s2] ss:$0 sm:$0xff] (!%p1372_p11)  ;;  %v1052_v54 = vld [vmem:[#allocation2 + $0x10] sm:$0xff] (!%p1372_p11) }
 0x154   : > { %v1504_v58 = vpop.f32.mrb[20].mxu0  ;;  %v1073_v52 = vadd.f32 (!%p1372_p11), %v1373_v51, %v1050_v49  ;;  %v1074_v53 = vadd.f32 (!%p1372_p11), %v1373_v51, %v1051_v50 }
 0x155   : > { %1038 = vst [vmem:[#allocation2 + $0x40] sm:$0xff] %v1022_v56  ;;  %v1023_v59 = vadd.f32 %v987_v57, %v365_v55  ;;  %v1568_v60 = vpop.f32.mrb[20].mxu1  ;;  %v1505_v61 = vpop.f32.mrb[21].mxu0  ;;  %v1053_v55 = vld [vmem:[#allocation2 + $0x18] sm:$0xff] (!%p1372_p11)  ;;  %v1054_v56 = vld [vmem:[#allocation2 + $0x20] sm:$0xff] (!%p1372_p11)  ;;  %v1075_v57 = vadd.f32 (!%p1372_p11), %v1373_v51, %v1052_v54 }
 0x156   : > { %v1506_v62 = vadd.f32 %v1505_v61, %v1504_v58  ;;  %v1569_v63 = vpop.f32.mrb[21].mxu1  ;;  %v1507_v0 = vpop.f32.mrb[22].mxu0  ;;  %v1076_v58 = vadd.f32 (!%p1372_p11), %v1373_v51, %v1053_v55  ;;  %v1056_v61 = vld [vmem:[#allocation2 + $0x30] sm:$0xff] (!%p1372_p11) }
 0x157   : > { %1039 = vst [vmem:[#allocation2 + $0x48] sm:$0xff] %v1023_v59  ;;  %v1570_v1 = vadd.f32 %v1569_v63, %v1568_v60  ;;  %v1571_v2 = vpop.f32.mrb[22].mxu1  ;;  %v1508_v3 = vpop.f32.mrb[23].mxu0  ;;  %v1055_v59 = vld [vmem:[#allocation2 + $0x28] sm:$0xff] (!%p1372_p11)  ;;  %v1077_v60 = vadd.f32 (!%p1372_p11), %v1373_v51, %v1054_v56  ;;  %v1089_v63 = vmax.f32 (!%p1372_p11), %v1073_v52, 0.0 }
 0x158   : > { %v1509_v5 = vadd.f32 %v1508_v3, %v1507_v0  ;;  %v1572_v6 = vpop.f32.mrb[23].mxu1  ;;  %v1090_v0 = vmax.f32 (!%p1372_p11), %v1074_v53, 0.0 }
 0x159   : > { %v992_v7 = vadd.f32 %v1570_v1, %v1506_v62  ;;  %v1573_v8 = vadd.f32 %v1572_v6, %v1571_v2  ;;  %v1057_v62 = vld [vmem:[#allocation2 + $0x38] sm:$0xff] (!%p1372_p11)  ;;  %v1078_v1 = vadd.f32 (!%p1372_p11), %v1373_v51, %v1055_v59  ;;  %v1079_v2 = vadd.f32 (!%p1372_p11), %v1373_v51, %v1056_v61 }
 0x15a   : > { %v1091_v6 = vmax.f32 (!%p1372_p11), %v1075_v57, 0.0 }
 0x15b   : > { %v1024_v10 = vadd.f32 %v992_v7, %v366_v4  ;;  %v995_v11 = vadd.f32 %v1573_v8, %v1509_v5  ;;  %v1092_v7 = vmax.f32 (!%p1372_p11), %v1076_v58, 0.0  ;;  %v1093_v8 = vmax.f32 (!%p1372_p11), %v1077_v60, 0.0 }
 0x15c   : > { %v1510_v12 = vpop.f32.mrb[24].mxu0  ;;  %v1058_v3 = vld [vmem:[#allocation2 + $0x40] sm:$0xff] (!%p1372_p11) }
 0x15d   : > { %1040 = vst [vmem:[#allocation2 + $0x50] sm:$0xff] %v1024_v10  ;;  %v1025_v13 = vadd.f32 %v995_v11, %v367_v9  ;;  %v1574_v14 = vpop.f32.mrb[24].mxu1  ;;  %v1511_v15 = vpop.f32.mrb[25].mxu0  ;;  %v1080_v9 = vadd.f32 (!%p1372_p11), %v1373_v51, %v1057_v62 }
 0x15e   : > { %v1512_v16 = vadd.f32 %v1511_v15, %v1510_v12  ;;  %v1575_v17 = vpop.f32.mrb[25].mxu1  ;;  %v1513_v18 = vpop.f32.mrb[26].mxu0  ;;  %v1059_v4 = vld [vmem:[#allocation2 + $0x48] sm:$0xff] (!%p1372_p11)  ;;  %v1414_v12 = vpack.c.bf16 (!%p1372_p11), %v1090_v0, %v1089_v63  ;;  %v1081_v15 = vadd.f32 (!%p1372_p11), %v1373_v51, %v1058_v3 }
 0x15f   : > { %1041 = vst [vmem:[#allocation2 + $0x58] sm:$0xff] %v1025_v13  ;;  %v1576_v19 = vadd.f32 %v1575_v17, %v1574_v14  ;;  %v1577_v20 = vpop.f32.mrb[26].mxu1  ;;  %v1514_v21 = vpop.f32.mrb[27].mxu0  ;;  %v1094_v13 = vmax.f32 (!%p1372_p11), %v1078_v1, 0.0  ;;  %v1095_v14 = vmax.f32 (!%p1372_p11), %v1079_v2, 0.0  ;;  %v1419_v17 = vpack.c.bf16 (!%p1372_p11), %v1092_v7, %v1091_v6 }
 0x160   : > { %v1515_v23 = vadd.f32 %v1514_v21, %v1513_v18  ;;  %v1578_v24 = vpop.f32.mrb[27].mxu1  ;;  %v1096_v18 = vmax.f32 (!%p1372_p11), %v1080_v9, 0.0  ;;  %1415 = vst [vmem:[%s2001_s3] sm:$0xff] (!%p1372_p11), %v1414_v12  }
 0x161   : > { %v1000_v25 = vadd.f32 %v1576_v19, %v1512_v16  ;;  %v1579_v26 = vadd.f32 %v1578_v24, %v1577_v20  ;;  %v1082_v19 = vadd.f32 (!%p1372_p11), %v1373_v51, %v1059_v4  ;;  %v1097_v24 = vmax.f32 (!%p1372_p11), %v1081_v15, 0.0  ;;  %1451 = vst [vmem:[%s2001_s3 + $0x8] sm:$0xff] (!%p1372_p11), %v1419_v17  }
 0x163   : > { %v1026_v28 = vadd.f32 %v1000_v25, %v368_v22  ;;  %v1003_v29 = vadd.f32 %v1579_v26, %v1515_v23  ;;  %v1424_v23 = vpack.c.bf16 (!%p1372_p11), %v1094_v13, %v1093_v8 }
 0x164   : > { %v1516_v30 = vpop.f32.mrb[28].mxu0  ;;  %v1060_v5 = vld [vmem:[#allocation2 + $0x50] sm:$0xff] (!%p1372_p11) }
 0x165   : > { %1042 = vst [vmem:[#allocation2 + $0x60] sm:$0xff] %v1026_v28  ;;  %v1027_v31 = vadd.f32 %v1003_v29, %v369_v27  ;;  %v1580_v32 = vpop.f32.mrb[28].mxu1  ;;  %v1517_v33 = vpop.f32.mrb[29].mxu0  ;;  %v1083_v20 = vadd.f32 (!%p1372_p11), %v1373_v51, %v1060_v5  ;;  %v1429_v27 = vpack.c.bf16 (!%p1372_p11), %v1096_v18, %v1095_v14  ;;  %v1098_v28 = vmax.f32 (!%p1372_p11), %v1082_v19, 0.0  ;;  %1452 = vst [vmem:[%s2001_s3 + $0x10] sm:$0xff] (!%p1372_p11), %v1424_v23  }
 0x166   : > { %v1518_v34 = vadd.f32 %v1517_v33, %v1516_v30  ;;  %v1581_v35 = vpop.f32.mrb[29].mxu1  ;;  %v1519_v36 = vpop.f32.mrb[30].mxu0  ;;  %v1061_v10 = vld [vmem:[#allocation2 + $0x58] sm:$0xff] (!%p1372_p11) }
 0x167   : > { %1043 = vst [vmem:[#allocation2 + $0x68] sm:$0xff] %v1027_v31  ;;  %v1582_v37 = vadd.f32 %v1581_v35, %v1580_v32  ;;  %v1583_v38 = vpop.f32.mrb[30].mxu1  ;;  %v1520_v39 = vpop.f32.mrb[31].mxu0  ;;  %v1084_v25 = vadd.f32 (!%p1372_p11), %v1373_v51, %v1061_v10  ;;  %v1099_v29 = vmax.f32 (!%p1372_p11), %v1083_v20, 0.0  ;;  %1453 = vst [vmem:[%s2001_s3 + $0x18] sm:$0xff] (!%p1372_p11), %v1429_v27   ;;  %v1434_v35 = vpack.c.bf16 (!%p1372_p11), %v1098_v28, %v1097_v24 }
 0x168   : > { %v1521_v41 = vadd.f32 %v1520_v39, %v1519_v36  ;;  %v1584_v42 = vpop.f32.mrb[31].mxu1 }
 0x169   : > { %v1008_v43 = vadd.f32 %v1582_v37, %v1518_v34  ;;  %v1585_v44 = vadd.f32 %v1584_v42, %v1583_v38  ;;  %1049 = sbr.rel (%p1372_p11) target bundleno = 382 (0x17e), region = 63  ;;  %v1100_v31 = vmax.f32 (!%p1372_p11), %v1084_v25, 0.0  ;;  %1454 = vst [vmem:[%s2001_s3 + $0x20] sm:$0xff] (!%p1372_p11), %v1434_v35  }
 0x16b   : > { %v1028_v46 = vadd.f32 %v1008_v43, %v370_v40  ;;  %v1011_v47 = vadd.f32 %v1585_v44, %v1521_v41  ;;  %v1439_v37 = vpack.c.bf16 (!%p1372_p11), %v1100_v31, %v1099_v29 }
 0x16c   : > { %v1062_v11 = vld [vmem:[#allocation2 + $0x60] sm:$0xff] (!%p1372_p11) }
 0x16d   : > { %1044 = vst [vmem:[#allocation2 + $0x70] sm:$0xff] %v1028_v46  ;;  %v1029_v48 = vadd.f32 %v1011_v47, %v371_v45  ;;  %v1085_v26 = vadd.f32 (!%p1372_p11), %v1373_v51, %v1062_v11  ;;  %1455 = vst [vmem:[%s2001_s3 + $0x28] sm:$0xff] (!%p1372_p11), %v1439_v37  }
 0x16e   : > { %v1063_v16 = vld [vmem:[#allocation2 + $0x68] sm:$0xff] (!%p1372_p11) }
 0x16f   : > { %1045 = vst [vmem:[#allocation2 + $0x78] sm:$0xff] %v1029_v48  ;;  %v1086_v30 = vadd.f32 (!%p1372_p11), %v1373_v51, %v1063_v16  ;;  %v1101_v32 = vmax.f32 (!%p1372_p11), %v1085_v26, 0.0 }
 0x171   : > { %v1102_v36 = vmax.f32 %v1086_v30, 0.0 }
 0x173   : > { %v1444_v40 = vpack.c.bf16 %v1102_v36, %v1101_v32 }
 0x174   : > { %v1064_v21 = vld [vmem:[#allocation2 + $0x70] sm:$0xff] }
 0x175   : > { %v1087_v33 = vadd.f32 %v1373_v51, %v1064_v21  ;;  %1456 = vst [vmem:[%s2001_s3 + $0x30] sm:$0xff] %v1444_v40  }
 0x176   : > { %v1065_v22 = vld [vmem:[#allocation2 + $0x78] sm:$0xff] }
 0x177   : > { %v1088_v34 = vadd.f32 %v1373_v51, %v1065_v22  ;;  %v1103_v38 = vmax.f32 %v1087_v33, 0.0 }
 0x179   : > { %v1104_v39 = vmax.f32 %v1088_v34, 0.0 }
 0x17b   : > { %v1449_v41 = vpack.c.bf16 %v1104_v39, %v1103_v38 }
 0x17d   : > { %1457 = vst [vmem:[%s2001_s3 + $0x38] sm:$0xff] %v1449_v41  }
 0x17e PF: > { %s13_s16 = sadd.s32 1, %s1745_s16   ;;  %s2002_s12 = smov %s1733_s13 }
 0x17f   : > { %p10_p12 = scmp.ge.s32.totalorder %s13_s16, 6   ;;  %s2003_s13 = smov %s1803_s20 }
 0x180   : > { %s2004_s14 = smov %s1741_s15  ;;  %s2005_s15 = smov %s2007_s17 }
 0x181   :  { %12 = sbr.rel (!%p10_p12) target bundleno = 3 (0x3), region = 104 }

// kernel: simple_video_generator.23
= control target key start
LH: loop header
LB: loop body
LE: loop exit
PB: predicated region body
PF: predicated region fallthrough
CT: control target
= control target key end

     0   :  { %s586_s1 = inlined_call_operand.vmem [shape: bf16[128,128], index: 1, kind: input, shape index: {}]   ;;  %s587_s0 = inlined_call_operand.vmem [shape: bf16[128,128], index: 0, kind: input, shape index: {}]   ;;  %s588_s2 = inlined_call_operand.vmem [shape: f32[1,128], index: 2, kind: input, shape index: {}]   ;;  %s589_s3 = inlined_call_operand.vmem [shape: f32[128,128], index: 3, kind: output, shape index: {}]  }
   0x1   :  { %v451_v0 = vld [vmem:[%s586_s1] sm:$0xff]   ;;  %v452_v1 = vld [vmem:[%s586_s1 + $0x8] sm:$0xff]   ;;  %v453_v2 = vld [vmem:[%s586_s1 + $0x10] sm:$0xff]  }
   0x2   :  { %403 = vmatprep.subr.bf16.mxu0 %v451_v0  ;;  %435 = vmatprep.subr.bf16.mxu1 %v451_v0  ;;  %v454_v3 = vld [vmem:[%s586_s1 + $0x18] sm:$0xff]   ;;  %v459_v4 = vld [vmem:[%s587_s0] sm:$0xff]   ;;  %v456_v7 = vld [vmem:[%s586_s1 + $0x28] sm:$0xff]  }
   0x3   :  { %404 = vmatpush3.bf16.msra.mxu0 %v451_v0  ;;  %443 = vmatpush3.bf16.msra.mxu1 %v451_v0  ;;  %v460_v5 = vld [vmem:[%s587_s0 + $0x20] sm:$0xff]   ;;  %v457_v8 = vld [vmem:[%s586_s1 + $0x30] sm:$0xff]   ;;  %v458_v9 = vld [vmem:[%s586_s1 + $0x38] sm:$0xff]  }
   0x4   :  { %405 = vmatprep.subr.bf16.mxu0 %v452_v1  ;;  %436 = vmatprep.subr.bf16.mxu1 %v452_v1  ;;  %v455_v6 = vld [vmem:[%s586_s1 + $0x20] sm:$0xff]   ;;  %v461_v10 = vld [vmem:[%s587_s0 + $0x8] sm:$0xff]   ;;  %v463_v12 = vld [vmem:[%s587_s0 + $0x10] sm:$0xff]  }
   0x5   :  { %419 = vmatprep.mubr.bf16.mxu0 %v459_v4  ;;  %427 = vmatprep.mubr.bf16.mxu1 %v460_v5  ;;  %v462_v11 = vld [vmem:[%s587_s0 + $0x28] sm:$0xff]   ;;  %v464_v13 = vld [vmem:[%s587_s0 + $0x30] sm:$0xff]   ;;  %v465_v14 = vld [vmem:[%s587_s0 + $0x18] sm:$0xff]  }
   0x6   :  { %v466_v15 = vld [vmem:[%s587_s0 + $0x38] sm:$0xff]   ;;  %v386_v16 = vld [vmem:[%s588_s2] ss:$0 sm:$0xff] }
   0x7   :  { %406 = vmatpush3.bf16.msra.mxu0 %v452_v1  ;;  %444 = vmatpush3.bf16.msra.mxu1 %v452_v1 }
   0x8   :  { %407 = vmatprep.subr.bf16.mxu0 %v453_v2  ;;  %437 = vmatprep.subr.bf16.mxu1 %v453_v2 }
   0xb   :  { %408 = vmatpush3.bf16.msra.mxu0 %v453_v2  ;;  %445 = vmatpush3.bf16.msra.mxu1 %v453_v2 }
   0xc   :  { %409 = vmatprep.subr.bf16.mxu0 %v454_v3  ;;  %438 = vmatprep.subr.bf16.mxu1 %v454_v3 }
   0xf   :  { %410 = vmatpush3.bf16.msra.mxu0 %v454_v3  ;;  %446 = vmatpush3.bf16.msra.mxu1 %v454_v3 }
  0x10   :  { %411 = vmatprep.subr.bf16.mxu0 %v455_v6  ;;  %439 = vmatprep.subr.bf16.mxu1 %v455_v6 }
  0x13   :  { %412 = vmatpush3.bf16.msra.mxu0 %v455_v6  ;;  %447 = vmatpush3.bf16.msra.mxu1 %v455_v6 }
  0x14   :  { %413 = vmatprep.subr.bf16.mxu0 %v456_v7  ;;  %440 = vmatprep.subr.bf16.mxu1 %v456_v7 }
  0x17   :  { %414 = vmatpush3.bf16.msra.mxu0 %v456_v7  ;;  %448 = vmatpush3.bf16.msra.mxu1 %v456_v7 }
  0x18   :  { %415 = vmatprep.subr.bf16.mxu0 %v457_v8  ;;  %441 = vmatprep.subr.bf16.mxu1 %v457_v8 }
  0x1b   :  { %416 = vmatpush3.bf16.msra.mxu0 %v457_v8  ;;  %449 = vmatpush3.bf16.msra.mxu1 %v457_v8 }
  0x1c   :  { %417 = vmatprep.subr.bf16.mxu0 %v458_v9  ;;  %442 = vmatprep.subr.bf16.mxu1 %v458_v9 }
  0x1f   :  { %418 = vmatpush3.bf16.msra.mxu0 %v458_v9  ;;  %450 = vmatpush3.bf16.msra.mxu1 %v458_v9 }
  0x22   :  { %420 = vmatmul.mubr.bf16.vlgmr.msra.gmra.mrb[0].mxu0 %v461_v10  ;;  %428 = vmatmul.mubr.bf16.vlgmr.msra.gmra.mrb[0].mxu1 %v462_v11 }
  0x23   :  { %423 = vmatprep.mubr.bf16.mxu0 %v463_v12  ;;  %431 = vmatprep.mubr.bf16.mxu1 %v464_v13 }
  0x2a   :  { %424 = vmatmul.mubr.bf16.gmra.mrb[4].mxu0 %v465_v14  ;;  %432 = vmatmul.mubr.bf16.gmra.mrb[4].mxu1 %v466_v15 }
  0xf5   :  { %v421_v17 = vpop.f32.mrb[0].mxu0  ;;  %v429_v18 = vpop.f32.mrb[0].mxu1 }
  0xf6   :  { %v336_v19 = vadd.f32 %v421_v17, %v386_v16  ;;  %v344_v20 = vadd.f32 %v429_v18, %v386_v16  ;;  %v213_v21 = vpop.f32.mrb[1].mxu0  ;;  %v245_v22 = vpop.f32.mrb[1].mxu1 }
  0xf7   :  { %v334_v23 = vadd.f32 %v386_v16, %v213_v21  ;;  %v342_v24 = vadd.f32 %v386_v16, %v245_v22  ;;  %v422_v25 = vpop.f32.mrb[2].mxu0  ;;  %v430_v26 = vpop.f32.mrb[2].mxu1 }
  0xf8   :  { %352 = vst [vmem:[%s589_s3 + $0x10] sm:$0xff] %v336_v19  ;;  %360 = vst [vmem:[%s589_s3 + $0x50] sm:$0xff] %v344_v20  ;;  %v337_v27 = vadd.f32 %v422_v25, %v386_v16  ;;  %v345_v28 = vadd.f32 %v430_v26, %v386_v16  ;;  %v216_v29 = vpop.f32.mrb[3].mxu0  ;;  %v248_v30 = vpop.f32.mrb[3].mxu1 }
  0xf9   :  { %350 = vst [vmem:[%s589_s3] sm:$0xff] %v334_v23  ;;  %358 = vst [vmem:[%s589_s3 + $0x40] sm:$0xff] %v342_v24  ;;  %v335_v31 = vadd.f32 %v386_v16, %v216_v29  ;;  %v343_v32 = vadd.f32 %v386_v16, %v248_v30 }
  0xfa   :  { %353 = vst [vmem:[%s589_s3 + $0x18] sm:$0xff] %v337_v27  ;;  %361 = vst [vmem:[%s589_s3 + $0x58] sm:$0xff] %v345_v28 }
  0xfb   :  { %351 = vst [vmem:[%s589_s3 + $0x8] sm:$0xff] %v335_v31  ;;  %359 = vst [vmem:[%s589_s3 + $0x48] sm:$0xff] %v343_v32 }
  0xfd   :  { %v425_v33 = vpop.f32.mrb[4].mxu0  ;;  %v433_v34 = vpop.f32.mrb[4].mxu1 }
  0xfe   :  { %v340_v35 = vadd.f32 %v425_v33, %v386_v16  ;;  %v348_v36 = vadd.f32 %v433_v34, %v386_v16  ;;  %v229_v37 = vpop.f32.mrb[5].mxu0  ;;  %v261_v38 = vpop.f32.mrb[5].mxu1 }
  0xff   :  { %v338_v39 = vadd.f32 %v386_v16, %v229_v37  ;;  %v346_v40 = vadd.f32 %v386_v16, %v261_v38  ;;  %v426_v41 = vpop.f32.mrb[6].mxu0  ;;  %v434_v42 = vpop.f32.mrb[6].mxu1 }
 0x100   :  { %356 = vst [vmem:[%s589_s3 + $0x30] sm:$0xff] %v340_v35  ;;  %364 = vst [vmem:[%s589_s3 + $0x70] sm:$0xff] %v348_v36  ;;  %v341_v43 = vadd.f32 %v426_v41, %v386_v16  ;;  %v349_v44 = vadd.f32 %v434_v42, %v386_v16  ;;  %v232_v45 = vpop.f32.mrb[7].mxu0  ;;  %v264_v46 = vpop.f32.mrb[7].mxu1 }
 0x101   :  { %354 = vst [vmem:[%s589_s3 + $0x20] sm:$0xff] %v338_v39  ;;  %362 = vst [vmem:[%s589_s3 + $0x60] sm:$0xff] %v346_v40  ;;  %v339_v47 = vadd.f32 %v386_v16, %v232_v45  ;;  %v347_v48 = vadd.f32 %v386_v16, %v264_v46 }
 0x102   :  { %357 = vst [vmem:[%s589_s3 + $0x38] sm:$0xff] %v341_v43  ;;  %365 = vst [vmem:[%s589_s3 + $0x78] sm:$0xff] %v349_v44 }
 0x103   :  { %355 = vst [vmem:[%s589_s3 + $0x28] sm:$0xff] %v339_v47  ;;  %363 = vst [vmem:[%s589_s3 + $0x68] sm:$0xff] %v347_v48 }

// kernel: simple_video_generator.24
= control target key start
LH: loop header
LB: loop body
LE: loop exit
PB: predicated region body
PF: predicated region fallthrough
CT: control target
= control target key end

     0   :  { %s1868_s15 = smov 0   ;;  %s1870_s16 = smov 0   ;;  %s2164_s0 = inlined_call_operand.vmem [shape: bf16[128,1024], index: 0, kind: input, shape index: {}]   ;;  %s2165_s1 = inlined_call_operand.vmem [shape: bf16[1024,128], index: 1, kind: input, shape index: {}]   ;;  %s2166_s2 = inlined_call_operand.vmem [shape: f32[1,128], index: 2, kind: input, shape index: {}]   ;;  %s2167_s3 = inlined_call_operand.vmem [shape: f32[128,128], index: 3, kind: input, shape index: {}]   ;;  %s2168_s4 = inlined_call_operand.vmem [shape: bf16[128,128], index: 4, kind: output, shape index: {}]  }
   0x1   :  { %s1872_s17 = smov 0   ;;  %s1874_s18 = smov 0  }
   0x2   :  { %s1876_s19 = smov 0  }
   0x3 LB: > { %s26_s20 = sadd.s32 1, %s1836_s18  ;;  %p49_p1 = scmp.ne.s32.totalorder %s1828_s16, %s1824_s15  ;;  %s1840_s19 = sphi %s1876_s19, %s14_s19   ;;  %s1836_s18 = sphi %s1874_s18, %s2172_s18   ;;  %s1832_s17 = sphi %s1872_s17, %s2171_s17   ;;  %s1828_s16 = sphi %s1870_s16, %s2170_s16   ;;  %s1824_s15 = sphi %s1868_s15, %s2169_s15  }
   0x4   : > { %p27_p0 = scmp.ge.s32.totalorder %s26_s20, 2  ;;  %p50_p2 = scmp.eq.s32.totalorder %s1840_s19, 0 }
   0x5   : > { %s42_s22 = sadd.s32 1, %s1828_s16  ;;  %p1394_p5 = scmp.ge.s32.totalorder %s1840_s19, 2 }
   0x6   : > { %s2174_s20 = smov (%p27_p0, %s26_s20), 0  ;;  %p51_p3 = por %p50_p2, %p49_p1 }
   0x7   : > { %s38_s21 = ssub.s32 %s1836_s18, %s2174_s20  ;;  %203 = sbr.rel (%p1394_p5) target bundleno = 34 (0x22), region = 24 }
   0x8   : > { %p40_p4 = scmp.eq.s32.totalorder %s38_s21, 0 }
   0xa   : > { %s1903_s23 = scalar_select %p40_p4, %s1828_s16, %s42_s22  }
   0xe   : > { %206 = sbr.rel (!%p51_p3) target bundleno = 34 (0x22), region = 28  ;;  %s208_s24 = sand.u32 (%p51_p3), 1, %s1828_s16  }
   0xf   : > { %s1489_s25 = sshll.u32 (%p51_p3), %s1836_s18, 4  ;;  %s1395_s26 = sshll.u32 (%p51_p3), %s208_s24, 8 }
  0x10   : > { %s1911_s29 = scalar_lea.vmem (%p51_p3), %s2164_s0, %s1489_s25  ;;  %s1916_s30 = scalar_lea.vmem (%p51_p3), [#allocation3], %s1395_s26 }
  0x11   : > { %v229_v0 = vld [vmem:[%s1911_s29] sm:$0xff] (%p51_p3)  ;;  %v231_v1 = vld [vmem:[%s1911_s29 + $0x8] sm:$0xff] (%p51_p3) }
  0x12   : > { %v233_v2 = vld [vmem:[%s1911_s29 + $0x20] sm:$0xff] (%p51_p3)  ;;  %230 = vst [vmem:[%s1916_s30] sm:$0xff] (%p51_p3), %v229_v0  ;;  %232 = vst [vmem:[%s1916_s30 + $0x8] sm:$0xff] (%p51_p3), %v231_v1  ;;  %v235_v3 = vld [vmem:[%s1911_s29 + $0x28] sm:$0xff] (%p51_p3) }
  0x13   : > { %234 = vst [vmem:[%s1916_s30 + $0x10] sm:$0xff] (%p51_p3), %v233_v2  ;;  %v237_v4 = vld [vmem:[%s1911_s29 + $0x40] sm:$0xff] (%p51_p3)  ;;  %v239_v5 = vld [vmem:[%s1911_s29 + $0x48] sm:$0xff] (%p51_p3)  ;;  %236 = vst [vmem:[%s1916_s30 + $0x18] sm:$0xff] (%p51_p3), %v235_v3 }
  0x14   : > { %238 = vst [vmem:[%s1916_s30 + $0x20] sm:$0xff] (%p51_p3), %v237_v4  ;;  %240 = vst [vmem:[%s1916_s30 + $0x28] sm:$0xff] (%p51_p3), %v239_v5  ;;  %v241_v6 = vld [vmem:[%s1911_s29 + $0x60] sm:$0xff] (%p51_p3)  ;;  %v243_v7 = vld [vmem:[%s1911_s29 + $0x68] sm:$0xff] (%p51_p3) }
  0x15   : > { %v245_v8 = vld [vmem:[%s1911_s29 + $0x80] sm:$0xff]  ;;  %242 = vst [vmem:[%s1916_s30 + $0x30] sm:$0xff] %v241_v6  ;;  %244 = vst [vmem:[%s1916_s30 + $0x38] sm:$0xff] %v243_v7  ;;  %v247_v9 = vld [vmem:[%s1911_s29 + $0x88] sm:$0xff] }
  0x16   : > { %246 = vst [vmem:[%s1916_s30 + $0x40] sm:$0xff] %v245_v8  ;;  %v249_v10 = vld [vmem:[%s1911_s29 + $0xa0] sm:$0xff]  ;;  %v251_v11 = vld [vmem:[%s1911_s29 + $0xa8] sm:$0xff]  ;;  %248 = vst [vmem:[%s1916_s30 + $0x48] sm:$0xff] %v247_v9 }
  0x17   : > { %250 = vst [vmem:[%s1916_s30 + $0x50] sm:$0xff] %v249_v10  ;;  %252 = vst [vmem:[%s1916_s30 + $0x58] sm:$0xff] %v251_v11  ;;  %v253_v12 = vld [vmem:[%s1911_s29 + $0xc0] sm:$0xff]  ;;  %v255_v13 = vld [vmem:[%s1911_s29 + $0xc8] sm:$0xff] }
  0x18   : > { %v257_v14 = vld [vmem:[%s1911_s29 + $0xe0] sm:$0xff]  ;;  %254 = vst [vmem:[%s1916_s30 + $0x60] sm:$0xff] %v253_v12  ;;  %256 = vst [vmem:[%s1916_s30 + $0x68] sm:$0xff] %v255_v13  ;;  %v259_v15 = vld [vmem:[%s1911_s29 + $0xe8] sm:$0xff] }
  0x19   : > { %258 = vst [vmem:[%s1916_s30 + $0x70] sm:$0xff] %v257_v14  ;;  %v261_v16 = vld [vmem:[%s1911_s29 + $0x100] sm:$0xff]  ;;  %v263_v17 = vld [vmem:[%s1911_s29 + $0x108] sm:$0xff]  ;;  %260 = vst [vmem:[%s1916_s30 + $0x78] sm:$0xff] %v259_v15 }
  0x1a   : > { %262 = vst [vmem:[%s1916_s30 + $0x80] sm:$0xff] %v261_v16  ;;  %264 = vst [vmem:[%s1916_s30 + $0x88] sm:$0xff] %v263_v17  ;;  %v265_v18 = vld [vmem:[%s1911_s29 + $0x120] sm:$0xff]  ;;  %v267_v19 = vld [vmem:[%s1911_s29 + $0x128] sm:$0xff] }
  0x1b   : > { %v269_v20 = vld [vmem:[%s1911_s29 + $0x140] sm:$0xff]  ;;  %266 = vst [vmem:[%s1916_s30 + $0x90] sm:$0xff] %v265_v18  ;;  %268 = vst [vmem:[%s1916_s30 + $0x98] sm:$0xff] %v267_v19  ;;  %v271_v21 = vld [vmem:[%s1911_s29 + $0x148] sm:$0xff] }
  0x1c   : > { %270 = vst [vmem:[%s1916_s30 + $0xa0] sm:$0xff] %v269_v20  ;;  %v273_v22 = vld [vmem:[%s1911_s29 + $0x160] sm:$0xff]  ;;  %v275_v23 = vld [vmem:[%s1911_s29 + $0x168] sm:$0xff]  ;;  %272 = vst [vmem:[%s1916_s30 + $0xa8] sm:$0xff] %v271_v21 }
  0x1d   : > { %274 = vst [vmem:[%s1916_s30 + $0xb0] sm:$0xff] %v273_v22  ;;  %276 = vst [vmem:[%s1916_s30 + $0xb8] sm:$0xff] %v275_v23  ;;  %v277_v24 = vld [vmem:[%s1911_s29 + $0x180] sm:$0xff]  ;;  %v279_v25 = vld [vmem:[%s1911_s29 + $0x188] sm:$0xff] }
  0x1e   : > { %v281_v26 = vld [vmem:[%s1911_s29 + $0x1a0] sm:$0xff]  ;;  %278 = vst [vmem:[%s1916_s30 + $0xc0] sm:$0xff] %v277_v24  ;;  %280 = vst [vmem:[%s1916_s30 + $0xc8] sm:$0xff] %v279_v25  ;;  %v283_v27 = vld [vmem:[%s1911_s29 + $0x1a8] sm:$0xff] }
  0x1f   : > { %282 = vst [vmem:[%s1916_s30 + $0xd0] sm:$0xff] %v281_v26  ;;  %v285_v28 = vld [vmem:[%s1911_s29 + $0x1c0] sm:$0xff]  ;;  %v287_v29 = vld [vmem:[%s1911_s29 + $0x1c8] sm:$0xff]  ;;  %284 = vst [vmem:[%s1916_s30 + $0xd8] sm:$0xff] %v283_v27 }
  0x20   : > { %286 = vst [vmem:[%s1916_s30 + $0xe0] sm:$0xff] %v285_v28  ;;  %288 = vst [vmem:[%s1916_s30 + $0xe8] sm:$0xff] %v287_v29  ;;  %v289_v30 = vld [vmem:[%s1911_s29 + $0x1e0] sm:$0xff]  ;;  %v291_v31 = vld [vmem:[%s1911_s29 + $0x1e8] sm:$0xff] }
  0x21   : > { %290 = vst [vmem:[%s1916_s30 + $0xf0] sm:$0xff] %v289_v30  ;;  %292 = vst [vmem:[%s1916_s30 + $0xf8] sm:$0xff] %v291_v31 }
  0x22 PF: > { %p1398_p6 = scmp.ge.s32.totalorder %s1840_s19, 1  ;;  %p309_p7 = scmp.lt.s32.totalorder %s1840_s19, 3 }
  0x24   : > { %p310_p8 = pnand %p1398_p6, %p309_p7 }
  0x25   : > { %s316_s5 = sand.u32 (!%p310_p8), 1, %s1824_s15   ;;  %s1400_s6 = sshll.u32 (!%p310_p8), %s1832_s17, 6 }
  0x26   : > { %313 = sbr.rel (%p310_p8) target bundleno = 382 (0x17e), region = 55  ;;  %s1399_s7 = sshll.u32 (!%p310_p8), %s316_s5, 8 }
  0x27   : > { %p366_p9 = scmp.lt.s32.totalorder (!%p310_p8), %s1400_s6, 127  ;;  %s1988_s12 = scalar_lea.vmem (!%p310_p8), [#allocation3], %s1399_s7 }
  0x28   : > { %p1402_p10 = scmp.ne.s32.totalorder (!%p310_p8), %s1832_s17, 0 }
  0x2d   : > { %s2176_s6 = smov (!%p366_p9, %s1400_s6), 127  ;;  %399 = sbr.rel (%p1402_p10) target bundleno = 55 (0x37), region = 63 }
  0x2e   : > { %s1401_s8 = sshll.u32 %s2176_s6, 2  ;;  %v1842_v32 = vmov (!%p1402_p10), 0.0  }
  0x2f   : > { %s1986_s11 = scalar_lea.vmem %s2165_s1, %s1401_s8  ;;  %400 = vst [vmem:[#allocation2] sm:$0xff] (!%p1402_p10), %v1842_v32  ;;  %401 = vst [vmem:[#allocation2 + $0x8] sm:$0xff] (!%p1402_p10), %v1842_v32 }
  0x30   : > { %402 = vst [vmem:[#allocation2 + $0x10] sm:$0xff] (!%p1402_p10), %v1842_v32  ;;  %403 = vst [vmem:[#allocation2 + $0x18] sm:$0xff] (!%p1402_p10), %v1842_v32 }
  0x31   : > { %404 = vst [vmem:[#allocation2 + $0x20] sm:$0xff] (!%p1402_p10), %v1842_v32  ;;  %405 = vst [vmem:[#allocation2 + $0x28] sm:$0xff] (!%p1402_p10), %v1842_v32 }
  0x32   : > { %406 = vst [vmem:[#allocation2 + $0x30] sm:$0xff] (!%p1402_p10), %v1842_v32  ;;  %407 = vst [vmem:[#allocation2 + $0x38] sm:$0xff] (!%p1402_p10), %v1842_v32 }
  0x33   : > { %408 = vst [vmem:[#allocation2 + $0x40] sm:$0xff] (!%p1402_p10), %v1842_v32  ;;  %409 = vst [vmem:[#allocation2 + $0x48] sm:$0xff] (!%p1402_p10), %v1842_v32 }
  0x34   : > { %410 = vst [vmem:[#allocation2 + $0x50] sm:$0xff] %v1842_v32  ;;  %411 = vst [vmem:[#allocation2 + $0x58] sm:$0xff] %v1842_v32 }
  0x35   : > { %412 = vst [vmem:[#allocation2 + $0x60] sm:$0xff] %v1842_v32  ;;  %413 = vst [vmem:[#allocation2 + $0x68] sm:$0xff] %v1842_v32 }
  0x36   : > { %414 = vst [vmem:[#allocation2 + $0x70] sm:$0xff] %v1842_v32  ;;  %415 = vst [vmem:[#allocation2 + $0x78] sm:$0xff] %v1842_v32 }
  0x37 PF: > { %v1722_v33 = vld [vmem:[%s1986_s11 + $0x40] sm:$0xff]   ;;  %v1726_v37 = vld [vmem:[%s1986_s11 + $0x48] sm:$0xff]   ;;  %v1730_v41 = vld [vmem:[%s1986_s11 + $0x50] sm:$0xff]   ;;  %p1467_p11 = scmp.ne.s32.totalorder %s1832_s17, 1 }
  0x38   : > { %v1723_v34 = vld [vmem:[%s1986_s11 + $0xc0] sm:$0xff]   ;;  %1553 = vmatprep.subr.bf16.mxu0 %v1722_v33  ;;  %v1727_v38 = vld [vmem:[%s1986_s11 + $0xc8] sm:$0xff]   ;;  %v1731_v42 = vld [vmem:[%s1986_s11 + $0xd0] sm:$0xff]  }
  0x39   : > { %v1724_v35 = vld [vmem:[%s1986_s11] sm:$0xff]   ;;  %1617 = vmatprep.subr.bf16.mxu1 %v1723_v34  ;;  %v1728_v39 = vld [vmem:[%s1986_s11 + $0x8] sm:$0xff]   ;;  %v1732_v43 = vld [vmem:[%s1986_s11 + $0x10] sm:$0xff]  }
  0x3a   : > { %v1725_v36 = vld [vmem:[%s1986_s11 + $0x80] sm:$0xff]   ;;  %1554 = vmatpush3.bf16.msra.mxu0 %v1724_v35  ;;  %v1729_v40 = vld [vmem:[%s1986_s11 + $0x88] sm:$0xff]   ;;  %v1733_v44 = vld [vmem:[%s1986_s11 + $0x90] sm:$0xff]  }
  0x3b   : > { %1618 = vmatpush3.bf16.msra.mxu1 %v1725_v36  ;;  %1555 = vmatprep.subr.bf16.mxu0 %v1726_v37  ;;  %v1734_v45 = vld [vmem:[%s1986_s11 + $0x58] sm:$0xff]   ;;  %v1738_v49 = vld [vmem:[%s1986_s11 + $0x60] sm:$0xff]   ;;  %v1742_v53 = vld [vmem:[%s1986_s11 + $0x68] sm:$0xff]  }
  0x3c   : > { %1619 = vmatprep.subr.bf16.mxu1 %v1727_v38  ;;  %v1735_v46 = vld [vmem:[%s1986_s11 + $0xd8] sm:$0xff]   ;;  %v1739_v50 = vld [vmem:[%s1986_s11 + $0xe0] sm:$0xff]   ;;  %v1743_v54 = vld [vmem:[%s1986_s11 + $0xe8] sm:$0xff]  }
  0x3d   : > { %v1736_v47 = vld [vmem:[%s1986_s11 + $0x18] sm:$0xff]   ;;  %v1740_v51 = vld [vmem:[%s1986_s11 + $0x20] sm:$0xff]   ;;  %v1744_v55 = vld [vmem:[%s1986_s11 + $0x28] sm:$0xff]  }
  0x3e   : > { %1556 = vmatpush3.bf16.msra.mxu0 %v1728_v39  ;;  %v1737_v48 = vld [vmem:[%s1986_s11 + $0x98] sm:$0xff]   ;;  %v1741_v52 = vld [vmem:[%s1986_s11 + $0xa0] sm:$0xff]   ;;  %v1745_v56 = vld [vmem:[%s1986_s11 + $0xa8] sm:$0xff]  }
  0x3f   : > { %1620 = vmatpush3.bf16.msra.mxu1 %v1729_v40  ;;  %1557 = vmatprep.subr.bf16.mxu0 %v1730_v41  ;;  %v1746_v57 = vld [vmem:[%s1986_s11 + $0x70] sm:$0xff]   ;;  %v1750_v61 = vld [vmem:[%s1986_s11 + $0x78] sm:$0xff]  }
  0x40   : > { %1621 = vmatprep.subr.bf16.mxu1 %v1731_v42  ;;  %v1747_v58 = vld [vmem:[%s1986_s11 + $0xf0] sm:$0xff]   ;;  %v1751_v62 = vld [vmem:[%s1986_s11 + $0xf8] sm:$0xff]   ;;  %v416_v42 = vld [vmem:[#allocation2] sm:$0xff] }
  0x41   : > { %v1748_v59 = vld [vmem:[%s1986_s11 + $0x30] sm:$0xff]   ;;  %v1752_v63 = vld [vmem:[%s1986_s11 + $0x38] sm:$0xff]  }
  0x42   : > { %1558 = vmatpush3.bf16.msra.mxu0 %v1732_v43  ;;  %v1749_v60 = vld [vmem:[%s1986_s11 + $0xb0] sm:$0xff]   ;;  %v1753_v0 = vld [vmem:[%s1986_s11 + $0xb8] sm:$0xff]  }
  0x43   : > { %1622 = vmatpush3.bf16.msra.mxu1 %v1733_v44  ;;  %1559 = vmatprep.subr.bf16.mxu0 %v1734_v45  ;;  %v1754_v1 = vld [vmem:[%s1988_s12] ss:$16 sps:$4 sm:$0xff]   ;;  %v1756_v2 = vld [vmem:[%s1988_s12 + $0x4] ss:$16 sps:$4 sm:$0xff]   ;;  %v1757_v3 = vld [vmem:[%s1988_s12 + $0x8] ss:$16 sps:$4 sm:$0xff]  }
  0x44   : > { %1623 = vmatprep.subr.bf16.mxu1 %v1735_v46  ;;  %v1759_v4 = vld [vmem:[%s1988_s12 + $0xc] ss:$16 sps:$4 sm:$0xff]   ;;  %912 = vmatprep.mubr.bf16.mxu0 %v1756_v2  ;;  %v1760_v5 = vld [vmem:[%s1988_s12 + $0x24] ss:$16 sps:$4 sm:$0xff]   ;;  %v1764_v7 = vld [vmem:[%s1988_s12 + $0x20] ss:$16 sps:$4 sm:$0xff]  }
  0x45   : > { %1009 = vmatprep.mubr.bf16.mxu1 %v1759_v4  ;;  %v1762_v6 = vld [vmem:[%s1988_s12 + $0x2c] ss:$16 sps:$4 sm:$0xff]   ;;  %v1765_v8 = vld [vmem:[%s1988_s12 + $0x28] ss:$16 sps:$4 sm:$0xff]   ;;  %v1766_v9 = vld [vmem:[%s1988_s12 + $0x44] ss:$16 sps:$4 sm:$0xff]  }
  0x46   : > { %1560 = vmatpush3.bf16.msra.mxu0 %v1736_v47  ;;  %v1768_v10 = vld [vmem:[%s1988_s12 + $0x4c] ss:$16 sps:$4 sm:$0xff]   ;;  %v1770_v11 = vld [vmem:[%s1988_s12 + $0x40] ss:$16 sps:$4 sm:$0xff]   ;;  %v1771_v12 = vld [vmem:[%s1988_s12 + $0x48] ss:$16 sps:$4 sm:$0xff]  }
  0x47   : > { %1624 = vmatpush3.bf16.msra.mxu1 %v1737_v48  ;;  %1561 = vmatprep.subr.bf16.mxu0 %v1738_v49  ;;  %v1772_v13 = vld [vmem:[%s1988_s12 + $0x64] ss:$16 sps:$4 sm:$0xff]   ;;  %v1774_v14 = vld [vmem:[%s1988_s12 + $0x6c] ss:$16 sps:$4 sm:$0xff]   ;;  %v1776_v15 = vld [vmem:[%s1988_s12 + $0x60] ss:$16 sps:$4 sm:$0xff]  }
  0x48   : > { %1625 = vmatprep.subr.bf16.mxu1 %v1739_v50  ;;  %v1777_v16 = vld [vmem:[%s1988_s12 + $0x68] ss:$16 sps:$4 sm:$0xff]   ;;  %v1778_v17 = vld [vmem:[%s1988_s12 + $0x84] ss:$16 sps:$4 sm:$0xff]   ;;  %v1780_v18 = vld [vmem:[%s1988_s12 + $0x8c] ss:$16 sps:$4 sm:$0xff]  }
  0x49   : > { %v1782_v19 = vld [vmem:[%s1988_s12 + $0x80] ss:$16 sps:$4 sm:$0xff]   ;;  %v1783_v20 = vld [vmem:[%s1988_s12 + $0x88] ss:$16 sps:$4 sm:$0xff]   ;;  %v1784_v21 = vld [vmem:[%s1988_s12 + $0xa4] ss:$16 sps:$4 sm:$0xff]  }
  0x4a   : > { %1562 = vmatpush3.bf16.msra.mxu0 %v1740_v51  ;;  %v1786_v22 = vld [vmem:[%s1988_s12 + $0xac] ss:$16 sps:$4 sm:$0xff]   ;;  %v1788_v23 = vld [vmem:[%s1988_s12 + $0xa0] ss:$16 sps:$4 sm:$0xff]   ;;  %v1789_v24 = vld [vmem:[%s1988_s12 + $0xa8] ss:$16 sps:$4 sm:$0xff]  }
  0x4b   : > { %1626 = vmatpush3.bf16.msra.mxu1 %v1741_v52  ;;  %1563 = vmatprep.subr.bf16.mxu0 %v1742_v53  ;;  %v1790_v25 = vld [vmem:[%s1988_s12 + $0xc4] ss:$16 sps:$4 sm:$0xff]   ;;  %v1792_v26 = vld [vmem:[%s1988_s12 + $0xcc] ss:$16 sps:$4 sm:$0xff]   ;;  %v1794_v27 = vld [vmem:[%s1988_s12 + $0xc0] ss:$16 sps:$4 sm:$0xff]  }
  0x4c   : > { %1627 = vmatprep.subr.bf16.mxu1 %v1743_v54  ;;  %v1795_v28 = vld [vmem:[%s1988_s12 + $0xc8] ss:$16 sps:$4 sm:$0xff]   ;;  %v1796_v29 = vld [vmem:[%s1988_s12 + $0xe4] ss:$16 sps:$4 sm:$0xff]   ;;  %v1798_v30 = vld [vmem:[%s1988_s12 + $0xec] ss:$16 sps:$4 sm:$0xff]  }
  0x4d   : > { %v1800_v31 = vld [vmem:[%s1988_s12 + $0xe0] ss:$16 sps:$4 sm:$0xff]   ;;  %v1801_v32 = vld [vmem:[%s1988_s12 + $0xe8] ss:$16 sps:$4 sm:$0xff]  }
  0x4e   : > { %1564 = vmatpush3.bf16.msra.mxu0 %v1744_v55  ;;  %v417_v47 = vld [vmem:[#allocation2 + $0x8] sm:$0xff] }
  0x4f   : > { %1628 = vmatpush3.bf16.msra.mxu1 %v1745_v56  ;;  %1565 = vmatprep.subr.bf16.mxu0 %v1746_v57 }
  0x50   : > { %1629 = vmatprep.subr.bf16.mxu1 %v1747_v58 }
  0x52   : > { %1566 = vmatpush3.bf16.msra.mxu0 %v1748_v59 }
  0x53   : > { %1630 = vmatpush3.bf16.msra.mxu1 %v1749_v60  ;;  %1567 = vmatprep.subr.bf16.mxu0 %v1750_v61  ;;  %v418_v60 = vld [vmem:[#allocation2 + $0x10] sm:$0xff] }
  0x54   : > { %1631 = vmatprep.subr.bf16.mxu1 %v1751_v62 }
  0x56   : > { %1568 = vmatpush3.bf16.msra.mxu0 %v1752_v63 }
  0x57   : > { %1632 = vmatpush3.bf16.msra.mxu1 %v1753_v0 }
  0x59   : > { %913 = vmatmul.mubr.bf16.vlgmr.msra.gmra.mrb[0].mxu0 %v1754_v1  ;;  %v419_v1 = vld [vmem:[#allocation2 + $0x18] sm:$0xff] }
  0x5a   : > { %1010 = vmatmul.mubr.bf16.vlgmr.msra.gmra.mrb[0].mxu1 %v1757_v3  ;;  %920 = vmatprep.mubr.bf16.mxu0 %v1760_v5 }
  0x5b   : > { %1017 = vmatprep.mubr.bf16.mxu1 %v1762_v6 }
  0x61   : > { %921 = vmatmul.mubr.bf16.gmra.mrb[4].mxu0 %v1764_v7 }
  0x62   : > { %1018 = vmatmul.mubr.bf16.gmra.mrb[4].mxu1 %v1765_v8  ;;  %928 = vmatprep.mubr.bf16.mxu0 %v1766_v9 }
  0x63   : > { %1025 = vmatprep.mubr.bf16.mxu1 %v1768_v10 }
  0x69   : > { %929 = vmatmul.mubr.bf16.gmra.mrb[8].mxu0 %v1770_v11 }
  0x6a   : > { %1026 = vmatmul.mubr.bf16.gmra.mrb[8].mxu1 %v1771_v12  ;;  %936 = vmatprep.mubr.bf16.mxu0 %v1772_v13 }
  0x6b   : > { %1033 = vmatprep.mubr.bf16.mxu1 %v1774_v14  ;;  %v420_v14 = vld [vmem:[#allocation2 + $0x20] sm:$0xff] }
  0x71   : > { %937 = vmatmul.mubr.bf16.gmra.mrb[12].mxu0 %v1776_v15 }
  0x72   : > { %1034 = vmatmul.mubr.bf16.gmra.mrb[12].mxu1 %v1777_v16  ;;  %944 = vmatprep.mubr.bf16.mxu0 %v1778_v17 }
  0x73   : > { %1041 = vmatprep.mubr.bf16.mxu1 %v1780_v18 }
  0x79   : > { %945 = vmatmul.mubr.bf16.gmra.mrb[16].mxu0 %v1782_v19  ;;  %v421_v19 = vld [vmem:[#allocation2 + $0x28] sm:$0xff] }
  0x7a   : > { %1042 = vmatmul.mubr.bf16.gmra.mrb[16].mxu1 %v1783_v20  ;;  %952 = vmatprep.mubr.bf16.mxu0 %v1784_v21 }
  0x7b   : > { %1049 = vmatprep.mubr.bf16.mxu1 %v1786_v22 }
  0x81   : > { %953 = vmatmul.mubr.bf16.gmra.mrb[20].mxu0 %v1788_v23 }
  0x82   : > { %1050 = vmatmul.mubr.bf16.gmra.mrb[20].mxu1 %v1789_v24  ;;  %960 = vmatprep.mubr.bf16.mxu0 %v1790_v25 }
  0x83   : > { %1057 = vmatprep.mubr.bf16.mxu1 %v1792_v26 }
  0x89   : > { %961 = vmatmul.mubr.bf16.gmra.mrb[24].mxu0 %v1794_v27 }
  0x8a   : > { %1058 = vmatmul.mubr.bf16.gmra.mrb[24].mxu1 %v1795_v28  ;;  %968 = vmatprep.mubr.bf16.mxu0 %v1796_v29 }
  0x8b   : > { %1065 = vmatprep.mubr.bf16.mxu1 %v1798_v30 }
  0x91   : > { %969 = vmatmul.mubr.bf16.gmra.mrb[28].mxu0 %v1800_v31 }
  0x92   : > { %1066 = vmatmul.mubr.bf16.gmra.mrb[28].mxu1 %v1801_v32  ;;  %v422_v32 = vld [vmem:[#allocation2 + $0x30] sm:$0xff] }
 0x12c   : > { %v1569_v33 = vpop.f32.mrb[0].mxu0 }
 0x12d   : > { %v1633_v34 = vpop.f32.mrb[0].mxu1  ;;  %v1570_v35 = vpop.f32.mrb[1].mxu0 }
 0x12e   : > { %v1571_v36 = vadd.f32 %v1570_v35, %v1569_v33  ;;  %v1634_v37 = vpop.f32.mrb[1].mxu1  ;;  %v1572_v38 = vpop.f32.mrb[2].mxu0 }
 0x12f   : > { %v1635_v39 = vadd.f32 %v1634_v37, %v1633_v34  ;;  %v1636_v40 = vpop.f32.mrb[2].mxu1  ;;  %v1573_v41 = vpop.f32.mrb[3].mxu0  ;;  %v423_v37 = vld [vmem:[#allocation2 + $0x38] sm:$0xff] }
 0x130   : > { %v1574_v43 = vadd.f32 %v1573_v41, %v1572_v38  ;;  %v1637_v44 = vpop.f32.mrb[3].mxu1 }
 0x131   : > { %v1012_v45 = vadd.f32 %v1635_v39, %v1571_v36  ;;  %v1638_v46 = vadd.f32 %v1637_v44, %v1636_v40 }
 0x133   : > { %v1074_v48 = vadd.f32 %v1012_v45, %v416_v42  ;;  %v1015_v49 = vadd.f32 %v1638_v46, %v1574_v43 }
 0x134   : > { %v1575_v50 = vpop.f32.mrb[4].mxu0 }
 0x135   : > { %1090 = vst [vmem:[#allocation2] sm:$0xff] %v1074_v48  ;;  %v1075_v51 = vadd.f32 %v1015_v49, %v417_v47  ;;  %v1639_v52 = vpop.f32.mrb[4].mxu1  ;;  %v1576_v53 = vpop.f32.mrb[5].mxu0 }
 0x136   : > { %v1577_v54 = vadd.f32 %v1576_v53, %v1575_v50  ;;  %v1640_v55 = vpop.f32.mrb[5].mxu1  ;;  %v1578_v56 = vpop.f32.mrb[6].mxu0  ;;  %v424_v50 = vld [vmem:[#allocation2 + $0x40] sm:$0xff] }
 0x137   : > { %1091 = vst [vmem:[#allocation2 + $0x8] sm:$0xff] %v1075_v51  ;;  %v1641_v57 = vadd.f32 %v1640_v55, %v1639_v52  ;;  %v1642_v58 = vpop.f32.mrb[6].mxu1  ;;  %v1579_v59 = vpop.f32.mrb[7].mxu0  ;;  %v425_v55 = vld [vmem:[#allocation2 + $0x48] sm:$0xff] }
 0x138   : > { %v1580_v61 = vadd.f32 %v1579_v59, %v1578_v56  ;;  %v1643_v62 = vpop.f32.mrb[7].mxu1 }
 0x139   : > { %v1020_v63 = vadd.f32 %v1641_v57, %v1577_v54  ;;  %v1644_v0 = vadd.f32 %v1643_v62, %v1642_v58 }
 0x13b   : > { %v1076_v2 = vadd.f32 %v1020_v63, %v418_v60  ;;  %v1023_v3 = vadd.f32 %v1644_v0, %v1580_v61 }
 0x13c   : > { %v1581_v4 = vpop.f32.mrb[8].mxu0 }
 0x13d   : > { %1092 = vst [vmem:[#allocation2 + $0x10] sm:$0xff] %v1076_v2  ;;  %v1077_v5 = vadd.f32 %v1023_v3, %v419_v1  ;;  %v1645_v6 = vpop.f32.mrb[8].mxu1  ;;  %v1582_v7 = vpop.f32.mrb[9].mxu0 }
 0x13e   : > { %v1583_v8 = vadd.f32 %v1582_v7, %v1581_v4  ;;  %v1646_v9 = vpop.f32.mrb[9].mxu1  ;;  %v1584_v10 = vpop.f32.mrb[10].mxu0  ;;  %v426_v4 = vld [vmem:[#allocation2 + $0x50] sm:$0xff] }
 0x13f   : > { %1093 = vst [vmem:[#allocation2 + $0x18] sm:$0xff] %v1077_v5  ;;  %v1647_v11 = vadd.f32 %v1646_v9, %v1645_v6  ;;  %v1648_v12 = vpop.f32.mrb[10].mxu1  ;;  %v1585_v13 = vpop.f32.mrb[11].mxu0  ;;  %v427_v9 = vld [vmem:[#allocation2 + $0x58] sm:$0xff] }
 0x140   : > { %v1586_v15 = vadd.f32 %v1585_v13, %v1584_v10  ;;  %v1649_v16 = vpop.f32.mrb[11].mxu1 }
 0x141   : > { %v1028_v17 = vadd.f32 %v1647_v11, %v1583_v8  ;;  %v1650_v18 = vadd.f32 %v1649_v16, %v1648_v12 }
 0x143   : > { %v1078_v20 = vadd.f32 %v1028_v17, %v420_v14  ;;  %v1031_v21 = vadd.f32 %v1650_v18, %v1586_v15 }
 0x144   : > { %v1587_v22 = vpop.f32.mrb[12].mxu0 }
 0x145   : > { %1094 = vst [vmem:[#allocation2 + $0x20] sm:$0xff] %v1078_v20  ;;  %v1079_v23 = vadd.f32 %v1031_v21, %v421_v19  ;;  %v1651_v24 = vpop.f32.mrb[12].mxu1  ;;  %v1588_v25 = vpop.f32.mrb[13].mxu0 }
 0x146   : > { %v1589_v26 = vadd.f32 %v1588_v25, %v1587_v22  ;;  %v1652_v27 = vpop.f32.mrb[13].mxu1  ;;  %v1590_v28 = vpop.f32.mrb[14].mxu0  ;;  %v428_v22 = vld [vmem:[#allocation2 + $0x60] sm:$0xff] }
 0x147   : > { %1095 = vst [vmem:[#allocation2 + $0x28] sm:$0xff] %v1079_v23  ;;  %v1653_v29 = vadd.f32 %v1652_v27, %v1651_v24  ;;  %v1654_v30 = vpop.f32.mrb[14].mxu1  ;;  %v1591_v31 = vpop.f32.mrb[15].mxu0  ;;  %v429_v27 = vld [vmem:[#allocation2 + $0x68] sm:$0xff] }
 0x148   : > { %v1592_v33 = vadd.f32 %v1591_v31, %v1590_v28  ;;  %v1655_v34 = vpop.f32.mrb[15].mxu1 }
 0x149   : > { %v1036_v35 = vadd.f32 %v1653_v29, %v1589_v26  ;;  %v1656_v36 = vadd.f32 %v1655_v34, %v1654_v30 }
 0x14b   : > { %v1080_v38 = vadd.f32 %v1036_v35, %v422_v32  ;;  %v1039_v39 = vadd.f32 %v1656_v36, %v1592_v33 }
 0x14c   : > { %v1593_v40 = vpop.f32.mrb[16].mxu0 }
 0x14d   : > { %1096 = vst [vmem:[#allocation2 + $0x30] sm:$0xff] %v1080_v38  ;;  %v1081_v41 = vadd.f32 %v1039_v39, %v423_v37  ;;  %v1657_v42 = vpop.f32.mrb[16].mxu1  ;;  %v1594_v43 = vpop.f32.mrb[17].mxu0 }
 0x14e   : > { %v1595_v44 = vadd.f32 %v1594_v43, %v1593_v40  ;;  %v1658_v45 = vpop.f32.mrb[17].mxu1  ;;  %v1596_v46 = vpop.f32.mrb[18].mxu0  ;;  %v430_v40 = vld [vmem:[#allocation2 + $0x70] sm:$0xff] }
 0x14f   : > { %1097 = vst [vmem:[#allocation2 + $0x38] sm:$0xff] %v1081_v41  ;;  %v1659_v47 = vadd.f32 %v1658_v45, %v1657_v42  ;;  %v1660_v48 = vpop.f32.mrb[18].mxu1  ;;  %v1597_v49 = vpop.f32.mrb[19].mxu0  ;;  %v431_v45 = vld [vmem:[#allocation2 + $0x78] sm:$0xff] }
 0x150   : > { %v1598_v51 = vadd.f32 %v1597_v49, %v1596_v46  ;;  %v1661_v52 = vpop.f32.mrb[19].mxu1  ;;  %v1110_v49 = vld [vmem:[#allocation2] sm:$0xff] (!%p1467_p11) }
 0x151   : > { %v1044_v53 = vadd.f32 %v1659_v47, %v1595_v44  ;;  %v1662_v54 = vadd.f32 %v1661_v52, %v1660_v48 }
 0x153   : > { %v1082_v56 = vadd.f32 %v1044_v53, %v424_v50  ;;  %v1047_v57 = vadd.f32 %v1662_v54, %v1598_v51  ;;  %v1111_v50 = vld [vmem:[#allocation2 + $0x8] sm:$0xff] (!%p1467_p11)  ;;  %v2059_v51 = vld [vmem:[%s2166_s2] ss:$0 sm:$0xff] (!%p1467_p11) }
 0x154   : > { %v1599_v58 = vpop.f32.mrb[20].mxu0  ;;  %v1133_v52 = vadd.f32 (!%p1467_p11), %v2059_v51, %v1110_v49  ;;  %v1134_v53 = vadd.f32 (!%p1467_p11), %v2059_v51, %v1111_v50  ;;  %v1149_v54 = vld [vmem:[%s2167_s3] sm:$0xff] (!%p1467_p11) }
 0x155   : > { %1098 = vst [vmem:[#allocation2 + $0x40] sm:$0xff] %v1082_v56  ;;  %v1083_v59 = vadd.f32 %v1047_v57, %v425_v55  ;;  %v1663_v60 = vpop.f32.mrb[20].mxu1  ;;  %v1600_v61 = vpop.f32.mrb[21].mxu0  ;;  %v1150_v55 = vld [vmem:[%s2167_s3 + $0x8] sm:$0xff] (!%p1467_p11)  ;;  %v1112_v56 = vld [vmem:[#allocation2 + $0x10] sm:$0xff] (!%p1467_p11)  ;;  %v1113_v57 = vld [vmem:[#allocation2 + $0x18] sm:$0xff] (!%p1467_p11) }
 0x156   : > { %v1601_v62 = vadd.f32 %v1600_v61, %v1599_v58  ;;  %v1664_v63 = vpop.f32.mrb[21].mxu1  ;;  %v1602_v0 = vpop.f32.mrb[22].mxu0  ;;  %v1135_v58 = vadd.f32 (!%p1467_p11), %v2059_v51, %v1112_v56  ;;  %v1165_v61 = vadd.f32 (!%p1467_p11), %v1149_v54, %v1133_v52 }
 0x157   : > { %1099 = vst [vmem:[#allocation2 + $0x48] sm:$0xff] %v1083_v59  ;;  %v1665_v1 = vadd.f32 %v1664_v63, %v1663_v60  ;;  %v1666_v2 = vpop.f32.mrb[22].mxu1  ;;  %v1603_v3 = vpop.f32.mrb[23].mxu0  ;;  %v1151_v59 = vld [vmem:[%s2167_s3 + $0x10] sm:$0xff] (!%p1467_p11)  ;;  %v1152_v60 = vld [vmem:[%s2167_s3 + $0x18] sm:$0xff] (!%p1467_p11)  ;;  %v1136_v63 = vadd.f32 (!%p1467_p11), %v2059_v51, %v1113_v57 }
 0x158   : > { %v1604_v5 = vadd.f32 %v1603_v3, %v1602_v0  ;;  %v1667_v6 = vpop.f32.mrb[23].mxu1  ;;  %v1114_v0 = vld [vmem:[#allocation2 + $0x20] sm:$0xff] (!%p1467_p11)  ;;  %v1167_v3 = vadd.f32 (!%p1467_p11), %v1151_v59, %v1135_v58 }
 0x159   : > { %v1052_v7 = vadd.f32 %v1665_v1, %v1601_v62  ;;  %v1668_v8 = vadd.f32 %v1667_v6, %v1666_v2  ;;  %v1166_v62 = vadd.f32 (!%p1467_p11), %v1150_v55, %v1134_v53  ;;  %v1115_v1 = vld [vmem:[#allocation2 + $0x28] sm:$0xff] (!%p1467_p11)  ;;  %v1153_v2 = vld [vmem:[%s2167_s3 + $0x20] sm:$0xff] (!%p1467_p11) }
 0x15a   : > { %v1154_v6 = vld [vmem:[%s2167_s3 + $0x28] sm:$0xff] (!%p1467_p11) }
 0x15b   : > { %v1084_v10 = vadd.f32 %v1052_v7, %v426_v4  ;;  %v1055_v11 = vadd.f32 %v1668_v8, %v1604_v5  ;;  %v1137_v4 = vadd.f32 (!%p1467_p11), %v2059_v51, %v1114_v0  ;;  %v1138_v5 = vadd.f32 (!%p1467_p11), %v2059_v51, %v1115_v1  ;;  %v1116_v7 = vld [vmem:[#allocation2 + $0x30] sm:$0xff] (!%p1467_p11)  ;;  %v1117_v8 = vld [vmem:[#allocation2 + $0x38] sm:$0xff] (!%p1467_p11) }
 0x15c   : > { %v1605_v12 = vpop.f32.mrb[24].mxu0 }
 0x15d   : > { %1100 = vst [vmem:[#allocation2 + $0x50] sm:$0xff] %v1084_v10  ;;  %v1085_v13 = vadd.f32 %v1055_v11, %v427_v9  ;;  %v1669_v14 = vpop.f32.mrb[24].mxu1  ;;  %v1606_v15 = vpop.f32.mrb[25].mxu0  ;;  %v1509_v9 = vpack.c.bf16 (!%p1467_p11), %v1166_v62, %v1165_v61  ;;  %v1168_v10 = vadd.f32 (!%p1467_p11), %v1152_v60, %v1136_v63  ;;  %v1139_v11 = vadd.f32 (!%p1467_p11), %v2059_v51, %v1116_v7 }
 0x15e   : > { %v1607_v16 = vadd.f32 %v1606_v15, %v1605_v12  ;;  %v1670_v17 = vpop.f32.mrb[25].mxu1  ;;  %v1608_v18 = vpop.f32.mrb[26].mxu0  ;;  %v1140_v12 = vadd.f32 (!%p1467_p11), %v2059_v51, %v1117_v8  ;;  %v1118_v15 = vld [vmem:[#allocation2 + $0x40] sm:$0xff] (!%p1467_p11) }
 0x15f   : > { %1101 = vst [vmem:[#allocation2 + $0x58] sm:$0xff] %v1085_v13  ;;  %v1671_v19 = vadd.f32 %v1670_v17, %v1669_v14  ;;  %v1672_v20 = vpop.f32.mrb[26].mxu1  ;;  %v1609_v21 = vpop.f32.mrb[27].mxu0  ;;  %v1155_v13 = vld [vmem:[%s2167_s3 + $0x30] sm:$0xff] (!%p1467_p11)  ;;  %v1156_v14 = vld [vmem:[%s2167_s3 + $0x38] sm:$0xff] (!%p1467_p11)  ;;  %v1170_v17 = vadd.f32 (!%p1467_p11), %v1154_v6, %v1138_v5  ;;  %1510 = vst [vmem:[%s2168_s4] sm:$0xff] (!%p1467_p11), %v1509_v9  }
 0x160   : > { %v1610_v23 = vadd.f32 %v1609_v21, %v1608_v18  ;;  %v1673_v24 = vpop.f32.mrb[27].mxu1  ;;  %v1119_v18 = vld [vmem:[#allocation2 + $0x48] sm:$0xff] (!%p1467_p11) }
 0x161   : > { %v1060_v25 = vadd.f32 %v1671_v19, %v1607_v16  ;;  %v1674_v26 = vadd.f32 %v1673_v24, %v1672_v20  ;;  %v1169_v16 = vadd.f32 (!%p1467_p11), %v1153_v2, %v1137_v4  ;;  %v1141_v19 = vadd.f32 (!%p1467_p11), %v2059_v51, %v1118_v15  ;;  %v1157_v20 = vld [vmem:[%s2167_s3 + $0x40] sm:$0xff] (!%p1467_p11)  ;;  %v1158_v21 = vld [vmem:[%s2167_s3 + $0x48] sm:$0xff] (!%p1467_p11) }
 0x162   : > { %v1172_v24 = vadd.f32 (!%p1467_p11), %v1156_v14, %v1140_v12 }
 0x163   : > { %v1086_v28 = vadd.f32 %v1060_v25, %v428_v22  ;;  %v1063_v29 = vadd.f32 %v1674_v26, %v1610_v23  ;;  %v1514_v22 = vpack.c.bf16 (!%p1467_p11), %v1168_v10, %v1167_v3  ;;  %v1171_v23 = vadd.f32 (!%p1467_p11), %v1155_v13, %v1139_v11 }
 0x164   : > { %v1611_v30 = vpop.f32.mrb[28].mxu0  ;;  %v1142_v25 = vadd.f32 (!%p1467_p11), %v2059_v51, %v1119_v18  ;;  %v1120_v26 = vld [vmem:[#allocation2 + $0x50] sm:$0xff] (!%p1467_p11) }
 0x165   : > { %1102 = vst [vmem:[#allocation2 + $0x60] sm:$0xff] %v1086_v28  ;;  %v1087_v31 = vadd.f32 %v1063_v29, %v429_v27  ;;  %v1675_v32 = vpop.f32.mrb[28].mxu1  ;;  %v1612_v33 = vpop.f32.mrb[29].mxu0  ;;  %v1159_v28 = vld [vmem:[%s2167_s3 + $0x50] sm:$0xff] (!%p1467_p11)  ;;  %v1519_v29 = vpack.c.bf16 (!%p1467_p11), %v1170_v17, %v1169_v16  ;;  %1546 = vst [vmem:[%s2168_s4 + $0x8] sm:$0xff] (!%p1467_p11), %v1514_v22  }
 0x166   : > { %v1613_v34 = vadd.f32 %v1612_v33, %v1611_v30  ;;  %v1676_v35 = vpop.f32.mrb[29].mxu1  ;;  %v1614_v36 = vpop.f32.mrb[30].mxu0  ;;  %v1121_v27 = vld [vmem:[#allocation2 + $0x58] sm:$0xff] (!%p1467_p11)  ;;  %v1173_v30 = vadd.f32 (!%p1467_p11), %v1157_v20, %v1141_v19 }
 0x167   : > { %1103 = vst [vmem:[#allocation2 + $0x68] sm:$0xff] %v1087_v31  ;;  %v1677_v37 = vadd.f32 %v1676_v35, %v1675_v32  ;;  %v1678_v38 = vpop.f32.mrb[30].mxu1  ;;  %v1615_v39 = vpop.f32.mrb[31].mxu0  ;;  %v1143_v31 = vadd.f32 (!%p1467_p11), %v2059_v51, %v1120_v26  ;;  %v1144_v32 = vadd.f32 (!%p1467_p11), %v2059_v51, %v1121_v27  ;;  %v1160_v33 = vld [vmem:[%s2167_s3 + $0x58] sm:$0xff] (!%p1467_p11)  ;;  %1547 = vst [vmem:[%s2168_s4 + $0x10] sm:$0xff] (!%p1467_p11), %v1519_v29  }
 0x168   : > { %v1616_v41 = vadd.f32 %v1615_v39, %v1614_v36  ;;  %v1679_v42 = vpop.f32.mrb[31].mxu1  ;;  %v1524_v36 = vpack.c.bf16 (!%p1467_p11), %v1172_v24, %v1171_v23 }
 0x169   : > { %v1068_v43 = vadd.f32 %v1677_v37, %v1613_v34  ;;  %v1680_v44 = vadd.f32 %v1679_v42, %v1678_v38  ;;  %1109 = sbr.rel (%p1467_p11) target bundleno = 382 (0x17e), region = 67  ;;  %v1174_v37 = vadd.f32 (!%p1467_p11), %v1158_v21, %v1142_v25 }
 0x16a   : > { %1548 = vst [vmem:[%s2168_s4 + $0x18] sm:$0xff] (!%p1467_p11), %v1524_v36  }
 0x16b   : > { %v1088_v46 = vadd.f32 %v1068_v43, %v430_v40  ;;  %v1071_v47 = vadd.f32 %v1680_v44, %v1616_v41  ;;  %v1161_v40 = vld [vmem:[%s2167_s3 + $0x60] sm:$0xff] (!%p1467_p11)  ;;  %v1162_v41 = vld [vmem:[%s2167_s3 + $0x68] sm:$0xff] (!%p1467_p11)  ;;  %v1175_v43 = vadd.f32 (!%p1467_p11), %v1159_v28, %v1143_v31  ;;  %v1176_v44 = vadd.f32 (!%p1467_p11), %v1160_v33, %v1144_v32 }
 0x16c   : > { %v1122_v34 = vld [vmem:[#allocation2 + $0x60] sm:$0xff] (!%p1467_p11)  ;;  %v1529_v49 = vpack.c.bf16 (!%p1467_p11), %v1174_v37, %v1173_v30 }
 0x16d   : > { %1104 = vst [vmem:[#allocation2 + $0x70] sm:$0xff] %v1088_v46  ;;  %v1089_v48 = vadd.f32 %v1071_v47, %v431_v45  ;;  %v1145_v38 = vadd.f32 (!%p1467_p11), %v2059_v51, %v1122_v34  ;;  %v1163_v47 = vld [vmem:[%s2167_s3 + $0x70] sm:$0xff] (!%p1467_p11)  ;;  %v1534_v54 = vpack.c.bf16 (!%p1467_p11), %v1176_v44, %v1175_v43 }
 0x16e   : > { %v1123_v35 = vld [vmem:[#allocation2 + $0x68] sm:$0xff] (!%p1467_p11)  ;;  %1549 = vst [vmem:[%s2168_s4 + $0x20] sm:$0xff] (!%p1467_p11), %v1529_v49  }
 0x16f   : > { %1105 = vst [vmem:[#allocation2 + $0x78] sm:$0xff] %v1089_v48  ;;  %v1146_v39 = vadd.f32 (!%p1467_p11), %v2059_v51, %v1123_v35  ;;  %v1164_v48 = vld [vmem:[%s2167_s3 + $0x78] sm:$0xff] (!%p1467_p11)  ;;  %v1177_v50 = vadd.f32 (!%p1467_p11), %v1161_v40, %v1145_v38  ;;  %1550 = vst [vmem:[%s2168_s4 + $0x28] sm:$0xff] (!%p1467_p11), %v1534_v54  }
 0x171   : > { %v1178_v52 = vadd.f32 %v1162_v41, %v1146_v39 }
 0x173   : > { %v1539_v56 = vpack.c.bf16 %v1178_v52, %v1177_v50 }
 0x174   : > { %v1124_v42 = vld [vmem:[#allocation2 + $0x70] sm:$0xff] }
 0x175   : > { %v1147_v46 = vadd.f32 %v2059_v51, %v1124_v42  ;;  %1551 = vst [vmem:[%s2168_s4 + $0x30] sm:$0xff] %v1539_v56  }
 0x176   : > { %v1125_v45 = vld [vmem:[#allocation2 + $0x78] sm:$0xff] }
 0x177   : > { %v1148_v53 = vadd.f32 %v2059_v51, %v1125_v45  ;;  %v1179_v55 = vadd.f32 %v1163_v47, %v1147_v46 }
 0x179   : > { %v1180_v57 = vadd.f32 %v1164_v48, %v1148_v53 }
 0x17b   : > { %v1544_v58 = vpack.c.bf16 %v1180_v57, %v1179_v55 }
 0x17d   : > { %1552 = vst [vmem:[%s2168_s4 + $0x38] sm:$0xff] %v1544_v58  }
 0x17e PF: > { %s14_s19 = sadd.s32 1, %s1840_s19   ;;  %s2169_s15 = smov %s1828_s16 }
 0x17f   : > { %p11_p12 = scmp.ge.s32.totalorder %s14_s19, 4   ;;  %s2170_s16 = smov %s1903_s23 }
 0x180   : > { %s2171_s17 = smov %s1836_s18  ;;  %s2172_s18 = smov %s2174_s20 }
 0x181   :  { %13 = sbr.rel (!%p11_p12) target bundleno = 3 (0x3), region = 111 }

// kernel: simple_video_generator.25
= control target key start
LH: loop header
LB: loop body
LE: loop exit
PB: predicated region body
PF: predicated region fallthrough
CT: control target
= control target key end

     0   :  { %s2641_s12 = smov 0   ;;  %s2643_s13 = smov 0   ;;  %s3022_s0 = inlined_call_operand.vmem [shape: bf16[512,1024], index: 0, kind: input, shape index: {}]   ;;  %s3023_s1 = inlined_call_operand.vmem [shape: bf16[1024,128], index: 1, kind: input, shape index: {}]   ;;  %s3024_s2 = inlined_call_operand.vmem [shape: f32[1,128], index: 2, kind: input, shape index: {}]   ;;  %s3025_s3 = inlined_call_operand.vmem [shape: bf16[512,128], index: 3, kind: output, shape index: {}]  }
   0x1   :  { %s2645_s14 = smov 0   ;;  %s2647_s15 = smov 0  }
   0x2   :  { %s2649_s16 = smov 0   ;;  %s2651_s17 = smov 0  }
   0x3   :  { %s2653_s18 = smov 0  }
   0x4 LB: > { %s25_s19 = sadd.s32 1, %s2610_s16  ;;  %s32_s20 = sadd.s32 1, %s2614_s17  ;;  %s2618_s18 = sphi %s2653_s18, %s13_s18   ;;  %s2614_s17 = sphi %s2651_s17, %s3031_s17   ;;  %s2610_s16 = sphi %s2649_s16, %s3030_s16   ;;  %s2606_s15 = sphi %s2647_s15, %s3029_s15   ;;  %s2602_s14 = sphi %s2645_s14, %s3028_s14   ;;  %s2598_s13 = sphi %s2643_s13, %s3027_s13   ;;  %s2594_s12 = sphi %s2641_s12, %s3026_s12  }
   0x5   : > { %p26_p0 = scmp.ge.s32.totalorder %s25_s19, 2  ;;  %p48_p1 = scmp.ne.s32.totalorder %s2598_s13, %s2594_s12 }
   0x6   : > { %p49_p2 = scmp.eq.s32.totalorder %s2618_s18, 0  ;;  %s41_s24 = sadd.s32 1, %s2598_s13 }
   0x7   : > { %s3033_s19 = smov (%p26_p0, %s25_s19), 0  ;;  %s3035_s20 = smov (!%p26_p0, %s32_s20), %s2614_s17 }
   0x8   : > { %p50_p3 = por %p49_p2, %p48_p1  ;;  %p34_p4 = scmp.ge.s32.totalorder %s3035_s20, 2 }
   0x9   : > { %s37_s21 = ssub.s32 %s2610_s16, %s3033_s19  ;;  %p1882_p6 = scmp.ge.s32.totalorder %s2618_s18, 4 }
   0xa   : > { %s3037_s20 = smov (%p34_p4, %s3035_s20), 0 }
   0xb   : > { %s36_s22 = ssub.s32 %s2614_s17, %s3037_s20  ;;  %162 = sbr.rel (%p1882_p6) target bundleno = 57 (0x39), region = 20 }
   0xc   : > { %s38_s23 = sor.u32 %s37_s21, %s36_s22 }
   0xd   : > { %p39_p5 = scmp.eq.s32.totalorder %s38_s23, 0 }
   0xf   : > { %s2692_s25 = scalar_select %p39_p5, %s2598_s13, %s41_s24  }
  0x12   : > { %165 = sbr.rel (!%p50_p3) target bundleno = 57 (0x39), region = 24  ;;  %s167_s26 = sand.u32 (%p50_p3), 1, %s2598_s13  }
  0x13   : > { %s1885_s27 = sshll.u32 (%p50_p3), %s2610_s16, 2  ;;  %s1883_s28 = sshll.u32 (%p50_p3), %s167_s26, 9 }
  0x14   : > { %s2027_s29 = sshll.u32 (%p50_p3), %s2614_s17, 8  ;;  %s2706_s8 = scalar_lea.vmem (%p50_p3), [#allocation3], %s1883_s28 }
  0x15   : > { %s173_s30 = sadd.s32 (%p50_p3), %s2027_s29, %s1885_s27 }
  0x16   : > { %s1887_s4 = sshll.u32 (%p50_p3), %s173_s30, 2 }
  0x17   : > { %s2701_s7 = scalar_lea.vmem (%p50_p3), %s3022_s0, %s1887_s4 }
  0x18   : > { %v188_v0 = vld [vmem:[%s2701_s7] sm:$0xff] (%p50_p3)  ;;  %v190_v1 = vld [vmem:[%s2701_s7 + $0x8] sm:$0xff] (%p50_p3) }
  0x19   : > { %v192_v2 = vld [vmem:[%s2701_s7 + $0x20] sm:$0xff]  ;;  %189 = vst [vmem:[%s2706_s8] sm:$0xff] %v188_v0  ;;  %191 = vst [vmem:[%s2706_s8 + $0x8] sm:$0xff] %v190_v1  ;;  %v194_v3 = vld [vmem:[%s2701_s7 + $0x28] sm:$0xff] }
  0x1a   : > { %193 = vst [vmem:[%s2706_s8 + $0x10] sm:$0xff] %v192_v2  ;;  %v196_v4 = vld [vmem:[%s2701_s7 + $0x40] sm:$0xff]  ;;  %v198_v5 = vld [vmem:[%s2701_s7 + $0x48] sm:$0xff]  ;;  %195 = vst [vmem:[%s2706_s8 + $0x18] sm:$0xff] %v194_v3 }
  0x1b   : > { %197 = vst [vmem:[%s2706_s8 + $0x20] sm:$0xff] %v196_v4  ;;  %199 = vst [vmem:[%s2706_s8 + $0x28] sm:$0xff] %v198_v5  ;;  %v200_v6 = vld [vmem:[%s2701_s7 + $0x60] sm:$0xff]  ;;  %v202_v7 = vld [vmem:[%s2701_s7 + $0x68] sm:$0xff] }
  0x1c   : > { %v204_v8 = vld [vmem:[%s2701_s7 + $0x80] sm:$0xff]  ;;  %201 = vst [vmem:[%s2706_s8 + $0x30] sm:$0xff] %v200_v6  ;;  %203 = vst [vmem:[%s2706_s8 + $0x38] sm:$0xff] %v202_v7  ;;  %v206_v9 = vld [vmem:[%s2701_s7 + $0x88] sm:$0xff] }
  0x1d   : > { %205 = vst [vmem:[%s2706_s8 + $0x40] sm:$0xff] %v204_v8  ;;  %v208_v10 = vld [vmem:[%s2701_s7 + $0xa0] sm:$0xff]  ;;  %v210_v11 = vld [vmem:[%s2701_s7 + $0xa8] sm:$0xff]  ;;  %207 = vst [vmem:[%s2706_s8 + $0x48] sm:$0xff] %v206_v9 }
  0x1e   : > { %209 = vst [vmem:[%s2706_s8 + $0x50] sm:$0xff] %v208_v10  ;;  %211 = vst [vmem:[%s2706_s8 + $0x58] sm:$0xff] %v210_v11  ;;  %v212_v12 = vld [vmem:[%s2701_s7 + $0xc0] sm:$0xff]  ;;  %v214_v13 = vld [vmem:[%s2701_s7 + $0xc8] sm:$0xff] }
  0x1f   : > { %v216_v14 = vld [vmem:[%s2701_s7 + $0xe0] sm:$0xff]  ;;  %213 = vst [vmem:[%s2706_s8 + $0x60] sm:$0xff] %v212_v12  ;;  %215 = vst [vmem:[%s2706_s8 + $0x68] sm:$0xff] %v214_v13  ;;  %v218_v15 = vld [vmem:[%s2701_s7 + $0xe8] sm:$0xff] }
  0x20   : > { %217 = vst [vmem:[%s2706_s8 + $0x70] sm:$0xff] %v216_v14  ;;  %v220_v16 = vld [vmem:[%s2701_s7 + $0x100] sm:$0xff]  ;;  %v222_v17 = vld [vmem:[%s2701_s7 + $0x108] sm:$0xff]  ;;  %219 = vst [vmem:[%s2706_s8 + $0x78] sm:$0xff] %v218_v15 }
  0x21   : > { %221 = vst [vmem:[%s2706_s8 + $0x80] sm:$0xff] %v220_v16  ;;  %223 = vst [vmem:[%s2706_s8 + $0x88] sm:$0xff] %v222_v17  ;;  %v224_v18 = vld [vmem:[%s2701_s7 + $0x120] sm:$0xff]  ;;  %v226_v19 = vld [vmem:[%s2701_s7 + $0x128] sm:$0xff] }
  0x22   : > { %v228_v20 = vld [vmem:[%s2701_s7 + $0x140] sm:$0xff]  ;;  %225 = vst [vmem:[%s2706_s8 + $0x90] sm:$0xff] %v224_v18  ;;  %227 = vst [vmem:[%s2706_s8 + $0x98] sm:$0xff] %v226_v19  ;;  %v230_v21 = vld [vmem:[%s2701_s7 + $0x148] sm:$0xff] }
  0x23   : > { %229 = vst [vmem:[%s2706_s8 + $0xa0] sm:$0xff] %v228_v20  ;;  %v232_v22 = vld [vmem:[%s2701_s7 + $0x160] sm:$0xff]  ;;  %v234_v23 = vld [vmem:[%s2701_s7 + $0x168] sm:$0xff]  ;;  %231 = vst [vmem:[%s2706_s8 + $0xa8] sm:$0xff] %v230_v21 }
  0x24   : > { %233 = vst [vmem:[%s2706_s8 + $0xb0] sm:$0xff] %v232_v22  ;;  %235 = vst [vmem:[%s2706_s8 + $0xb8] sm:$0xff] %v234_v23  ;;  %v236_v24 = vld [vmem:[%s2701_s7 + $0x180] sm:$0xff]  ;;  %v238_v25 = vld [vmem:[%s2701_s7 + $0x188] sm:$0xff] }
  0x25   : > { %v240_v26 = vld [vmem:[%s2701_s7 + $0x1a0] sm:$0xff]  ;;  %237 = vst [vmem:[%s2706_s8 + $0xc0] sm:$0xff] %v236_v24  ;;  %239 = vst [vmem:[%s2706_s8 + $0xc8] sm:$0xff] %v238_v25  ;;  %v242_v27 = vld [vmem:[%s2701_s7 + $0x1a8] sm:$0xff] }
  0x26   : > { %241 = vst [vmem:[%s2706_s8 + $0xd0] sm:$0xff] %v240_v26  ;;  %v244_v28 = vld [vmem:[%s2701_s7 + $0x1c0] sm:$0xff]  ;;  %v246_v29 = vld [vmem:[%s2701_s7 + $0x1c8] sm:$0xff]  ;;  %243 = vst [vmem:[%s2706_s8 + $0xd8] sm:$0xff] %v242_v27 }
  0x27   : > { %245 = vst [vmem:[%s2706_s8 + $0xe0] sm:$0xff] %v244_v28  ;;  %247 = vst [vmem:[%s2706_s8 + $0xe8] sm:$0xff] %v246_v29  ;;  %v248_v30 = vld [vmem:[%s2701_s7 + $0x1e0] sm:$0xff]  ;;  %v250_v31 = vld [vmem:[%s2701_s7 + $0x1e8] sm:$0xff] }
  0x28   : > { %v252_v32 = vld [vmem:[%s2701_s7 + $0x200] sm:$0xff]  ;;  %249 = vst [vmem:[%s2706_s8 + $0xf0] sm:$0xff] %v248_v30  ;;  %251 = vst [vmem:[%s2706_s8 + $0xf8] sm:$0xff] %v250_v31  ;;  %v254_v33 = vld [vmem:[%s2701_s7 + $0x208] sm:$0xff] }
  0x29   : > { %253 = vst [vmem:[%s2706_s8 + $0x100] sm:$0xff] %v252_v32  ;;  %v256_v34 = vld [vmem:[%s2701_s7 + $0x220] sm:$0xff]  ;;  %v258_v35 = vld [vmem:[%s2701_s7 + $0x228] sm:$0xff]  ;;  %255 = vst [vmem:[%s2706_s8 + $0x108] sm:$0xff] %v254_v33 }
  0x2a   : > { %257 = vst [vmem:[%s2706_s8 + $0x110] sm:$0xff] %v256_v34  ;;  %259 = vst [vmem:[%s2706_s8 + $0x118] sm:$0xff] %v258_v35  ;;  %v260_v36 = vld [vmem:[%s2701_s7 + $0x240] sm:$0xff]  ;;  %v262_v37 = vld [vmem:[%s2701_s7 + $0x248] sm:$0xff] }
  0x2b   : > { %v264_v38 = vld [vmem:[%s2701_s7 + $0x260] sm:$0xff]  ;;  %261 = vst [vmem:[%s2706_s8 + $0x120] sm:$0xff] %v260_v36  ;;  %263 = vst [vmem:[%s2706_s8 + $0x128] sm:$0xff] %v262_v37  ;;  %v266_v39 = vld [vmem:[%s2701_s7 + $0x268] sm:$0xff] }
  0x2c   : > { %265 = vst [vmem:[%s2706_s8 + $0x130] sm:$0xff] %v264_v38  ;;  %v268_v40 = vld [vmem:[%s2701_s7 + $0x280] sm:$0xff]  ;;  %v270_v41 = vld [vmem:[%s2701_s7 + $0x288] sm:$0xff]  ;;  %267 = vst [vmem:[%s2706_s8 + $0x138] sm:$0xff] %v266_v39 }
  0x2d   : > { %269 = vst [vmem:[%s2706_s8 + $0x140] sm:$0xff] %v268_v40  ;;  %271 = vst [vmem:[%s2706_s8 + $0x148] sm:$0xff] %v270_v41  ;;  %v272_v42 = vld [vmem:[%s2701_s7 + $0x2a0] sm:$0xff]  ;;  %v274_v43 = vld [vmem:[%s2701_s7 + $0x2a8] sm:$0xff] }
  0x2e   : > { %v276_v44 = vld [vmem:[%s2701_s7 + $0x2c0] sm:$0xff]  ;;  %273 = vst [vmem:[%s2706_s8 + $0x150] sm:$0xff] %v272_v42  ;;  %275 = vst [vmem:[%s2706_s8 + $0x158] sm:$0xff] %v274_v43  ;;  %v278_v45 = vld [vmem:[%s2701_s7 + $0x2c8] sm:$0xff] }
  0x2f   : > { %277 = vst [vmem:[%s2706_s8 + $0x160] sm:$0xff] %v276_v44  ;;  %v280_v46 = vld [vmem:[%s2701_s7 + $0x2e0] sm:$0xff]  ;;  %v282_v47 = vld [vmem:[%s2701_s7 + $0x2e8] sm:$0xff]  ;;  %279 = vst [vmem:[%s2706_s8 + $0x168] sm:$0xff] %v278_v45 }
  0x30   : > { %281 = vst [vmem:[%s2706_s8 + $0x170] sm:$0xff] %v280_v46  ;;  %283 = vst [vmem:[%s2706_s8 + $0x178] sm:$0xff] %v282_v47  ;;  %v284_v48 = vld [vmem:[%s2701_s7 + $0x300] sm:$0xff]  ;;  %v286_v49 = vld [vmem:[%s2701_s7 + $0x308] sm:$0xff] }
  0x31   : > { %v288_v50 = vld [vmem:[%s2701_s7 + $0x320] sm:$0xff]  ;;  %285 = vst [vmem:[%s2706_s8 + $0x180] sm:$0xff] %v284_v48  ;;  %287 = vst [vmem:[%s2706_s8 + $0x188] sm:$0xff] %v286_v49  ;;  %v290_v51 = vld [vmem:[%s2701_s7 + $0x328] sm:$0xff] }
  0x32   : > { %289 = vst [vmem:[%s2706_s8 + $0x190] sm:$0xff] %v288_v50  ;;  %v292_v52 = vld [vmem:[%s2701_s7 + $0x340] sm:$0xff]  ;;  %v294_v53 = vld [vmem:[%s2701_s7 + $0x348] sm:$0xff]  ;;  %291 = vst [vmem:[%s2706_s8 + $0x198] sm:$0xff] %v290_v51 }
  0x33   : > { %293 = vst [vmem:[%s2706_s8 + $0x1a0] sm:$0xff] %v292_v52  ;;  %295 = vst [vmem:[%s2706_s8 + $0x1a8] sm:$0xff] %v294_v53  ;;  %v296_v54 = vld [vmem:[%s2701_s7 + $0x360] sm:$0xff]  ;;  %v298_v55 = vld [vmem:[%s2701_s7 + $0x368] sm:$0xff] }
  0x34   : > { %v300_v56 = vld [vmem:[%s2701_s7 + $0x380] sm:$0xff]  ;;  %297 = vst [vmem:[%s2706_s8 + $0x1b0] sm:$0xff] %v296_v54  ;;  %299 = vst [vmem:[%s2706_s8 + $0x1b8] sm:$0xff] %v298_v55  ;;  %v302_v57 = vld [vmem:[%s2701_s7 + $0x388] sm:$0xff] }
  0x35   : > { %301 = vst [vmem:[%s2706_s8 + $0x1c0] sm:$0xff] %v300_v56  ;;  %v304_v58 = vld [vmem:[%s2701_s7 + $0x3a0] sm:$0xff]  ;;  %v306_v59 = vld [vmem:[%s2701_s7 + $0x3a8] sm:$0xff]  ;;  %303 = vst [vmem:[%s2706_s8 + $0x1c8] sm:$0xff] %v302_v57 }
  0x36   : > { %305 = vst [vmem:[%s2706_s8 + $0x1d0] sm:$0xff] %v304_v58  ;;  %307 = vst [vmem:[%s2706_s8 + $0x1d8] sm:$0xff] %v306_v59  ;;  %v308_v60 = vld [vmem:[%s2701_s7 + $0x3c0] sm:$0xff]  ;;  %v310_v61 = vld [vmem:[%s2701_s7 + $0x3c8] sm:$0xff] }
  0x37   : > { %v312_v62 = vld [vmem:[%s2701_s7 + $0x3e0] sm:$0xff]  ;;  %309 = vst [vmem:[%s2706_s8 + $0x1e0] sm:$0xff] %v308_v60  ;;  %311 = vst [vmem:[%s2706_s8 + $0x1e8] sm:$0xff] %v310_v61  ;;  %v314_v63 = vld [vmem:[%s2701_s7 + $0x3e8] sm:$0xff] }
  0x38   : > { %313 = vst [vmem:[%s2706_s8 + $0x1f0] sm:$0xff] %v312_v62  ;;  %315 = vst [vmem:[%s2706_s8 + $0x1f8] sm:$0xff] %v314_v63 }
  0x39 PF: > { %p1888_p7 = scmp.ge.s32.totalorder %s2618_s18, 1  ;;  %p332_p8 = scmp.lt.s32.totalorder %s2618_s18, 5 }
  0x3b   : > { %p333_p9 = pnand %p1888_p7, %p332_p8 }
  0x3c   : > { %s339_s9 = sand.u32 (!%p333_p9), 1, %s2594_s12   ;;  %s1890_s10 = sshll.u32 (!%p333_p9), %s2602_s14, 6 }
  0x3d   : > { %336 = sbr.rel (%p333_p9) target bundleno = 477 (0x1dd), region = 51  ;;  %s1889_s11 = sshll.u32 (!%p333_p9), %s339_s9, 9 }
  0x3e   : > { %p379_p10 = scmp.lt.s32.totalorder (!%p333_p9), %s1890_s10, 127  ;;  %s1892_s21 = sshll.u32 (!%p333_p9), %s2606_s15, 5 }
  0x3f   : > { %p391_p11 = scmp.lt.s32.totalorder (!%p333_p9), %s1892_s21, 63  ;;  %s2848_s12 = scalar_lea.vmem (!%p333_p9), [#allocation3], %s1889_s11 }
  0x40   : > { %p1894_p12 = scmp.ne.s32.totalorder (!%p333_p9), %s2602_s14, 0 }
  0x44   : > { %s3039_s10 = smov (!%p379_p10, %s1890_s10), 127  ;;  %s3041_s21 = smov (!%p391_p11, %s1892_s21), 63 }
  0x45   : > { %s1891_s22 = sshll.u32 %s3039_s10, 2  ;;  %s1893_s27 = sshll.u32 %s3041_s21, 2  ;;  %v2620_v0 = vmov (!%p1894_p12), 0.0  }
  0x46   : > { %s2841_s26 = scalar_lea.vmem %s3023_s1, %s1891_s22  ;;  %s2846_s30 = scalar_lea.vmem %s3025_s3, %s1893_s27  ;;  %404 = vst [vmem:[#allocation2] sm:$0xff] (!%p1894_p12), %v2620_v0  ;;  %405 = vst [vmem:[#allocation2 + $0x8] sm:$0xff] (!%p1894_p12), %v2620_v0 }
  0x47   : > { %403 = sbr.rel (%p1894_p12) target bundleno = 86 (0x56), region = 59  ;;  %406 = vst [vmem:[#allocation2 + $0x10] sm:$0xff] (!%p1894_p12), %v2620_v0  ;;  %407 = vst [vmem:[#allocation2 + $0x18] sm:$0xff] (!%p1894_p12), %v2620_v0 }
  0x48   : > { %408 = vst [vmem:[#allocation2 + $0x20] sm:$0xff] (!%p1894_p12), %v2620_v0  ;;  %409 = vst [vmem:[#allocation2 + $0x28] sm:$0xff] (!%p1894_p12), %v2620_v0 }
  0x49   : > { %410 = vst [vmem:[#allocation2 + $0x30] sm:$0xff] (!%p1894_p12), %v2620_v0  ;;  %411 = vst [vmem:[#allocation2 + $0x38] sm:$0xff] (!%p1894_p12), %v2620_v0 }
  0x4a   : > { %412 = vst [vmem:[#allocation2 + $0x40] sm:$0xff] (!%p1894_p12), %v2620_v0  ;;  %413 = vst [vmem:[#allocation2 + $0x48] sm:$0xff] (!%p1894_p12), %v2620_v0 }
  0x4b   : > { %414 = vst [vmem:[#allocation2 + $0x50] sm:$0xff] (!%p1894_p12), %v2620_v0  ;;  %415 = vst [vmem:[#allocation2 + $0x58] sm:$0xff] (!%p1894_p12), %v2620_v0 }
  0x4c   : > { %416 = vst [vmem:[#allocation2 + $0x60] sm:$0xff] (!%p1894_p12), %v2620_v0  ;;  %417 = vst [vmem:[#allocation2 + $0x68] sm:$0xff] (!%p1894_p12), %v2620_v0 }
  0x4d   : > { %418 = vst [vmem:[#allocation2 + $0x70] sm:$0xff] (!%p1894_p12), %v2620_v0  ;;  %419 = vst [vmem:[#allocation2 + $0x78] sm:$0xff] (!%p1894_p12), %v2620_v0 }
  0x4e   : > { %420 = vst [vmem:[#allocation2 + $0x80] sm:$0xff] %v2620_v0  ;;  %421 = vst [vmem:[#allocation2 + $0x88] sm:$0xff] %v2620_v0 }
  0x4f   : > { %422 = vst [vmem:[#allocation2 + $0x90] sm:$0xff] %v2620_v0  ;;  %423 = vst [vmem:[#allocation2 + $0x98] sm:$0xff] %v2620_v0 }
  0x50   : > { %424 = vst [vmem:[#allocation2 + $0xa0] sm:$0xff] %v2620_v0  ;;  %425 = vst [vmem:[#allocation2 + $0xa8] sm:$0xff] %v2620_v0 }
  0x51   : > { %426 = vst [vmem:[#allocation2 + $0xb0] sm:$0xff] %v2620_v0  ;;  %427 = vst [vmem:[#allocation2 + $0xb8] sm:$0xff] %v2620_v0 }
  0x52   : > { %428 = vst [vmem:[#allocation2 + $0xc0] sm:$0xff] %v2620_v0  ;;  %429 = vst [vmem:[#allocation2 + $0xc8] sm:$0xff] %v2620_v0 }
  0x53   : > { %430 = vst [vmem:[#allocation2 + $0xd0] sm:$0xff] %v2620_v0  ;;  %431 = vst [vmem:[#allocation2 + $0xd8] sm:$0xff] %v2620_v0 }
  0x54   : > { %432 = vst [vmem:[#allocation2 + $0xe0] sm:$0xff] %v2620_v0  ;;  %433 = vst [vmem:[#allocation2 + $0xe8] sm:$0xff] %v2620_v0 }
  0x55   : > { %434 = vst [vmem:[#allocation2 + $0xf0] sm:$0xff] %v2620_v0  ;;  %435 = vst [vmem:[#allocation2 + $0xf8] sm:$0xff] %v2620_v0 }
  0x56 PF: > { %v2436_v1 = vld [vmem:[%s2841_s26 + $0x40] sm:$0xff]   ;;  %v2440_v5 = vld [vmem:[%s2841_s26 + $0x48] sm:$0xff]   ;;  %v2444_v9 = vld [vmem:[%s2841_s26 + $0x50] sm:$0xff]   ;;  %p1991_p13 = scmp.ne.s32.totalorder %s2602_s14, 1 }
  0x57   : > { %v2437_v2 = vld [vmem:[%s2841_s26 + $0xc0] sm:$0xff]   ;;  %2155 = vmatprep.subr.bf16.mxu0 %v2436_v1  ;;  %v2441_v6 = vld [vmem:[%s2841_s26 + $0xc8] sm:$0xff]   ;;  %v2445_v10 = vld [vmem:[%s2841_s26 + $0xd0] sm:$0xff]  }
  0x58   : > { %v2438_v3 = vld [vmem:[%s2841_s26] sm:$0xff]   ;;  %2267 = vmatprep.subr.bf16.mxu1 %v2437_v2  ;;  %v2442_v7 = vld [vmem:[%s2841_s26 + $0x8] sm:$0xff]   ;;  %v2446_v11 = vld [vmem:[%s2841_s26 + $0x10] sm:$0xff]  }
  0x59   : > { %v2439_v4 = vld [vmem:[%s2841_s26 + $0x80] sm:$0xff]   ;;  %2156 = vmatpush3.bf16.msra.mxu0 %v2438_v3  ;;  %v2443_v8 = vld [vmem:[%s2841_s26 + $0x88] sm:$0xff]   ;;  %v2447_v12 = vld [vmem:[%s2841_s26 + $0x90] sm:$0xff]  }
  0x5a   : > { %2268 = vmatpush3.bf16.msra.mxu1 %v2439_v4  ;;  %2157 = vmatprep.subr.bf16.mxu0 %v2440_v5  ;;  %v2448_v13 = vld [vmem:[%s2841_s26 + $0x58] sm:$0xff]   ;;  %v2452_v17 = vld [vmem:[%s2841_s26 + $0x60] sm:$0xff]   ;;  %v2456_v21 = vld [vmem:[%s2841_s26 + $0x68] sm:$0xff]  }
  0x5b   : > { %2269 = vmatprep.subr.bf16.mxu1 %v2441_v6  ;;  %v2449_v14 = vld [vmem:[%s2841_s26 + $0xd8] sm:$0xff]   ;;  %v2453_v18 = vld [vmem:[%s2841_s26 + $0xe0] sm:$0xff]   ;;  %v2457_v22 = vld [vmem:[%s2841_s26 + $0xe8] sm:$0xff]  }
  0x5c   : > { %v2450_v15 = vld [vmem:[%s2841_s26 + $0x18] sm:$0xff]   ;;  %v2454_v19 = vld [vmem:[%s2841_s26 + $0x20] sm:$0xff]   ;;  %v2458_v23 = vld [vmem:[%s2841_s26 + $0x28] sm:$0xff]  }
  0x5d   : > { %2158 = vmatpush3.bf16.msra.mxu0 %v2442_v7  ;;  %v2451_v16 = vld [vmem:[%s2841_s26 + $0x98] sm:$0xff]   ;;  %v2455_v20 = vld [vmem:[%s2841_s26 + $0xa0] sm:$0xff]   ;;  %v2459_v24 = vld [vmem:[%s2841_s26 + $0xa8] sm:$0xff]  }
  0x5e   : > { %2270 = vmatpush3.bf16.msra.mxu1 %v2443_v8  ;;  %2159 = vmatprep.subr.bf16.mxu0 %v2444_v9  ;;  %v2460_v25 = vld [vmem:[%s2841_s26 + $0x70] sm:$0xff]   ;;  %v2464_v29 = vld [vmem:[%s2841_s26 + $0x78] sm:$0xff]  }
  0x5f   : > { %2271 = vmatprep.subr.bf16.mxu1 %v2445_v10  ;;  %v2461_v26 = vld [vmem:[%s2841_s26 + $0xf0] sm:$0xff]   ;;  %v2465_v30 = vld [vmem:[%s2841_s26 + $0xf8] sm:$0xff]  }
  0x60   : > { %v2462_v27 = vld [vmem:[%s2841_s26 + $0x30] sm:$0xff]   ;;  %v2466_v31 = vld [vmem:[%s2841_s26 + $0x38] sm:$0xff]  }
  0x61   : > { %2160 = vmatpush3.bf16.msra.mxu0 %v2446_v11  ;;  %v2463_v28 = vld [vmem:[%s2841_s26 + $0xb0] sm:$0xff]   ;;  %v2467_v32 = vld [vmem:[%s2841_s26 + $0xb8] sm:$0xff]  }
  0x62   : > { %2272 = vmatpush3.bf16.msra.mxu1 %v2447_v12  ;;  %2161 = vmatprep.subr.bf16.mxu0 %v2448_v13  ;;  %v2468_v33 = vld [vmem:[%s2848_s12] ss:$16 sps:$4 sm:$0xff]   ;;  %v2470_v34 = vld [vmem:[%s2848_s12 + $0x4] ss:$16 sps:$4 sm:$0xff]   ;;  %v2471_v35 = vld [vmem:[%s2848_s12 + $0x8] ss:$16 sps:$4 sm:$0xff]  }
  0x63   : > { %2273 = vmatprep.subr.bf16.mxu1 %v2449_v14  ;;  %v2473_v36 = vld [vmem:[%s2848_s12 + $0xc] ss:$16 sps:$4 sm:$0xff]   ;;  %1140 = vmatprep.mubr.bf16.mxu0 %v2470_v34  ;;  %v2474_v37 = vld [vmem:[%s2848_s12 + $0x24] ss:$16 sps:$4 sm:$0xff]   ;;  %v2478_v39 = vld [vmem:[%s2848_s12 + $0x20] ss:$16 sps:$4 sm:$0xff]  }
  0x64   : > { %1301 = vmatprep.mubr.bf16.mxu1 %v2473_v36  ;;  %v2476_v38 = vld [vmem:[%s2848_s12 + $0x2c] ss:$16 sps:$4 sm:$0xff]   ;;  %v2479_v40 = vld [vmem:[%s2848_s12 + $0x28] ss:$16 sps:$4 sm:$0xff]   ;;  %v2480_v41 = vld [vmem:[%s2848_s12 + $0x44] ss:$16 sps:$4 sm:$0xff]  }
  0x65   : > { %2162 = vmatpush3.bf16.msra.mxu0 %v2450_v15  ;;  %v2482_v42 = vld [vmem:[%s2848_s12 + $0x4c] ss:$16 sps:$4 sm:$0xff]   ;;  %v2484_v43 = vld [vmem:[%s2848_s12 + $0x40] ss:$16 sps:$4 sm:$0xff]   ;;  %v2485_v44 = vld [vmem:[%s2848_s12 + $0x48] ss:$16 sps:$4 sm:$0xff]  }
  0x66   : > { %2274 = vmatpush3.bf16.msra.mxu1 %v2451_v16  ;;  %2163 = vmatprep.subr.bf16.mxu0 %v2452_v17  ;;  %v2486_v45 = vld [vmem:[%s2848_s12 + $0x64] ss:$16 sps:$4 sm:$0xff]   ;;  %v2488_v46 = vld [vmem:[%s2848_s12 + $0x6c] ss:$16 sps:$4 sm:$0xff]   ;;  %v2490_v47 = vld [vmem:[%s2848_s12 + $0x60] ss:$16 sps:$4 sm:$0xff]  }
  0x67   : > { %2275 = vmatprep.subr.bf16.mxu1 %v2453_v18  ;;  %v2491_v48 = vld [vmem:[%s2848_s12 + $0x68] ss:$16 sps:$4 sm:$0xff]   ;;  %v2492_v49 = vld [vmem:[%s2848_s12 + $0x84] ss:$16 sps:$4 sm:$0xff]   ;;  %v2494_v50 = vld [vmem:[%s2848_s12 + $0x8c] ss:$16 sps:$4 sm:$0xff]  }
  0x68   : > { %v2496_v51 = vld [vmem:[%s2848_s12 + $0x80] ss:$16 sps:$4 sm:$0xff]   ;;  %v2497_v52 = vld [vmem:[%s2848_s12 + $0x88] ss:$16 sps:$4 sm:$0xff]   ;;  %v2498_v53 = vld [vmem:[%s2848_s12 + $0xa4] ss:$16 sps:$4 sm:$0xff]  }
  0x69   : > { %2164 = vmatpush3.bf16.msra.mxu0 %v2454_v19  ;;  %v2500_v54 = vld [vmem:[%s2848_s12 + $0xac] ss:$16 sps:$4 sm:$0xff]   ;;  %v2502_v55 = vld [vmem:[%s2848_s12 + $0xa0] ss:$16 sps:$4 sm:$0xff]   ;;  %v2503_v56 = vld [vmem:[%s2848_s12 + $0xa8] ss:$16 sps:$4 sm:$0xff]  }
  0x6a   : > { %2276 = vmatpush3.bf16.msra.mxu1 %v2455_v20  ;;  %2165 = vmatprep.subr.bf16.mxu0 %v2456_v21  ;;  %v2504_v57 = vld [vmem:[%s2848_s12 + $0xc4] ss:$16 sps:$4 sm:$0xff]   ;;  %v2506_v58 = vld [vmem:[%s2848_s12 + $0xcc] ss:$16 sps:$4 sm:$0xff]   ;;  %v2508_v59 = vld [vmem:[%s2848_s12 + $0xc0] ss:$16 sps:$4 sm:$0xff]  }
  0x6b   : > { %2277 = vmatprep.subr.bf16.mxu1 %v2457_v22  ;;  %v2509_v60 = vld [vmem:[%s2848_s12 + $0xc8] ss:$16 sps:$4 sm:$0xff]   ;;  %v2510_v61 = vld [vmem:[%s2848_s12 + $0xe4] ss:$16 sps:$4 sm:$0xff]   ;;  %v2512_v62 = vld [vmem:[%s2848_s12 + $0xec] ss:$16 sps:$4 sm:$0xff]  }
  0x6c   : > { %v2514_v63 = vld [vmem:[%s2848_s12 + $0xe0] ss:$16 sps:$4 sm:$0xff]   ;;  %v2515_v0 = vld [vmem:[%s2848_s12 + $0xe8] ss:$16 sps:$4 sm:$0xff]   ;;  %v2516_v1 = vld [vmem:[%s2848_s12 + $0x104] ss:$16 sps:$4 sm:$0xff]  }
  0x6d   : > { %2166 = vmatpush3.bf16.msra.mxu0 %v2458_v23  ;;  %v2518_v2 = vld [vmem:[%s2848_s12 + $0x10c] ss:$16 sps:$4 sm:$0xff]   ;;  %v2520_v3 = vld [vmem:[%s2848_s12 + $0x100] ss:$16 sps:$4 sm:$0xff]   ;;  %v2521_v4 = vld [vmem:[%s2848_s12 + $0x108] ss:$16 sps:$4 sm:$0xff]  }
  0x6e   : > { %2278 = vmatpush3.bf16.msra.mxu1 %v2459_v24  ;;  %2167 = vmatprep.subr.bf16.mxu0 %v2460_v25  ;;  %v2522_v5 = vld [vmem:[%s2848_s12 + $0x124] ss:$16 sps:$4 sm:$0xff]   ;;  %v2524_v6 = vld [vmem:[%s2848_s12 + $0x12c] ss:$16 sps:$4 sm:$0xff]   ;;  %v2526_v7 = vld [vmem:[%s2848_s12 + $0x120] ss:$16 sps:$4 sm:$0xff]  }
  0x6f   : > { %2279 = vmatprep.subr.bf16.mxu1 %v2461_v26  ;;  %v2527_v8 = vld [vmem:[%s2848_s12 + $0x128] ss:$16 sps:$4 sm:$0xff]   ;;  %v2528_v9 = vld [vmem:[%s2848_s12 + $0x144] ss:$16 sps:$4 sm:$0xff]   ;;  %v2530_v10 = vld [vmem:[%s2848_s12 + $0x14c] ss:$16 sps:$4 sm:$0xff]  }
  0x70   : > { %v2532_v11 = vld [vmem:[%s2848_s12 + $0x140] ss:$16 sps:$4 sm:$0xff]   ;;  %v2533_v12 = vld [vmem:[%s2848_s12 + $0x148] ss:$16 sps:$4 sm:$0xff]   ;;  %v2534_v13 = vld [vmem:[%s2848_s12 + $0x164] ss:$16 sps:$4 sm:$0xff]  }
  0x71   : > { %2168 = vmatpush3.bf16.msra.mxu0 %v2462_v27  ;;  %v2536_v14 = vld [vmem:[%s2848_s12 + $0x16c] ss:$16 sps:$4 sm:$0xff]   ;;  %v2538_v15 = vld [vmem:[%s2848_s12 + $0x160] ss:$16 sps:$4 sm:$0xff]   ;;  %v2539_v16 = vld [vmem:[%s2848_s12 + $0x168] ss:$16 sps:$4 sm:$0xff]  }
  0x72   : > { %2280 = vmatpush3.bf16.msra.mxu1 %v2463_v28  ;;  %2169 = vmatprep.subr.bf16.mxu0 %v2464_v29  ;;  %v2540_v17 = vld [vmem:[%s2848_s12 + $0x184] ss:$16 sps:$4 sm:$0xff]   ;;  %v2542_v18 = vld [vmem:[%s2848_s12 + $0x18c] ss:$16 sps:$4 sm:$0xff]   ;;  %v2544_v19 = vld [vmem:[%s2848_s12 + $0x180] ss:$16 sps:$4 sm:$0xff]  }
  0x73   : > { %2281 = vmatprep.subr.bf16.mxu1 %v2465_v30  ;;  %v2545_v20 = vld [vmem:[%s2848_s12 + $0x188] ss:$16 sps:$4 sm:$0xff]   ;;  %v2546_v21 = vld [vmem:[%s2848_s12 + $0x1a4] ss:$16 sps:$4 sm:$0xff]   ;;  %v2548_v22 = vld [vmem:[%s2848_s12 + $0x1ac] ss:$16 sps:$4 sm:$0xff]  }
  0x74   : > { %v2550_v23 = vld [vmem:[%s2848_s12 + $0x1a0] ss:$16 sps:$4 sm:$0xff]   ;;  %v2551_v24 = vld [vmem:[%s2848_s12 + $0x1a8] ss:$16 sps:$4 sm:$0xff]   ;;  %v2552_v25 = vld [vmem:[%s2848_s12 + $0x1c4] ss:$16 sps:$4 sm:$0xff]  }
  0x75   : > { %2170 = vmatpush3.bf16.msra.mxu0 %v2466_v31  ;;  %v2554_v26 = vld [vmem:[%s2848_s12 + $0x1cc] ss:$16 sps:$4 sm:$0xff]   ;;  %v2556_v27 = vld [vmem:[%s2848_s12 + $0x1c0] ss:$16 sps:$4 sm:$0xff]   ;;  %v2557_v28 = vld [vmem:[%s2848_s12 + $0x1c8] ss:$16 sps:$4 sm:$0xff]  }
  0x76   : > { %2282 = vmatpush3.bf16.msra.mxu1 %v2467_v32  ;;  %v2558_v29 = vld [vmem:[%s2848_s12 + $0x1e4] ss:$16 sps:$4 sm:$0xff]   ;;  %v2560_v30 = vld [vmem:[%s2848_s12 + $0x1ec] ss:$16 sps:$4 sm:$0xff]   ;;  %v2562_v31 = vld [vmem:[%s2848_s12 + $0x1e0] ss:$16 sps:$4 sm:$0xff]  }
  0x77   : > { %v2563_v32 = vld [vmem:[%s2848_s12 + $0x1e8] ss:$16 sps:$4 sm:$0xff]  }
  0x78   : > { %1141 = vmatmul.mubr.bf16.vlgmr.msra.gmra.mrb[0].mxu0 %v2468_v33 }
  0x79   : > { %1302 = vmatmul.mubr.bf16.vlgmr.msra.gmra.mrb[0].mxu1 %v2471_v35  ;;  %1148 = vmatprep.mubr.bf16.mxu0 %v2474_v37 }
  0x7a   : > { %1309 = vmatprep.mubr.bf16.mxu1 %v2476_v38 }
  0x80   : > { %1149 = vmatmul.mubr.bf16.gmra.mrb[4].mxu0 %v2478_v39 }
  0x81   : > { %1310 = vmatmul.mubr.bf16.gmra.mrb[4].mxu1 %v2479_v40  ;;  %1156 = vmatprep.mubr.bf16.mxu0 %v2480_v41 }
  0x82   : > { %1317 = vmatprep.mubr.bf16.mxu1 %v2482_v42  ;;  %v436_v42 = vld [vmem:[#allocation2] sm:$0xff] }
  0x88   : > { %1157 = vmatmul.mubr.bf16.gmra.mrb[8].mxu0 %v2484_v43 }
  0x89   : > { %1318 = vmatmul.mubr.bf16.gmra.mrb[8].mxu1 %v2485_v44  ;;  %1164 = vmatprep.mubr.bf16.mxu0 %v2486_v45 }
  0x8a   : > { %1325 = vmatprep.mubr.bf16.mxu1 %v2488_v46 }
  0x90   : > { %1165 = vmatmul.mubr.bf16.gmra.mrb[12].mxu0 %v2490_v47  ;;  %v437_v47 = vld [vmem:[#allocation2 + $0x8] sm:$0xff] }
  0x91   : > { %1326 = vmatmul.mubr.bf16.gmra.mrb[12].mxu1 %v2491_v48  ;;  %1172 = vmatprep.mubr.bf16.mxu0 %v2492_v49 }
  0x92   : > { %1333 = vmatprep.mubr.bf16.mxu1 %v2494_v50 }
  0x98   : > { %1173 = vmatmul.mubr.bf16.gmra.mrb[16].mxu0 %v2496_v51 }
  0x99   : > { %1334 = vmatmul.mubr.bf16.gmra.mrb[16].mxu1 %v2497_v52  ;;  %1180 = vmatprep.mubr.bf16.mxu0 %v2498_v53 }
  0x9a   : > { %1341 = vmatprep.mubr.bf16.mxu1 %v2500_v54 }
  0xa0   : > { %1181 = vmatmul.mubr.bf16.gmra.mrb[20].mxu0 %v2502_v55 }
  0xa1   : > { %1342 = vmatmul.mubr.bf16.gmra.mrb[20].mxu1 %v2503_v56  ;;  %1188 = vmatprep.mubr.bf16.mxu0 %v2504_v57 }
  0xa2   : > { %1349 = vmatprep.mubr.bf16.mxu1 %v2506_v58 }
  0xa8   : > { %1189 = vmatmul.mubr.bf16.gmra.mrb[24].mxu0 %v2508_v59 }
  0xa9   : > { %1350 = vmatmul.mubr.bf16.gmra.mrb[24].mxu1 %v2509_v60  ;;  %1196 = vmatprep.mubr.bf16.mxu0 %v2510_v61  ;;  %v438_v60 = vld [vmem:[#allocation2 + $0x10] sm:$0xff] }
  0xaa   : > { %1357 = vmatprep.mubr.bf16.mxu1 %v2512_v62 }
  0xb0   : > { %1197 = vmatmul.mubr.bf16.gmra.mrb[28].mxu0 %v2514_v63 }
  0xb1   : > { %1358 = vmatmul.mubr.bf16.gmra.mrb[28].mxu1 %v2515_v0  ;;  %1204 = vmatprep.mubr.bf16.mxu0 %v2516_v1  ;;  %v439_v1 = vld [vmem:[#allocation2 + $0x18] sm:$0xff] }
  0xb2   : > { %1365 = vmatprep.mubr.bf16.mxu1 %v2518_v2 }
  0xb8   : > { %1205 = vmatmul.mubr.bf16.gmra.mrb[32].mxu0 %v2520_v3 }
  0xb9   : > { %1366 = vmatmul.mubr.bf16.gmra.mrb[32].mxu1 %v2521_v4  ;;  %1212 = vmatprep.mubr.bf16.mxu0 %v2522_v5 }
  0xba   : > { %1373 = vmatprep.mubr.bf16.mxu1 %v2524_v6 }
  0xc0   : > { %1213 = vmatmul.mubr.bf16.gmra.mrb[36].mxu0 %v2526_v7 }
  0xc1   : > { %1374 = vmatmul.mubr.bf16.gmra.mrb[36].mxu1 %v2527_v8  ;;  %1220 = vmatprep.mubr.bf16.mxu0 %v2528_v9 }
  0xc2   : > { %1381 = vmatprep.mubr.bf16.mxu1 %v2530_v10 }
  0xc8   : > { %1221 = vmatmul.mubr.bf16.gmra.mrb[40].mxu0 %v2532_v11 }
  0xc9   : > { %1382 = vmatmul.mubr.bf16.gmra.mrb[40].mxu1 %v2533_v12  ;;  %1228 = vmatprep.mubr.bf16.mxu0 %v2534_v13 }
  0xca   : > { %1389 = vmatprep.mubr.bf16.mxu1 %v2536_v14  ;;  %v440_v14 = vld [vmem:[#allocation2 + $0x20] sm:$0xff] }
  0xd0   : > { %1229 = vmatmul.mubr.bf16.gmra.mrb[44].mxu0 %v2538_v15 }
  0xd1   : > { %1390 = vmatmul.mubr.bf16.gmra.mrb[44].mxu1 %v2539_v16  ;;  %1236 = vmatprep.mubr.bf16.mxu0 %v2540_v17 }
  0xd2   : > { %1397 = vmatprep.mubr.bf16.mxu1 %v2542_v18 }
  0xd8   : > { %1237 = vmatmul.mubr.bf16.gmra.mrb[48].mxu0 %v2544_v19  ;;  %v441_v19 = vld [vmem:[#allocation2 + $0x28] sm:$0xff] }
  0xd9   : > { %1398 = vmatmul.mubr.bf16.gmra.mrb[48].mxu1 %v2545_v20  ;;  %1244 = vmatprep.mubr.bf16.mxu0 %v2546_v21 }
  0xda   : > { %1405 = vmatprep.mubr.bf16.mxu1 %v2548_v22 }
  0xe0   : > { %1245 = vmatmul.mubr.bf16.gmra.mrb[52].mxu0 %v2550_v23 }
  0xe1   : > { %1406 = vmatmul.mubr.bf16.gmra.mrb[52].mxu1 %v2551_v24  ;;  %1252 = vmatprep.mubr.bf16.mxu0 %v2552_v25 }
  0xe2   : > { %1413 = vmatprep.mubr.bf16.mxu1 %v2554_v26 }
  0xe8   : > { %1253 = vmatmul.mubr.bf16.gmra.mrb[56].mxu0 %v2556_v27 }
  0xe9   : > { %1414 = vmatmul.mubr.bf16.gmra.mrb[56].mxu1 %v2557_v28  ;;  %1260 = vmatprep.mubr.bf16.mxu0 %v2558_v29 }
  0xea   : > { %1421 = vmatprep.mubr.bf16.mxu1 %v2560_v30 }
  0xf0   : > { %1261 = vmatmul.mubr.bf16.gmra.mrb[60].mxu0 %v2562_v31 }
  0xf1   : > { %1422 = vmatmul.mubr.bf16.gmra.mrb[60].mxu1 %v2563_v32  ;;  %v442_v32 = vld [vmem:[#allocation2 + $0x30] sm:$0xff] }
 0x14b   : > { %v2171_v33 = vpop.f32.mrb[0].mxu0 }
 0x14c   : > { %v2283_v34 = vpop.f32.mrb[0].mxu1  ;;  %v2172_v35 = vpop.f32.mrb[1].mxu0 }
 0x14d   : > { %v2173_v36 = vadd.f32 %v2172_v35, %v2171_v33  ;;  %v2284_v37 = vpop.f32.mrb[1].mxu1  ;;  %v2174_v38 = vpop.f32.mrb[2].mxu0 }
 0x14e   : > { %v2285_v39 = vadd.f32 %v2284_v37, %v2283_v34  ;;  %v2286_v40 = vpop.f32.mrb[2].mxu1  ;;  %v2175_v41 = vpop.f32.mrb[3].mxu0  ;;  %v443_v37 = vld [vmem:[#allocation2 + $0x38] sm:$0xff] }
 0x14f   : > { %v2176_v43 = vadd.f32 %v2175_v41, %v2174_v38  ;;  %v2287_v44 = vpop.f32.mrb[3].mxu1 }
 0x150   : > { %v1304_v45 = vadd.f32 %v2285_v39, %v2173_v36  ;;  %v2288_v46 = vadd.f32 %v2287_v44, %v2286_v40 }
 0x152   : > { %v1430_v48 = vadd.f32 %v1304_v45, %v436_v42  ;;  %v1307_v49 = vadd.f32 %v2288_v46, %v2176_v43 }
 0x153   : > { %v2177_v50 = vpop.f32.mrb[4].mxu0 }
 0x154   : > { %1462 = vst [vmem:[#allocation2] sm:$0xff] %v1430_v48  ;;  %v1431_v51 = vadd.f32 %v1307_v49, %v437_v47  ;;  %v2289_v52 = vpop.f32.mrb[4].mxu1  ;;  %v2178_v53 = vpop.f32.mrb[5].mxu0 }
 0x155   : > { %v2179_v54 = vadd.f32 %v2178_v53, %v2177_v50  ;;  %v2290_v55 = vpop.f32.mrb[5].mxu1  ;;  %v2180_v56 = vpop.f32.mrb[6].mxu0  ;;  %v444_v50 = vld [vmem:[#allocation2 + $0x40] sm:$0xff] }
 0x156   : > { %1463 = vst [vmem:[#allocation2 + $0x8] sm:$0xff] %v1431_v51  ;;  %v2291_v57 = vadd.f32 %v2290_v55, %v2289_v52  ;;  %v2292_v58 = vpop.f32.mrb[6].mxu1  ;;  %v2181_v59 = vpop.f32.mrb[7].mxu0  ;;  %v445_v55 = vld [vmem:[#allocation2 + $0x48] sm:$0xff] }
 0x157   : > { %v2182_v61 = vadd.f32 %v2181_v59, %v2180_v56  ;;  %v2293_v62 = vpop.f32.mrb[7].mxu1 }
 0x158   : > { %v1312_v63 = vadd.f32 %v2291_v57, %v2179_v54  ;;  %v2294_v0 = vadd.f32 %v2293_v62, %v2292_v58 }
 0x15a   : > { %v1432_v2 = vadd.f32 %v1312_v63, %v438_v60  ;;  %v1315_v3 = vadd.f32 %v2294_v0, %v2182_v61 }
 0x15b   : > { %v2183_v4 = vpop.f32.mrb[8].mxu0 }
 0x15c   : > { %1464 = vst [vmem:[#allocation2 + $0x10] sm:$0xff] %v1432_v2  ;;  %v1433_v5 = vadd.f32 %v1315_v3, %v439_v1  ;;  %v2295_v6 = vpop.f32.mrb[8].mxu1  ;;  %v2184_v7 = vpop.f32.mrb[9].mxu0 }
 0x15d   : > { %v2185_v8 = vadd.f32 %v2184_v7, %v2183_v4  ;;  %v2296_v9 = vpop.f32.mrb[9].mxu1  ;;  %v2186_v10 = vpop.f32.mrb[10].mxu0  ;;  %v446_v4 = vld [vmem:[#allocation2 + $0x50] sm:$0xff] }
 0x15e   : > { %1465 = vst [vmem:[#allocation2 + $0x18] sm:$0xff] %v1433_v5  ;;  %v2297_v11 = vadd.f32 %v2296_v9, %v2295_v6  ;;  %v2298_v12 = vpop.f32.mrb[10].mxu1  ;;  %v2187_v13 = vpop.f32.mrb[11].mxu0  ;;  %v447_v9 = vld [vmem:[#allocation2 + $0x58] sm:$0xff] }
 0x15f   : > { %v2188_v15 = vadd.f32 %v2187_v13, %v2186_v10  ;;  %v2299_v16 = vpop.f32.mrb[11].mxu1 }
 0x160   : > { %v1320_v17 = vadd.f32 %v2297_v11, %v2185_v8  ;;  %v2300_v18 = vadd.f32 %v2299_v16, %v2298_v12 }
 0x162   : > { %v1434_v20 = vadd.f32 %v1320_v17, %v440_v14  ;;  %v1323_v21 = vadd.f32 %v2300_v18, %v2188_v15 }
 0x163   : > { %v2189_v22 = vpop.f32.mrb[12].mxu0 }
 0x164   : > { %1466 = vst [vmem:[#allocation2 + $0x20] sm:$0xff] %v1434_v20  ;;  %v1435_v23 = vadd.f32 %v1323_v21, %v441_v19  ;;  %v2301_v24 = vpop.f32.mrb[12].mxu1  ;;  %v2190_v25 = vpop.f32.mrb[13].mxu0 }
 0x165   : > { %v2191_v26 = vadd.f32 %v2190_v25, %v2189_v22  ;;  %v2302_v27 = vpop.f32.mrb[13].mxu1  ;;  %v2192_v28 = vpop.f32.mrb[14].mxu0  ;;  %v448_v22 = vld [vmem:[#allocation2 + $0x60] sm:$0xff] }
 0x166   : > { %1467 = vst [vmem:[#allocation2 + $0x28] sm:$0xff] %v1435_v23  ;;  %v2303_v29 = vadd.f32 %v2302_v27, %v2301_v24  ;;  %v2304_v30 = vpop.f32.mrb[14].mxu1  ;;  %v2193_v31 = vpop.f32.mrb[15].mxu0  ;;  %v449_v27 = vld [vmem:[#allocation2 + $0x68] sm:$0xff] }
 0x167   : > { %v2194_v33 = vadd.f32 %v2193_v31, %v2192_v28  ;;  %v2305_v34 = vpop.f32.mrb[15].mxu1 }
 0x168   : > { %v1328_v35 = vadd.f32 %v2303_v29, %v2191_v26  ;;  %v2306_v36 = vadd.f32 %v2305_v34, %v2304_v30 }
 0x16a   : > { %v1436_v38 = vadd.f32 %v1328_v35, %v442_v32  ;;  %v1331_v39 = vadd.f32 %v2306_v36, %v2194_v33 }
 0x16b   : > { %v2195_v40 = vpop.f32.mrb[16].mxu0 }
 0x16c   : > { %1468 = vst [vmem:[#allocation2 + $0x30] sm:$0xff] %v1436_v38  ;;  %v1437_v41 = vadd.f32 %v1331_v39, %v443_v37  ;;  %v2307_v42 = vpop.f32.mrb[16].mxu1  ;;  %v2196_v43 = vpop.f32.mrb[17].mxu0 }
 0x16d   : > { %v2197_v44 = vadd.f32 %v2196_v43, %v2195_v40  ;;  %v2308_v45 = vpop.f32.mrb[17].mxu1  ;;  %v2198_v46 = vpop.f32.mrb[18].mxu0  ;;  %v450_v40 = vld [vmem:[#allocation2 + $0x70] sm:$0xff] }
 0x16e   : > { %1469 = vst [vmem:[#allocation2 + $0x38] sm:$0xff] %v1437_v41  ;;  %v2309_v47 = vadd.f32 %v2308_v45, %v2307_v42  ;;  %v2310_v48 = vpop.f32.mrb[18].mxu1  ;;  %v2199_v49 = vpop.f32.mrb[19].mxu0  ;;  %v451_v45 = vld [vmem:[#allocation2 + $0x78] sm:$0xff] }
 0x16f   : > { %v2200_v51 = vadd.f32 %v2199_v49, %v2198_v46  ;;  %v2311_v52 = vpop.f32.mrb[19].mxu1 }
 0x170   : > { %v1336_v53 = vadd.f32 %v2309_v47, %v2197_v44  ;;  %v2312_v54 = vadd.f32 %v2311_v52, %v2310_v48 }
 0x172   : > { %v1438_v56 = vadd.f32 %v1336_v53, %v444_v50  ;;  %v1339_v57 = vadd.f32 %v2312_v54, %v2200_v51 }
 0x173   : > { %v2201_v58 = vpop.f32.mrb[20].mxu0 }
 0x174   : > { %1470 = vst [vmem:[#allocation2 + $0x40] sm:$0xff] %v1438_v56  ;;  %v1439_v59 = vadd.f32 %v1339_v57, %v445_v55  ;;  %v2313_v60 = vpop.f32.mrb[20].mxu1  ;;  %v2202_v61 = vpop.f32.mrb[21].mxu0 }
 0x175   : > { %v2203_v62 = vadd.f32 %v2202_v61, %v2201_v58  ;;  %v2314_v63 = vpop.f32.mrb[21].mxu1  ;;  %v2204_v0 = vpop.f32.mrb[22].mxu0  ;;  %v452_v58 = vld [vmem:[#allocation2 + $0x80] sm:$0xff] }
 0x176   : > { %1471 = vst [vmem:[#allocation2 + $0x48] sm:$0xff] %v1439_v59  ;;  %v2315_v1 = vadd.f32 %v2314_v63, %v2313_v60  ;;  %v2316_v2 = vpop.f32.mrb[22].mxu1  ;;  %v2205_v3 = vpop.f32.mrb[23].mxu0  ;;  %v453_v63 = vld [vmem:[#allocation2 + $0x88] sm:$0xff] }
 0x177   : > { %v2206_v5 = vadd.f32 %v2205_v3, %v2204_v0  ;;  %v2317_v6 = vpop.f32.mrb[23].mxu1 }
 0x178   : > { %v1344_v7 = vadd.f32 %v2315_v1, %v2203_v62  ;;  %v2318_v8 = vadd.f32 %v2317_v6, %v2316_v2 }
 0x17a   : > { %v1440_v10 = vadd.f32 %v1344_v7, %v446_v4  ;;  %v1347_v11 = vadd.f32 %v2318_v8, %v2206_v5 }
 0x17b   : > { %v2207_v12 = vpop.f32.mrb[24].mxu0 }
 0x17c   : > { %1472 = vst [vmem:[#allocation2 + $0x50] sm:$0xff] %v1440_v10  ;;  %v1441_v13 = vadd.f32 %v1347_v11, %v447_v9  ;;  %v2319_v14 = vpop.f32.mrb[24].mxu1  ;;  %v2208_v15 = vpop.f32.mrb[25].mxu0 }
 0x17d   : > { %v2209_v16 = vadd.f32 %v2208_v15, %v2207_v12  ;;  %v2320_v17 = vpop.f32.mrb[25].mxu1  ;;  %v2210_v18 = vpop.f32.mrb[26].mxu0  ;;  %v454_v12 = vld [vmem:[#allocation2 + $0x90] sm:$0xff] }
 0x17e   : > { %1473 = vst [vmem:[#allocation2 + $0x58] sm:$0xff] %v1441_v13  ;;  %v2321_v19 = vadd.f32 %v2320_v17, %v2319_v14  ;;  %v2322_v20 = vpop.f32.mrb[26].mxu1  ;;  %v2211_v21 = vpop.f32.mrb[27].mxu0  ;;  %v455_v17 = vld [vmem:[#allocation2 + $0x98] sm:$0xff] }
 0x17f   : > { %v2212_v23 = vadd.f32 %v2211_v21, %v2210_v18  ;;  %v2323_v24 = vpop.f32.mrb[27].mxu1 }
 0x180   : > { %v1352_v25 = vadd.f32 %v2321_v19, %v2209_v16  ;;  %v2324_v26 = vadd.f32 %v2323_v24, %v2322_v20 }
 0x182   : > { %v1442_v28 = vadd.f32 %v1352_v25, %v448_v22  ;;  %v1355_v29 = vadd.f32 %v2324_v26, %v2212_v23 }
 0x183   : > { %v2213_v30 = vpop.f32.mrb[28].mxu0 }
 0x184   : > { %1474 = vst [vmem:[#allocation2 + $0x60] sm:$0xff] %v1442_v28  ;;  %v1443_v31 = vadd.f32 %v1355_v29, %v449_v27  ;;  %v2325_v32 = vpop.f32.mrb[28].mxu1  ;;  %v2214_v33 = vpop.f32.mrb[29].mxu0 }
 0x185   : > { %v2215_v34 = vadd.f32 %v2214_v33, %v2213_v30  ;;  %v2326_v35 = vpop.f32.mrb[29].mxu1  ;;  %v2216_v36 = vpop.f32.mrb[30].mxu0  ;;  %v456_v30 = vld [vmem:[#allocation2 + $0xa0] sm:$0xff] }
 0x186   : > { %1475 = vst [vmem:[#allocation2 + $0x68] sm:$0xff] %v1443_v31  ;;  %v2327_v37 = vadd.f32 %v2326_v35, %v2325_v32  ;;  %v2328_v38 = vpop.f32.mrb[30].mxu1  ;;  %v2217_v39 = vpop.f32.mrb[31].mxu0  ;;  %v457_v35 = vld [vmem:[#allocation2 + $0xa8] sm:$0xff] }
 0x187   : > { %v2218_v41 = vadd.f32 %v2217_v39, %v2216_v36  ;;  %v2329_v42 = vpop.f32.mrb[31].mxu1 }
 0x188   : > { %v1360_v43 = vadd.f32 %v2327_v37, %v2215_v34  ;;  %v2330_v44 = vadd.f32 %v2329_v42, %v2328_v38 }
 0x18a   : > { %v1444_v46 = vadd.f32 %v1360_v43, %v450_v40  ;;  %v1363_v47 = vadd.f32 %v2330_v44, %v2218_v41 }
 0x18b   : > { %v2219_v48 = vpop.f32.mrb[32].mxu0 }
 0x18c   : > { %1476 = vst [vmem:[#allocation2 + $0x70] sm:$0xff] %v1444_v46  ;;  %v1445_v49 = vadd.f32 %v1363_v47, %v451_v45  ;;  %v2331_v50 = vpop.f32.mrb[32].mxu1  ;;  %v2220_v51 = vpop.f32.mrb[33].mxu0 }
 0x18d   : > { %v2221_v52 = vadd.f32 %v2220_v51, %v2219_v48  ;;  %v2332_v53 = vpop.f32.mrb[33].mxu1  ;;  %v2222_v54 = vpop.f32.mrb[34].mxu0  ;;  %v458_v48 = vld [vmem:[#allocation2 + $0xb0] sm:$0xff] }
 0x18e   : > { %1477 = vst [vmem:[#allocation2 + $0x78] sm:$0xff] %v1445_v49  ;;  %v2333_v55 = vadd.f32 %v2332_v53, %v2331_v50  ;;  %v2334_v56 = vpop.f32.mrb[34].mxu1  ;;  %v2223_v57 = vpop.f32.mrb[35].mxu0  ;;  %v459_v53 = vld [vmem:[#allocation2 + $0xb8] sm:$0xff] }
 0x18f   : > { %v2224_v59 = vadd.f32 %v2223_v57, %v2222_v54  ;;  %v2335_v60 = vpop.f32.mrb[35].mxu1 }
 0x190   : > { %v1368_v61 = vadd.f32 %v2333_v55, %v2221_v52  ;;  %v2336_v62 = vadd.f32 %v2335_v60, %v2334_v56 }
 0x192   : > { %v1446_v0 = vadd.f32 %v1368_v61, %v452_v58  ;;  %v1371_v1 = vadd.f32 %v2336_v62, %v2224_v59 }
 0x193   : > { %v2225_v2 = vpop.f32.mrb[36].mxu0 }
 0x194   : > { %1478 = vst [vmem:[#allocation2 + $0x80] sm:$0xff] %v1446_v0  ;;  %v1447_v3 = vadd.f32 %v1371_v1, %v453_v63  ;;  %v2337_v4 = vpop.f32.mrb[36].mxu1  ;;  %v2226_v5 = vpop.f32.mrb[37].mxu0 }
 0x195   : > { %v2227_v6 = vadd.f32 %v2226_v5, %v2225_v2  ;;  %v2338_v7 = vpop.f32.mrb[37].mxu1  ;;  %v2228_v8 = vpop.f32.mrb[38].mxu0  ;;  %v460_v2 = vld [vmem:[#allocation2 + $0xc0] sm:$0xff] }
 0x196   : > { %1479 = vst [vmem:[#allocation2 + $0x88] sm:$0xff] %v1447_v3  ;;  %v2339_v9 = vadd.f32 %v2338_v7, %v2337_v4  ;;  %v2340_v10 = vpop.f32.mrb[38].mxu1  ;;  %v2229_v11 = vpop.f32.mrb[39].mxu0  ;;  %v461_v7 = vld [vmem:[#allocation2 + $0xc8] sm:$0xff] }
 0x197   : > { %v2230_v13 = vadd.f32 %v2229_v11, %v2228_v8  ;;  %v2341_v14 = vpop.f32.mrb[39].mxu1 }
 0x198   : > { %v1376_v15 = vadd.f32 %v2339_v9, %v2227_v6  ;;  %v2342_v16 = vadd.f32 %v2341_v14, %v2340_v10 }
 0x19a   : > { %v1448_v18 = vadd.f32 %v1376_v15, %v454_v12  ;;  %v1379_v19 = vadd.f32 %v2342_v16, %v2230_v13 }
 0x19b   : > { %v2231_v20 = vpop.f32.mrb[40].mxu0 }
 0x19c   : > { %1480 = vst [vmem:[#allocation2 + $0x90] sm:$0xff] %v1448_v18  ;;  %v1449_v21 = vadd.f32 %v1379_v19, %v455_v17  ;;  %v2343_v22 = vpop.f32.mrb[40].mxu1  ;;  %v2232_v23 = vpop.f32.mrb[41].mxu0 }
 0x19d   : > { %v2233_v24 = vadd.f32 %v2232_v23, %v2231_v20  ;;  %v2344_v25 = vpop.f32.mrb[41].mxu1  ;;  %v2234_v26 = vpop.f32.mrb[42].mxu0  ;;  %v462_v20 = vld [vmem:[#allocation2 + $0xd0] sm:$0xff] }
 0x19e   : > { %1481 = vst [vmem:[#allocation2 + $0x98] sm:$0xff] %v1449_v21  ;;  %v2345_v27 = vadd.f32 %v2344_v25, %v2343_v22  ;;  %v2346_v28 = vpop.f32.mrb[42].mxu1  ;;  %v2235_v29 = vpop.f32.mrb[43].mxu0  ;;  %v463_v25 = vld [vmem:[#allocation2 + $0xd8] sm:$0xff] }
 0x19f   : > { %v2236_v31 = vadd.f32 %v2235_v29, %v2234_v26  ;;  %v2347_v32 = vpop.f32.mrb[43].mxu1 }
 0x1a0   : > { %v1384_v33 = vadd.f32 %v2345_v27, %v2233_v24  ;;  %v2348_v34 = vadd.f32 %v2347_v32, %v2346_v28 }
 0x1a2   : > { %v1450_v36 = vadd.f32 %v1384_v33, %v456_v30  ;;  %v1387_v37 = vadd.f32 %v2348_v34, %v2236_v31 }
 0x1a3   : > { %v2237_v38 = vpop.f32.mrb[44].mxu0 }
 0x1a4   : > { %1482 = vst [vmem:[#allocation2 + $0xa0] sm:$0xff] %v1450_v36  ;;  %v1451_v39 = vadd.f32 %v1387_v37, %v457_v35  ;;  %v2349_v40 = vpop.f32.mrb[44].mxu1  ;;  %v2238_v41 = vpop.f32.mrb[45].mxu0 }
 0x1a5   : > { %v2239_v42 = vadd.f32 %v2238_v41, %v2237_v38  ;;  %v2350_v43 = vpop.f32.mrb[45].mxu1  ;;  %v2240_v44 = vpop.f32.mrb[46].mxu0  ;;  %v464_v38 = vld [vmem:[#allocation2 + $0xe0] sm:$0xff] }
 0x1a6   : > { %1483 = vst [vmem:[#allocation2 + $0xa8] sm:$0xff] %v1451_v39  ;;  %v2351_v45 = vadd.f32 %v2350_v43, %v2349_v40  ;;  %v2352_v46 = vpop.f32.mrb[46].mxu1  ;;  %v2241_v47 = vpop.f32.mrb[47].mxu0  ;;  %v465_v43 = vld [vmem:[#allocation2 + $0xe8] sm:$0xff] }
 0x1a7   : > { %v2242_v49 = vadd.f32 %v2241_v47, %v2240_v44  ;;  %v2353_v50 = vpop.f32.mrb[47].mxu1 }
 0x1a8   : > { %v1392_v51 = vadd.f32 %v2351_v45, %v2239_v42  ;;  %v2354_v52 = vadd.f32 %v2353_v50, %v2352_v46 }
 0x1aa   : > { %v1452_v54 = vadd.f32 %v1392_v51, %v458_v48  ;;  %v1395_v55 = vadd.f32 %v2354_v52, %v2242_v49 }
 0x1ab   : > { %v2243_v56 = vpop.f32.mrb[48].mxu0 }
 0x1ac   : > { %1484 = vst [vmem:[#allocation2 + $0xb0] sm:$0xff] %v1452_v54  ;;  %v1453_v57 = vadd.f32 %v1395_v55, %v459_v53  ;;  %v2355_v58 = vpop.f32.mrb[48].mxu1  ;;  %v2244_v59 = vpop.f32.mrb[49].mxu0 }
 0x1ad   : > { %v2245_v60 = vadd.f32 %v2244_v59, %v2243_v56  ;;  %v2356_v61 = vpop.f32.mrb[49].mxu1  ;;  %v2246_v62 = vpop.f32.mrb[50].mxu0  ;;  %v466_v56 = vld [vmem:[#allocation2 + $0xf0] sm:$0xff] }
 0x1ae   : > { %1485 = vst [vmem:[#allocation2 + $0xb8] sm:$0xff] %v1453_v57  ;;  %v2357_v63 = vadd.f32 %v2356_v61, %v2355_v58  ;;  %v2358_v0 = vpop.f32.mrb[50].mxu1  ;;  %v2247_v1 = vpop.f32.mrb[51].mxu0  ;;  %v467_v61 = vld [vmem:[#allocation2 + $0xf8] sm:$0xff] }
 0x1af   : > { %v2248_v3 = vadd.f32 %v2247_v1, %v2246_v62  ;;  %v2359_v4 = vpop.f32.mrb[51].mxu1  ;;  %v1498_v1 = vld [vmem:[#allocation2] sm:$0xff] (!%p1991_p13) }
 0x1b0   : > { %v1400_v5 = vadd.f32 %v2357_v63, %v2245_v60  ;;  %v2360_v6 = vadd.f32 %v2359_v4, %v2358_v0 }
 0x1b2   : > { %v1454_v8 = vadd.f32 %v1400_v5, %v460_v2  ;;  %v1403_v9 = vadd.f32 %v2360_v6, %v2248_v3  ;;  %v1499_v2 = vld [vmem:[#allocation2 + $0x8] sm:$0xff] (!%p1991_p13)  ;;  %v2951_v3 = vld [vmem:[%s3024_s2] ss:$0 sm:$0xff] (!%p1991_p13)  ;;  %v1500_v6 = vld [vmem:[#allocation2 + $0x10] sm:$0xff] (!%p1991_p13) }
 0x1b3   : > { %v2249_v10 = vpop.f32.mrb[52].mxu0  ;;  %v1537_v4 = vadd.f32 (!%p1991_p13), %v2951_v3, %v1498_v1  ;;  %v1538_v5 = vadd.f32 (!%p1991_p13), %v2951_v3, %v1499_v2  ;;  %v1520_v1 = vld [vmem:[#allocation2 + $0xb0] sm:$0xff] (!%p1991_p13) }
 0x1b4   : > { %1486 = vst [vmem:[#allocation2 + $0xc0] sm:$0xff] %v1454_v8  ;;  %v1455_v11 = vadd.f32 %v1403_v9, %v461_v7  ;;  %v2361_v12 = vpop.f32.mrb[52].mxu1  ;;  %v2250_v13 = vpop.f32.mrb[53].mxu0  ;;  %v1501_v7 = vld [vmem:[#allocation2 + $0x18] sm:$0xff] (!%p1991_p13)  ;;  %v1502_v8 = vld [vmem:[#allocation2 + $0x20] sm:$0xff] (!%p1991_p13)  ;;  %v1539_v9 = vadd.f32 (!%p1991_p13), %v2951_v3, %v1500_v6 }
 0x1b5   : > { %v2251_v14 = vadd.f32 %v2250_v13, %v2249_v10  ;;  %v2362_v15 = vpop.f32.mrb[53].mxu1  ;;  %v2252_v16 = vpop.f32.mrb[54].mxu0  ;;  %v1540_v10 = vadd.f32 (!%p1991_p13), %v2951_v3, %v1501_v7  ;;  %v1504_v13 = vld [vmem:[#allocation2 + $0x30] sm:$0xff] (!%p1991_p13)  ;;  %v1521_v2 = vld [vmem:[#allocation2 + $0xb8] sm:$0xff] (!%p1991_p13) }
 0x1b6   : > { %1487 = vst [vmem:[#allocation2 + $0xc8] sm:$0xff] %v1455_v11  ;;  %v2363_v17 = vadd.f32 %v2362_v15, %v2361_v12  ;;  %v2364_v18 = vpop.f32.mrb[54].mxu1  ;;  %v2253_v19 = vpop.f32.mrb[55].mxu0  ;;  %v1503_v11 = vld [vmem:[#allocation2 + $0x28] sm:$0xff] (!%p1991_p13)  ;;  %v1541_v12 = vadd.f32 (!%p1991_p13), %v2951_v3, %v1502_v8  ;;  %v1569_v15 = vmax.f32 (!%p1991_p13), %v1537_v4, 0.0 }
 0x1b7   : > { %v2254_v21 = vadd.f32 %v2253_v19, %v2252_v16  ;;  %v2365_v22 = vpop.f32.mrb[55].mxu1  ;;  %v1570_v16 = vmax.f32 (!%p1991_p13), %v1538_v5, 0.0  ;;  %v1506_v19 = vld [vmem:[#allocation2 + $0x40] sm:$0xff] (!%p1991_p13) }
 0x1b8   : > { %v1408_v23 = vadd.f32 %v2363_v17, %v2251_v14  ;;  %v2366_v24 = vadd.f32 %v2365_v22, %v2364_v18  ;;  %v1505_v14 = vld [vmem:[#allocation2 + $0x38] sm:$0xff] (!%p1991_p13)  ;;  %v1542_v17 = vadd.f32 (!%p1991_p13), %v2951_v3, %v1503_v11  ;;  %v1543_v18 = vadd.f32 (!%p1991_p13), %v2951_v3, %v1504_v13 }
 0x1b9   : > { %v1571_v22 = vmax.f32 (!%p1991_p13), %v1539_v9, 0.0 }
 0x1ba   : > { %v1456_v26 = vadd.f32 %v1408_v23, %v462_v20  ;;  %v1411_v27 = vadd.f32 %v2366_v24, %v2254_v21  ;;  %v1507_v20 = vld [vmem:[#allocation2 + $0x48] sm:$0xff] (!%p1991_p13)  ;;  %v1508_v21 = vld [vmem:[#allocation2 + $0x50] sm:$0xff] (!%p1991_p13)  ;;  %v1572_v23 = vmax.f32 (!%p1991_p13), %v1540_v10, 0.0  ;;  %v1573_v24 = vmax.f32 (!%p1991_p13), %v1541_v12, 0.0 }
 0x1bb   : > { %v2255_v28 = vpop.f32.mrb[56].mxu0  ;;  %v1522_v8 = vld [vmem:[#allocation2 + $0xc0] sm:$0xff] (!%p1991_p13) }
 0x1bc   : > { %1488 = vst [vmem:[#allocation2 + $0xd0] sm:$0xff] %v1456_v26  ;;  %v1457_v29 = vadd.f32 %v1411_v27, %v463_v25  ;;  %v2367_v30 = vpop.f32.mrb[56].mxu1  ;;  %v2256_v31 = vpop.f32.mrb[57].mxu0  ;;  %v1544_v25 = vadd.f32 (!%p1991_p13), %v2951_v3, %v1505_v14  ;;  %v1509_v26 = vld [vmem:[#allocation2 + $0x58] sm:$0xff] (!%p1991_p13)  ;;  %v1510_v27 = vld [vmem:[#allocation2 + $0x60] sm:$0xff] (!%p1991_p13) }
 0x1bd   : > { %v2257_v32 = vadd.f32 %v2256_v31, %v2255_v28  ;;  %v2368_v33 = vpop.f32.mrb[57].mxu1  ;;  %v2258_v34 = vpop.f32.mrb[58].mxu0  ;;  %v2063_v28 = vpack.c.bf16 (!%p1991_p13), %v1570_v16, %v1569_v15  ;;  %v1545_v31 = vadd.f32 (!%p1991_p13), %v2951_v3, %v1506_v19  ;;  %v1523_v9 = vld [vmem:[#allocation2 + $0xc8] sm:$0xff] (!%p1991_p13) }
 0x1be   : > { %1489 = vst [vmem:[#allocation2 + $0xd8] sm:$0xff] %v1457_v29  ;;  %v2369_v35 = vadd.f32 %v2368_v33, %v2367_v30  ;;  %v2370_v36 = vpop.f32.mrb[58].mxu1  ;;  %v2259_v37 = vpop.f32.mrb[59].mxu0  ;;  %v1574_v29 = vmax.f32 (!%p1991_p13), %v1542_v17, 0.0  ;;  %v1575_v30 = vmax.f32 (!%p1991_p13), %v1543_v18, 0.0  ;;  %v2068_v33 = vpack.c.bf16 (!%p1991_p13), %v1572_v23, %v1571_v22 }
 0x1bf   : > { %v2260_v39 = vadd.f32 %v2259_v37, %v2258_v34  ;;  %v2371_v40 = vpop.f32.mrb[59].mxu1  ;;  %v1576_v34 = vmax.f32 (!%p1991_p13), %v1544_v25, 0.0  ;;  %v1512_v37 = vld [vmem:[#allocation2 + $0x70] sm:$0xff] (!%p1991_p13)  ;;  %2064 = vst [vmem:[%s2846_s30] sm:$0xff] (!%p1991_p13), %v2063_v28   ;;  %v1559_v17 = vadd.f32 (!%p1991_p13), %v2951_v3, %v1520_v1  ;;  %v1560_v18 = vadd.f32 (!%p1991_p13), %v2951_v3, %v1521_v2 }
 0x1c0   : > { %v1416_v41 = vadd.f32 %v2369_v35, %v2257_v32  ;;  %v2372_v42 = vadd.f32 %v2371_v40, %v2370_v36  ;;  %v1511_v32 = vld [vmem:[#allocation2 + $0x68] sm:$0xff] (!%p1991_p13)  ;;  %v1546_v35 = vadd.f32 (!%p1991_p13), %v2951_v3, %v1507_v20  ;;  %v1547_v36 = vadd.f32 (!%p1991_p13), %v2951_v3, %v1508_v21  ;;  %2140 = vst [vmem:[%s2846_s30 + $0x8] sm:$0xff] (!%p1991_p13), %v2068_v33  }
 0x1c1   : > { %v1577_v40 = vmax.f32 (!%p1991_p13), %v1545_v31, 0.0  ;;  %v1561_v22 = vadd.f32 (!%p1991_p13), %v2951_v3, %v1522_v8  ;;  %v1562_v23 = vadd.f32 (!%p1991_p13), %v2951_v3, %v1523_v9  ;;  %v1592_v28 = vmax.f32 (!%p1991_p13), %v1560_v18, 0.0 }
 0x1c2   : > { %v1458_v44 = vadd.f32 %v1416_v41, %v464_v38  ;;  %v1419_v45 = vadd.f32 %v2372_v42, %v2260_v39  ;;  %v1513_v38 = vld [vmem:[#allocation2 + $0x78] sm:$0xff] (!%p1991_p13)  ;;  %v2073_v39 = vpack.c.bf16 (!%p1991_p13), %v1574_v29, %v1573_v24  ;;  %v1548_v41 = vadd.f32 (!%p1991_p13), %v2951_v3, %v1509_v26 }
 0x1c3   : > { %v2261_v46 = vpop.f32.mrb[60].mxu0  ;;  %v1549_v42 = vadd.f32 (!%p1991_p13), %v2951_v3, %v1510_v27  ;;  %v1524_v14 = vld [vmem:[#allocation2 + $0xd0] sm:$0xff] (!%p1991_p13)  ;;  %v1591_v27 = vmax.f32 (!%p1991_p13), %v1559_v17, 0.0  ;;  %v1593_v33 = vmax.f32 (!%p1991_p13), %v1561_v22, 0.0 }
 0x1c4   : > { %1490 = vst [vmem:[#allocation2 + $0xe0] sm:$0xff] %v1458_v44  ;;  %v1459_v47 = vadd.f32 %v1419_v45, %v465_v43  ;;  %v2373_v48 = vpop.f32.mrb[60].mxu1  ;;  %v2262_v49 = vpop.f32.mrb[61].mxu0  ;;  %v1514_v43 = vld [vmem:[#allocation2 + $0x80] sm:$0xff] (!%p1991_p13)  ;;  %v1515_v44 = vld [vmem:[#allocation2 + $0x88] sm:$0xff] (!%p1991_p13)  ;;  %v2078_v45 = vpack.c.bf16 (!%p1991_p13), %v1576_v34, %v1575_v30  ;;  %2141 = vst [vmem:[%s2846_s30 + $0x10] sm:$0xff] (!%p1991_p13), %v2073_v39   ;;  %v1563_v29 = vadd.f32 (!%p1991_p13), %v2951_v3, %v1524_v14 }
 0x1c5   : > { %v2263_v50 = vadd.f32 %v2262_v49, %v2261_v46  ;;  %v2374_v51 = vpop.f32.mrb[61].mxu1  ;;  %v2264_v52 = vpop.f32.mrb[62].mxu0  ;;  %v1578_v46 = vmax.f32 (!%p1991_p13), %v1546_v35, 0.0  ;;  %v1516_v49 = vld [vmem:[#allocation2 + $0x90] sm:$0xff] (!%p1991_p13)  ;;  %v1525_v19 = vld [vmem:[#allocation2 + $0xd8] sm:$0xff] (!%p1991_p13)  ;;  %v1594_v34 = vmax.f32 (!%p1991_p13), %v1562_v23, 0.0 }
 0x1c6   : > { %1491 = vst [vmem:[#allocation2 + $0xe8] sm:$0xff] %v1459_v47  ;;  %v2375_v53 = vadd.f32 %v2374_v51, %v2373_v48  ;;  %v2376_v54 = vpop.f32.mrb[62].mxu1  ;;  %v2265_v55 = vpop.f32.mrb[63].mxu0  ;;  %v1579_v47 = vmax.f32 (!%p1991_p13), %v1547_v36, 0.0  ;;  %v1550_v48 = vadd.f32 (!%p1991_p13), %v2951_v3, %v1511_v32  ;;  %v1581_v51 = vmax.f32 (!%p1991_p13), %v1549_v42, 0.0  ;;  %2142 = vst [vmem:[%s2846_s30 + $0x18] sm:$0xff] (!%p1991_p13), %v2078_v45  }
 0x1c7   : > { %v2266_v57 = vadd.f32 %v2265_v55, %v2264_v52  ;;  %v2377_v58 = vpop.f32.mrb[63].mxu1  ;;  %v1551_v52 = vadd.f32 (!%p1991_p13), %v2951_v3, %v1512_v37  ;;  %v2083_v55 = vpack.c.bf16 (!%p1991_p13), %v1578_v46, %v1577_v40  ;;  %v1564_v35 = vadd.f32 (!%p1991_p13), %v2951_v3, %v1525_v19 }
 0x1c8   : > { %v1424_v59 = vadd.f32 %v2375_v53, %v2263_v50  ;;  %v2378_v60 = vadd.f32 %v2377_v58, %v2376_v54  ;;  %1497 = sbr.rel (%p1991_p13) target bundleno = 477 (0x1dd), region = 63  ;;  %v1580_v50 = vmax.f32 (!%p1991_p13), %v1548_v41, 0.0  ;;  %v1552_v53 = vadd.f32 (!%p1991_p13), %v2951_v3, %v1513_v38  ;;  %v1517_v54 = vld [vmem:[#allocation2 + $0x98] sm:$0xff] (!%p1991_p13) }
 0x1c9   : > { %v1554_v58 = vadd.f32 (!%p1991_p13), %v2951_v3, %v1515_v44  ;;  %2143 = vst [vmem:[%s2846_s30 + $0x20] sm:$0xff] (!%p1991_p13), %v2083_v55   ;;  %v1556_v7 = vadd.f32 (!%p1991_p13), %v2951_v3, %v1517_v54  ;;  %v2118_v36 = vpack.c.bf16 (!%p1991_p13), %v1592_v28, %v1591_v27  ;;  %v1595_v37 = vmax.f32 (!%p1991_p13), %v1563_v29, 0.0 }
 0x1ca   : > { %v1460_v62 = vadd.f32 %v1424_v59, %v466_v56  ;;  %v1427_v63 = vadd.f32 %v2378_v60, %v2266_v57  ;;  %v1582_v56 = vmax.f32 (!%p1991_p13), %v1550_v48, 0.0  ;;  %v1553_v57 = vadd.f32 (!%p1991_p13), %v2951_v3, %v1514_v43  ;;  %v1518_v59 = vld [vmem:[#allocation2 + $0xa0] sm:$0xff] (!%p1991_p13)  ;;  %v1519_v60 = vld [vmem:[#allocation2 + $0xa8] sm:$0xff] (!%p1991_p13) }
 0x1cb   : > { %v1586_v6 = vmax.f32 (!%p1991_p13), %v1554_v58, 0.0  ;;  %v1557_v12 = vadd.f32 (!%p1991_p13), %v2951_v3, %v1518_v59  ;;  %v1558_v13 = vadd.f32 (!%p1991_p13), %v2951_v3, %v1519_v60  ;;  %v1588_v16 = vmax.f32 (!%p1991_p13), %v1556_v7, 0.0  ;;  %v1526_v24 = vld [vmem:[#allocation2 + $0xe0] sm:$0xff] (!%p1991_p13)  ;;  %2150 = vst [vmem:[%s2846_s30 + $0x58] sm:$0xff] (!%p1991_p13), %v2118_v36  }
 0x1cc   : > { %1492 = vst [vmem:[#allocation2 + $0xf0] sm:$0xff] %v1460_v62  ;;  %v1461_v0 = vadd.f32 %v1427_v63, %v467_v61  ;;  %v2088_v61 = vpack.c.bf16 (!%p1991_p13), %v1580_v50, %v1579_v47  ;;  %v1583_v62 = vmax.f32 (!%p1991_p13), %v1551_v52, 0.0  ;;  %v1584_v63 = vmax.f32 (!%p1991_p13), %v1552_v53, 0.0 }
 0x1cd   : > { %v2093_v4 = vpack.c.bf16 (!%p1991_p13), %v1582_v56, %v1581_v51  ;;  %v1585_v5 = vmax.f32 (!%p1991_p13), %v1553_v57, 0.0  ;;  %v1589_v20 = vmax.f32 (!%p1991_p13), %v1557_v12, 0.0  ;;  %v1590_v21 = vmax.f32 (!%p1991_p13), %v1558_v13, 0.0  ;;  %v1527_v25 = vld [vmem:[#allocation2 + $0xe8] sm:$0xff] (!%p1991_p13) }
 0x1ce   : > { %1493 = vst [vmem:[#allocation2 + $0xf8] sm:$0xff] %v1461_v0  ;;  %v1555_v0 = vadd.f32 (!%p1991_p13), %v2951_v3, %v1516_v49  ;;  %2144 = vst [vmem:[%s2846_s30 + $0x28] sm:$0xff] (!%p1991_p13), %v2088_v61   ;;  %v2098_v10 = vpack.c.bf16 (!%p1991_p13), %v1584_v63, %v1583_v62  ;;  %v1565_v38 = vadd.f32 (!%p1991_p13), %v2951_v3, %v1526_v24  ;;  %v1596_v41 = vmax.f32 (!%p1991_p13), %v1564_v35, 0.0 }
 0x1cf   : > { %2145 = vst [vmem:[%s2846_s30 + $0x30] sm:$0xff] %v2093_v4   ;;  %v2103_v15 = vpack.c.bf16 %v1586_v6, %v1585_v5  ;;  %v2113_v32 = vpack.c.bf16 %v1590_v21, %v1589_v20  ;;  %v1566_v39 = vadd.f32 %v2951_v3, %v1527_v25  ;;  %v2123_v40 = vpack.c.bf16 %v1594_v34, %v1593_v33 }
 0x1d0   : > { %v1587_v11 = vmax.f32 %v1555_v0, 0.0  ;;  %2146 = vst [vmem:[%s2846_s30 + $0x38] sm:$0xff] %v2098_v10   ;;  %v1597_v44 = vmax.f32 %v1565_v38, 0.0  ;;  %v2128_v46 = vpack.c.bf16 %v1596_v41, %v1595_v37 }
 0x1d1   : > { %2147 = vst [vmem:[%s2846_s30 + $0x40] sm:$0xff] %v2103_v15   ;;  %2149 = vst [vmem:[%s2846_s30 + $0x50] sm:$0xff] %v2113_v32   ;;  %v1598_v45 = vmax.f32 %v1566_v39, 0.0 }
 0x1d2   : > { %v2108_v26 = vpack.c.bf16 %v1588_v16, %v1587_v11  ;;  %2151 = vst [vmem:[%s2846_s30 + $0x60] sm:$0xff] %v2123_v40   ;;  %2152 = vst [vmem:[%s2846_s30 + $0x68] sm:$0xff] %v2128_v46  }
 0x1d3   : > { %v1528_v30 = vld [vmem:[#allocation2 + $0xf0] sm:$0xff]  ;;  %v2133_v49 = vpack.c.bf16 %v1598_v45, %v1597_v44 }
 0x1d4   : > { %2148 = vst [vmem:[%s2846_s30 + $0x48] sm:$0xff] %v2108_v26   ;;  %v1567_v42 = vadd.f32 %v2951_v3, %v1528_v30 }
 0x1d5   : > { %v1529_v31 = vld [vmem:[#allocation2 + $0xf8] sm:$0xff]  ;;  %2153 = vst [vmem:[%s2846_s30 + $0x70] sm:$0xff] %v2133_v49  }
 0x1d6   : > { %v1568_v43 = vadd.f32 %v2951_v3, %v1529_v31  ;;  %v1599_v47 = vmax.f32 %v1567_v42, 0.0 }
 0x1d8   : > { %v1600_v48 = vmax.f32 %v1568_v43, 0.0 }
 0x1da   : > { %v2138_v50 = vpack.c.bf16 %v1600_v48, %v1599_v47 }
 0x1dc   : > { %2154 = vst [vmem:[%s2846_s30 + $0x78] sm:$0xff] %v2138_v50  }
 0x1dd PF: > { %s13_s18 = sadd.s32 1, %s2618_s18   ;;  %s3026_s12 = smov %s2598_s13 }
 0x1de   : > { %p10_p0 = scmp.ge.s32.totalorder %s13_s18, 6   ;;  %s3027_s13 = smov %s2692_s25 }
 0x1df   : > { %s3028_s14 = smov %s2610_s16  ;;  %s3029_s15 = smov %s2614_s17 }
 0x1e0   : > { %s3030_s16 = smov %s3033_s19  ;;  %s3031_s17 = smov %s3037_s20 }
 0x1e1   :  { %12 = sbr.rel (!%p10_p0) target bundleno = 4 (0x4), region = 104 }

// kernel: simple_video_generator.26
= control target key start
LH: loop header
LB: loop body
LE: loop exit
PB: predicated region body
PF: predicated region fallthrough
CT: control target
= control target key end

     0   :  { %s1180_s12 = smov 0   ;;  %s1182_s13 = smov 0   ;;  %s1330_s0 = inlined_call_operand.vmem [shape: bf16[512,128], index: 0, kind: input, shape index: {}]   ;;  %s1331_s1 = inlined_call_operand.vmem [shape: bf16[128,128], index: 1, kind: input, shape index: {}]   ;;  %s1332_s2 = inlined_call_operand.vmem [shape: f32[1,128], index: 2, kind: input, shape index: {}]   ;;  %s1333_s3 = inlined_call_operand.vmem [shape: f32[512,128], index: 3, kind: output, shape index: {}]  }
   0x1   :  { %s1184_s14 = smov 0  }
   0x2 LB: > { %s32_s15 = sadd.s32 1, %s1154_s13  ;;  %p968_p0 = scmp.ge.s32.totalorder %s1158_s14, 1  ;;  %s1158_s14 = sphi %s1184_s14, %s13_s14   ;;  %s1154_s13 = sphi %s1182_s13, %s1335_s13   ;;  %s1150_s12 = sphi %s1180_s12, %s1334_s12  }
   0x3   : > { %p34_p1 = scmp.ge.s32.totalorder %s32_s15, 2  ;;  %p188_p2 = scmp.lt.s32.totalorder %s1158_s14, 3 }
   0x5   : > { %s1337_s15 = smov (%p34_p1, %s32_s15), 0  ;;  %p189_p3 = pnand %p968_p0, %p188_p2 }
   0x6   : > { %v1112_v0 = vld [vmem:[%s1331_s1] sm:$0xff] (!%p189_p3)   ;;  %s969_s18 = sshll.u32 (!%p189_p3), %s1150_s12, 5  ;;  %v1113_v1 = vld [vmem:[%s1331_s1 + $0x8] sm:$0xff] (!%p189_p3)   ;;  %v1114_v2 = vld [vmem:[%s1331_s1 + $0x10] sm:$0xff] (!%p189_p3)  }
   0x7   : > { %192 = sbr.rel (%p189_p3) target bundleno = 281 (0x119), region = 32  ;;  %p230_p4 = scmp.lt.s32.totalorder (!%p189_p3), %s969_s18, 63  ;;  %1024 = vmatprep.subr.bf16.mxu0 (!%p189_p3), %v1112_v0  ;;  %1072 = vmatprep.subr.bf16.mxu1 (!%p189_p3), %v1112_v0  ;;  %v1115_v3 = vld [vmem:[%s1331_s1 + $0x18] sm:$0xff] (!%p189_p3)   ;;  %v1116_v6 = vld [vmem:[%s1331_s1 + $0x20] sm:$0xff] (!%p189_p3)   ;;  %v1117_v7 = vld [vmem:[%s1331_s1 + $0x28] sm:$0xff] (!%p189_p3)  }
   0x8   : > { %1025 = vmatpush3.bf16.msra.mxu0 (!%p189_p3), %v1112_v0  ;;  %1080 = vmatpush3.bf16.msra.mxu1 (!%p189_p3), %v1112_v0  ;;  %v1118_v8 = vld [vmem:[%s1331_s1 + $0x30] sm:$0xff] (!%p189_p3)   ;;  %v1119_v9 = vld [vmem:[%s1331_s1 + $0x38] sm:$0xff] (!%p189_p3)   ;;  %v1250_v24 = vld [vmem:[%s1332_s2] ss:$0 sm:$0xff] (!%p189_p3) }
   0x9   : > { %1026 = vmatprep.subr.bf16.mxu0 (!%p189_p3), %v1113_v1  ;;  %1073 = vmatprep.subr.bf16.mxu1 (!%p189_p3), %v1113_v1 }
   0xc   : > { %1027 = vmatpush3.bf16.msra.mxu0 (!%p189_p3), %v1113_v1  ;;  %1081 = vmatpush3.bf16.msra.mxu1 (!%p189_p3), %v1113_v1 }
   0xd   : > { %1028 = vmatprep.subr.bf16.mxu0 (!%p189_p3), %v1114_v2  ;;  %1074 = vmatprep.subr.bf16.mxu1 (!%p189_p3), %v1114_v2 }
   0xe   : > { %s1339_s18 = smov (!%p230_p4, %s969_s18), 63 }
   0xf   : > { %s970_s23 = sshll.u32 %s1339_s18, 2  ;;  %s972_s10 = sshll.u32 %s1339_s18, 3 }
  0x10   : > { %s1213_s26 = scalar_lea.vmem %s1330_s0, %s970_s23  ;;  %1029 = vmatpush3.bf16.msra.mxu0 %v1114_v2  ;;  %1082 = vmatpush3.bf16.msra.mxu1 %v1114_v2  ;;  %s1255_s19 = scalar_lea.vmem %s1333_s3, %s972_s10 }
  0x11   : > { %v1120_v4 = vld [vmem:[%s1213_s26] sm:$0xff]   ;;  %1030 = vmatprep.subr.bf16.mxu0 %v1115_v3  ;;  %1075 = vmatprep.subr.bf16.mxu1 %v1115_v3  ;;  %v1122_v10 = vld [vmem:[%s1213_s26 + $0x8] sm:$0xff]   ;;  %v1124_v12 = vld [vmem:[%s1213_s26 + $0x10] sm:$0xff]  }
  0x12   : > { %v1121_v5 = vld [vmem:[%s1213_s26 + $0x40] sm:$0xff]   ;;  %1040 = vmatprep.mubr.bf16.mxu0 %v1120_v4  ;;  %v1123_v11 = vld [vmem:[%s1213_s26 + $0x48] sm:$0xff]   ;;  %v1125_v13 = vld [vmem:[%s1213_s26 + $0x50] sm:$0xff]  }
  0x13   : > { %1056 = vmatprep.mubr.bf16.mxu1 %v1121_v5  ;;  %v1126_v14 = vld [vmem:[%s1213_s26 + $0x18] sm:$0xff]   ;;  %v1128_v16 = vld [vmem:[%s1213_s26 + $0x20] sm:$0xff]   ;;  %v1130_v18 = vld [vmem:[%s1213_s26 + $0x28] sm:$0xff]  }
  0x14   : > { %1031 = vmatpush3.bf16.msra.mxu0 %v1115_v3  ;;  %1083 = vmatpush3.bf16.msra.mxu1 %v1115_v3  ;;  %v1127_v15 = vld [vmem:[%s1213_s26 + $0x58] sm:$0xff]   ;;  %v1129_v17 = vld [vmem:[%s1213_s26 + $0x60] sm:$0xff]   ;;  %v1131_v19 = vld [vmem:[%s1213_s26 + $0x68] sm:$0xff]  }
  0x15   : > { %1032 = vmatprep.subr.bf16.mxu0 %v1116_v6  ;;  %1076 = vmatprep.subr.bf16.mxu1 %v1116_v6  ;;  %v1132_v20 = vld [vmem:[%s1213_s26 + $0x30] sm:$0xff]   ;;  %v1134_v22 = vld [vmem:[%s1213_s26 + $0x38] sm:$0xff]  }
  0x16   : > { %v1133_v21 = vld [vmem:[%s1213_s26 + $0x70] sm:$0xff]   ;;  %v1135_v23 = vld [vmem:[%s1213_s26 + $0x78] sm:$0xff]  }
  0x18   : > { %1033 = vmatpush3.bf16.msra.mxu0 %v1116_v6  ;;  %1084 = vmatpush3.bf16.msra.mxu1 %v1116_v6 }
  0x19   : > { %1034 = vmatprep.subr.bf16.mxu0 %v1117_v7  ;;  %1077 = vmatprep.subr.bf16.mxu1 %v1117_v7 }
  0x1c   : > { %1035 = vmatpush3.bf16.msra.mxu0 %v1117_v7  ;;  %1085 = vmatpush3.bf16.msra.mxu1 %v1117_v7 }
  0x1d   : > { %1036 = vmatprep.subr.bf16.mxu0 %v1118_v8  ;;  %1078 = vmatprep.subr.bf16.mxu1 %v1118_v8 }
  0x20   : > { %1037 = vmatpush3.bf16.msra.mxu0 %v1118_v8  ;;  %1086 = vmatpush3.bf16.msra.mxu1 %v1118_v8 }
  0x21   : > { %1038 = vmatprep.subr.bf16.mxu0 %v1119_v9  ;;  %1079 = vmatprep.subr.bf16.mxu1 %v1119_v9 }
  0x24   : > { %1039 = vmatpush3.bf16.msra.mxu0 %v1119_v9  ;;  %1087 = vmatpush3.bf16.msra.mxu1 %v1119_v9 }
  0x27   : > { %1041 = vmatmul.mubr.bf16.vlgmr.msra.gmra.mrb[0].mxu0 %v1122_v10  ;;  %1057 = vmatmul.mubr.bf16.vlgmr.msra.gmra.mrb[0].mxu1 %v1123_v11 }
  0x28   : > { %1044 = vmatprep.mubr.bf16.mxu0 %v1124_v12  ;;  %1060 = vmatprep.mubr.bf16.mxu1 %v1125_v13 }
  0x2f   : > { %1045 = vmatmul.mubr.bf16.gmra.mrb[4].mxu0 %v1126_v14  ;;  %1061 = vmatmul.mubr.bf16.gmra.mrb[4].mxu1 %v1127_v15 }
  0x30   : > { %1048 = vmatprep.mubr.bf16.mxu0 %v1128_v16  ;;  %1064 = vmatprep.mubr.bf16.mxu1 %v1129_v17 }
  0x37   : > { %1049 = vmatmul.mubr.bf16.gmra.mrb[8].mxu0 %v1130_v18  ;;  %1065 = vmatmul.mubr.bf16.gmra.mrb[8].mxu1 %v1131_v19 }
  0x38   : > { %1052 = vmatprep.mubr.bf16.mxu0 %v1132_v20  ;;  %1068 = vmatprep.mubr.bf16.mxu1 %v1133_v21 }
  0x3f   : > { %1053 = vmatmul.mubr.bf16.gmra.mrb[12].mxu0 %v1134_v22  ;;  %1069 = vmatmul.mubr.bf16.gmra.mrb[12].mxu1 %v1135_v23 }
  0xfa   : > { %v1042_v25 = vpop.f32.mrb[0].mxu0  ;;  %v1058_v26 = vpop.f32.mrb[0].mxu1 }
  0xfb   : > { %v789_v27 = vadd.f32 %v1042_v25, %v1250_v24  ;;  %v805_v28 = vadd.f32 %v1058_v26, %v1250_v24  ;;  %v554_v29 = vpop.f32.mrb[1].mxu0  ;;  %v618_v30 = vpop.f32.mrb[1].mxu1 }
  0xfc   : > { %v787_v31 = vadd.f32 %v1250_v24, %v554_v29  ;;  %v803_v32 = vadd.f32 %v1250_v24, %v618_v30  ;;  %v1043_v33 = vpop.f32.mrb[2].mxu0  ;;  %v1059_v34 = vpop.f32.mrb[2].mxu1 }
  0xfd   : > { %821 = vst [vmem:[%s1255_s19 + $0x10] sm:$0xff] %v789_v27  ;;  %837 = vst [vmem:[%s1255_s19 + $0x90] sm:$0xff] %v805_v28  ;;  %v790_v35 = vadd.f32 %v1043_v33, %v1250_v24  ;;  %v806_v36 = vadd.f32 %v1059_v34, %v1250_v24  ;;  %v557_v37 = vpop.f32.mrb[3].mxu0  ;;  %v621_v38 = vpop.f32.mrb[3].mxu1 }
  0xfe   : > { %819 = vst [vmem:[%s1255_s19] sm:$0xff] %v787_v31  ;;  %835 = vst [vmem:[%s1255_s19 + $0x80] sm:$0xff] %v803_v32  ;;  %v788_v39 = vadd.f32 %v1250_v24, %v557_v37  ;;  %v804_v40 = vadd.f32 %v1250_v24, %v621_v38 }
  0xff   : > { %822 = vst [vmem:[%s1255_s19 + $0x18] sm:$0xff] %v790_v35  ;;  %838 = vst [vmem:[%s1255_s19 + $0x98] sm:$0xff] %v806_v36 }
 0x100   : > { %820 = vst [vmem:[%s1255_s19 + $0x8] sm:$0xff] %v788_v39  ;;  %836 = vst [vmem:[%s1255_s19 + $0x88] sm:$0xff] %v804_v40 }
 0x102   : > { %v1046_v41 = vpop.f32.mrb[4].mxu0  ;;  %v1062_v42 = vpop.f32.mrb[4].mxu1 }
 0x103   : > { %v793_v43 = vadd.f32 %v1046_v41, %v1250_v24  ;;  %v809_v44 = vadd.f32 %v1062_v42, %v1250_v24  ;;  %v570_v45 = vpop.f32.mrb[5].mxu0  ;;  %v634_v46 = vpop.f32.mrb[5].mxu1 }
 0x104   : > { %v791_v47 = vadd.f32 %v1250_v24, %v570_v45  ;;  %v807_v48 = vadd.f32 %v1250_v24, %v634_v46  ;;  %v1047_v49 = vpop.f32.mrb[6].mxu0  ;;  %v1063_v50 = vpop.f32.mrb[6].mxu1 }
 0x105   : > { %825 = vst [vmem:[%s1255_s19 + $0x30] sm:$0xff] %v793_v43  ;;  %841 = vst [vmem:[%s1255_s19 + $0xb0] sm:$0xff] %v809_v44  ;;  %v794_v51 = vadd.f32 %v1047_v49, %v1250_v24  ;;  %v810_v52 = vadd.f32 %v1063_v50, %v1250_v24  ;;  %v573_v53 = vpop.f32.mrb[7].mxu0  ;;  %v637_v54 = vpop.f32.mrb[7].mxu1 }
 0x106   : > { %823 = vst [vmem:[%s1255_s19 + $0x20] sm:$0xff] %v791_v47  ;;  %839 = vst [vmem:[%s1255_s19 + $0xa0] sm:$0xff] %v807_v48  ;;  %v792_v55 = vadd.f32 %v1250_v24, %v573_v53  ;;  %v808_v56 = vadd.f32 %v1250_v24, %v637_v54 }
 0x107   : > { %826 = vst [vmem:[%s1255_s19 + $0x38] sm:$0xff] %v794_v51  ;;  %842 = vst [vmem:[%s1255_s19 + $0xb8] sm:$0xff] %v810_v52 }
 0x108   : > { %824 = vst [vmem:[%s1255_s19 + $0x28] sm:$0xff] %v792_v55  ;;  %840 = vst [vmem:[%s1255_s19 + $0xa8] sm:$0xff] %v808_v56 }
 0x10a   : > { %v1050_v57 = vpop.f32.mrb[8].mxu0  ;;  %v1066_v58 = vpop.f32.mrb[8].mxu1 }
 0x10b   : > { %v797_v59 = vadd.f32 %v1050_v57, %v1250_v24  ;;  %v813_v60 = vadd.f32 %v1066_v58, %v1250_v24  ;;  %v586_v61 = vpop.f32.mrb[9].mxu0  ;;  %v650_v62 = vpop.f32.mrb[9].mxu1 }
 0x10c   : > { %v795_v63 = vadd.f32 %v1250_v24, %v586_v61  ;;  %v811_v0 = vadd.f32 %v1250_v24, %v650_v62  ;;  %v1051_v1 = vpop.f32.mrb[10].mxu0  ;;  %v1067_v2 = vpop.f32.mrb[10].mxu1 }
 0x10d   : > { %829 = vst [vmem:[%s1255_s19 + $0x50] sm:$0xff] %v797_v59  ;;  %845 = vst [vmem:[%s1255_s19 + $0xd0] sm:$0xff] %v813_v60  ;;  %v798_v3 = vadd.f32 %v1051_v1, %v1250_v24  ;;  %v814_v4 = vadd.f32 %v1067_v2, %v1250_v24  ;;  %v589_v5 = vpop.f32.mrb[11].mxu0  ;;  %v653_v6 = vpop.f32.mrb[11].mxu1 }
 0x10e   : > { %827 = vst [vmem:[%s1255_s19 + $0x40] sm:$0xff] %v795_v63  ;;  %843 = vst [vmem:[%s1255_s19 + $0xc0] sm:$0xff] %v811_v0  ;;  %v796_v7 = vadd.f32 %v1250_v24, %v589_v5  ;;  %v812_v8 = vadd.f32 %v1250_v24, %v653_v6 }
 0x10f   : > { %830 = vst [vmem:[%s1255_s19 + $0x58] sm:$0xff] %v798_v3  ;;  %846 = vst [vmem:[%s1255_s19 + $0xd8] sm:$0xff] %v814_v4 }
 0x110   : > { %828 = vst [vmem:[%s1255_s19 + $0x48] sm:$0xff] %v796_v7  ;;  %844 = vst [vmem:[%s1255_s19 + $0xc8] sm:$0xff] %v812_v8 }
 0x112   : > { %v1054_v9 = vpop.f32.mrb[12].mxu0  ;;  %v1070_v10 = vpop.f32.mrb[12].mxu1 }
 0x113   : > { %v801_v11 = vadd.f32 %v1054_v9, %v1250_v24  ;;  %v817_v12 = vadd.f32 %v1070_v10, %v1250_v24  ;;  %v602_v13 = vpop.f32.mrb[13].mxu0  ;;  %v666_v14 = vpop.f32.mrb[13].mxu1 }
 0x114   : > { %v799_v15 = vadd.f32 %v1250_v24, %v602_v13  ;;  %v815_v16 = vadd.f32 %v1250_v24, %v666_v14  ;;  %v1055_v17 = vpop.f32.mrb[14].mxu0  ;;  %v1071_v18 = vpop.f32.mrb[14].mxu1 }
 0x115   : > { %833 = vst [vmem:[%s1255_s19 + $0x70] sm:$0xff] %v801_v11  ;;  %849 = vst [vmem:[%s1255_s19 + $0xf0] sm:$0xff] %v817_v12  ;;  %v802_v19 = vadd.f32 %v1055_v17, %v1250_v24  ;;  %v818_v20 = vadd.f32 %v1071_v18, %v1250_v24  ;;  %v605_v21 = vpop.f32.mrb[15].mxu0  ;;  %v669_v22 = vpop.f32.mrb[15].mxu1 }
 0x116   : > { %831 = vst [vmem:[%s1255_s19 + $0x60] sm:$0xff] %v799_v15  ;;  %847 = vst [vmem:[%s1255_s19 + $0xe0] sm:$0xff] %v815_v16  ;;  %v800_v23 = vadd.f32 %v1250_v24, %v605_v21  ;;  %v816_v25 = vadd.f32 %v1250_v24, %v669_v22 }
 0x117   : > { %834 = vst [vmem:[%s1255_s19 + $0x78] sm:$0xff] %v802_v19  ;;  %850 = vst [vmem:[%s1255_s19 + $0xf8] sm:$0xff] %v818_v20 }
 0x118   : > { %832 = vst [vmem:[%s1255_s19 + $0x68] sm:$0xff] %v800_v23  ;;  %848 = vst [vmem:[%s1255_s19 + $0xe8] sm:$0xff] %v816_v25 }
 0x119 PF: > { %s13_s14 = sadd.s32 1, %s1158_s14   ;;  %s1334_s12 = smov %s1154_s13 }
 0x11a   : > { %p10_p5 = scmp.ge.s32.totalorder %s13_s14, 4   ;;  %s1335_s13 = smov %s1337_s15 }
 0x11c   :  { %12 = sbr.rel (!%p10_p5) target bundleno = 2 (0x2), region = 76 }

// kernel: simple_video_generator.27
= control target key start
LH: loop header
LB: loop body
LE: loop exit
PB: predicated region body
PF: predicated region fallthrough
CT: control target
= control target key end

     0   :  { %s2547_s15 = smov 0   ;;  %s2549_s16 = smov 0   ;;  %s2842_s0 = inlined_call_operand.vmem [shape: bf16[512,512], index: 0, kind: input, shape index: {}]   ;;  %s2843_s1 = inlined_call_operand.vmem [shape: bf16[512,128], index: 1, kind: input, shape index: {}]   ;;  %s2844_s2 = inlined_call_operand.vmem [shape: f32[1,128], index: 2, kind: input, shape index: {}]   ;;  %s2845_s3 = inlined_call_operand.vmem [shape: f32[512,128], index: 3, kind: input, shape index: {}]   ;;  %s2846_s4 = inlined_call_operand.vmem [shape: bf16[512,128], index: 4, kind: output, shape index: {}]  }
   0x1   :  { %s2551_s17 = smov 0  }
   0x2 LB: > { %s33_s18 = sadd.s32 1, %s2516_s16  ;;  %p1855_p0 = scmp.ge.s32.totalorder %s2520_s17, 1  ;;  %s2520_s17 = sphi %s2551_s17, %s14_s17   ;;  %s2516_s16 = sphi %s2549_s16, %s2848_s16   ;;  %s2512_s15 = sphi %s2547_s15, %s2847_s15  }
   0x3   : > { %p35_p1 = scmp.ge.s32.totalorder %s33_s18, 2  ;;  %p232_p2 = scmp.lt.s32.totalorder %s2520_s17, 3 }
   0x5   : > { %s2850_s18 = smov (%p35_p1, %s33_s18), 0  ;;  %p233_p3 = pnand %p1855_p0, %p232_p2 }
   0x6   : > { %v2370_v0 = vld [vmem:[%s2843_s1 + $0x40] sm:$0xff] (!%p233_p3)   ;;  %v2374_v4 = vld [vmem:[%s2843_s1 + $0x48] sm:$0xff] (!%p233_p3)   ;;  %v2378_v8 = vld [vmem:[%s2843_s1 + $0x50] sm:$0xff] (!%p233_p3)   ;;  %s1856_s29 = sshll.u32 (!%p233_p3), %s2512_s15, 5 }
   0x7   : > { %236 = sbr.rel (%p233_p3) target bundleno = 387 (0x183), region = 36  ;;  %v2371_v1 = vld [vmem:[%s2843_s1 + $0xc0] sm:$0xff] (!%p233_p3)   ;;  %2122 = vmatprep.subr.bf16.mxu0 (!%p233_p3), %v2370_v0  ;;  %v2375_v5 = vld [vmem:[%s2843_s1 + $0xc8] sm:$0xff] (!%p233_p3)   ;;  %v2379_v9 = vld [vmem:[%s2843_s1 + $0xd0] sm:$0xff] (!%p233_p3)   ;;  %p287_p4 = scmp.lt.s32.totalorder (!%p233_p3), %s1856_s29, 63 }
   0x8   : > { %v2372_v2 = vld [vmem:[%s2843_s1] sm:$0xff] (!%p233_p3)   ;;  %2234 = vmatprep.subr.bf16.mxu1 (!%p233_p3), %v2371_v1  ;;  %v2376_v6 = vld [vmem:[%s2843_s1 + $0x8] sm:$0xff] (!%p233_p3)   ;;  %v2380_v10 = vld [vmem:[%s2843_s1 + $0x10] sm:$0xff] (!%p233_p3)  }
   0x9   : > { %v2373_v3 = vld [vmem:[%s2843_s1 + $0x80] sm:$0xff] (!%p233_p3)   ;;  %2123 = vmatpush3.bf16.msra.mxu0 (!%p233_p3), %v2372_v2  ;;  %v2377_v7 = vld [vmem:[%s2843_s1 + $0x88] sm:$0xff] (!%p233_p3)   ;;  %v2381_v11 = vld [vmem:[%s2843_s1 + $0x90] sm:$0xff] (!%p233_p3)  }
   0xa   : > { %2235 = vmatpush3.bf16.msra.mxu1 (!%p233_p3), %v2373_v3  ;;  %2124 = vmatprep.subr.bf16.mxu0 (!%p233_p3), %v2374_v4  ;;  %v2382_v12 = vld [vmem:[%s2843_s1 + $0x58] sm:$0xff] (!%p233_p3)   ;;  %v2386_v16 = vld [vmem:[%s2843_s1 + $0x60] sm:$0xff] (!%p233_p3)   ;;  %v2390_v20 = vld [vmem:[%s2843_s1 + $0x68] sm:$0xff] (!%p233_p3)  }
   0xb   : > { %2236 = vmatprep.subr.bf16.mxu1 (!%p233_p3), %v2375_v5  ;;  %v2383_v13 = vld [vmem:[%s2843_s1 + $0xd8] sm:$0xff] (!%p233_p3)   ;;  %v2387_v17 = vld [vmem:[%s2843_s1 + $0xe0] sm:$0xff] (!%p233_p3)   ;;  %v2391_v21 = vld [vmem:[%s2843_s1 + $0xe8] sm:$0xff] (!%p233_p3)  }
   0xc   : > { %v2384_v14 = vld [vmem:[%s2843_s1 + $0x18] sm:$0xff] (!%p233_p3)   ;;  %v2388_v18 = vld [vmem:[%s2843_s1 + $0x20] sm:$0xff] (!%p233_p3)   ;;  %v2392_v22 = vld [vmem:[%s2843_s1 + $0x28] sm:$0xff] (!%p233_p3)  }
   0xd   : > { %2125 = vmatpush3.bf16.msra.mxu0 (!%p233_p3), %v2376_v6  ;;  %v2385_v15 = vld [vmem:[%s2843_s1 + $0x98] sm:$0xff] (!%p233_p3)   ;;  %v2389_v19 = vld [vmem:[%s2843_s1 + $0xa0] sm:$0xff] (!%p233_p3)   ;;  %v2393_v23 = vld [vmem:[%s2843_s1 + $0xa8] sm:$0xff] (!%p233_p3)  }
   0xe   : > { %2237 = vmatpush3.bf16.msra.mxu1 %v2377_v7  ;;  %2126 = vmatprep.subr.bf16.mxu0 %v2378_v8  ;;  %s2852_s29 = smov (!%p287_p4, %s1856_s29), 63  ;;  %v2394_v24 = vld [vmem:[%s2843_s1 + $0x70] sm:$0xff]   ;;  %v2398_v28 = vld [vmem:[%s2843_s1 + $0x78] sm:$0xff]  }
   0xf   : > { %2238 = vmatprep.subr.bf16.mxu1 %v2379_v9  ;;  %v2395_v25 = vld [vmem:[%s2843_s1 + $0xf0] sm:$0xff]   ;;  %s1994_s30 = sshll.u32 %s2852_s29, 4  ;;  %v2399_v29 = vld [vmem:[%s2843_s1 + $0xf8] sm:$0xff]   ;;  %s1860_s21 = sshll.u32 %s2852_s29, 3 }
  0x10   : > { %v2396_v26 = vld [vmem:[%s2843_s1 + $0x30] sm:$0xff]   ;;  %s2664_s12 = scalar_lea.vmem %s2842_s0, %s1994_s30  ;;  %v2400_v30 = vld [vmem:[%s2843_s1 + $0x38] sm:$0xff]   ;;  %s2745_s26 = scalar_lea.vmem %s2845_s3, %s1860_s21 }
  0x11   : > { %2127 = vmatpush3.bf16.msra.mxu0 %v2380_v10  ;;  %v2397_v27 = vld [vmem:[%s2843_s1 + $0xb0] sm:$0xff]   ;;  %v2401_v31 = vld [vmem:[%s2843_s1 + $0xb8] sm:$0xff]   ;;  %s1862_s27 = sshll.u32 %s2852_s29, 2 }
  0x12   : > { %2239 = vmatpush3.bf16.msra.mxu1 %v2381_v11  ;;  %2128 = vmatprep.subr.bf16.mxu0 %v2382_v12  ;;  %v2402_v32 = vld [vmem:[%s2664_s12] ss:$16 sps:$4 sm:$0xff]   ;;  %v2404_v33 = vld [vmem:[%s2664_s12 + $0x4] ss:$16 sps:$4 sm:$0xff]   ;;  %v2405_v34 = vld [vmem:[%s2664_s12 + $0x8] ss:$16 sps:$4 sm:$0xff]   ;;  %s2755_s5 = scalar_lea.vmem %s2846_s4, %s1862_s27 }
  0x13   : > { %2240 = vmatprep.subr.bf16.mxu1 %v2383_v13  ;;  %v2407_v35 = vld [vmem:[%s2664_s12 + $0xc] ss:$16 sps:$4 sm:$0xff]   ;;  %1068 = vmatprep.mubr.bf16.mxu0 %v2404_v33  ;;  %v2408_v36 = vld [vmem:[%s2664_s12 + $0x24] ss:$16 sps:$4 sm:$0xff]   ;;  %v2412_v38 = vld [vmem:[%s2664_s12 + $0x20] ss:$16 sps:$4 sm:$0xff]  }
  0x14   : > { %1229 = vmatprep.mubr.bf16.mxu1 %v2407_v35  ;;  %v2410_v37 = vld [vmem:[%s2664_s12 + $0x2c] ss:$16 sps:$4 sm:$0xff]   ;;  %v2413_v39 = vld [vmem:[%s2664_s12 + $0x28] ss:$16 sps:$4 sm:$0xff]   ;;  %v2414_v40 = vld [vmem:[%s2664_s12 + $0x44] ss:$16 sps:$4 sm:$0xff]  }
  0x15   : > { %2129 = vmatpush3.bf16.msra.mxu0 %v2384_v14  ;;  %v2416_v41 = vld [vmem:[%s2664_s12 + $0x4c] ss:$16 sps:$4 sm:$0xff]   ;;  %v2418_v42 = vld [vmem:[%s2664_s12 + $0x40] ss:$16 sps:$4 sm:$0xff]   ;;  %v2419_v43 = vld [vmem:[%s2664_s12 + $0x48] ss:$16 sps:$4 sm:$0xff]  }
  0x16   : > { %2241 = vmatpush3.bf16.msra.mxu1 %v2385_v15  ;;  %2130 = vmatprep.subr.bf16.mxu0 %v2386_v16  ;;  %v2420_v44 = vld [vmem:[%s2664_s12 + $0x64] ss:$16 sps:$4 sm:$0xff]   ;;  %v2422_v45 = vld [vmem:[%s2664_s12 + $0x6c] ss:$16 sps:$4 sm:$0xff]   ;;  %v2424_v46 = vld [vmem:[%s2664_s12 + $0x60] ss:$16 sps:$4 sm:$0xff]  }
  0x17   : > { %2242 = vmatprep.subr.bf16.mxu1 %v2387_v17  ;;  %v2425_v47 = vld [vmem:[%s2664_s12 + $0x68] ss:$16 sps:$4 sm:$0xff]   ;;  %v2426_v48 = vld [vmem:[%s2664_s12 + $0x84] ss:$16 sps:$4 sm:$0xff]   ;;  %v2428_v49 = vld [vmem:[%s2664_s12 + $0x8c] ss:$16 sps:$4 sm:$0xff]  }
  0x18   : > { %v2430_v50 = vld [vmem:[%s2664_s12 + $0x80] ss:$16 sps:$4 sm:$0xff]   ;;  %v2431_v51 = vld [vmem:[%s2664_s12 + $0x88] ss:$16 sps:$4 sm:$0xff]   ;;  %v2432_v52 = vld [vmem:[%s2664_s12 + $0xa4] ss:$16 sps:$4 sm:$0xff]  }
  0x19   : > { %2131 = vmatpush3.bf16.msra.mxu0 %v2388_v18  ;;  %v2434_v53 = vld [vmem:[%s2664_s12 + $0xac] ss:$16 sps:$4 sm:$0xff]   ;;  %v2436_v54 = vld [vmem:[%s2664_s12 + $0xa0] ss:$16 sps:$4 sm:$0xff]   ;;  %v2437_v55 = vld [vmem:[%s2664_s12 + $0xa8] ss:$16 sps:$4 sm:$0xff]  }
  0x1a   : > { %2243 = vmatpush3.bf16.msra.mxu1 %v2389_v19  ;;  %2132 = vmatprep.subr.bf16.mxu0 %v2390_v20  ;;  %v2438_v56 = vld [vmem:[%s2664_s12 + $0xc4] ss:$16 sps:$4 sm:$0xff]   ;;  %v2440_v57 = vld [vmem:[%s2664_s12 + $0xcc] ss:$16 sps:$4 sm:$0xff]   ;;  %v2442_v58 = vld [vmem:[%s2664_s12 + $0xc0] ss:$16 sps:$4 sm:$0xff]  }
  0x1b   : > { %2244 = vmatprep.subr.bf16.mxu1 %v2391_v21  ;;  %v2443_v59 = vld [vmem:[%s2664_s12 + $0xc8] ss:$16 sps:$4 sm:$0xff]   ;;  %v2444_v60 = vld [vmem:[%s2664_s12 + $0xe4] ss:$16 sps:$4 sm:$0xff]   ;;  %v2446_v61 = vld [vmem:[%s2664_s12 + $0xec] ss:$16 sps:$4 sm:$0xff]  }
  0x1c   : > { %v2448_v62 = vld [vmem:[%s2664_s12 + $0xe0] ss:$16 sps:$4 sm:$0xff]   ;;  %v2449_v63 = vld [vmem:[%s2664_s12 + $0xe8] ss:$16 sps:$4 sm:$0xff]   ;;  %v2450_v0 = vld [vmem:[%s2664_s12 + $0x104] ss:$16 sps:$4 sm:$0xff]  }
  0x1d   : > { %2133 = vmatpush3.bf16.msra.mxu0 %v2392_v22  ;;  %v2452_v1 = vld [vmem:[%s2664_s12 + $0x10c] ss:$16 sps:$4 sm:$0xff]   ;;  %v2454_v2 = vld [vmem:[%s2664_s12 + $0x100] ss:$16 sps:$4 sm:$0xff]   ;;  %v2455_v3 = vld [vmem:[%s2664_s12 + $0x108] ss:$16 sps:$4 sm:$0xff]  }
  0x1e   : > { %2245 = vmatpush3.bf16.msra.mxu1 %v2393_v23  ;;  %2134 = vmatprep.subr.bf16.mxu0 %v2394_v24  ;;  %v2456_v4 = vld [vmem:[%s2664_s12 + $0x124] ss:$16 sps:$4 sm:$0xff]   ;;  %v2458_v5 = vld [vmem:[%s2664_s12 + $0x12c] ss:$16 sps:$4 sm:$0xff]   ;;  %v2460_v6 = vld [vmem:[%s2664_s12 + $0x120] ss:$16 sps:$4 sm:$0xff]  }
  0x1f   : > { %2246 = vmatprep.subr.bf16.mxu1 %v2395_v25  ;;  %v2461_v7 = vld [vmem:[%s2664_s12 + $0x128] ss:$16 sps:$4 sm:$0xff]   ;;  %v2462_v8 = vld [vmem:[%s2664_s12 + $0x144] ss:$16 sps:$4 sm:$0xff]   ;;  %v2464_v9 = vld [vmem:[%s2664_s12 + $0x14c] ss:$16 sps:$4 sm:$0xff]  }
  0x20   : > { %v2466_v10 = vld [vmem:[%s2664_s12 + $0x140] ss:$16 sps:$4 sm:$0xff]   ;;  %v2467_v11 = vld [vmem:[%s2664_s12 + $0x148] ss:$16 sps:$4 sm:$0xff]   ;;  %v2468_v12 = vld [vmem:[%s2664_s12 + $0x164] ss:$16 sps:$4 sm:$0xff]  }
  0x21   : > { %2135 = vmatpush3.bf16.msra.mxu0 %v2396_v26  ;;  %v2470_v13 = vld [vmem:[%s2664_s12 + $0x16c] ss:$16 sps:$4 sm:$0xff]   ;;  %v2472_v14 = vld [vmem:[%s2664_s12 + $0x160] ss:$16 sps:$4 sm:$0xff]   ;;  %v2473_v15 = vld [vmem:[%s2664_s12 + $0x168] ss:$16 sps:$4 sm:$0xff]  }
  0x22   : > { %2247 = vmatpush3.bf16.msra.mxu1 %v2397_v27  ;;  %2136 = vmatprep.subr.bf16.mxu0 %v2398_v28  ;;  %v2474_v16 = vld [vmem:[%s2664_s12 + $0x184] ss:$16 sps:$4 sm:$0xff]   ;;  %v2476_v17 = vld [vmem:[%s2664_s12 + $0x18c] ss:$16 sps:$4 sm:$0xff]   ;;  %v2478_v18 = vld [vmem:[%s2664_s12 + $0x180] ss:$16 sps:$4 sm:$0xff]  }
  0x23   : > { %2248 = vmatprep.subr.bf16.mxu1 %v2399_v29  ;;  %v2479_v19 = vld [vmem:[%s2664_s12 + $0x188] ss:$16 sps:$4 sm:$0xff]   ;;  %v2480_v20 = vld [vmem:[%s2664_s12 + $0x1a4] ss:$16 sps:$4 sm:$0xff]   ;;  %v2482_v21 = vld [vmem:[%s2664_s12 + $0x1ac] ss:$16 sps:$4 sm:$0xff]  }
  0x24   : > { %v2484_v22 = vld [vmem:[%s2664_s12 + $0x1a0] ss:$16 sps:$4 sm:$0xff]   ;;  %v2485_v23 = vld [vmem:[%s2664_s12 + $0x1a8] ss:$16 sps:$4 sm:$0xff]   ;;  %v2486_v24 = vld [vmem:[%s2664_s12 + $0x1c4] ss:$16 sps:$4 sm:$0xff]  }
  0x25   : > { %2137 = vmatpush3.bf16.msra.mxu0 %v2400_v30  ;;  %v2488_v25 = vld [vmem:[%s2664_s12 + $0x1cc] ss:$16 sps:$4 sm:$0xff]   ;;  %v2490_v26 = vld [vmem:[%s2664_s12 + $0x1c0] ss:$16 sps:$4 sm:$0xff]   ;;  %v2491_v27 = vld [vmem:[%s2664_s12 + $0x1c8] ss:$16 sps:$4 sm:$0xff]  }
  0x26   : > { %2249 = vmatpush3.bf16.msra.mxu1 %v2401_v31  ;;  %v2492_v28 = vld [vmem:[%s2664_s12 + $0x1e4] ss:$16 sps:$4 sm:$0xff]   ;;  %v2494_v29 = vld [vmem:[%s2664_s12 + $0x1ec] ss:$16 sps:$4 sm:$0xff]   ;;  %v2496_v30 = vld [vmem:[%s2664_s12 + $0x1e0] ss:$16 sps:$4 sm:$0xff]  }
  0x27   : > { %v2497_v31 = vld [vmem:[%s2664_s12 + $0x1e8] ss:$16 sps:$4 sm:$0xff]  }
  0x28   : > { %1069 = vmatmul.mubr.bf16.vlgmr.msra.gmra.mrb[0].mxu0 %v2402_v32 }
  0x29   : > { %1230 = vmatmul.mubr.bf16.vlgmr.msra.gmra.mrb[0].mxu1 %v2405_v34  ;;  %1076 = vmatprep.mubr.bf16.mxu0 %v2408_v36 }
  0x2a   : > { %1237 = vmatprep.mubr.bf16.mxu1 %v2410_v37 }
  0x30   : > { %1077 = vmatmul.mubr.bf16.gmra.mrb[4].mxu0 %v2412_v38 }
  0x31   : > { %1238 = vmatmul.mubr.bf16.gmra.mrb[4].mxu1 %v2413_v39  ;;  %1084 = vmatprep.mubr.bf16.mxu0 %v2414_v40 }
  0x32   : > { %1245 = vmatprep.mubr.bf16.mxu1 %v2416_v41  ;;  %v2740_v41 = vld [vmem:[%s2844_s2] ss:$0 sm:$0xff] }
  0x38   : > { %1085 = vmatmul.mubr.bf16.gmra.mrb[8].mxu0 %v2418_v42 }
  0x39   : > { %1246 = vmatmul.mubr.bf16.gmra.mrb[8].mxu1 %v2419_v43  ;;  %1092 = vmatprep.mubr.bf16.mxu0 %v2420_v44 }
  0x3a   : > { %1253 = vmatprep.mubr.bf16.mxu1 %v2422_v45 }
  0x40   : > { %1093 = vmatmul.mubr.bf16.gmra.mrb[12].mxu0 %v2424_v46 }
  0x41   : > { %1254 = vmatmul.mubr.bf16.gmra.mrb[12].mxu1 %v2425_v47  ;;  %1100 = vmatprep.mubr.bf16.mxu0 %v2426_v48  ;;  %v1496_v48 = vld [vmem:[%s2745_s26] sm:$0xff] }
  0x42   : > { %1261 = vmatprep.mubr.bf16.mxu1 %v2428_v49  ;;  %v1497_v49 = vld [vmem:[%s2745_s26 + $0x8] sm:$0xff] }
  0x48   : > { %1101 = vmatmul.mubr.bf16.gmra.mrb[16].mxu0 %v2430_v50 }
  0x49   : > { %1262 = vmatmul.mubr.bf16.gmra.mrb[16].mxu1 %v2431_v51  ;;  %1108 = vmatprep.mubr.bf16.mxu0 %v2432_v52 }
  0x4a   : > { %1269 = vmatprep.mubr.bf16.mxu1 %v2434_v53 }
  0x50   : > { %1109 = vmatmul.mubr.bf16.gmra.mrb[20].mxu0 %v2436_v54 }
  0x51   : > { %1270 = vmatmul.mubr.bf16.gmra.mrb[20].mxu1 %v2437_v55  ;;  %1116 = vmatprep.mubr.bf16.mxu0 %v2438_v56 }
  0x52   : > { %1277 = vmatprep.mubr.bf16.mxu1 %v2440_v57 }
  0x58   : > { %1117 = vmatmul.mubr.bf16.gmra.mrb[24].mxu0 %v2442_v58 }
  0x59   : > { %1278 = vmatmul.mubr.bf16.gmra.mrb[24].mxu1 %v2443_v59  ;;  %1124 = vmatprep.mubr.bf16.mxu0 %v2444_v60 }
  0x5a   : > { %1285 = vmatprep.mubr.bf16.mxu1 %v2446_v61 }
  0x60   : > { %1125 = vmatmul.mubr.bf16.gmra.mrb[28].mxu0 %v2448_v62 }
  0x61   : > { %1286 = vmatmul.mubr.bf16.gmra.mrb[28].mxu1 %v2449_v63  ;;  %1132 = vmatprep.mubr.bf16.mxu0 %v2450_v0 }
  0x62   : > { %1293 = vmatprep.mubr.bf16.mxu1 %v2452_v1 }
  0x68   : > { %1133 = vmatmul.mubr.bf16.gmra.mrb[32].mxu0 %v2454_v2 }
  0x69   : > { %1294 = vmatmul.mubr.bf16.gmra.mrb[32].mxu1 %v2455_v3  ;;  %1140 = vmatprep.mubr.bf16.mxu0 %v2456_v4 }
  0x6a   : > { %1301 = vmatprep.mubr.bf16.mxu1 %v2458_v5  ;;  %v1498_v5 = vld [vmem:[%s2745_s26 + $0x10] sm:$0xff] }
  0x70   : > { %1141 = vmatmul.mubr.bf16.gmra.mrb[36].mxu0 %v2460_v6  ;;  %v1499_v6 = vld [vmem:[%s2745_s26 + $0x18] sm:$0xff] }
  0x71   : > { %1302 = vmatmul.mubr.bf16.gmra.mrb[36].mxu1 %v2461_v7  ;;  %1148 = vmatprep.mubr.bf16.mxu0 %v2462_v8 }
  0x72   : > { %1309 = vmatprep.mubr.bf16.mxu1 %v2464_v9 }
  0x78   : > { %1149 = vmatmul.mubr.bf16.gmra.mrb[40].mxu0 %v2466_v10 }
  0x79   : > { %1310 = vmatmul.mubr.bf16.gmra.mrb[40].mxu1 %v2467_v11  ;;  %1156 = vmatprep.mubr.bf16.mxu0 %v2468_v12 }
  0x7a   : > { %1317 = vmatprep.mubr.bf16.mxu1 %v2470_v13 }
  0x80   : > { %1157 = vmatmul.mubr.bf16.gmra.mrb[44].mxu0 %v2472_v14 }
  0x81   : > { %1318 = vmatmul.mubr.bf16.gmra.mrb[44].mxu1 %v2473_v15  ;;  %1164 = vmatprep.mubr.bf16.mxu0 %v2474_v16 }
  0x82   : > { %1325 = vmatprep.mubr.bf16.mxu1 %v2476_v17 }
  0x88   : > { %1165 = vmatmul.mubr.bf16.gmra.mrb[48].mxu0 %v2478_v18 }
  0x89   : > { %1326 = vmatmul.mubr.bf16.gmra.mrb[48].mxu1 %v2479_v19  ;;  %1172 = vmatprep.mubr.bf16.mxu0 %v2480_v20 }
  0x8a   : > { %1333 = vmatprep.mubr.bf16.mxu1 %v2482_v21 }
  0x90   : > { %1173 = vmatmul.mubr.bf16.gmra.mrb[52].mxu0 %v2484_v22 }
  0x91   : > { %1334 = vmatmul.mubr.bf16.gmra.mrb[52].mxu1 %v2485_v23  ;;  %1180 = vmatprep.mubr.bf16.mxu0 %v2486_v24 }
  0x92   : > { %1341 = vmatprep.mubr.bf16.mxu1 %v2488_v25 }
  0x98   : > { %1181 = vmatmul.mubr.bf16.gmra.mrb[56].mxu0 %v2490_v26  ;;  %v1500_v26 = vld [vmem:[%s2745_s26 + $0x20] sm:$0xff] }
  0x99   : > { %1342 = vmatmul.mubr.bf16.gmra.mrb[56].mxu1 %v2491_v27  ;;  %1188 = vmatprep.mubr.bf16.mxu0 %v2492_v28  ;;  %v1501_v27 = vld [vmem:[%s2745_s26 + $0x28] sm:$0xff] }
  0x9a   : > { %1349 = vmatprep.mubr.bf16.mxu1 %v2494_v29 }
  0xa0   : > { %1189 = vmatmul.mubr.bf16.gmra.mrb[60].mxu0 %v2496_v30 }
  0xa1   : > { %1350 = vmatmul.mubr.bf16.gmra.mrb[60].mxu1 %v2497_v31 }
  0xfb   : > { %v2138_v32 = vpop.f32.mrb[0].mxu0 }
  0xfc   : > { %v2250_v33 = vpop.f32.mrb[0].mxu1  ;;  %v2139_v34 = vpop.f32.mrb[1].mxu0 }
  0xfd   : > { %v2140_v35 = vadd.f32 %v2139_v34, %v2138_v32  ;;  %v2251_v36 = vpop.f32.mrb[1].mxu1  ;;  %v2141_v37 = vpop.f32.mrb[2].mxu0 }
  0xfe   : > { %v2252_v38 = vadd.f32 %v2251_v36, %v2250_v33  ;;  %v2253_v39 = vpop.f32.mrb[2].mxu1  ;;  %v2142_v40 = vpop.f32.mrb[3].mxu0 }
  0xff   : > { %v2143_v42 = vadd.f32 %v2142_v40, %v2141_v37  ;;  %v2254_v43 = vpop.f32.mrb[3].mxu1 }
 0x100   : > { %v1232_v44 = vadd.f32 %v2252_v38, %v2140_v35  ;;  %v2255_v45 = vadd.f32 %v2254_v43, %v2253_v39 }
 0x102   : > { %v1464_v46 = vadd.f32 %v2740_v41, %v1232_v44  ;;  %v1235_v47 = vadd.f32 %v2255_v45, %v2143_v42 }
 0x103   : > { %v2144_v50 = vpop.f32.mrb[4].mxu0 }
 0x104   : > { %v1465_v51 = vadd.f32 %v2740_v41, %v1235_v47  ;;  %v2256_v52 = vpop.f32.mrb[4].mxu1  ;;  %v2145_v53 = vpop.f32.mrb[5].mxu0  ;;  %v1528_v57 = vadd.f32 %v1496_v48, %v1464_v46  ;;  %v1502_v48 = vld [vmem:[%s2745_s26 + $0x30] sm:$0xff] }
 0x105   : > { %v2146_v54 = vadd.f32 %v2145_v53, %v2144_v50  ;;  %v2257_v55 = vpop.f32.mrb[5].mxu1  ;;  %v2147_v56 = vpop.f32.mrb[6].mxu0 }
 0x106   : > { %v1529_v58 = vadd.f32 %v1497_v49, %v1465_v51  ;;  %v2258_v59 = vadd.f32 %v2257_v55, %v2256_v52  ;;  %v2259_v60 = vpop.f32.mrb[6].mxu1  ;;  %v2148_v61 = vpop.f32.mrb[7].mxu0  ;;  %v1503_v49 = vld [vmem:[%s2745_s26 + $0x38] sm:$0xff] }
 0x107   : > { %v2149_v62 = vadd.f32 %v2148_v61, %v2147_v56  ;;  %v2260_v63 = vpop.f32.mrb[7].mxu1 }
 0x108   : > { %v2030_v0 = vpack.c.bf16 %v1529_v58, %v1528_v57  ;;  %v1240_v1 = vadd.f32 %v2258_v59, %v2146_v54  ;;  %v2261_v2 = vadd.f32 %v2260_v63, %v2259_v60 }
 0x10a   : > { %2031 = vst [vmem:[%s2755_s5] sm:$0xff] %v2030_v0   ;;  %v1466_v3 = vadd.f32 %v2740_v41, %v1240_v1  ;;  %v1243_v4 = vadd.f32 %v2261_v2, %v2149_v62 }
 0x10b   : > { %v2150_v7 = vpop.f32.mrb[8].mxu0 }
 0x10c   : > { %v1467_v8 = vadd.f32 %v2740_v41, %v1243_v4  ;;  %v2262_v9 = vpop.f32.mrb[8].mxu1  ;;  %v2151_v10 = vpop.f32.mrb[9].mxu0  ;;  %v1530_v14 = vadd.f32 %v1498_v5, %v1466_v3  ;;  %v1504_v5 = vld [vmem:[%s2745_s26 + $0x40] sm:$0xff] }
 0x10d   : > { %v2152_v11 = vadd.f32 %v2151_v10, %v2150_v7  ;;  %v2263_v12 = vpop.f32.mrb[9].mxu1  ;;  %v2153_v13 = vpop.f32.mrb[10].mxu0 }
 0x10e   : > { %v1531_v15 = vadd.f32 %v1499_v6, %v1467_v8  ;;  %v2264_v16 = vadd.f32 %v2263_v12, %v2262_v9  ;;  %v2265_v17 = vpop.f32.mrb[10].mxu1  ;;  %v2154_v18 = vpop.f32.mrb[11].mxu0  ;;  %v1505_v6 = vld [vmem:[%s2745_s26 + $0x48] sm:$0xff] }
 0x10f   : > { %v2155_v19 = vadd.f32 %v2154_v18, %v2153_v13  ;;  %v2266_v20 = vpop.f32.mrb[11].mxu1 }
 0x110   : > { %v2035_v21 = vpack.c.bf16 %v1531_v15, %v1530_v14  ;;  %v1248_v22 = vadd.f32 %v2264_v16, %v2152_v11  ;;  %v2267_v23 = vadd.f32 %v2266_v20, %v2265_v17 }
 0x112   : > { %2107 = vst [vmem:[%s2755_s5 + $0x8] sm:$0xff] %v2035_v21   ;;  %v1468_v24 = vadd.f32 %v2740_v41, %v1248_v22  ;;  %v1251_v25 = vadd.f32 %v2267_v23, %v2155_v19 }
 0x113   : > { %v2156_v28 = vpop.f32.mrb[12].mxu0 }
 0x114   : > { %v1469_v29 = vadd.f32 %v2740_v41, %v1251_v25  ;;  %v2268_v30 = vpop.f32.mrb[12].mxu1  ;;  %v2157_v31 = vpop.f32.mrb[13].mxu0  ;;  %v1532_v35 = vadd.f32 %v1500_v26, %v1468_v24  ;;  %v1506_v26 = vld [vmem:[%s2745_s26 + $0x50] sm:$0xff] }
 0x115   : > { %v2158_v32 = vadd.f32 %v2157_v31, %v2156_v28  ;;  %v2269_v33 = vpop.f32.mrb[13].mxu1  ;;  %v2159_v34 = vpop.f32.mrb[14].mxu0 }
 0x116   : > { %v1533_v36 = vadd.f32 %v1501_v27, %v1469_v29  ;;  %v2270_v37 = vadd.f32 %v2269_v33, %v2268_v30  ;;  %v2271_v38 = vpop.f32.mrb[14].mxu1  ;;  %v2160_v39 = vpop.f32.mrb[15].mxu0  ;;  %v1507_v27 = vld [vmem:[%s2745_s26 + $0x58] sm:$0xff] }
 0x117   : > { %v2161_v40 = vadd.f32 %v2160_v39, %v2159_v34  ;;  %v2272_v42 = vpop.f32.mrb[15].mxu1 }
 0x118   : > { %v2040_v43 = vpack.c.bf16 %v1533_v36, %v1532_v35  ;;  %v1256_v44 = vadd.f32 %v2270_v37, %v2158_v32  ;;  %v2273_v45 = vadd.f32 %v2272_v42, %v2271_v38 }
 0x11a   : > { %2108 = vst [vmem:[%s2755_s5 + $0x10] sm:$0xff] %v2040_v43   ;;  %v1470_v46 = vadd.f32 %v2740_v41, %v1256_v44  ;;  %v1259_v47 = vadd.f32 %v2273_v45, %v2161_v40 }
 0x11b   : > { %v2162_v50 = vpop.f32.mrb[16].mxu0 }
 0x11c   : > { %v1471_v51 = vadd.f32 %v2740_v41, %v1259_v47  ;;  %v2274_v52 = vpop.f32.mrb[16].mxu1  ;;  %v2163_v53 = vpop.f32.mrb[17].mxu0  ;;  %v1534_v57 = vadd.f32 %v1502_v48, %v1470_v46  ;;  %v1508_v48 = vld [vmem:[%s2745_s26 + $0x60] sm:$0xff] }
 0x11d   : > { %v2164_v54 = vadd.f32 %v2163_v53, %v2162_v50  ;;  %v2275_v55 = vpop.f32.mrb[17].mxu1  ;;  %v2165_v56 = vpop.f32.mrb[18].mxu0 }
 0x11e   : > { %v1535_v58 = vadd.f32 %v1503_v49, %v1471_v51  ;;  %v2276_v59 = vadd.f32 %v2275_v55, %v2274_v52  ;;  %v2277_v60 = vpop.f32.mrb[18].mxu1  ;;  %v2166_v61 = vpop.f32.mrb[19].mxu0  ;;  %v1509_v49 = vld [vmem:[%s2745_s26 + $0x68] sm:$0xff] }
 0x11f   : > { %v2167_v62 = vadd.f32 %v2166_v61, %v2165_v56  ;;  %v2278_v63 = vpop.f32.mrb[19].mxu1 }
 0x120   : > { %v2045_v0 = vpack.c.bf16 %v1535_v58, %v1534_v57  ;;  %v1264_v1 = vadd.f32 %v2276_v59, %v2164_v54  ;;  %v2279_v2 = vadd.f32 %v2278_v63, %v2277_v60 }
 0x122   : > { %2109 = vst [vmem:[%s2755_s5 + $0x18] sm:$0xff] %v2045_v0   ;;  %v1472_v3 = vadd.f32 %v2740_v41, %v1264_v1  ;;  %v1267_v4 = vadd.f32 %v2279_v2, %v2167_v62 }
 0x123   : > { %v2168_v7 = vpop.f32.mrb[20].mxu0 }
 0x124   : > { %v1473_v8 = vadd.f32 %v2740_v41, %v1267_v4  ;;  %v2280_v9 = vpop.f32.mrb[20].mxu1  ;;  %v2169_v10 = vpop.f32.mrb[21].mxu0  ;;  %v1536_v14 = vadd.f32 %v1504_v5, %v1472_v3  ;;  %v1510_v5 = vld [vmem:[%s2745_s26 + $0x70] sm:$0xff] }
 0x125   : > { %v2170_v11 = vadd.f32 %v2169_v10, %v2168_v7  ;;  %v2281_v12 = vpop.f32.mrb[21].mxu1  ;;  %v2171_v13 = vpop.f32.mrb[22].mxu0 }
 0x126   : > { %v1537_v15 = vadd.f32 %v1505_v6, %v1473_v8  ;;  %v2282_v16 = vadd.f32 %v2281_v12, %v2280_v9  ;;  %v2283_v17 = vpop.f32.mrb[22].mxu1  ;;  %v2172_v18 = vpop.f32.mrb[23].mxu0  ;;  %v1511_v6 = vld [vmem:[%s2745_s26 + $0x78] sm:$0xff] }
 0x127   : > { %v2173_v19 = vadd.f32 %v2172_v18, %v2171_v13  ;;  %v2284_v20 = vpop.f32.mrb[23].mxu1 }
 0x128   : > { %v2050_v21 = vpack.c.bf16 %v1537_v15, %v1536_v14  ;;  %v1272_v22 = vadd.f32 %v2282_v16, %v2170_v11  ;;  %v2285_v23 = vadd.f32 %v2284_v20, %v2283_v17 }
 0x12a   : > { %2110 = vst [vmem:[%s2755_s5 + $0x20] sm:$0xff] %v2050_v21   ;;  %v1474_v24 = vadd.f32 %v2740_v41, %v1272_v22  ;;  %v1275_v25 = vadd.f32 %v2285_v23, %v2173_v19 }
 0x12b   : > { %v2174_v28 = vpop.f32.mrb[24].mxu0 }
 0x12c   : > { %v1475_v29 = vadd.f32 %v2740_v41, %v1275_v25  ;;  %v2286_v30 = vpop.f32.mrb[24].mxu1  ;;  %v2175_v31 = vpop.f32.mrb[25].mxu0  ;;  %v1538_v35 = vadd.f32 %v1506_v26, %v1474_v24  ;;  %v1512_v26 = vld [vmem:[%s2745_s26 + $0x80] sm:$0xff] }
 0x12d   : > { %v2176_v32 = vadd.f32 %v2175_v31, %v2174_v28  ;;  %v2287_v33 = vpop.f32.mrb[25].mxu1  ;;  %v2177_v34 = vpop.f32.mrb[26].mxu0 }
 0x12e   : > { %v1539_v36 = vadd.f32 %v1507_v27, %v1475_v29  ;;  %v2288_v37 = vadd.f32 %v2287_v33, %v2286_v30  ;;  %v2289_v38 = vpop.f32.mrb[26].mxu1  ;;  %v2178_v39 = vpop.f32.mrb[27].mxu0  ;;  %v1513_v27 = vld [vmem:[%s2745_s26 + $0x88] sm:$0xff] }
 0x12f   : > { %v2179_v40 = vadd.f32 %v2178_v39, %v2177_v34  ;;  %v2290_v42 = vpop.f32.mrb[27].mxu1 }
 0x130   : > { %v2055_v43 = vpack.c.bf16 %v1539_v36, %v1538_v35  ;;  %v1280_v44 = vadd.f32 %v2288_v37, %v2176_v32  ;;  %v2291_v45 = vadd.f32 %v2290_v42, %v2289_v38 }
 0x132   : > { %2111 = vst [vmem:[%s2755_s5 + $0x28] sm:$0xff] %v2055_v43   ;;  %v1476_v46 = vadd.f32 %v2740_v41, %v1280_v44  ;;  %v1283_v47 = vadd.f32 %v2291_v45, %v2179_v40 }
 0x133   : > { %v2180_v50 = vpop.f32.mrb[28].mxu0 }
 0x134   : > { %v1477_v51 = vadd.f32 %v2740_v41, %v1283_v47  ;;  %v2292_v52 = vpop.f32.mrb[28].mxu1  ;;  %v2181_v53 = vpop.f32.mrb[29].mxu0  ;;  %v1540_v57 = vadd.f32 %v1508_v48, %v1476_v46  ;;  %v1514_v48 = vld [vmem:[%s2745_s26 + $0x90] sm:$0xff] }
 0x135   : > { %v2182_v54 = vadd.f32 %v2181_v53, %v2180_v50  ;;  %v2293_v55 = vpop.f32.mrb[29].mxu1  ;;  %v2183_v56 = vpop.f32.mrb[30].mxu0 }
 0x136   : > { %v1541_v58 = vadd.f32 %v1509_v49, %v1477_v51  ;;  %v2294_v59 = vadd.f32 %v2293_v55, %v2292_v52  ;;  %v2295_v60 = vpop.f32.mrb[30].mxu1  ;;  %v2184_v61 = vpop.f32.mrb[31].mxu0  ;;  %v1515_v49 = vld [vmem:[%s2745_s26 + $0x98] sm:$0xff] }
 0x137   : > { %v2185_v62 = vadd.f32 %v2184_v61, %v2183_v56  ;;  %v2296_v63 = vpop.f32.mrb[31].mxu1 }
 0x138   : > { %v2060_v0 = vpack.c.bf16 %v1541_v58, %v1540_v57  ;;  %v1288_v1 = vadd.f32 %v2294_v59, %v2182_v54  ;;  %v2297_v2 = vadd.f32 %v2296_v63, %v2295_v60 }
 0x13a   : > { %2112 = vst [vmem:[%s2755_s5 + $0x30] sm:$0xff] %v2060_v0   ;;  %v1478_v3 = vadd.f32 %v2740_v41, %v1288_v1  ;;  %v1291_v4 = vadd.f32 %v2297_v2, %v2185_v62 }
 0x13b   : > { %v2186_v7 = vpop.f32.mrb[32].mxu0 }
 0x13c   : > { %v1479_v8 = vadd.f32 %v2740_v41, %v1291_v4  ;;  %v2298_v9 = vpop.f32.mrb[32].mxu1  ;;  %v2187_v10 = vpop.f32.mrb[33].mxu0  ;;  %v1542_v14 = vadd.f32 %v1510_v5, %v1478_v3  ;;  %v1516_v5 = vld [vmem:[%s2745_s26 + $0xa0] sm:$0xff] }
 0x13d   : > { %v2188_v11 = vadd.f32 %v2187_v10, %v2186_v7  ;;  %v2299_v12 = vpop.f32.mrb[33].mxu1  ;;  %v2189_v13 = vpop.f32.mrb[34].mxu0 }
 0x13e   : > { %v1543_v15 = vadd.f32 %v1511_v6, %v1479_v8  ;;  %v2300_v16 = vadd.f32 %v2299_v12, %v2298_v9  ;;  %v2301_v17 = vpop.f32.mrb[34].mxu1  ;;  %v2190_v18 = vpop.f32.mrb[35].mxu0  ;;  %v1517_v6 = vld [vmem:[%s2745_s26 + $0xa8] sm:$0xff] }
 0x13f   : > { %v2191_v19 = vadd.f32 %v2190_v18, %v2189_v13  ;;  %v2302_v20 = vpop.f32.mrb[35].mxu1 }
 0x140   : > { %v2065_v21 = vpack.c.bf16 %v1543_v15, %v1542_v14  ;;  %v1296_v22 = vadd.f32 %v2300_v16, %v2188_v11  ;;  %v2303_v23 = vadd.f32 %v2302_v20, %v2301_v17 }
 0x142   : > { %2113 = vst [vmem:[%s2755_s5 + $0x38] sm:$0xff] %v2065_v21   ;;  %v1480_v24 = vadd.f32 %v2740_v41, %v1296_v22  ;;  %v1299_v25 = vadd.f32 %v2303_v23, %v2191_v19 }
 0x143   : > { %v2192_v28 = vpop.f32.mrb[36].mxu0 }
 0x144   : > { %v1481_v29 = vadd.f32 %v2740_v41, %v1299_v25  ;;  %v2304_v30 = vpop.f32.mrb[36].mxu1  ;;  %v2193_v31 = vpop.f32.mrb[37].mxu0  ;;  %v1544_v35 = vadd.f32 %v1512_v26, %v1480_v24  ;;  %v1518_v26 = vld [vmem:[%s2745_s26 + $0xb0] sm:$0xff] }
 0x145   : > { %v2194_v32 = vadd.f32 %v2193_v31, %v2192_v28  ;;  %v2305_v33 = vpop.f32.mrb[37].mxu1  ;;  %v2195_v34 = vpop.f32.mrb[38].mxu0 }
 0x146   : > { %v1545_v36 = vadd.f32 %v1513_v27, %v1481_v29  ;;  %v2306_v37 = vadd.f32 %v2305_v33, %v2304_v30  ;;  %v2307_v38 = vpop.f32.mrb[38].mxu1  ;;  %v2196_v39 = vpop.f32.mrb[39].mxu0  ;;  %v1519_v27 = vld [vmem:[%s2745_s26 + $0xb8] sm:$0xff] }
 0x147   : > { %v2197_v40 = vadd.f32 %v2196_v39, %v2195_v34  ;;  %v2308_v42 = vpop.f32.mrb[39].mxu1 }
 0x148   : > { %v2070_v43 = vpack.c.bf16 %v1545_v36, %v1544_v35  ;;  %v1304_v44 = vadd.f32 %v2306_v37, %v2194_v32  ;;  %v2309_v45 = vadd.f32 %v2308_v42, %v2307_v38 }
 0x14a   : > { %2114 = vst [vmem:[%s2755_s5 + $0x40] sm:$0xff] %v2070_v43   ;;  %v1482_v46 = vadd.f32 %v2740_v41, %v1304_v44  ;;  %v1307_v47 = vadd.f32 %v2309_v45, %v2197_v40 }
 0x14b   : > { %v2198_v50 = vpop.f32.mrb[40].mxu0 }
 0x14c   : > { %v1483_v51 = vadd.f32 %v2740_v41, %v1307_v47  ;;  %v2310_v52 = vpop.f32.mrb[40].mxu1  ;;  %v2199_v53 = vpop.f32.mrb[41].mxu0  ;;  %v1546_v57 = vadd.f32 %v1514_v48, %v1482_v46  ;;  %v1520_v48 = vld [vmem:[%s2745_s26 + $0xc0] sm:$0xff] }
 0x14d   : > { %v2200_v54 = vadd.f32 %v2199_v53, %v2198_v50  ;;  %v2311_v55 = vpop.f32.mrb[41].mxu1  ;;  %v2201_v56 = vpop.f32.mrb[42].mxu0 }
 0x14e   : > { %v1547_v58 = vadd.f32 %v1515_v49, %v1483_v51  ;;  %v2312_v59 = vadd.f32 %v2311_v55, %v2310_v52  ;;  %v2313_v60 = vpop.f32.mrb[42].mxu1  ;;  %v2202_v61 = vpop.f32.mrb[43].mxu0  ;;  %v1521_v49 = vld [vmem:[%s2745_s26 + $0xc8] sm:$0xff] }
 0x14f   : > { %v2203_v62 = vadd.f32 %v2202_v61, %v2201_v56  ;;  %v2314_v63 = vpop.f32.mrb[43].mxu1 }
 0x150   : > { %v2075_v0 = vpack.c.bf16 %v1547_v58, %v1546_v57  ;;  %v1312_v1 = vadd.f32 %v2312_v59, %v2200_v54  ;;  %v2315_v2 = vadd.f32 %v2314_v63, %v2313_v60 }
 0x152   : > { %2115 = vst [vmem:[%s2755_s5 + $0x48] sm:$0xff] %v2075_v0   ;;  %v1484_v3 = vadd.f32 %v2740_v41, %v1312_v1  ;;  %v1315_v4 = vadd.f32 %v2315_v2, %v2203_v62 }
 0x153   : > { %v2204_v7 = vpop.f32.mrb[44].mxu0 }
 0x154   : > { %v1485_v8 = vadd.f32 %v2740_v41, %v1315_v4  ;;  %v2316_v9 = vpop.f32.mrb[44].mxu1  ;;  %v2205_v10 = vpop.f32.mrb[45].mxu0  ;;  %v1548_v14 = vadd.f32 %v1516_v5, %v1484_v3  ;;  %v1522_v5 = vld [vmem:[%s2745_s26 + $0xd0] sm:$0xff] }
 0x155   : > { %v2206_v11 = vadd.f32 %v2205_v10, %v2204_v7  ;;  %v2317_v12 = vpop.f32.mrb[45].mxu1  ;;  %v2207_v13 = vpop.f32.mrb[46].mxu0 }
 0x156   : > { %v1549_v15 = vadd.f32 %v1517_v6, %v1485_v8  ;;  %v2318_v16 = vadd.f32 %v2317_v12, %v2316_v9  ;;  %v2319_v17 = vpop.f32.mrb[46].mxu1  ;;  %v2208_v18 = vpop.f32.mrb[47].mxu0  ;;  %v1523_v6 = vld [vmem:[%s2745_s26 + $0xd8] sm:$0xff] }
 0x157   : > { %v2209_v19 = vadd.f32 %v2208_v18, %v2207_v13  ;;  %v2320_v20 = vpop.f32.mrb[47].mxu1 }
 0x158   : > { %v2080_v21 = vpack.c.bf16 %v1549_v15, %v1548_v14  ;;  %v1320_v22 = vadd.f32 %v2318_v16, %v2206_v11  ;;  %v2321_v23 = vadd.f32 %v2320_v20, %v2319_v17 }
 0x15a   : > { %2116 = vst [vmem:[%s2755_s5 + $0x50] sm:$0xff] %v2080_v21   ;;  %v1486_v24 = vadd.f32 %v2740_v41, %v1320_v22  ;;  %v1323_v25 = vadd.f32 %v2321_v23, %v2209_v19 }
 0x15b   : > { %v2210_v28 = vpop.f32.mrb[48].mxu0 }
 0x15c   : > { %v1487_v29 = vadd.f32 %v2740_v41, %v1323_v25  ;;  %v2322_v30 = vpop.f32.mrb[48].mxu1  ;;  %v2211_v31 = vpop.f32.mrb[49].mxu0  ;;  %v1550_v35 = vadd.f32 %v1518_v26, %v1486_v24  ;;  %v1524_v26 = vld [vmem:[%s2745_s26 + $0xe0] sm:$0xff] }
 0x15d   : > { %v2212_v32 = vadd.f32 %v2211_v31, %v2210_v28  ;;  %v2323_v33 = vpop.f32.mrb[49].mxu1  ;;  %v2213_v34 = vpop.f32.mrb[50].mxu0 }
 0x15e   : > { %v1551_v36 = vadd.f32 %v1519_v27, %v1487_v29  ;;  %v2324_v37 = vadd.f32 %v2323_v33, %v2322_v30  ;;  %v2325_v38 = vpop.f32.mrb[50].mxu1  ;;  %v2214_v39 = vpop.f32.mrb[51].mxu0  ;;  %v1525_v27 = vld [vmem:[%s2745_s26 + $0xe8] sm:$0xff] }
 0x15f   : > { %v2215_v40 = vadd.f32 %v2214_v39, %v2213_v34  ;;  %v2326_v42 = vpop.f32.mrb[51].mxu1 }
 0x160   : > { %v2085_v43 = vpack.c.bf16 %v1551_v36, %v1550_v35  ;;  %v1328_v44 = vadd.f32 %v2324_v37, %v2212_v32  ;;  %v2327_v45 = vadd.f32 %v2326_v42, %v2325_v38 }
 0x162   : > { %2117 = vst [vmem:[%s2755_s5 + $0x58] sm:$0xff] %v2085_v43   ;;  %v1488_v46 = vadd.f32 %v2740_v41, %v1328_v44  ;;  %v1331_v47 = vadd.f32 %v2327_v45, %v2215_v40 }
 0x163   : > { %v2216_v50 = vpop.f32.mrb[52].mxu0 }
 0x164   : > { %v1489_v51 = vadd.f32 %v2740_v41, %v1331_v47  ;;  %v2328_v52 = vpop.f32.mrb[52].mxu1  ;;  %v2217_v53 = vpop.f32.mrb[53].mxu0  ;;  %v1552_v57 = vadd.f32 %v1520_v48, %v1488_v46  ;;  %v1526_v48 = vld [vmem:[%s2745_s26 + $0xf0] sm:$0xff] }
 0x165   : > { %v2218_v54 = vadd.f32 %v2217_v53, %v2216_v50  ;;  %v2329_v55 = vpop.f32.mrb[53].mxu1  ;;  %v2219_v56 = vpop.f32.mrb[54].mxu0 }
 0x166   : > { %v1553_v58 = vadd.f32 %v1521_v49, %v1489_v51  ;;  %v2330_v59 = vadd.f32 %v2329_v55, %v2328_v52  ;;  %v2331_v60 = vpop.f32.mrb[54].mxu1  ;;  %v2220_v61 = vpop.f32.mrb[55].mxu0  ;;  %v1527_v49 = vld [vmem:[%s2745_s26 + $0xf8] sm:$0xff] }
 0x167   : > { %v2221_v62 = vadd.f32 %v2220_v61, %v2219_v56  ;;  %v2332_v63 = vpop.f32.mrb[55].mxu1 }
 0x168   : > { %v2090_v0 = vpack.c.bf16 %v1553_v58, %v1552_v57  ;;  %v1336_v1 = vadd.f32 %v2330_v59, %v2218_v54  ;;  %v2333_v2 = vadd.f32 %v2332_v63, %v2331_v60 }
 0x16a   : > { %2118 = vst [vmem:[%s2755_s5 + $0x60] sm:$0xff] %v2090_v0   ;;  %v1490_v3 = vadd.f32 %v2740_v41, %v1336_v1  ;;  %v1339_v4 = vadd.f32 %v2333_v2, %v2221_v62 }
 0x16b   : > { %v2222_v7 = vpop.f32.mrb[56].mxu0 }
 0x16c   : > { %v1491_v8 = vadd.f32 %v2740_v41, %v1339_v4  ;;  %v2334_v9 = vpop.f32.mrb[56].mxu1  ;;  %v2223_v10 = vpop.f32.mrb[57].mxu0  ;;  %v1554_v14 = vadd.f32 %v1522_v5, %v1490_v3 }
 0x16d   : > { %v2224_v11 = vadd.f32 %v2223_v10, %v2222_v7  ;;  %v2335_v12 = vpop.f32.mrb[57].mxu1  ;;  %v2225_v13 = vpop.f32.mrb[58].mxu0 }
 0x16e   : > { %v1555_v15 = vadd.f32 %v1523_v6, %v1491_v8  ;;  %v2336_v16 = vadd.f32 %v2335_v12, %v2334_v9  ;;  %v2337_v17 = vpop.f32.mrb[58].mxu1  ;;  %v2226_v18 = vpop.f32.mrb[59].mxu0 }
 0x16f   : > { %v2227_v19 = vadd.f32 %v2226_v18, %v2225_v13  ;;  %v2338_v20 = vpop.f32.mrb[59].mxu1 }
 0x170   : > { %v2095_v21 = vpack.c.bf16 %v1555_v15, %v1554_v14  ;;  %v1344_v22 = vadd.f32 %v2336_v16, %v2224_v11  ;;  %v2339_v23 = vadd.f32 %v2338_v20, %v2337_v17 }
 0x172   : > { %2119 = vst [vmem:[%s2755_s5 + $0x68] sm:$0xff] %v2095_v21   ;;  %v1492_v24 = vadd.f32 %v2740_v41, %v1344_v22  ;;  %v1347_v25 = vadd.f32 %v2339_v23, %v2227_v19 }
 0x173   : > { %v2228_v28 = vpop.f32.mrb[60].mxu0 }
 0x174   : > { %v1493_v29 = vadd.f32 %v2740_v41, %v1347_v25  ;;  %v2340_v30 = vpop.f32.mrb[60].mxu1  ;;  %v2229_v31 = vpop.f32.mrb[61].mxu0  ;;  %v1556_v35 = vadd.f32 %v1524_v26, %v1492_v24 }
 0x175   : > { %v2230_v32 = vadd.f32 %v2229_v31, %v2228_v28  ;;  %v2341_v33 = vpop.f32.mrb[61].mxu1  ;;  %v2231_v34 = vpop.f32.mrb[62].mxu0 }
 0x176   : > { %v1557_v36 = vadd.f32 %v1525_v27, %v1493_v29  ;;  %v2342_v37 = vadd.f32 %v2341_v33, %v2340_v30  ;;  %v2343_v38 = vpop.f32.mrb[62].mxu1  ;;  %v2232_v39 = vpop.f32.mrb[63].mxu0 }
 0x177   : > { %v2233_v40 = vadd.f32 %v2232_v39, %v2231_v34  ;;  %v2344_v42 = vpop.f32.mrb[63].mxu1 }
 0x178   : > { %v2100_v43 = vpack.c.bf16 %v1557_v36, %v1556_v35  ;;  %v1352_v44 = vadd.f32 %v2342_v37, %v2230_v32  ;;  %v2345_v45 = vadd.f32 %v2344_v42, %v2343_v38 }
 0x17a   : > { %2120 = vst [vmem:[%s2755_s5 + $0x70] sm:$0xff] %v2100_v43   ;;  %v1494_v46 = vadd.f32 %v2740_v41, %v1352_v44  ;;  %v1355_v47 = vadd.f32 %v2345_v45, %v2233_v40 }
 0x17c   : > { %v1495_v50 = vadd.f32 %v2740_v41, %v1355_v47  ;;  %v1558_v51 = vadd.f32 %v1526_v48, %v1494_v46 }
 0x17e   : > { %v1559_v52 = vadd.f32 %v1527_v49, %v1495_v50 }
 0x180   : > { %v2105_v53 = vpack.c.bf16 %v1559_v52, %v1558_v51 }
 0x182   : > { %2121 = vst [vmem:[%s2755_s5 + $0x78] sm:$0xff] %v2105_v53  }
 0x183 PF: > { %s14_s17 = sadd.s32 1, %s2520_s17   ;;  %s2847_s15 = smov %s2516_s16 }
 0x184   : > { %p11_p5 = scmp.ge.s32.totalorder %s14_s17, 4   ;;  %s2848_s16 = smov %s2850_s18 }
 0x186   :  { %13 = sbr.rel (!%p11_p5) target bundleno = 2 (0x2), region = 83 }

// kernel: simple_video_generator.28
= control target key start
LH: loop header
LB: loop body
LE: loop exit
PB: predicated region body
PF: predicated region fallthrough
CT: control target
= control target key end

     0   :  { %s2433_s12 = smov 0   ;;  %s2435_s13 = smov 0   ;;  %s2690_s0 = inlined_call_operand.vmem [shape: bf16[2048,512], index: 0, kind: input, shape index: {}]   ;;  %s2691_s1 = inlined_call_operand.vmem [shape: bf16[512,128], index: 1, kind: input, shape index: {}]   ;;  %s2692_s2 = inlined_call_operand.vmem [shape: f32[1,128], index: 2, kind: input, shape index: {}]   ;;  %s2693_s3 = inlined_call_operand.vmem [shape: bf16[2048,128], index: 3, kind: output, shape index: {}]  }
   0x1   :  { %s2437_s14 = smov 0  }
   0x2 LB: > { %s32_s15 = sadd.s32 1, %s2407_s13  ;;  %p1748_p0 = scmp.ge.s32.totalorder %s2411_s14, 1  ;;  %s2411_s14 = sphi %s2437_s14, %s13_s14   ;;  %s2407_s13 = sphi %s2435_s13, %s2695_s13   ;;  %s2403_s12 = sphi %s2433_s12, %s2694_s12  }
   0x3   : > { %p34_p1 = scmp.ge.s32.totalorder %s32_s15, 8  ;;  %p191_p2 = scmp.lt.s32.totalorder %s2411_s14, 9 }
   0x5   : > { %s2697_s15 = smov (%p34_p1, %s32_s15), 0  ;;  %p192_p3 = pnand %p1748_p0, %p191_p2 }
   0x6   : > { %v2261_v0 = vld [vmem:[%s2691_s1 + $0x40] sm:$0xff] (!%p192_p3)   ;;  %v2265_v4 = vld [vmem:[%s2691_s1 + $0x48] sm:$0xff] (!%p192_p3)   ;;  %v2269_v8 = vld [vmem:[%s2691_s1 + $0x50] sm:$0xff] (!%p192_p3)   ;;  %s1749_s25 = sshll.u32 (!%p192_p3), %s2403_s12, 5 }
   0x7   : > { %195 = sbr.rel (%p192_p3) target bundleno = 387 (0x183), region = 32  ;;  %v2262_v1 = vld [vmem:[%s2691_s1 + $0xc0] sm:$0xff] (!%p192_p3)   ;;  %2013 = vmatprep.subr.bf16.mxu0 (!%p192_p3), %v2261_v0  ;;  %v2266_v5 = vld [vmem:[%s2691_s1 + $0xc8] sm:$0xff] (!%p192_p3)   ;;  %v2270_v9 = vld [vmem:[%s2691_s1 + $0xd0] sm:$0xff] (!%p192_p3)   ;;  %p236_p4 = scmp.lt.s32.totalorder (!%p192_p3), %s1749_s25, 255 }
   0x8   : > { %v2263_v2 = vld [vmem:[%s2691_s1] sm:$0xff] (!%p192_p3)   ;;  %2125 = vmatprep.subr.bf16.mxu1 (!%p192_p3), %v2262_v1  ;;  %v2267_v6 = vld [vmem:[%s2691_s1 + $0x8] sm:$0xff] (!%p192_p3)   ;;  %v2271_v10 = vld [vmem:[%s2691_s1 + $0x10] sm:$0xff] (!%p192_p3)  }
   0x9   : > { %v2264_v3 = vld [vmem:[%s2691_s1 + $0x80] sm:$0xff] (!%p192_p3)   ;;  %2014 = vmatpush3.bf16.msra.mxu0 (!%p192_p3), %v2263_v2  ;;  %v2268_v7 = vld [vmem:[%s2691_s1 + $0x88] sm:$0xff] (!%p192_p3)   ;;  %v2272_v11 = vld [vmem:[%s2691_s1 + $0x90] sm:$0xff] (!%p192_p3)  }
   0xa   : > { %2126 = vmatpush3.bf16.msra.mxu1 (!%p192_p3), %v2264_v3  ;;  %2015 = vmatprep.subr.bf16.mxu0 (!%p192_p3), %v2265_v4  ;;  %v2273_v12 = vld [vmem:[%s2691_s1 + $0x58] sm:$0xff] (!%p192_p3)   ;;  %v2277_v16 = vld [vmem:[%s2691_s1 + $0x60] sm:$0xff] (!%p192_p3)   ;;  %v2281_v20 = vld [vmem:[%s2691_s1 + $0x68] sm:$0xff] (!%p192_p3)  }
   0xb   : > { %2127 = vmatprep.subr.bf16.mxu1 (!%p192_p3), %v2266_v5  ;;  %v2274_v13 = vld [vmem:[%s2691_s1 + $0xd8] sm:$0xff] (!%p192_p3)   ;;  %v2278_v17 = vld [vmem:[%s2691_s1 + $0xe0] sm:$0xff] (!%p192_p3)   ;;  %v2282_v21 = vld [vmem:[%s2691_s1 + $0xe8] sm:$0xff] (!%p192_p3)  }
   0xc   : > { %v2275_v14 = vld [vmem:[%s2691_s1 + $0x18] sm:$0xff] (!%p192_p3)   ;;  %v2279_v18 = vld [vmem:[%s2691_s1 + $0x20] sm:$0xff] (!%p192_p3)   ;;  %v2283_v22 = vld [vmem:[%s2691_s1 + $0x28] sm:$0xff] (!%p192_p3)  }
   0xd   : > { %2016 = vmatpush3.bf16.msra.mxu0 (!%p192_p3), %v2267_v6  ;;  %v2276_v15 = vld [vmem:[%s2691_s1 + $0x98] sm:$0xff] (!%p192_p3)   ;;  %v2280_v19 = vld [vmem:[%s2691_s1 + $0xa0] sm:$0xff] (!%p192_p3)   ;;  %v2284_v23 = vld [vmem:[%s2691_s1 + $0xa8] sm:$0xff] (!%p192_p3)  }
   0xe   : > { %2128 = vmatpush3.bf16.msra.mxu1 %v2268_v7  ;;  %2017 = vmatprep.subr.bf16.mxu0 %v2269_v8  ;;  %s2699_s25 = smov (!%p236_p4, %s1749_s25), 255  ;;  %v2285_v24 = vld [vmem:[%s2691_s1 + $0x70] sm:$0xff]   ;;  %v2289_v28 = vld [vmem:[%s2691_s1 + $0x78] sm:$0xff]  }
   0xf   : > { %2129 = vmatprep.subr.bf16.mxu1 %v2270_v9  ;;  %v2286_v25 = vld [vmem:[%s2691_s1 + $0xf0] sm:$0xff]   ;;  %s1885_s24 = sshll.u32 %s2699_s25, 4  ;;  %v2290_v29 = vld [vmem:[%s2691_s1 + $0xf8] sm:$0xff]   ;;  %s1753_s17 = sshll.u32 %s2699_s25, 2 }
  0x10   : > { %v2287_v26 = vld [vmem:[%s2691_s1 + $0x30] sm:$0xff]   ;;  %s2550_s12 = scalar_lea.vmem %s2690_s0, %s1885_s24  ;;  %v2291_v30 = vld [vmem:[%s2691_s1 + $0x38] sm:$0xff]   ;;  %s2633_s20 = scalar_lea.vmem %s2693_s3, %s1753_s17 }
  0x11   : > { %2018 = vmatpush3.bf16.msra.mxu0 %v2271_v10  ;;  %v2288_v27 = vld [vmem:[%s2691_s1 + $0xb0] sm:$0xff]   ;;  %v2292_v31 = vld [vmem:[%s2691_s1 + $0xb8] sm:$0xff]  }
  0x12   : > { %2130 = vmatpush3.bf16.msra.mxu1 %v2272_v11  ;;  %2019 = vmatprep.subr.bf16.mxu0 %v2273_v12  ;;  %v2293_v32 = vld [vmem:[%s2550_s12] ss:$16 sps:$4 sm:$0xff]   ;;  %v2295_v33 = vld [vmem:[%s2550_s12 + $0x4] ss:$16 sps:$4 sm:$0xff]   ;;  %v2296_v34 = vld [vmem:[%s2550_s12 + $0x8] ss:$16 sps:$4 sm:$0xff]  }
  0x13   : > { %2131 = vmatprep.subr.bf16.mxu1 %v2274_v13  ;;  %v2298_v35 = vld [vmem:[%s2550_s12 + $0xc] ss:$16 sps:$4 sm:$0xff]   ;;  %1008 = vmatprep.mubr.bf16.mxu0 %v2295_v33  ;;  %v2299_v36 = vld [vmem:[%s2550_s12 + $0x24] ss:$16 sps:$4 sm:$0xff]   ;;  %v2303_v38 = vld [vmem:[%s2550_s12 + $0x20] ss:$16 sps:$4 sm:$0xff]  }
  0x14   : > { %1169 = vmatprep.mubr.bf16.mxu1 %v2298_v35  ;;  %v2301_v37 = vld [vmem:[%s2550_s12 + $0x2c] ss:$16 sps:$4 sm:$0xff]   ;;  %v2304_v39 = vld [vmem:[%s2550_s12 + $0x28] ss:$16 sps:$4 sm:$0xff]   ;;  %v2305_v40 = vld [vmem:[%s2550_s12 + $0x44] ss:$16 sps:$4 sm:$0xff]  }
  0x15   : > { %2020 = vmatpush3.bf16.msra.mxu0 %v2275_v14  ;;  %v2307_v41 = vld [vmem:[%s2550_s12 + $0x4c] ss:$16 sps:$4 sm:$0xff]   ;;  %v2309_v42 = vld [vmem:[%s2550_s12 + $0x40] ss:$16 sps:$4 sm:$0xff]   ;;  %v2310_v43 = vld [vmem:[%s2550_s12 + $0x48] ss:$16 sps:$4 sm:$0xff]  }
  0x16   : > { %2132 = vmatpush3.bf16.msra.mxu1 %v2276_v15  ;;  %2021 = vmatprep.subr.bf16.mxu0 %v2277_v16  ;;  %v2311_v44 = vld [vmem:[%s2550_s12 + $0x64] ss:$16 sps:$4 sm:$0xff]   ;;  %v2313_v45 = vld [vmem:[%s2550_s12 + $0x6c] ss:$16 sps:$4 sm:$0xff]   ;;  %v2315_v46 = vld [vmem:[%s2550_s12 + $0x60] ss:$16 sps:$4 sm:$0xff]  }
  0x17   : > { %2133 = vmatprep.subr.bf16.mxu1 %v2278_v17  ;;  %v2316_v47 = vld [vmem:[%s2550_s12 + $0x68] ss:$16 sps:$4 sm:$0xff]   ;;  %v2317_v48 = vld [vmem:[%s2550_s12 + $0x84] ss:$16 sps:$4 sm:$0xff]   ;;  %v2319_v49 = vld [vmem:[%s2550_s12 + $0x8c] ss:$16 sps:$4 sm:$0xff]  }
  0x18   : > { %v2321_v50 = vld [vmem:[%s2550_s12 + $0x80] ss:$16 sps:$4 sm:$0xff]   ;;  %v2322_v51 = vld [vmem:[%s2550_s12 + $0x88] ss:$16 sps:$4 sm:$0xff]   ;;  %v2323_v52 = vld [vmem:[%s2550_s12 + $0xa4] ss:$16 sps:$4 sm:$0xff]  }
  0x19   : > { %2022 = vmatpush3.bf16.msra.mxu0 %v2279_v18  ;;  %v2325_v53 = vld [vmem:[%s2550_s12 + $0xac] ss:$16 sps:$4 sm:$0xff]   ;;  %v2327_v54 = vld [vmem:[%s2550_s12 + $0xa0] ss:$16 sps:$4 sm:$0xff]   ;;  %v2328_v55 = vld [vmem:[%s2550_s12 + $0xa8] ss:$16 sps:$4 sm:$0xff]  }
  0x1a   : > { %2134 = vmatpush3.bf16.msra.mxu1 %v2280_v19  ;;  %2023 = vmatprep.subr.bf16.mxu0 %v2281_v20  ;;  %v2329_v56 = vld [vmem:[%s2550_s12 + $0xc4] ss:$16 sps:$4 sm:$0xff]   ;;  %v2331_v57 = vld [vmem:[%s2550_s12 + $0xcc] ss:$16 sps:$4 sm:$0xff]   ;;  %v2333_v58 = vld [vmem:[%s2550_s12 + $0xc0] ss:$16 sps:$4 sm:$0xff]  }
  0x1b   : > { %2135 = vmatprep.subr.bf16.mxu1 %v2282_v21  ;;  %v2334_v59 = vld [vmem:[%s2550_s12 + $0xc8] ss:$16 sps:$4 sm:$0xff]   ;;  %v2335_v60 = vld [vmem:[%s2550_s12 + $0xe4] ss:$16 sps:$4 sm:$0xff]   ;;  %v2337_v61 = vld [vmem:[%s2550_s12 + $0xec] ss:$16 sps:$4 sm:$0xff]  }
  0x1c   : > { %v2339_v62 = vld [vmem:[%s2550_s12 + $0xe0] ss:$16 sps:$4 sm:$0xff]   ;;  %v2340_v63 = vld [vmem:[%s2550_s12 + $0xe8] ss:$16 sps:$4 sm:$0xff]   ;;  %v2341_v0 = vld [vmem:[%s2550_s12 + $0x104] ss:$16 sps:$4 sm:$0xff]  }
  0x1d   : > { %2024 = vmatpush3.bf16.msra.mxu0 %v2283_v22  ;;  %v2343_v1 = vld [vmem:[%s2550_s12 + $0x10c] ss:$16 sps:$4 sm:$0xff]   ;;  %v2345_v2 = vld [vmem:[%s2550_s12 + $0x100] ss:$16 sps:$4 sm:$0xff]   ;;  %v2346_v3 = vld [vmem:[%s2550_s12 + $0x108] ss:$16 sps:$4 sm:$0xff]  }
  0x1e   : > { %2136 = vmatpush3.bf16.msra.mxu1 %v2284_v23  ;;  %2025 = vmatprep.subr.bf16.mxu0 %v2285_v24  ;;  %v2347_v4 = vld [vmem:[%s2550_s12 + $0x124] ss:$16 sps:$4 sm:$0xff]   ;;  %v2349_v5 = vld [vmem:[%s2550_s12 + $0x12c] ss:$16 sps:$4 sm:$0xff]   ;;  %v2351_v6 = vld [vmem:[%s2550_s12 + $0x120] ss:$16 sps:$4 sm:$0xff]  }
  0x1f   : > { %2137 = vmatprep.subr.bf16.mxu1 %v2286_v25  ;;  %v2352_v7 = vld [vmem:[%s2550_s12 + $0x128] ss:$16 sps:$4 sm:$0xff]   ;;  %v2353_v8 = vld [vmem:[%s2550_s12 + $0x144] ss:$16 sps:$4 sm:$0xff]   ;;  %v2355_v9 = vld [vmem:[%s2550_s12 + $0x14c] ss:$16 sps:$4 sm:$0xff]  }
  0x20   : > { %v2357_v10 = vld [vmem:[%s2550_s12 + $0x140] ss:$16 sps:$4 sm:$0xff]   ;;  %v2358_v11 = vld [vmem:[%s2550_s12 + $0x148] ss:$16 sps:$4 sm:$0xff]   ;;  %v2359_v12 = vld [vmem:[%s2550_s12 + $0x164] ss:$16 sps:$4 sm:$0xff]  }
  0x21   : > { %2026 = vmatpush3.bf16.msra.mxu0 %v2287_v26  ;;  %v2361_v13 = vld [vmem:[%s2550_s12 + $0x16c] ss:$16 sps:$4 sm:$0xff]   ;;  %v2363_v14 = vld [vmem:[%s2550_s12 + $0x160] ss:$16 sps:$4 sm:$0xff]   ;;  %v2364_v15 = vld [vmem:[%s2550_s12 + $0x168] ss:$16 sps:$4 sm:$0xff]  }
  0x22   : > { %2138 = vmatpush3.bf16.msra.mxu1 %v2288_v27  ;;  %2027 = vmatprep.subr.bf16.mxu0 %v2289_v28  ;;  %v2365_v16 = vld [vmem:[%s2550_s12 + $0x184] ss:$16 sps:$4 sm:$0xff]   ;;  %v2367_v17 = vld [vmem:[%s2550_s12 + $0x18c] ss:$16 sps:$4 sm:$0xff]   ;;  %v2369_v18 = vld [vmem:[%s2550_s12 + $0x180] ss:$16 sps:$4 sm:$0xff]  }
  0x23   : > { %2139 = vmatprep.subr.bf16.mxu1 %v2290_v29  ;;  %v2370_v19 = vld [vmem:[%s2550_s12 + $0x188] ss:$16 sps:$4 sm:$0xff]   ;;  %v2371_v20 = vld [vmem:[%s2550_s12 + $0x1a4] ss:$16 sps:$4 sm:$0xff]   ;;  %v2373_v21 = vld [vmem:[%s2550_s12 + $0x1ac] ss:$16 sps:$4 sm:$0xff]  }
  0x24   : > { %v2375_v22 = vld [vmem:[%s2550_s12 + $0x1a0] ss:$16 sps:$4 sm:$0xff]   ;;  %v2376_v23 = vld [vmem:[%s2550_s12 + $0x1a8] ss:$16 sps:$4 sm:$0xff]   ;;  %v2377_v24 = vld [vmem:[%s2550_s12 + $0x1c4] ss:$16 sps:$4 sm:$0xff]  }
  0x25   : > { %2028 = vmatpush3.bf16.msra.mxu0 %v2291_v30  ;;  %v2379_v25 = vld [vmem:[%s2550_s12 + $0x1cc] ss:$16 sps:$4 sm:$0xff]   ;;  %v2381_v26 = vld [vmem:[%s2550_s12 + $0x1c0] ss:$16 sps:$4 sm:$0xff]   ;;  %v2382_v27 = vld [vmem:[%s2550_s12 + $0x1c8] ss:$16 sps:$4 sm:$0xff]  }
  0x26   : > { %2140 = vmatpush3.bf16.msra.mxu1 %v2292_v31  ;;  %v2383_v28 = vld [vmem:[%s2550_s12 + $0x1e4] ss:$16 sps:$4 sm:$0xff]   ;;  %v2385_v29 = vld [vmem:[%s2550_s12 + $0x1ec] ss:$16 sps:$4 sm:$0xff]   ;;  %v2387_v30 = vld [vmem:[%s2550_s12 + $0x1e0] ss:$16 sps:$4 sm:$0xff]  }
  0x27   : > { %v2388_v31 = vld [vmem:[%s2550_s12 + $0x1e8] ss:$16 sps:$4 sm:$0xff]  }
  0x28   : > { %1009 = vmatmul.mubr.bf16.vlgmr.msra.gmra.mrb[0].mxu0 %v2293_v32 }
  0x29   : > { %1170 = vmatmul.mubr.bf16.vlgmr.msra.gmra.mrb[0].mxu1 %v2296_v34  ;;  %1016 = vmatprep.mubr.bf16.mxu0 %v2299_v36 }
  0x2a   : > { %1177 = vmatprep.mubr.bf16.mxu1 %v2301_v37 }
  0x30   : > { %1017 = vmatmul.mubr.bf16.gmra.mrb[4].mxu0 %v2303_v38 }
  0x31   : > { %1178 = vmatmul.mubr.bf16.gmra.mrb[4].mxu1 %v2304_v39  ;;  %1024 = vmatprep.mubr.bf16.mxu0 %v2305_v40 }
  0x32   : > { %1185 = vmatprep.mubr.bf16.mxu1 %v2307_v41  ;;  %v2625_v41 = vld [vmem:[%s2692_s2] ss:$0 sm:$0xff] }
  0x38   : > { %1025 = vmatmul.mubr.bf16.gmra.mrb[8].mxu0 %v2309_v42 }
  0x39   : > { %1186 = vmatmul.mubr.bf16.gmra.mrb[8].mxu1 %v2310_v43  ;;  %1032 = vmatprep.mubr.bf16.mxu0 %v2311_v44 }
  0x3a   : > { %1193 = vmatprep.mubr.bf16.mxu1 %v2313_v45 }
  0x40   : > { %1033 = vmatmul.mubr.bf16.gmra.mrb[12].mxu0 %v2315_v46 }
  0x41   : > { %1194 = vmatmul.mubr.bf16.gmra.mrb[12].mxu1 %v2316_v47  ;;  %1040 = vmatprep.mubr.bf16.mxu0 %v2317_v48 }
  0x42   : > { %1201 = vmatprep.mubr.bf16.mxu1 %v2319_v49 }
  0x48   : > { %1041 = vmatmul.mubr.bf16.gmra.mrb[16].mxu0 %v2321_v50 }
  0x49   : > { %1202 = vmatmul.mubr.bf16.gmra.mrb[16].mxu1 %v2322_v51  ;;  %1048 = vmatprep.mubr.bf16.mxu0 %v2323_v52 }
  0x4a   : > { %1209 = vmatprep.mubr.bf16.mxu1 %v2325_v53 }
  0x50   : > { %1049 = vmatmul.mubr.bf16.gmra.mrb[20].mxu0 %v2327_v54 }
  0x51   : > { %1210 = vmatmul.mubr.bf16.gmra.mrb[20].mxu1 %v2328_v55  ;;  %1056 = vmatprep.mubr.bf16.mxu0 %v2329_v56 }
  0x52   : > { %1217 = vmatprep.mubr.bf16.mxu1 %v2331_v57 }
  0x58   : > { %1057 = vmatmul.mubr.bf16.gmra.mrb[24].mxu0 %v2333_v58 }
  0x59   : > { %1218 = vmatmul.mubr.bf16.gmra.mrb[24].mxu1 %v2334_v59  ;;  %1064 = vmatprep.mubr.bf16.mxu0 %v2335_v60 }
  0x5a   : > { %1225 = vmatprep.mubr.bf16.mxu1 %v2337_v61 }
  0x60   : > { %1065 = vmatmul.mubr.bf16.gmra.mrb[28].mxu0 %v2339_v62 }
  0x61   : > { %1226 = vmatmul.mubr.bf16.gmra.mrb[28].mxu1 %v2340_v63  ;;  %1072 = vmatprep.mubr.bf16.mxu0 %v2341_v0 }
  0x62   : > { %1233 = vmatprep.mubr.bf16.mxu1 %v2343_v1 }
  0x68   : > { %1073 = vmatmul.mubr.bf16.gmra.mrb[32].mxu0 %v2345_v2 }
  0x69   : > { %1234 = vmatmul.mubr.bf16.gmra.mrb[32].mxu1 %v2346_v3  ;;  %1080 = vmatprep.mubr.bf16.mxu0 %v2347_v4 }
  0x6a   : > { %1241 = vmatprep.mubr.bf16.mxu1 %v2349_v5 }
  0x70   : > { %1081 = vmatmul.mubr.bf16.gmra.mrb[36].mxu0 %v2351_v6 }
  0x71   : > { %1242 = vmatmul.mubr.bf16.gmra.mrb[36].mxu1 %v2352_v7  ;;  %1088 = vmatprep.mubr.bf16.mxu0 %v2353_v8 }
  0x72   : > { %1249 = vmatprep.mubr.bf16.mxu1 %v2355_v9 }
  0x78   : > { %1089 = vmatmul.mubr.bf16.gmra.mrb[40].mxu0 %v2357_v10 }
  0x79   : > { %1250 = vmatmul.mubr.bf16.gmra.mrb[40].mxu1 %v2358_v11  ;;  %1096 = vmatprep.mubr.bf16.mxu0 %v2359_v12 }
  0x7a   : > { %1257 = vmatprep.mubr.bf16.mxu1 %v2361_v13 }
  0x80   : > { %1097 = vmatmul.mubr.bf16.gmra.mrb[44].mxu0 %v2363_v14 }
  0x81   : > { %1258 = vmatmul.mubr.bf16.gmra.mrb[44].mxu1 %v2364_v15  ;;  %1104 = vmatprep.mubr.bf16.mxu0 %v2365_v16 }
  0x82   : > { %1265 = vmatprep.mubr.bf16.mxu1 %v2367_v17 }
  0x88   : > { %1105 = vmatmul.mubr.bf16.gmra.mrb[48].mxu0 %v2369_v18 }
  0x89   : > { %1266 = vmatmul.mubr.bf16.gmra.mrb[48].mxu1 %v2370_v19  ;;  %1112 = vmatprep.mubr.bf16.mxu0 %v2371_v20 }
  0x8a   : > { %1273 = vmatprep.mubr.bf16.mxu1 %v2373_v21 }
  0x90   : > { %1113 = vmatmul.mubr.bf16.gmra.mrb[52].mxu0 %v2375_v22 }
  0x91   : > { %1274 = vmatmul.mubr.bf16.gmra.mrb[52].mxu1 %v2376_v23  ;;  %1120 = vmatprep.mubr.bf16.mxu0 %v2377_v24 }
  0x92   : > { %1281 = vmatprep.mubr.bf16.mxu1 %v2379_v25 }
  0x98   : > { %1121 = vmatmul.mubr.bf16.gmra.mrb[56].mxu0 %v2381_v26 }
  0x99   : > { %1282 = vmatmul.mubr.bf16.gmra.mrb[56].mxu1 %v2382_v27  ;;  %1128 = vmatprep.mubr.bf16.mxu0 %v2383_v28 }
  0x9a   : > { %1289 = vmatprep.mubr.bf16.mxu1 %v2385_v29 }
  0xa0   : > { %1129 = vmatmul.mubr.bf16.gmra.mrb[60].mxu0 %v2387_v30 }
  0xa1   : > { %1290 = vmatmul.mubr.bf16.gmra.mrb[60].mxu1 %v2388_v31 }
  0xfb   : > { %v2029_v32 = vpop.f32.mrb[0].mxu0 }
  0xfc   : > { %v2141_v33 = vpop.f32.mrb[0].mxu1  ;;  %v2030_v34 = vpop.f32.mrb[1].mxu0 }
  0xfd   : > { %v2031_v35 = vadd.f32 %v2030_v34, %v2029_v32  ;;  %v2142_v36 = vpop.f32.mrb[1].mxu1  ;;  %v2032_v37 = vpop.f32.mrb[2].mxu0 }
  0xfe   : > { %v2143_v38 = vadd.f32 %v2142_v36, %v2141_v33  ;;  %v2144_v39 = vpop.f32.mrb[2].mxu1  ;;  %v2033_v40 = vpop.f32.mrb[3].mxu0 }
  0xff   : > { %v2034_v42 = vadd.f32 %v2033_v40, %v2032_v37  ;;  %v2145_v43 = vpop.f32.mrb[3].mxu1 }
 0x100   : > { %v1172_v44 = vadd.f32 %v2143_v38, %v2031_v35  ;;  %v2146_v45 = vadd.f32 %v2145_v43, %v2144_v39 }
 0x102   : > { %v1404_v46 = vadd.f32 %v2625_v41, %v1172_v44  ;;  %v1175_v47 = vadd.f32 %v2146_v45, %v2034_v42 }
 0x103   : > { %v2035_v48 = vpop.f32.mrb[4].mxu0 }
 0x104   : > { %v1405_v49 = vadd.f32 %v2625_v41, %v1175_v47  ;;  %v2147_v50 = vpop.f32.mrb[4].mxu1  ;;  %v2036_v51 = vpop.f32.mrb[5].mxu0  ;;  %v1436_v55 = vmax.f32 %v1404_v46, 0.0 }
 0x105   : > { %v2037_v52 = vadd.f32 %v2036_v51, %v2035_v48  ;;  %v2148_v53 = vpop.f32.mrb[5].mxu1  ;;  %v2038_v54 = vpop.f32.mrb[6].mxu0 }
 0x106   : > { %v1437_v56 = vmax.f32 %v1405_v49, 0.0  ;;  %v2149_v57 = vadd.f32 %v2148_v53, %v2147_v50  ;;  %v2150_v58 = vpop.f32.mrb[6].mxu1  ;;  %v2039_v59 = vpop.f32.mrb[7].mxu0 }
 0x107   : > { %v2040_v60 = vadd.f32 %v2039_v59, %v2038_v54  ;;  %v2151_v61 = vpop.f32.mrb[7].mxu1 }
 0x108   : > { %v1921_v62 = vpack.c.bf16 %v1437_v56, %v1436_v55  ;;  %v1180_v63 = vadd.f32 %v2149_v57, %v2037_v52  ;;  %v2152_v0 = vadd.f32 %v2151_v61, %v2150_v58 }
 0x10a   : > { %1922 = vst [vmem:[%s2633_s20] sm:$0xff] %v1921_v62   ;;  %v1406_v1 = vadd.f32 %v2625_v41, %v1180_v63  ;;  %v1183_v2 = vadd.f32 %v2152_v0, %v2040_v60 }
 0x10b   : > { %v2041_v3 = vpop.f32.mrb[8].mxu0 }
 0x10c   : > { %v1407_v4 = vadd.f32 %v2625_v41, %v1183_v2  ;;  %v2153_v5 = vpop.f32.mrb[8].mxu1  ;;  %v2042_v6 = vpop.f32.mrb[9].mxu0  ;;  %v1438_v10 = vmax.f32 %v1406_v1, 0.0 }
 0x10d   : > { %v2043_v7 = vadd.f32 %v2042_v6, %v2041_v3  ;;  %v2154_v8 = vpop.f32.mrb[9].mxu1  ;;  %v2044_v9 = vpop.f32.mrb[10].mxu0 }
 0x10e   : > { %v1439_v11 = vmax.f32 %v1407_v4, 0.0  ;;  %v2155_v12 = vadd.f32 %v2154_v8, %v2153_v5  ;;  %v2156_v13 = vpop.f32.mrb[10].mxu1  ;;  %v2045_v14 = vpop.f32.mrb[11].mxu0 }
 0x10f   : > { %v2046_v15 = vadd.f32 %v2045_v14, %v2044_v9  ;;  %v2157_v16 = vpop.f32.mrb[11].mxu1 }
 0x110   : > { %v1926_v17 = vpack.c.bf16 %v1439_v11, %v1438_v10  ;;  %v1188_v18 = vadd.f32 %v2155_v12, %v2043_v7  ;;  %v2158_v19 = vadd.f32 %v2157_v16, %v2156_v13 }
 0x112   : > { %1998 = vst [vmem:[%s2633_s20 + $0x8] sm:$0xff] %v1926_v17   ;;  %v1408_v20 = vadd.f32 %v2625_v41, %v1188_v18  ;;  %v1191_v21 = vadd.f32 %v2158_v19, %v2046_v15 }
 0x113   : > { %v2047_v22 = vpop.f32.mrb[12].mxu0 }
 0x114   : > { %v1409_v23 = vadd.f32 %v2625_v41, %v1191_v21  ;;  %v2159_v24 = vpop.f32.mrb[12].mxu1  ;;  %v2048_v25 = vpop.f32.mrb[13].mxu0  ;;  %v1440_v29 = vmax.f32 %v1408_v20, 0.0 }
 0x115   : > { %v2049_v26 = vadd.f32 %v2048_v25, %v2047_v22  ;;  %v2160_v27 = vpop.f32.mrb[13].mxu1  ;;  %v2050_v28 = vpop.f32.mrb[14].mxu0 }
 0x116   : > { %v1441_v30 = vmax.f32 %v1409_v23, 0.0  ;;  %v2161_v31 = vadd.f32 %v2160_v27, %v2159_v24  ;;  %v2162_v32 = vpop.f32.mrb[14].mxu1  ;;  %v2051_v33 = vpop.f32.mrb[15].mxu0 }
 0x117   : > { %v2052_v34 = vadd.f32 %v2051_v33, %v2050_v28  ;;  %v2163_v35 = vpop.f32.mrb[15].mxu1 }
 0x118   : > { %v1931_v36 = vpack.c.bf16 %v1441_v30, %v1440_v29  ;;  %v1196_v37 = vadd.f32 %v2161_v31, %v2049_v26  ;;  %v2164_v38 = vadd.f32 %v2163_v35, %v2162_v32 }
 0x11a   : > { %1999 = vst [vmem:[%s2633_s20 + $0x10] sm:$0xff] %v1931_v36   ;;  %v1410_v39 = vadd.f32 %v2625_v41, %v1196_v37  ;;  %v1199_v40 = vadd.f32 %v2164_v38, %v2052_v34 }
 0x11b   : > { %v2053_v42 = vpop.f32.mrb[16].mxu0 }
 0x11c   : > { %v1411_v43 = vadd.f32 %v2625_v41, %v1199_v40  ;;  %v2165_v44 = vpop.f32.mrb[16].mxu1  ;;  %v2054_v45 = vpop.f32.mrb[17].mxu0  ;;  %v1442_v49 = vmax.f32 %v1410_v39, 0.0 }
 0x11d   : > { %v2055_v46 = vadd.f32 %v2054_v45, %v2053_v42  ;;  %v2166_v47 = vpop.f32.mrb[17].mxu1  ;;  %v2056_v48 = vpop.f32.mrb[18].mxu0 }
 0x11e   : > { %v1443_v50 = vmax.f32 %v1411_v43, 0.0  ;;  %v2167_v51 = vadd.f32 %v2166_v47, %v2165_v44  ;;  %v2168_v52 = vpop.f32.mrb[18].mxu1  ;;  %v2057_v53 = vpop.f32.mrb[19].mxu0 }
 0x11f   : > { %v2058_v54 = vadd.f32 %v2057_v53, %v2056_v48  ;;  %v2169_v55 = vpop.f32.mrb[19].mxu1 }
 0x120   : > { %v1936_v56 = vpack.c.bf16 %v1443_v50, %v1442_v49  ;;  %v1204_v57 = vadd.f32 %v2167_v51, %v2055_v46  ;;  %v2170_v58 = vadd.f32 %v2169_v55, %v2168_v52 }
 0x122   : > { %2000 = vst [vmem:[%s2633_s20 + $0x18] sm:$0xff] %v1936_v56   ;;  %v1412_v59 = vadd.f32 %v2625_v41, %v1204_v57  ;;  %v1207_v60 = vadd.f32 %v2170_v58, %v2058_v54 }
 0x123   : > { %v2059_v61 = vpop.f32.mrb[20].mxu0 }
 0x124   : > { %v1413_v62 = vadd.f32 %v2625_v41, %v1207_v60  ;;  %v2171_v63 = vpop.f32.mrb[20].mxu1  ;;  %v2060_v0 = vpop.f32.mrb[21].mxu0  ;;  %v1444_v4 = vmax.f32 %v1412_v59, 0.0 }
 0x125   : > { %v2061_v1 = vadd.f32 %v2060_v0, %v2059_v61  ;;  %v2172_v2 = vpop.f32.mrb[21].mxu1  ;;  %v2062_v3 = vpop.f32.mrb[22].mxu0 }
 0x126   : > { %v1445_v5 = vmax.f32 %v1413_v62, 0.0  ;;  %v2173_v6 = vadd.f32 %v2172_v2, %v2171_v63  ;;  %v2174_v7 = vpop.f32.mrb[22].mxu1  ;;  %v2063_v8 = vpop.f32.mrb[23].mxu0 }
 0x127   : > { %v2064_v9 = vadd.f32 %v2063_v8, %v2062_v3  ;;  %v2175_v10 = vpop.f32.mrb[23].mxu1 }
 0x128   : > { %v1941_v11 = vpack.c.bf16 %v1445_v5, %v1444_v4  ;;  %v1212_v12 = vadd.f32 %v2173_v6, %v2061_v1  ;;  %v2176_v13 = vadd.f32 %v2175_v10, %v2174_v7 }
 0x12a   : > { %2001 = vst [vmem:[%s2633_s20 + $0x20] sm:$0xff] %v1941_v11   ;;  %v1414_v14 = vadd.f32 %v2625_v41, %v1212_v12  ;;  %v1215_v15 = vadd.f32 %v2176_v13, %v2064_v9 }
 0x12b   : > { %v2065_v16 = vpop.f32.mrb[24].mxu0 }
 0x12c   : > { %v1415_v17 = vadd.f32 %v2625_v41, %v1215_v15  ;;  %v2177_v18 = vpop.f32.mrb[24].mxu1  ;;  %v2066_v19 = vpop.f32.mrb[25].mxu0  ;;  %v1446_v23 = vmax.f32 %v1414_v14, 0.0 }
 0x12d   : > { %v2067_v20 = vadd.f32 %v2066_v19, %v2065_v16  ;;  %v2178_v21 = vpop.f32.mrb[25].mxu1  ;;  %v2068_v22 = vpop.f32.mrb[26].mxu0 }
 0x12e   : > { %v1447_v24 = vmax.f32 %v1415_v17, 0.0  ;;  %v2179_v25 = vadd.f32 %v2178_v21, %v2177_v18  ;;  %v2180_v26 = vpop.f32.mrb[26].mxu1  ;;  %v2069_v27 = vpop.f32.mrb[27].mxu0 }
 0x12f   : > { %v2070_v28 = vadd.f32 %v2069_v27, %v2068_v22  ;;  %v2181_v29 = vpop.f32.mrb[27].mxu1 }
 0x130   : > { %v1946_v30 = vpack.c.bf16 %v1447_v24, %v1446_v23  ;;  %v1220_v31 = vadd.f32 %v2179_v25, %v2067_v20  ;;  %v2182_v32 = vadd.f32 %v2181_v29, %v2180_v26 }
 0x132   : > { %2002 = vst [vmem:[%s2633_s20 + $0x28] sm:$0xff] %v1946_v30   ;;  %v1416_v33 = vadd.f32 %v2625_v41, %v1220_v31  ;;  %v1223_v34 = vadd.f32 %v2182_v32, %v2070_v28 }
 0x133   : > { %v2071_v35 = vpop.f32.mrb[28].mxu0 }
 0x134   : > { %v1417_v36 = vadd.f32 %v2625_v41, %v1223_v34  ;;  %v2183_v37 = vpop.f32.mrb[28].mxu1  ;;  %v2072_v38 = vpop.f32.mrb[29].mxu0  ;;  %v1448_v43 = vmax.f32 %v1416_v33, 0.0 }
 0x135   : > { %v2073_v39 = vadd.f32 %v2072_v38, %v2071_v35  ;;  %v2184_v40 = vpop.f32.mrb[29].mxu1  ;;  %v2074_v42 = vpop.f32.mrb[30].mxu0 }
 0x136   : > { %v1449_v44 = vmax.f32 %v1417_v36, 0.0  ;;  %v2185_v45 = vadd.f32 %v2184_v40, %v2183_v37  ;;  %v2186_v46 = vpop.f32.mrb[30].mxu1  ;;  %v2075_v47 = vpop.f32.mrb[31].mxu0 }
 0x137   : > { %v2076_v48 = vadd.f32 %v2075_v47, %v2074_v42  ;;  %v2187_v49 = vpop.f32.mrb[31].mxu1 }
 0x138   : > { %v1951_v50 = vpack.c.bf16 %v1449_v44, %v1448_v43  ;;  %v1228_v51 = vadd.f32 %v2185_v45, %v2073_v39  ;;  %v2188_v52 = vadd.f32 %v2187_v49, %v2186_v46 }
 0x13a   : > { %2003 = vst [vmem:[%s2633_s20 + $0x30] sm:$0xff] %v1951_v50   ;;  %v1418_v53 = vadd.f32 %v2625_v41, %v1228_v51  ;;  %v1231_v54 = vadd.f32 %v2188_v52, %v2076_v48 }
 0x13b   : > { %v2077_v55 = vpop.f32.mrb[32].mxu0 }
 0x13c   : > { %v1419_v56 = vadd.f32 %v2625_v41, %v1231_v54  ;;  %v2189_v57 = vpop.f32.mrb[32].mxu1  ;;  %v2078_v58 = vpop.f32.mrb[33].mxu0  ;;  %v1450_v62 = vmax.f32 %v1418_v53, 0.0 }
 0x13d   : > { %v2079_v59 = vadd.f32 %v2078_v58, %v2077_v55  ;;  %v2190_v60 = vpop.f32.mrb[33].mxu1  ;;  %v2080_v61 = vpop.f32.mrb[34].mxu0 }
 0x13e   : > { %v1451_v63 = vmax.f32 %v1419_v56, 0.0  ;;  %v2191_v0 = vadd.f32 %v2190_v60, %v2189_v57  ;;  %v2192_v1 = vpop.f32.mrb[34].mxu1  ;;  %v2081_v2 = vpop.f32.mrb[35].mxu0 }
 0x13f   : > { %v2082_v3 = vadd.f32 %v2081_v2, %v2080_v61  ;;  %v2193_v4 = vpop.f32.mrb[35].mxu1 }
 0x140   : > { %v1956_v5 = vpack.c.bf16 %v1451_v63, %v1450_v62  ;;  %v1236_v6 = vadd.f32 %v2191_v0, %v2079_v59  ;;  %v2194_v7 = vadd.f32 %v2193_v4, %v2192_v1 }
 0x142   : > { %2004 = vst [vmem:[%s2633_s20 + $0x38] sm:$0xff] %v1956_v5   ;;  %v1420_v8 = vadd.f32 %v2625_v41, %v1236_v6  ;;  %v1239_v9 = vadd.f32 %v2194_v7, %v2082_v3 }
 0x143   : > { %v2083_v10 = vpop.f32.mrb[36].mxu0 }
 0x144   : > { %v1421_v11 = vadd.f32 %v2625_v41, %v1239_v9  ;;  %v2195_v12 = vpop.f32.mrb[36].mxu1  ;;  %v2084_v13 = vpop.f32.mrb[37].mxu0  ;;  %v1452_v17 = vmax.f32 %v1420_v8, 0.0 }
 0x145   : > { %v2085_v14 = vadd.f32 %v2084_v13, %v2083_v10  ;;  %v2196_v15 = vpop.f32.mrb[37].mxu1  ;;  %v2086_v16 = vpop.f32.mrb[38].mxu0 }
 0x146   : > { %v1453_v18 = vmax.f32 %v1421_v11, 0.0  ;;  %v2197_v19 = vadd.f32 %v2196_v15, %v2195_v12  ;;  %v2198_v20 = vpop.f32.mrb[38].mxu1  ;;  %v2087_v21 = vpop.f32.mrb[39].mxu0 }
 0x147   : > { %v2088_v22 = vadd.f32 %v2087_v21, %v2086_v16  ;;  %v2199_v23 = vpop.f32.mrb[39].mxu1 }
 0x148   : > { %v1961_v24 = vpack.c.bf16 %v1453_v18, %v1452_v17  ;;  %v1244_v25 = vadd.f32 %v2197_v19, %v2085_v14  ;;  %v2200_v26 = vadd.f32 %v2199_v23, %v2198_v20 }
 0x14a   : > { %2005 = vst [vmem:[%s2633_s20 + $0x40] sm:$0xff] %v1961_v24   ;;  %v1422_v27 = vadd.f32 %v2625_v41, %v1244_v25  ;;  %v1247_v28 = vadd.f32 %v2200_v26, %v2088_v22 }
 0x14b   : > { %v2089_v29 = vpop.f32.mrb[40].mxu0 }
 0x14c   : > { %v1423_v30 = vadd.f32 %v2625_v41, %v1247_v28  ;;  %v2201_v31 = vpop.f32.mrb[40].mxu1  ;;  %v2090_v32 = vpop.f32.mrb[41].mxu0  ;;  %v1454_v36 = vmax.f32 %v1422_v27, 0.0 }
 0x14d   : > { %v2091_v33 = vadd.f32 %v2090_v32, %v2089_v29  ;;  %v2202_v34 = vpop.f32.mrb[41].mxu1  ;;  %v2092_v35 = vpop.f32.mrb[42].mxu0 }
 0x14e   : > { %v1455_v37 = vmax.f32 %v1423_v30, 0.0  ;;  %v2203_v38 = vadd.f32 %v2202_v34, %v2201_v31  ;;  %v2204_v39 = vpop.f32.mrb[42].mxu1  ;;  %v2093_v40 = vpop.f32.mrb[43].mxu0 }
 0x14f   : > { %v2094_v42 = vadd.f32 %v2093_v40, %v2092_v35  ;;  %v2205_v43 = vpop.f32.mrb[43].mxu1 }
 0x150   : > { %v1966_v44 = vpack.c.bf16 %v1455_v37, %v1454_v36  ;;  %v1252_v45 = vadd.f32 %v2203_v38, %v2091_v33  ;;  %v2206_v46 = vadd.f32 %v2205_v43, %v2204_v39 }
 0x152   : > { %2006 = vst [vmem:[%s2633_s20 + $0x48] sm:$0xff] %v1966_v44   ;;  %v1424_v47 = vadd.f32 %v2625_v41, %v1252_v45  ;;  %v1255_v48 = vadd.f32 %v2206_v46, %v2094_v42 }
 0x153   : > { %v2095_v49 = vpop.f32.mrb[44].mxu0 }
 0x154   : > { %v1425_v50 = vadd.f32 %v2625_v41, %v1255_v48  ;;  %v2207_v51 = vpop.f32.mrb[44].mxu1  ;;  %v2096_v52 = vpop.f32.mrb[45].mxu0  ;;  %v1456_v56 = vmax.f32 %v1424_v47, 0.0 }
 0x155   : > { %v2097_v53 = vadd.f32 %v2096_v52, %v2095_v49  ;;  %v2208_v54 = vpop.f32.mrb[45].mxu1  ;;  %v2098_v55 = vpop.f32.mrb[46].mxu0 }
 0x156   : > { %v1457_v57 = vmax.f32 %v1425_v50, 0.0  ;;  %v2209_v58 = vadd.f32 %v2208_v54, %v2207_v51  ;;  %v2210_v59 = vpop.f32.mrb[46].mxu1  ;;  %v2099_v60 = vpop.f32.mrb[47].mxu0 }
 0x157   : > { %v2100_v61 = vadd.f32 %v2099_v60, %v2098_v55  ;;  %v2211_v62 = vpop.f32.mrb[47].mxu1 }
 0x158   : > { %v1971_v63 = vpack.c.bf16 %v1457_v57, %v1456_v56  ;;  %v1260_v0 = vadd.f32 %v2209_v58, %v2097_v53  ;;  %v2212_v1 = vadd.f32 %v2211_v62, %v2210_v59 }
 0x15a   : > { %2007 = vst [vmem:[%s2633_s20 + $0x50] sm:$0xff] %v1971_v63   ;;  %v1426_v2 = vadd.f32 %v2625_v41, %v1260_v0  ;;  %v1263_v3 = vadd.f32 %v2212_v1, %v2100_v61 }
 0x15b   : > { %v2101_v4 = vpop.f32.mrb[48].mxu0 }
 0x15c   : > { %v1427_v5 = vadd.f32 %v2625_v41, %v1263_v3  ;;  %v2213_v6 = vpop.f32.mrb[48].mxu1  ;;  %v2102_v7 = vpop.f32.mrb[49].mxu0  ;;  %v1458_v11 = vmax.f32 %v1426_v2, 0.0 }
 0x15d   : > { %v2103_v8 = vadd.f32 %v2102_v7, %v2101_v4  ;;  %v2214_v9 = vpop.f32.mrb[49].mxu1  ;;  %v2104_v10 = vpop.f32.mrb[50].mxu0 }
 0x15e   : > { %v1459_v12 = vmax.f32 %v1427_v5, 0.0  ;;  %v2215_v13 = vadd.f32 %v2214_v9, %v2213_v6  ;;  %v2216_v14 = vpop.f32.mrb[50].mxu1  ;;  %v2105_v15 = vpop.f32.mrb[51].mxu0 }
 0x15f   : > { %v2106_v16 = vadd.f32 %v2105_v15, %v2104_v10  ;;  %v2217_v17 = vpop.f32.mrb[51].mxu1 }
 0x160   : > { %v1976_v18 = vpack.c.bf16 %v1459_v12, %v1458_v11  ;;  %v1268_v19 = vadd.f32 %v2215_v13, %v2103_v8  ;;  %v2218_v20 = vadd.f32 %v2217_v17, %v2216_v14 }
 0x162   : > { %2008 = vst [vmem:[%s2633_s20 + $0x58] sm:$0xff] %v1976_v18   ;;  %v1428_v21 = vadd.f32 %v2625_v41, %v1268_v19  ;;  %v1271_v22 = vadd.f32 %v2218_v20, %v2106_v16 }
 0x163   : > { %v2107_v23 = vpop.f32.mrb[52].mxu0 }
 0x164   : > { %v1429_v24 = vadd.f32 %v2625_v41, %v1271_v22  ;;  %v2219_v25 = vpop.f32.mrb[52].mxu1  ;;  %v2108_v26 = vpop.f32.mrb[53].mxu0  ;;  %v1460_v30 = vmax.f32 %v1428_v21, 0.0 }
 0x165   : > { %v2109_v27 = vadd.f32 %v2108_v26, %v2107_v23  ;;  %v2220_v28 = vpop.f32.mrb[53].mxu1  ;;  %v2110_v29 = vpop.f32.mrb[54].mxu0 }
 0x166   : > { %v1461_v31 = vmax.f32 %v1429_v24, 0.0  ;;  %v2221_v32 = vadd.f32 %v2220_v28, %v2219_v25  ;;  %v2222_v33 = vpop.f32.mrb[54].mxu1  ;;  %v2111_v34 = vpop.f32.mrb[55].mxu0 }
 0x167   : > { %v2112_v35 = vadd.f32 %v2111_v34, %v2110_v29  ;;  %v2223_v36 = vpop.f32.mrb[55].mxu1 }
 0x168   : > { %v1981_v37 = vpack.c.bf16 %v1461_v31, %v1460_v30  ;;  %v1276_v38 = vadd.f32 %v2221_v32, %v2109_v27  ;;  %v2224_v39 = vadd.f32 %v2223_v36, %v2222_v33 }
 0x16a   : > { %2009 = vst [vmem:[%s2633_s20 + $0x60] sm:$0xff] %v1981_v37   ;;  %v1430_v40 = vadd.f32 %v2625_v41, %v1276_v38  ;;  %v1279_v42 = vadd.f32 %v2224_v39, %v2112_v35 }
 0x16b   : > { %v2113_v43 = vpop.f32.mrb[56].mxu0 }
 0x16c   : > { %v1431_v44 = vadd.f32 %v2625_v41, %v1279_v42  ;;  %v2225_v45 = vpop.f32.mrb[56].mxu1  ;;  %v2114_v46 = vpop.f32.mrb[57].mxu0  ;;  %v1462_v50 = vmax.f32 %v1430_v40, 0.0 }
 0x16d   : > { %v2115_v47 = vadd.f32 %v2114_v46, %v2113_v43  ;;  %v2226_v48 = vpop.f32.mrb[57].mxu1  ;;  %v2116_v49 = vpop.f32.mrb[58].mxu0 }
 0x16e   : > { %v1463_v51 = vmax.f32 %v1431_v44, 0.0  ;;  %v2227_v52 = vadd.f32 %v2226_v48, %v2225_v45  ;;  %v2228_v53 = vpop.f32.mrb[58].mxu1  ;;  %v2117_v54 = vpop.f32.mrb[59].mxu0 }
 0x16f   : > { %v2118_v55 = vadd.f32 %v2117_v54, %v2116_v49  ;;  %v2229_v56 = vpop.f32.mrb[59].mxu1 }
 0x170   : > { %v1986_v57 = vpack.c.bf16 %v1463_v51, %v1462_v50  ;;  %v1284_v58 = vadd.f32 %v2227_v52, %v2115_v47  ;;  %v2230_v59 = vadd.f32 %v2229_v56, %v2228_v53 }
 0x172   : > { %2010 = vst [vmem:[%s2633_s20 + $0x68] sm:$0xff] %v1986_v57   ;;  %v1432_v60 = vadd.f32 %v2625_v41, %v1284_v58  ;;  %v1287_v61 = vadd.f32 %v2230_v59, %v2118_v55 }
 0x173   : > { %v2119_v62 = vpop.f32.mrb[60].mxu0 }
 0x174   : > { %v1433_v63 = vadd.f32 %v2625_v41, %v1287_v61  ;;  %v2231_v0 = vpop.f32.mrb[60].mxu1  ;;  %v2120_v1 = vpop.f32.mrb[61].mxu0  ;;  %v1464_v5 = vmax.f32 %v1432_v60, 0.0 }
 0x175   : > { %v2121_v2 = vadd.f32 %v2120_v1, %v2119_v62  ;;  %v2232_v3 = vpop.f32.mrb[61].mxu1  ;;  %v2122_v4 = vpop.f32.mrb[62].mxu0 }
 0x176   : > { %v1465_v6 = vmax.f32 %v1433_v63, 0.0  ;;  %v2233_v7 = vadd.f32 %v2232_v3, %v2231_v0  ;;  %v2234_v8 = vpop.f32.mrb[62].mxu1  ;;  %v2123_v9 = vpop.f32.mrb[63].mxu0 }
 0x177   : > { %v2124_v10 = vadd.f32 %v2123_v9, %v2122_v4  ;;  %v2235_v11 = vpop.f32.mrb[63].mxu1 }
 0x178   : > { %v1991_v12 = vpack.c.bf16 %v1465_v6, %v1464_v5  ;;  %v1292_v13 = vadd.f32 %v2233_v7, %v2121_v2  ;;  %v2236_v14 = vadd.f32 %v2235_v11, %v2234_v8 }
 0x17a   : > { %2011 = vst [vmem:[%s2633_s20 + $0x70] sm:$0xff] %v1991_v12   ;;  %v1434_v15 = vadd.f32 %v2625_v41, %v1292_v13  ;;  %v1295_v16 = vadd.f32 %v2236_v14, %v2124_v10 }
 0x17c   : > { %v1435_v17 = vadd.f32 %v2625_v41, %v1295_v16  ;;  %v1466_v18 = vmax.f32 %v1434_v15, 0.0 }
 0x17e   : > { %v1467_v19 = vmax.f32 %v1435_v17, 0.0 }
 0x180   : > { %v1996_v20 = vpack.c.bf16 %v1467_v19, %v1466_v18 }
 0x182   : > { %2012 = vst [vmem:[%s2633_s20 + $0x78] sm:$0xff] %v1996_v20  }
 0x183 PF: > { %s13_s14 = sadd.s32 1, %s2411_s14   ;;  %s2694_s12 = smov %s2407_s13 }
 0x184   : > { %p10_p5 = scmp.ge.s32.totalorder %s13_s14, 10   ;;  %s2695_s13 = smov %s2697_s15 }
 0x186   :  { %12 = sbr.rel (!%p10_p5) target bundleno = 2 (0x2), region = 76 }

// kernel: simple_video_generator.29
= control target key start
LH: loop header
LB: loop body
LE: loop exit
PB: predicated region body
PF: predicated region fallthrough
CT: control target
= control target key end

     0   :  { %s1180_s12 = smov 0   ;;  %s1182_s13 = smov 0   ;;  %s1330_s0 = inlined_call_operand.vmem [shape: bf16[2048,128], index: 0, kind: input, shape index: {}]   ;;  %s1331_s1 = inlined_call_operand.vmem [shape: bf16[128,128], index: 1, kind: input, shape index: {}]   ;;  %s1332_s2 = inlined_call_operand.vmem [shape: f32[1,128], index: 2, kind: input, shape index: {}]   ;;  %s1333_s3 = inlined_call_operand.vmem [shape: f32[2048,128], index: 3, kind: output, shape index: {}]  }
   0x1   :  { %s1184_s14 = smov 0  }
   0x2 LB: > { %s32_s15 = sadd.s32 1, %s1154_s13  ;;  %p968_p0 = scmp.ge.s32.totalorder %s1158_s14, 1  ;;  %s1158_s14 = sphi %s1184_s14, %s13_s14   ;;  %s1154_s13 = sphi %s1182_s13, %s1335_s13   ;;  %s1150_s12 = sphi %s1180_s12, %s1334_s12  }
   0x3   : > { %p34_p1 = scmp.ge.s32.totalorder %s32_s15, 8  ;;  %p188_p2 = scmp.lt.s32.totalorder %s1158_s14, 9 }
   0x5   : > { %s1337_s15 = smov (%p34_p1, %s32_s15), 0  ;;  %p189_p3 = pnand %p968_p0, %p188_p2 }
   0x6   : > { %v1112_v0 = vld [vmem:[%s1331_s1] sm:$0xff] (!%p189_p3)   ;;  %s969_s18 = sshll.u32 (!%p189_p3), %s1150_s12, 5  ;;  %v1113_v1 = vld [vmem:[%s1331_s1 + $0x8] sm:$0xff] (!%p189_p3)   ;;  %v1114_v2 = vld [vmem:[%s1331_s1 + $0x10] sm:$0xff] (!%p189_p3)  }
   0x7   : > { %192 = sbr.rel (%p189_p3) target bundleno = 281 (0x119), region = 32  ;;  %p230_p4 = scmp.lt.s32.totalorder (!%p189_p3), %s969_s18, 255  ;;  %1024 = vmatprep.subr.bf16.mxu0 (!%p189_p3), %v1112_v0  ;;  %1072 = vmatprep.subr.bf16.mxu1 (!%p189_p3), %v1112_v0  ;;  %v1115_v3 = vld [vmem:[%s1331_s1 + $0x18] sm:$0xff] (!%p189_p3)   ;;  %v1116_v6 = vld [vmem:[%s1331_s1 + $0x20] sm:$0xff] (!%p189_p3)   ;;  %v1117_v7 = vld [vmem:[%s1331_s1 + $0x28] sm:$0xff] (!%p189_p3)  }
   0x8   : > { %1025 = vmatpush3.bf16.msra.mxu0 (!%p189_p3), %v1112_v0  ;;  %1080 = vmatpush3.bf16.msra.mxu1 (!%p189_p3), %v1112_v0  ;;  %v1118_v8 = vld [vmem:[%s1331_s1 + $0x30] sm:$0xff] (!%p189_p3)   ;;  %v1119_v9 = vld [vmem:[%s1331_s1 + $0x38] sm:$0xff] (!%p189_p3)   ;;  %v1250_v24 = vld [vmem:[%s1332_s2] ss:$0 sm:$0xff] (!%p189_p3) }
   0x9   : > { %1026 = vmatprep.subr.bf16.mxu0 (!%p189_p3), %v1113_v1  ;;  %1073 = vmatprep.subr.bf16.mxu1 (!%p189_p3), %v1113_v1 }
   0xc   : > { %1027 = vmatpush3.bf16.msra.mxu0 (!%p189_p3), %v1113_v1  ;;  %1081 = vmatpush3.bf16.msra.mxu1 (!%p189_p3), %v1113_v1 }
   0xd   : > { %1028 = vmatprep.subr.bf16.mxu0 (!%p189_p3), %v1114_v2  ;;  %1074 = vmatprep.subr.bf16.mxu1 (!%p189_p3), %v1114_v2 }
   0xe   : > { %s1339_s18 = smov (!%p230_p4, %s969_s18), 255 }
   0xf   : > { %s970_s23 = sshll.u32 %s1339_s18, 2  ;;  %s972_s10 = sshll.u32 %s1339_s18, 3 }
  0x10   : > { %s1213_s26 = scalar_lea.vmem %s1330_s0, %s970_s23  ;;  %1029 = vmatpush3.bf16.msra.mxu0 %v1114_v2  ;;  %1082 = vmatpush3.bf16.msra.mxu1 %v1114_v2  ;;  %s1255_s19 = scalar_lea.vmem %s1333_s3, %s972_s10 }
  0x11   : > { %v1120_v4 = vld [vmem:[%s1213_s26] sm:$0xff]   ;;  %1030 = vmatprep.subr.bf16.mxu0 %v1115_v3  ;;  %1075 = vmatprep.subr.bf16.mxu1 %v1115_v3  ;;  %v1122_v10 = vld [vmem:[%s1213_s26 + $0x8] sm:$0xff]   ;;  %v1124_v12 = vld [vmem:[%s1213_s26 + $0x10] sm:$0xff]  }
  0x12   : > { %v1121_v5 = vld [vmem:[%s1213_s26 + $0x40] sm:$0xff]   ;;  %1040 = vmatprep.mubr.bf16.mxu0 %v1120_v4  ;;  %v1123_v11 = vld [vmem:[%s1213_s26 + $0x48] sm:$0xff]   ;;  %v1125_v13 = vld [vmem:[%s1213_s26 + $0x50] sm:$0xff]  }
  0x13   : > { %1056 = vmatprep.mubr.bf16.mxu1 %v1121_v5  ;;  %v1126_v14 = vld [vmem:[%s1213_s26 + $0x18] sm:$0xff]   ;;  %v1128_v16 = vld [vmem:[%s1213_s26 + $0x20] sm:$0xff]   ;;  %v1130_v18 = vld [vmem:[%s1213_s26 + $0x28] sm:$0xff]  }
  0x14   : > { %1031 = vmatpush3.bf16.msra.mxu0 %v1115_v3  ;;  %1083 = vmatpush3.bf16.msra.mxu1 %v1115_v3  ;;  %v1127_v15 = vld [vmem:[%s1213_s26 + $0x58] sm:$0xff]   ;;  %v1129_v17 = vld [vmem:[%s1213_s26 + $0x60] sm:$0xff]   ;;  %v1131_v19 = vld [vmem:[%s1213_s26 + $0x68] sm:$0xff]  }
  0x15   : > { %1032 = vmatprep.subr.bf16.mxu0 %v1116_v6  ;;  %1076 = vmatprep.subr.bf16.mxu1 %v1116_v6  ;;  %v1132_v20 = vld [vmem:[%s1213_s26 + $0x30] sm:$0xff]   ;;  %v1134_v22 = vld [vmem:[%s1213_s26 + $0x38] sm:$0xff]  }
  0x16   : > { %v1133_v21 = vld [vmem:[%s1213_s26 + $0x70] sm:$0xff]   ;;  %v1135_v23 = vld [vmem:[%s1213_s26 + $0x78] sm:$0xff]  }
  0x18   : > { %1033 = vmatpush3.bf16.msra.mxu0 %v1116_v6  ;;  %1084 = vmatpush3.bf16.msra.mxu1 %v1116_v6 }
  0x19   : > { %1034 = vmatprep.subr.bf16.mxu0 %v1117_v7  ;;  %1077 = vmatprep.subr.bf16.mxu1 %v1117_v7 }
  0x1c   : > { %1035 = vmatpush3.bf16.msra.mxu0 %v1117_v7  ;;  %1085 = vmatpush3.bf16.msra.mxu1 %v1117_v7 }
  0x1d   : > { %1036 = vmatprep.subr.bf16.mxu0 %v1118_v8  ;;  %1078 = vmatprep.subr.bf16.mxu1 %v1118_v8 }
  0x20   : > { %1037 = vmatpush3.bf16.msra.mxu0 %v1118_v8  ;;  %1086 = vmatpush3.bf16.msra.mxu1 %v1118_v8 }
  0x21   : > { %1038 = vmatprep.subr.bf16.mxu0 %v1119_v9  ;;  %1079 = vmatprep.subr.bf16.mxu1 %v1119_v9 }
  0x24   : > { %1039 = vmatpush3.bf16.msra.mxu0 %v1119_v9  ;;  %1087 = vmatpush3.bf16.msra.mxu1 %v1119_v9 }
  0x27   : > { %1041 = vmatmul.mubr.bf16.vlgmr.msra.gmra.mrb[0].mxu0 %v1122_v10  ;;  %1057 = vmatmul.mubr.bf16.vlgmr.msra.gmra.mrb[0].mxu1 %v1123_v11 }
  0x28   : > { %1044 = vmatprep.mubr.bf16.mxu0 %v1124_v12  ;;  %1060 = vmatprep.mubr.bf16.mxu1 %v1125_v13 }
  0x2f   : > { %1045 = vmatmul.mubr.bf16.gmra.mrb[4].mxu0 %v1126_v14  ;;  %1061 = vmatmul.mubr.bf16.gmra.mrb[4].mxu1 %v1127_v15 }
  0x30   : > { %1048 = vmatprep.mubr.bf16.mxu0 %v1128_v16  ;;  %1064 = vmatprep.mubr.bf16.mxu1 %v1129_v17 }
  0x37   : > { %1049 = vmatmul.mubr.bf16.gmra.mrb[8].mxu0 %v1130_v18  ;;  %1065 = vmatmul.mubr.bf16.gmra.mrb[8].mxu1 %v1131_v19 }
  0x38   : > { %1052 = vmatprep.mubr.bf16.mxu0 %v1132_v20  ;;  %1068 = vmatprep.mubr.bf16.mxu1 %v1133_v21 }
  0x3f   : > { %1053 = vmatmul.mubr.bf16.gmra.mrb[12].mxu0 %v1134_v22  ;;  %1069 = vmatmul.mubr.bf16.gmra.mrb[12].mxu1 %v1135_v23 }
  0xfa   : > { %v1042_v25 = vpop.f32.mrb[0].mxu0  ;;  %v1058_v26 = vpop.f32.mrb[0].mxu1 }
  0xfb   : > { %v789_v27 = vadd.f32 %v1042_v25, %v1250_v24  ;;  %v805_v28 = vadd.f32 %v1058_v26, %v1250_v24  ;;  %v554_v29 = vpop.f32.mrb[1].mxu0  ;;  %v618_v30 = vpop.f32.mrb[1].mxu1 }
  0xfc   : > { %v787_v31 = vadd.f32 %v1250_v24, %v554_v29  ;;  %v803_v32 = vadd.f32 %v1250_v24, %v618_v30  ;;  %v1043_v33 = vpop.f32.mrb[2].mxu0  ;;  %v1059_v34 = vpop.f32.mrb[2].mxu1 }
  0xfd   : > { %821 = vst [vmem:[%s1255_s19 + $0x10] sm:$0xff] %v789_v27  ;;  %837 = vst [vmem:[%s1255_s19 + $0x90] sm:$0xff] %v805_v28  ;;  %v790_v35 = vadd.f32 %v1043_v33, %v1250_v24  ;;  %v806_v36 = vadd.f32 %v1059_v34, %v1250_v24  ;;  %v557_v37 = vpop.f32.mrb[3].mxu0  ;;  %v621_v38 = vpop.f32.mrb[3].mxu1 }
  0xfe   : > { %819 = vst [vmem:[%s1255_s19] sm:$0xff] %v787_v31  ;;  %835 = vst [vmem:[%s1255_s19 + $0x80] sm:$0xff] %v803_v32  ;;  %v788_v39 = vadd.f32 %v1250_v24, %v557_v37  ;;  %v804_v40 = vadd.f32 %v1250_v24, %v621_v38 }
  0xff   : > { %822 = vst [vmem:[%s1255_s19 + $0x18] sm:$0xff] %v790_v35  ;;  %838 = vst [vmem:[%s1255_s19 + $0x98] sm:$0xff] %v806_v36 }
 0x100   : > { %820 = vst [vmem:[%s1255_s19 + $0x8] sm:$0xff] %v788_v39  ;;  %836 = vst [vmem:[%s1255_s19 + $0x88] sm:$0xff] %v804_v40 }
 0x102   : > { %v1046_v41 = vpop.f32.mrb[4].mxu0  ;;  %v1062_v42 = vpop.f32.mrb[4].mxu1 }
 0x103   : > { %v793_v43 = vadd.f32 %v1046_v41, %v1250_v24  ;;  %v809_v44 = vadd.f32 %v1062_v42, %v1250_v24  ;;  %v570_v45 = vpop.f32.mrb[5].mxu0  ;;  %v634_v46 = vpop.f32.mrb[5].mxu1 }
 0x104   : > { %v791_v47 = vadd.f32 %v1250_v24, %v570_v45  ;;  %v807_v48 = vadd.f32 %v1250_v24, %v634_v46  ;;  %v1047_v49 = vpop.f32.mrb[6].mxu0  ;;  %v1063_v50 = vpop.f32.mrb[6].mxu1 }
 0x105   : > { %825 = vst [vmem:[%s1255_s19 + $0x30] sm:$0xff] %v793_v43  ;;  %841 = vst [vmem:[%s1255_s19 + $0xb0] sm:$0xff] %v809_v44  ;;  %v794_v51 = vadd.f32 %v1047_v49, %v1250_v24  ;;  %v810_v52 = vadd.f32 %v1063_v50, %v1250_v24  ;;  %v573_v53 = vpop.f32.mrb[7].mxu0  ;;  %v637_v54 = vpop.f32.mrb[7].mxu1 }
 0x106   : > { %823 = vst [vmem:[%s1255_s19 + $0x20] sm:$0xff] %v791_v47  ;;  %839 = vst [vmem:[%s1255_s19 + $0xa0] sm:$0xff] %v807_v48  ;;  %v792_v55 = vadd.f32 %v1250_v24, %v573_v53  ;;  %v808_v56 = vadd.f32 %v1250_v24, %v637_v54 }
 0x107   : > { %826 = vst [vmem:[%s1255_s19 + $0x38] sm:$0xff] %v794_v51  ;;  %842 = vst [vmem:[%s1255_s19 + $0xb8] sm:$0xff] %v810_v52 }
 0x108   : > { %824 = vst [vmem:[%s1255_s19 + $0x28] sm:$0xff] %v792_v55  ;;  %840 = vst [vmem:[%s1255_s19 + $0xa8] sm:$0xff] %v808_v56 }
 0x10a   : > { %v1050_v57 = vpop.f32.mrb[8].mxu0  ;;  %v1066_v58 = vpop.f32.mrb[8].mxu1 }
 0x10b   : > { %v797_v59 = vadd.f32 %v1050_v57, %v1250_v24  ;;  %v813_v60 = vadd.f32 %v1066_v58, %v1250_v24  ;;  %v586_v61 = vpop.f32.mrb[9].mxu0  ;;  %v650_v62 = vpop.f32.mrb[9].mxu1 }
 0x10c   : > { %v795_v63 = vadd.f32 %v1250_v24, %v586_v61  ;;  %v811_v0 = vadd.f32 %v1250_v24, %v650_v62  ;;  %v1051_v1 = vpop.f32.mrb[10].mxu0  ;;  %v1067_v2 = vpop.f32.mrb[10].mxu1 }
 0x10d   : > { %829 = vst [vmem:[%s1255_s19 + $0x50] sm:$0xff] %v797_v59  ;;  %845 = vst [vmem:[%s1255_s19 + $0xd0] sm:$0xff] %v813_v60  ;;  %v798_v3 = vadd.f32 %v1051_v1, %v1250_v24  ;;  %v814_v4 = vadd.f32 %v1067_v2, %v1250_v24  ;;  %v589_v5 = vpop.f32.mrb[11].mxu0  ;;  %v653_v6 = vpop.f32.mrb[11].mxu1 }
 0x10e   : > { %827 = vst [vmem:[%s1255_s19 + $0x40] sm:$0xff] %v795_v63  ;;  %843 = vst [vmem:[%s1255_s19 + $0xc0] sm:$0xff] %v811_v0  ;;  %v796_v7 = vadd.f32 %v1250_v24, %v589_v5  ;;  %v812_v8 = vadd.f32 %v1250_v24, %v653_v6 }
 0x10f   : > { %830 = vst [vmem:[%s1255_s19 + $0x58] sm:$0xff] %v798_v3  ;;  %846 = vst [vmem:[%s1255_s19 + $0xd8] sm:$0xff] %v814_v4 }
 0x110   : > { %828 = vst [vmem:[%s1255_s19 + $0x48] sm:$0xff] %v796_v7  ;;  %844 = vst [vmem:[%s1255_s19 + $0xc8] sm:$0xff] %v812_v8 }
 0x112   : > { %v1054_v9 = vpop.f32.mrb[12].mxu0  ;;  %v1070_v10 = vpop.f32.mrb[12].mxu1 }
 0x113   : > { %v801_v11 = vadd.f32 %v1054_v9, %v1250_v24  ;;  %v817_v12 = vadd.f32 %v1070_v10, %v1250_v24  ;;  %v602_v13 = vpop.f32.mrb[13].mxu0  ;;  %v666_v14 = vpop.f32.mrb[13].mxu1 }
 0x114   : > { %v799_v15 = vadd.f32 %v1250_v24, %v602_v13  ;;  %v815_v16 = vadd.f32 %v1250_v24, %v666_v14  ;;  %v1055_v17 = vpop.f32.mrb[14].mxu0  ;;  %v1071_v18 = vpop.f32.mrb[14].mxu1 }
 0x115   : > { %833 = vst [vmem:[%s1255_s19 + $0x70] sm:$0xff] %v801_v11  ;;  %849 = vst [vmem:[%s1255_s19 + $0xf0] sm:$0xff] %v817_v12  ;;  %v802_v19 = vadd.f32 %v1055_v17, %v1250_v24  ;;  %v818_v20 = vadd.f32 %v1071_v18, %v1250_v24  ;;  %v605_v21 = vpop.f32.mrb[15].mxu0  ;;  %v669_v22 = vpop.f32.mrb[15].mxu1 }
 0x116   : > { %831 = vst [vmem:[%s1255_s19 + $0x60] sm:$0xff] %v799_v15  ;;  %847 = vst [vmem:[%s1255_s19 + $0xe0] sm:$0xff] %v815_v16  ;;  %v800_v23 = vadd.f32 %v1250_v24, %v605_v21  ;;  %v816_v25 = vadd.f32 %v1250_v24, %v669_v22 }
 0x117   : > { %834 = vst [vmem:[%s1255_s19 + $0x78] sm:$0xff] %v802_v19  ;;  %850 = vst [vmem:[%s1255_s19 + $0xf8] sm:$0xff] %v818_v20 }
 0x118   : > { %832 = vst [vmem:[%s1255_s19 + $0x68] sm:$0xff] %v800_v23  ;;  %848 = vst [vmem:[%s1255_s19 + $0xe8] sm:$0xff] %v816_v25 }
 0x119 PF: > { %s13_s14 = sadd.s32 1, %s1158_s14   ;;  %s1334_s12 = smov %s1154_s13 }
 0x11a   : > { %p10_p5 = scmp.ge.s32.totalorder %s13_s14, 10   ;;  %s1335_s13 = smov %s1337_s15 }
 0x11c   :  { %12 = sbr.rel (!%p10_p5) target bundleno = 2 (0x2), region = 76 }

// kernel: simple_video_generator.30
= control target key start
LH: loop header
LB: loop body
LE: loop exit
PB: predicated region body
PF: predicated region fallthrough
CT: control target
= control target key end

     0   :  { %s1858_s15 = smov 0   ;;  %s1860_s16 = smov 0   ;;  %s2073_s0 = inlined_call_operand.vmem [shape: bf16[2048,256], index: 0, kind: input, shape index: {}]   ;;  %s2074_s1 = inlined_call_operand.vmem [shape: bf16[256,128], index: 1, kind: input, shape index: {}]   ;;  %s2075_s2 = inlined_call_operand.vmem [shape: f32[1,128], index: 2, kind: input, shape index: {}]   ;;  %s2076_s3 = inlined_call_operand.vmem [shape: f32[2048,128], index: 3, kind: input, shape index: {}]   ;;  %s2077_s4 = inlined_call_operand.vmem [shape: bf16[2048,128], index: 4, kind: output, shape index: {}]  }
   0x1   :  { %s1862_s17 = smov 0  }
   0x2 LB: > { %s33_s18 = sadd.s32 1, %s1827_s16  ;;  %p1374_p0 = scmp.ge.s32.totalorder %s1831_s17, 1  ;;  %s1831_s17 = sphi %s1862_s17, %s14_s17   ;;  %s1827_s16 = sphi %s1860_s16, %s2079_s16   ;;  %s1823_s15 = sphi %s1858_s15, %s2078_s15  }
   0x3   : > { %p35_p1 = scmp.ge.s32.totalorder %s33_s18, 8  ;;  %p232_p2 = scmp.lt.s32.totalorder %s1831_s17, 9 }
   0x5   : > { %s2081_s18 = smov (%p35_p1, %s33_s18), 0  ;;  %p233_p3 = pnand %p1374_p0, %p232_p2 }
   0x6   : > { %v1745_v0 = vld [vmem:[%s2074_s1 + $0x40] sm:$0xff] (!%p233_p3)   ;;  %s1375_s21 = sshll.u32 (!%p233_p3), %s1823_s15, 5  ;;  %v1747_v2 = vld [vmem:[%s2074_s1 + $0x48] sm:$0xff] (!%p233_p3)   ;;  %v1749_v4 = vld [vmem:[%s2074_s1 + $0x50] sm:$0xff] (!%p233_p3)  }
   0x7   : > { %236 = sbr.rel (%p233_p3) target bundleno = 320 (0x140), region = 36  ;;  %v1746_v1 = vld [vmem:[%s2074_s1] sm:$0xff] (!%p233_p3)   ;;  %1593 = vmatprep.subr.bf16.mxu0 (!%p233_p3), %v1745_v0  ;;  %1705 = vmatprep.subr.bf16.mxu1 (!%p233_p3), %v1745_v0  ;;  %v1748_v3 = vld [vmem:[%s2074_s1 + $0x8] sm:$0xff] (!%p233_p3)   ;;  %p287_p4 = scmp.lt.s32.totalorder (!%p233_p3), %s1375_s21, 255  ;;  %v1750_v5 = vld [vmem:[%s2074_s1 + $0x10] sm:$0xff] (!%p233_p3)  }
   0x8   : > { %1594 = vmatpush3.bf16.msra.mxu0 (!%p233_p3), %v1746_v1  ;;  %1713 = vmatpush3.bf16.msra.mxu1 (!%p233_p3), %v1746_v1  ;;  %v1751_v6 = vld [vmem:[%s2074_s1 + $0x58] sm:$0xff] (!%p233_p3)   ;;  %v1753_v8 = vld [vmem:[%s2074_s1 + $0x60] sm:$0xff] (!%p233_p3)   ;;  %v1755_v10 = vld [vmem:[%s2074_s1 + $0x68] sm:$0xff] (!%p233_p3)  }
   0x9   : > { %1595 = vmatprep.subr.bf16.mxu0 (!%p233_p3), %v1747_v2  ;;  %1706 = vmatprep.subr.bf16.mxu1 (!%p233_p3), %v1747_v2  ;;  %v1752_v7 = vld [vmem:[%s2074_s1 + $0x18] sm:$0xff] (!%p233_p3)   ;;  %v1754_v9 = vld [vmem:[%s2074_s1 + $0x20] sm:$0xff] (!%p233_p3)   ;;  %v1756_v13 = vld [vmem:[%s2074_s1 + $0x28] sm:$0xff] (!%p233_p3)  }
   0xa   : > { %v1757_v14 = vld [vmem:[%s2074_s1 + $0x70] sm:$0xff] (!%p233_p3)   ;;  %v1759_v16 = vld [vmem:[%s2074_s1 + $0x78] sm:$0xff] (!%p233_p3)   ;;  %v1976_v51 = vld [vmem:[%s2075_s2] ss:$0 sm:$0xff] (!%p233_p3) }
   0xb   : > { %v1758_v15 = vld [vmem:[%s2074_s1 + $0x30] sm:$0xff] (!%p233_p3)   ;;  %v1760_v17 = vld [vmem:[%s2074_s1 + $0x38] sm:$0xff] (!%p233_p3)  }
   0xc   : > { %1596 = vmatpush3.bf16.msra.mxu0 (!%p233_p3), %v1748_v3  ;;  %1714 = vmatpush3.bf16.msra.mxu1 (!%p233_p3), %v1748_v3 }
   0xd   : > { %1597 = vmatprep.subr.bf16.mxu0 (!%p233_p3), %v1749_v4  ;;  %1707 = vmatprep.subr.bf16.mxu1 (!%p233_p3), %v1749_v4 }
   0xe   : > { %s2083_s21 = smov (!%p287_p4, %s1375_s21), 255 }
   0xf   : > { %s1465_s10 = sshll.u32 %s2083_s21, 3 }
  0x10   : > { %1598 = vmatpush3.bf16.msra.mxu0 %v1750_v5  ;;  %1715 = vmatpush3.bf16.msra.mxu1 %v1750_v5  ;;  %s1911_s15 = scalar_lea.vmem %s2073_s0, %s1465_s10  ;;  %s1971_s11 = scalar_lea.vmem %s2076_s3, %s1465_s10 }
  0x11   : > { %1599 = vmatprep.subr.bf16.mxu0 %v1751_v6  ;;  %1708 = vmatprep.subr.bf16.mxu1 %v1751_v6  ;;  %v1763_v11 = vld [vmem:[%s1911_s15 + $0x4] ss:$8 sps:$4 sm:$0xff]   ;;  %v1761_v18 = vld [vmem:[%s1911_s15] ss:$8 sps:$4 sm:$0xff]   ;;  %v1767_v20 = vld [vmem:[%s1911_s15 + $0x14] ss:$8 sps:$4 sm:$0xff]  }
  0x12   : > { %v1766_v12 = vld [vmem:[%s1911_s15 + $0x84] ss:$8 sps:$4 sm:$0xff]   ;;  %748 = vmatprep.mubr.bf16.mxu0 %v1763_v11  ;;  %v1764_v19 = vld [vmem:[%s1911_s15 + $0x80] ss:$8 sps:$4 sm:$0xff]   ;;  %v1769_v21 = vld [vmem:[%s1911_s15 + $0x94] ss:$8 sps:$4 sm:$0xff]  }
  0x13   : > { %812 = vmatprep.mubr.bf16.mxu1 %v1766_v12  ;;  %v1771_v22 = vld [vmem:[%s1911_s15 + $0x10] ss:$8 sps:$4 sm:$0xff]   ;;  %v1773_v24 = vld [vmem:[%s1911_s15 + $0x24] ss:$8 sps:$4 sm:$0xff]   ;;  %v1777_v26 = vld [vmem:[%s1911_s15 + $0x20] ss:$8 sps:$4 sm:$0xff]  }
  0x14   : > { %1600 = vmatpush3.bf16.msra.mxu0 %v1752_v7  ;;  %1716 = vmatpush3.bf16.msra.mxu1 %v1752_v7  ;;  %v1772_v23 = vld [vmem:[%s1911_s15 + $0x90] ss:$8 sps:$4 sm:$0xff]   ;;  %v1775_v25 = vld [vmem:[%s1911_s15 + $0xa4] ss:$8 sps:$4 sm:$0xff]   ;;  %v1778_v27 = vld [vmem:[%s1911_s15 + $0xa0] ss:$8 sps:$4 sm:$0xff]  }
  0x15   : > { %1601 = vmatprep.subr.bf16.mxu0 %v1753_v8  ;;  %1709 = vmatprep.subr.bf16.mxu1 %v1753_v8  ;;  %v1779_v28 = vld [vmem:[%s1911_s15 + $0x34] ss:$8 sps:$4 sm:$0xff]   ;;  %v1783_v30 = vld [vmem:[%s1911_s15 + $0x30] ss:$8 sps:$4 sm:$0xff]   ;;  %v1785_v32 = vld [vmem:[%s1911_s15 + $0x44] ss:$8 sps:$4 sm:$0xff]  }
  0x16   : > { %v1781_v29 = vld [vmem:[%s1911_s15 + $0xb4] ss:$8 sps:$4 sm:$0xff]   ;;  %v1784_v31 = vld [vmem:[%s1911_s15 + $0xb0] ss:$8 sps:$4 sm:$0xff]   ;;  %v1787_v33 = vld [vmem:[%s1911_s15 + $0xc4] ss:$8 sps:$4 sm:$0xff]  }
  0x17   : > { %v1789_v34 = vld [vmem:[%s1911_s15 + $0x40] ss:$8 sps:$4 sm:$0xff]   ;;  %v1791_v36 = vld [vmem:[%s1911_s15 + $0x54] ss:$8 sps:$4 sm:$0xff]   ;;  %v1795_v38 = vld [vmem:[%s1911_s15 + $0x50] ss:$8 sps:$4 sm:$0xff]  }
  0x18   : > { %1602 = vmatpush3.bf16.msra.mxu0 %v1754_v9  ;;  %1717 = vmatpush3.bf16.msra.mxu1 %v1754_v9  ;;  %v1790_v35 = vld [vmem:[%s1911_s15 + $0xc0] ss:$8 sps:$4 sm:$0xff]   ;;  %v1793_v37 = vld [vmem:[%s1911_s15 + $0xd4] ss:$8 sps:$4 sm:$0xff]   ;;  %v1796_v39 = vld [vmem:[%s1911_s15 + $0xd0] ss:$8 sps:$4 sm:$0xff]  }
  0x19   : > { %1603 = vmatprep.subr.bf16.mxu0 %v1755_v10  ;;  %1710 = vmatprep.subr.bf16.mxu1 %v1755_v10  ;;  %v1797_v40 = vld [vmem:[%s1911_s15 + $0x64] ss:$8 sps:$4 sm:$0xff]   ;;  %v1801_v42 = vld [vmem:[%s1911_s15 + $0x60] ss:$8 sps:$4 sm:$0xff]   ;;  %v1803_v44 = vld [vmem:[%s1911_s15 + $0x74] ss:$8 sps:$4 sm:$0xff]  }
  0x1a   : > { %v1799_v41 = vld [vmem:[%s1911_s15 + $0xe4] ss:$8 sps:$4 sm:$0xff]   ;;  %v1802_v43 = vld [vmem:[%s1911_s15 + $0xe0] ss:$8 sps:$4 sm:$0xff]   ;;  %v1805_v45 = vld [vmem:[%s1911_s15 + $0xf4] ss:$8 sps:$4 sm:$0xff]  }
  0x1b   : > { %v1807_v46 = vld [vmem:[%s1911_s15 + $0x70] ss:$8 sps:$4 sm:$0xff]   ;;  %v1015_v57 = vld [vmem:[%s1971_s11] sm:$0xff]  ;;  %v1016_v1 = vld [vmem:[%s1971_s11 + $0x8] sm:$0xff]  ;;  %s1381_s10 = sshll.u32 %s2083_s21, 2 }
  0x1c   : > { %1604 = vmatpush3.bf16.msra.mxu0 %v1756_v13  ;;  %1718 = vmatpush3.bf16.msra.mxu1 %v1756_v13  ;;  %v1808_v47 = vld [vmem:[%s1911_s15 + $0xf0] ss:$8 sps:$4 sm:$0xff]   ;;  %v1031_v58 = vld [vmem:[%s1971_s11 + $0x80] sm:$0xff]  ;;  %v1032_v2 = vld [vmem:[%s1971_s11 + $0x88] sm:$0xff]  ;;  %s1990_s19 = scalar_lea.vmem %s2077_s4, %s1381_s10 }
  0x1d   : > { %1605 = vmatprep.subr.bf16.mxu0 %v1757_v14  ;;  %1711 = vmatprep.subr.bf16.mxu1 %v1757_v14 }
  0x20   : > { %1606 = vmatpush3.bf16.msra.mxu0 %v1758_v15  ;;  %1719 = vmatpush3.bf16.msra.mxu1 %v1758_v15 }
  0x21   : > { %1607 = vmatprep.subr.bf16.mxu0 %v1759_v16  ;;  %1712 = vmatprep.subr.bf16.mxu1 %v1759_v16 }
  0x24   : > { %1608 = vmatpush3.bf16.msra.mxu0 %v1760_v17  ;;  %1720 = vmatpush3.bf16.msra.mxu1 %v1760_v17 }
  0x27   : > { %749 = vmatmul.mubr.bf16.vlgmr.msra.gmra.mrb[0].mxu0 %v1761_v18  ;;  %813 = vmatmul.mubr.bf16.vlgmr.msra.gmra.mrb[0].mxu1 %v1764_v19  ;;  %v1017_v19 = vld [vmem:[%s1971_s11 + $0x10] sm:$0xff] }
  0x28   : > { %756 = vmatprep.mubr.bf16.mxu0 %v1767_v20  ;;  %820 = vmatprep.mubr.bf16.mxu1 %v1769_v21  ;;  %v1033_v20 = vld [vmem:[%s1971_s11 + $0x90] sm:$0xff] }
  0x2f   : > { %757 = vmatmul.mubr.bf16.gmra.mrb[4].mxu0 %v1771_v22  ;;  %821 = vmatmul.mubr.bf16.gmra.mrb[4].mxu1 %v1772_v23 }
  0x30   : > { %764 = vmatprep.mubr.bf16.mxu0 %v1773_v24  ;;  %828 = vmatprep.mubr.bf16.mxu1 %v1775_v25 }
  0x37   : > { %765 = vmatmul.mubr.bf16.gmra.mrb[8].mxu0 %v1777_v26  ;;  %829 = vmatmul.mubr.bf16.gmra.mrb[8].mxu1 %v1778_v27  ;;  %v1018_v27 = vld [vmem:[%s1971_s11 + $0x18] sm:$0xff] }
  0x38   : > { %772 = vmatprep.mubr.bf16.mxu0 %v1779_v28  ;;  %836 = vmatprep.mubr.bf16.mxu1 %v1781_v29  ;;  %v1034_v28 = vld [vmem:[%s1971_s11 + $0x98] sm:$0xff] }
  0x3f   : > { %773 = vmatmul.mubr.bf16.gmra.mrb[12].mxu0 %v1783_v30  ;;  %837 = vmatmul.mubr.bf16.gmra.mrb[12].mxu1 %v1784_v31 }
  0x40   : > { %780 = vmatprep.mubr.bf16.mxu0 %v1785_v32  ;;  %844 = vmatprep.mubr.bf16.mxu1 %v1787_v33 }
  0x47   : > { %781 = vmatmul.mubr.bf16.gmra.mrb[16].mxu0 %v1789_v34  ;;  %845 = vmatmul.mubr.bf16.gmra.mrb[16].mxu1 %v1790_v35 }
  0x48   : > { %788 = vmatprep.mubr.bf16.mxu0 %v1791_v36  ;;  %852 = vmatprep.mubr.bf16.mxu1 %v1793_v37 }
  0x4f   : > { %789 = vmatmul.mubr.bf16.gmra.mrb[20].mxu0 %v1795_v38  ;;  %853 = vmatmul.mubr.bf16.gmra.mrb[20].mxu1 %v1796_v39 }
  0x50   : > { %796 = vmatprep.mubr.bf16.mxu0 %v1797_v40  ;;  %860 = vmatprep.mubr.bf16.mxu1 %v1799_v41 }
  0x57   : > { %797 = vmatmul.mubr.bf16.gmra.mrb[24].mxu0 %v1801_v42  ;;  %861 = vmatmul.mubr.bf16.gmra.mrb[24].mxu1 %v1802_v43 }
  0x58   : > { %804 = vmatprep.mubr.bf16.mxu0 %v1803_v44  ;;  %868 = vmatprep.mubr.bf16.mxu1 %v1805_v45  ;;  %v1019_v45 = vld [vmem:[%s1971_s11 + $0x20] sm:$0xff] }
  0x5f   : > { %805 = vmatmul.mubr.bf16.gmra.mrb[28].mxu0 %v1807_v46  ;;  %869 = vmatmul.mubr.bf16.gmra.mrb[28].mxu1 %v1808_v47  ;;  %v1035_v46 = vld [vmem:[%s1971_s11 + $0xa0] sm:$0xff] }
  0xfa   : > { %v1609_v48 = vpop.f32.mrb[0].mxu0  ;;  %v1657_v49 = vpop.f32.mrb[0].mxu1 }
  0xfb   : > { %v1610_v50 = vpop.f32.mrb[1].mxu0  ;;  %v1658_v52 = vpop.f32.mrb[1].mxu1 }
  0xfc   : > { %v1611_v53 = vadd.f32 %v1610_v50, %v1609_v48  ;;  %v1659_v54 = vadd.f32 %v1658_v52, %v1657_v49  ;;  %v1612_v55 = vpop.f32.mrb[2].mxu0  ;;  %v1660_v56 = vpop.f32.mrb[2].mxu1 }
  0xfd   : > { %v1613_v59 = vpop.f32.mrb[3].mxu0  ;;  %v1661_v60 = vpop.f32.mrb[3].mxu1 }
  0xfe   : > { %v983_v61 = vadd.f32 %v1611_v53, %v1976_v51  ;;  %v999_v62 = vadd.f32 %v1659_v54, %v1976_v51  ;;  %v1614_v63 = vadd.f32 %v1613_v59, %v1612_v55  ;;  %v1662_v0 = vadd.f32 %v1661_v60, %v1660_v56  ;;  %v1020_v54 = vld [vmem:[%s1971_s11 + $0x28] sm:$0xff] }
  0xff   : > { %v1036_v55 = vld [vmem:[%s1971_s11 + $0xa8] sm:$0xff] }
 0x100   : > { %v1047_v3 = vadd.f32 %v1015_v57, %v983_v61  ;;  %v1063_v4 = vadd.f32 %v1031_v58, %v999_v62  ;;  %v984_v5 = vadd.f32 %v1614_v63, %v1976_v51  ;;  %v1000_v6 = vadd.f32 %v1662_v0, %v1976_v51 }
 0x102   : > { %v1048_v7 = vadd.f32 %v1016_v1, %v984_v5  ;;  %v1064_v8 = vadd.f32 %v1032_v2, %v1000_v6  ;;  %v1615_v9 = vpop.f32.mrb[4].mxu0  ;;  %v1663_v10 = vpop.f32.mrb[4].mxu1 }
 0x103   : > { %v1616_v11 = vpop.f32.mrb[5].mxu0  ;;  %v1664_v12 = vpop.f32.mrb[5].mxu1 }
 0x104   : > { %v1501_v13 = vpack.c.bf16 %v1048_v7, %v1047_v3  ;;  %v1541_v14 = vpack.c.bf16 %v1064_v8, %v1063_v4  ;;  %v1617_v15 = vadd.f32 %v1616_v11, %v1615_v9  ;;  %v1665_v16 = vadd.f32 %v1664_v12, %v1663_v10  ;;  %v1618_v17 = vpop.f32.mrb[6].mxu0  ;;  %v1666_v18 = vpop.f32.mrb[6].mxu1  ;;  %v1021_v8 = vld [vmem:[%s1971_s11 + $0x30] sm:$0xff] }
 0x105   : > { %v1619_v21 = vpop.f32.mrb[7].mxu0  ;;  %v1667_v22 = vpop.f32.mrb[7].mxu1  ;;  %v1037_v9 = vld [vmem:[%s1971_s11 + $0xb0] sm:$0xff] }
 0x106   : > { %1502 = vst [vmem:[%s1990_s19] sm:$0xff] %v1501_v13   ;;  %1585 = vst [vmem:[%s1990_s19 + $0x40] sm:$0xff] %v1541_v14   ;;  %v985_v23 = vadd.f32 %v1617_v15, %v1976_v51  ;;  %v1001_v24 = vadd.f32 %v1665_v16, %v1976_v51  ;;  %v1620_v25 = vadd.f32 %v1619_v21, %v1618_v17  ;;  %v1022_v16 = vld [vmem:[%s1971_s11 + $0x38] sm:$0xff] }
 0x107   : > { %v1668_v26 = vadd.f32 %v1667_v22, %v1666_v18  ;;  %v1038_v17 = vld [vmem:[%s1971_s11 + $0xb8] sm:$0xff] }
 0x108   : > { %v1049_v29 = vadd.f32 %v1017_v19, %v985_v23  ;;  %v1065_v30 = vadd.f32 %v1033_v20, %v1001_v24  ;;  %v986_v31 = vadd.f32 %v1620_v25, %v1976_v51 }
 0x109   : > { %v1002_v32 = vadd.f32 %v1668_v26, %v1976_v51 }
 0x10a   : > { %v1050_v33 = vadd.f32 %v1018_v27, %v986_v31  ;;  %v1621_v35 = vpop.f32.mrb[8].mxu0  ;;  %v1669_v36 = vpop.f32.mrb[8].mxu1 }
 0x10b   : > { %v1066_v34 = vadd.f32 %v1034_v28, %v1002_v32  ;;  %v1622_v37 = vpop.f32.mrb[9].mxu0  ;;  %v1670_v38 = vpop.f32.mrb[9].mxu1 }
 0x10c   : > { %v1506_v39 = vpack.c.bf16 %v1050_v33, %v1049_v29  ;;  %v1623_v41 = vadd.f32 %v1622_v37, %v1621_v35  ;;  %v1671_v42 = vadd.f32 %v1670_v38, %v1669_v36  ;;  %v1624_v43 = vpop.f32.mrb[10].mxu0  ;;  %v1672_v44 = vpop.f32.mrb[10].mxu1  ;;  %v1039_v35 = vld [vmem:[%s1971_s11 + $0xc0] sm:$0xff] }
 0x10d   : > { %v1546_v40 = vpack.c.bf16 %v1066_v34, %v1065_v30  ;;  %v1625_v47 = vpop.f32.mrb[11].mxu0  ;;  %v1673_v48 = vpop.f32.mrb[11].mxu1  ;;  %v1023_v34 = vld [vmem:[%s1971_s11 + $0x40] sm:$0xff] }
 0x10e   : > { %1578 = vst [vmem:[%s1990_s19 + $0x8] sm:$0xff] %v1506_v39   ;;  %v987_v49 = vadd.f32 %v1623_v41, %v1976_v51  ;;  %v1003_v50 = vadd.f32 %v1671_v42, %v1976_v51  ;;  %v1626_v52 = vadd.f32 %v1625_v47, %v1624_v43  ;;  %v1674_v53 = vadd.f32 %v1673_v48, %v1672_v44  ;;  %v1024_v42 = vld [vmem:[%s1971_s11 + $0x48] sm:$0xff] }
 0x10f   : > { %1586 = vst [vmem:[%s1990_s19 + $0x48] sm:$0xff] %v1546_v40   ;;  %v1040_v43 = vld [vmem:[%s1971_s11 + $0xc8] sm:$0xff] }
 0x110   : > { %v1051_v56 = vadd.f32 %v1019_v45, %v987_v49  ;;  %v1067_v57 = vadd.f32 %v1035_v46, %v1003_v50  ;;  %v988_v58 = vadd.f32 %v1626_v52, %v1976_v51  ;;  %v1004_v59 = vadd.f32 %v1674_v53, %v1976_v51 }
 0x112   : > { %v1052_v60 = vadd.f32 %v1020_v54, %v988_v58  ;;  %v1068_v61 = vadd.f32 %v1036_v55, %v1004_v59  ;;  %v1627_v62 = vpop.f32.mrb[12].mxu0  ;;  %v1675_v63 = vpop.f32.mrb[12].mxu1 }
 0x113   : > { %v1628_v0 = vpop.f32.mrb[13].mxu0  ;;  %v1676_v1 = vpop.f32.mrb[13].mxu1 }
 0x114   : > { %v1511_v2 = vpack.c.bf16 %v1052_v60, %v1051_v56  ;;  %v1551_v3 = vpack.c.bf16 %v1068_v61, %v1067_v57  ;;  %v1629_v4 = vadd.f32 %v1628_v0, %v1627_v62  ;;  %v1677_v5 = vadd.f32 %v1676_v1, %v1675_v63  ;;  %v1630_v6 = vpop.f32.mrb[14].mxu0  ;;  %v1678_v7 = vpop.f32.mrb[14].mxu1  ;;  %v1025_v61 = vld [vmem:[%s1971_s11 + $0x50] sm:$0xff] }
 0x115   : > { %v1631_v10 = vpop.f32.mrb[15].mxu0  ;;  %v1679_v11 = vpop.f32.mrb[15].mxu1  ;;  %v1041_v62 = vld [vmem:[%s1971_s11 + $0xd0] sm:$0xff] }
 0x116   : > { %1579 = vst [vmem:[%s1990_s19 + $0x10] sm:$0xff] %v1511_v2   ;;  %1587 = vst [vmem:[%s1990_s19 + $0x50] sm:$0xff] %v1551_v3   ;;  %v989_v12 = vadd.f32 %v1629_v4, %v1976_v51  ;;  %v1005_v13 = vadd.f32 %v1677_v5, %v1976_v51  ;;  %v1632_v14 = vadd.f32 %v1631_v10, %v1630_v6  ;;  %v1026_v5 = vld [vmem:[%s1971_s11 + $0x58] sm:$0xff] }
 0x117   : > { %v1680_v15 = vadd.f32 %v1679_v11, %v1678_v7  ;;  %v1042_v6 = vld [vmem:[%s1971_s11 + $0xd8] sm:$0xff] }
 0x118   : > { %v1053_v18 = vadd.f32 %v1021_v8, %v989_v12  ;;  %v1069_v19 = vadd.f32 %v1037_v9, %v1005_v13  ;;  %v990_v20 = vadd.f32 %v1632_v14, %v1976_v51 }
 0x119   : > { %v1006_v21 = vadd.f32 %v1680_v15, %v1976_v51 }
 0x11a   : > { %v1054_v22 = vadd.f32 %v1022_v16, %v990_v20  ;;  %v1633_v24 = vpop.f32.mrb[16].mxu0  ;;  %v1681_v25 = vpop.f32.mrb[16].mxu1 }
 0x11b   : > { %v1070_v23 = vadd.f32 %v1038_v17, %v1006_v21  ;;  %v1634_v26 = vpop.f32.mrb[17].mxu0  ;;  %v1682_v27 = vpop.f32.mrb[17].mxu1 }
 0x11c   : > { %v1516_v28 = vpack.c.bf16 %v1054_v22, %v1053_v18  ;;  %v1635_v30 = vadd.f32 %v1634_v26, %v1633_v24  ;;  %v1683_v31 = vadd.f32 %v1682_v27, %v1681_v25  ;;  %v1636_v32 = vpop.f32.mrb[18].mxu0  ;;  %v1684_v33 = vpop.f32.mrb[18].mxu1  ;;  %v1043_v24 = vld [vmem:[%s1971_s11 + $0xe0] sm:$0xff] }
 0x11d   : > { %v1556_v29 = vpack.c.bf16 %v1070_v23, %v1069_v19  ;;  %v1637_v36 = vpop.f32.mrb[19].mxu0  ;;  %v1685_v37 = vpop.f32.mrb[19].mxu1  ;;  %v1027_v23 = vld [vmem:[%s1971_s11 + $0x60] sm:$0xff] }
 0x11e   : > { %1580 = vst [vmem:[%s1990_s19 + $0x18] sm:$0xff] %v1516_v28   ;;  %v991_v38 = vadd.f32 %v1635_v30, %v1976_v51  ;;  %v1007_v39 = vadd.f32 %v1683_v31, %v1976_v51  ;;  %v1638_v40 = vadd.f32 %v1637_v36, %v1636_v32  ;;  %v1686_v41 = vadd.f32 %v1685_v37, %v1684_v33  ;;  %v1028_v31 = vld [vmem:[%s1971_s11 + $0x68] sm:$0xff] }
 0x11f   : > { %1588 = vst [vmem:[%s1990_s19 + $0x58] sm:$0xff] %v1556_v29   ;;  %v1044_v32 = vld [vmem:[%s1971_s11 + $0xe8] sm:$0xff] }
 0x120   : > { %v1055_v44 = vadd.f32 %v1023_v34, %v991_v38  ;;  %v1071_v45 = vadd.f32 %v1039_v35, %v1007_v39  ;;  %v992_v46 = vadd.f32 %v1638_v40, %v1976_v51  ;;  %v1008_v47 = vadd.f32 %v1686_v41, %v1976_v51 }
 0x122   : > { %v1056_v48 = vadd.f32 %v1024_v42, %v992_v46  ;;  %v1072_v49 = vadd.f32 %v1040_v43, %v1008_v47  ;;  %v1639_v50 = vpop.f32.mrb[20].mxu0  ;;  %v1687_v52 = vpop.f32.mrb[20].mxu1 }
 0x123   : > { %v1640_v53 = vpop.f32.mrb[21].mxu0  ;;  %v1688_v54 = vpop.f32.mrb[21].mxu1 }
 0x124   : > { %v1521_v55 = vpack.c.bf16 %v1056_v48, %v1055_v44  ;;  %v1561_v56 = vpack.c.bf16 %v1072_v49, %v1071_v45  ;;  %v1641_v57 = vadd.f32 %v1640_v53, %v1639_v50  ;;  %v1689_v58 = vadd.f32 %v1688_v54, %v1687_v52  ;;  %v1642_v59 = vpop.f32.mrb[22].mxu0  ;;  %v1690_v60 = vpop.f32.mrb[22].mxu1  ;;  %v1029_v49 = vld [vmem:[%s1971_s11 + $0x70] sm:$0xff] }
 0x125   : > { %v1643_v63 = vpop.f32.mrb[23].mxu0  ;;  %v1691_v0 = vpop.f32.mrb[23].mxu1  ;;  %v1045_v50 = vld [vmem:[%s1971_s11 + $0xf0] sm:$0xff] }
 0x126   : > { %1581 = vst [vmem:[%s1990_s19 + $0x20] sm:$0xff] %v1521_v55   ;;  %1589 = vst [vmem:[%s1990_s19 + $0x60] sm:$0xff] %v1561_v56   ;;  %v993_v1 = vadd.f32 %v1641_v57, %v1976_v51  ;;  %v1009_v2 = vadd.f32 %v1689_v58, %v1976_v51  ;;  %v1644_v3 = vadd.f32 %v1643_v63, %v1642_v59  ;;  %v1030_v58 = vld [vmem:[%s1971_s11 + $0x78] sm:$0xff] }
 0x127   : > { %v1692_v4 = vadd.f32 %v1691_v0, %v1690_v60  ;;  %v1046_v59 = vld [vmem:[%s1971_s11 + $0xf8] sm:$0xff] }
 0x128   : > { %v1057_v7 = vadd.f32 %v1025_v61, %v993_v1  ;;  %v1073_v8 = vadd.f32 %v1041_v62, %v1009_v2  ;;  %v994_v9 = vadd.f32 %v1644_v3, %v1976_v51 }
 0x129   : > { %v1010_v10 = vadd.f32 %v1692_v4, %v1976_v51 }
 0x12a   : > { %v1058_v11 = vadd.f32 %v1026_v5, %v994_v9  ;;  %v1645_v13 = vpop.f32.mrb[24].mxu0  ;;  %v1693_v14 = vpop.f32.mrb[24].mxu1 }
 0x12b   : > { %v1074_v12 = vadd.f32 %v1042_v6, %v1010_v10  ;;  %v1646_v15 = vpop.f32.mrb[25].mxu0  ;;  %v1694_v16 = vpop.f32.mrb[25].mxu1 }
 0x12c   : > { %v1526_v17 = vpack.c.bf16 %v1058_v11, %v1057_v7  ;;  %v1647_v19 = vadd.f32 %v1646_v15, %v1645_v13  ;;  %v1695_v20 = vadd.f32 %v1694_v16, %v1693_v14  ;;  %v1648_v21 = vpop.f32.mrb[26].mxu0  ;;  %v1696_v22 = vpop.f32.mrb[26].mxu1 }
 0x12d   : > { %v1566_v18 = vpack.c.bf16 %v1074_v12, %v1073_v8  ;;  %v1649_v25 = vpop.f32.mrb[27].mxu0  ;;  %v1697_v26 = vpop.f32.mrb[27].mxu1 }
 0x12e   : > { %1582 = vst [vmem:[%s1990_s19 + $0x28] sm:$0xff] %v1526_v17   ;;  %v995_v27 = vadd.f32 %v1647_v19, %v1976_v51  ;;  %v1011_v28 = vadd.f32 %v1695_v20, %v1976_v51  ;;  %v1650_v29 = vadd.f32 %v1649_v25, %v1648_v21  ;;  %v1698_v30 = vadd.f32 %v1697_v26, %v1696_v22 }
 0x12f   : > { %1590 = vst [vmem:[%s1990_s19 + $0x68] sm:$0xff] %v1566_v18  }
 0x130   : > { %v1059_v33 = vadd.f32 %v1027_v23, %v995_v27  ;;  %v1075_v34 = vadd.f32 %v1043_v24, %v1011_v28  ;;  %v996_v35 = vadd.f32 %v1650_v29, %v1976_v51  ;;  %v1012_v36 = vadd.f32 %v1698_v30, %v1976_v51 }
 0x132   : > { %v1060_v37 = vadd.f32 %v1028_v31, %v996_v35  ;;  %v1076_v38 = vadd.f32 %v1044_v32, %v1012_v36  ;;  %v1651_v39 = vpop.f32.mrb[28].mxu0  ;;  %v1699_v40 = vpop.f32.mrb[28].mxu1 }
 0x133   : > { %v1652_v41 = vpop.f32.mrb[29].mxu0  ;;  %v1700_v42 = vpop.f32.mrb[29].mxu1 }
 0x134   : > { %v1531_v43 = vpack.c.bf16 %v1060_v37, %v1059_v33  ;;  %v1571_v44 = vpack.c.bf16 %v1076_v38, %v1075_v34  ;;  %v1653_v45 = vadd.f32 %v1652_v41, %v1651_v39  ;;  %v1701_v46 = vadd.f32 %v1700_v42, %v1699_v40  ;;  %v1654_v47 = vpop.f32.mrb[30].mxu0  ;;  %v1702_v48 = vpop.f32.mrb[30].mxu1 }
 0x135   : > { %v1655_v52 = vpop.f32.mrb[31].mxu0  ;;  %v1703_v53 = vpop.f32.mrb[31].mxu1 }
 0x136   : > { %1583 = vst [vmem:[%s1990_s19 + $0x30] sm:$0xff] %v1531_v43   ;;  %1591 = vst [vmem:[%s1990_s19 + $0x70] sm:$0xff] %v1571_v44   ;;  %v997_v54 = vadd.f32 %v1653_v45, %v1976_v51  ;;  %v1013_v55 = vadd.f32 %v1701_v46, %v1976_v51  ;;  %v1656_v56 = vadd.f32 %v1655_v52, %v1654_v47 }
 0x137   : > { %v1704_v57 = vadd.f32 %v1703_v53, %v1702_v48 }
 0x138   : > { %v1061_v60 = vadd.f32 %v1029_v49, %v997_v54  ;;  %v1077_v61 = vadd.f32 %v1045_v50, %v1013_v55  ;;  %v998_v62 = vadd.f32 %v1656_v56, %v1976_v51 }
 0x139   : > { %v1014_v63 = vadd.f32 %v1704_v57, %v1976_v51 }
 0x13a   : > { %v1062_v0 = vadd.f32 %v1030_v58, %v998_v62 }
 0x13b   : > { %v1078_v1 = vadd.f32 %v1046_v59, %v1014_v63 }
 0x13c   : > { %v1536_v2 = vpack.c.bf16 %v1062_v0, %v1061_v60 }
 0x13d   : > { %v1576_v3 = vpack.c.bf16 %v1078_v1, %v1077_v61 }
 0x13e   : > { %1584 = vst [vmem:[%s1990_s19 + $0x38] sm:$0xff] %v1536_v2  }
 0x13f   : > { %1592 = vst [vmem:[%s1990_s19 + $0x78] sm:$0xff] %v1576_v3  }
 0x140 PF: > { %s14_s17 = sadd.s32 1, %s1831_s17   ;;  %s2078_s15 = smov %s1827_s16 }
 0x141   : > { %p11_p5 = scmp.ge.s32.totalorder %s14_s17, 10   ;;  %s2079_s16 = smov %s2081_s18 }
 0x143   :  { %13 = sbr.rel (!%p11_p5) target bundleno = 2 (0x2), region = 83 }

// kernel: simple_video_generator.31
= control target key start
LH: loop header
LB: loop body
LE: loop exit
PB: predicated region body
PF: predicated region fallthrough
CT: control target
= control target key end

     0   :  { %s1744_s12 = smov 0   ;;  %s1746_s13 = smov 0   ;;  %s1918_s0 = inlined_call_operand.vmem [shape: bf16[8192,256], index: 0, kind: input, shape index: {}]   ;;  %s1919_s1 = inlined_call_operand.vmem [shape: bf16[256,128], index: 1, kind: input, shape index: {}]   ;;  %s1920_s2 = inlined_call_operand.vmem [shape: f32[1,128], index: 2, kind: input, shape index: {}]   ;;  %s1921_s3 = inlined_call_operand.vmem [shape: bf16[8192,128], index: 3, kind: output, shape index: {}]  }
   0x1   :  { %s1748_s14 = smov 0  }
   0x2 LB: > { %s32_s15 = sadd.s32 1, %s1718_s13  ;;  %p1267_p0 = scmp.ge.s32.totalorder %s1722_s14, 1  ;;  %s1722_s14 = sphi %s1748_s14, %s13_s14   ;;  %s1718_s13 = sphi %s1746_s13, %s1923_s13   ;;  %s1714_s12 = sphi %s1744_s12, %s1922_s12  }
   0x3   : > { %p34_p1 = scmp.ge.s32.totalorder %s32_s15, 32  ;;  %p191_p2 = scmp.lt.s32.totalorder %s1722_s14, 33 }
   0x5   : > { %s1925_s15 = smov (%p34_p1, %s32_s15), 0  ;;  %p192_p3 = pnand %p1267_p0, %p191_p2 }
   0x6   : > { %v1636_v0 = vld [vmem:[%s1919_s1 + $0x40] sm:$0xff] (!%p192_p3)   ;;  %s1268_s18 = sshll.u32 (!%p192_p3), %s1714_s12, 5  ;;  %v1638_v2 = vld [vmem:[%s1919_s1 + $0x48] sm:$0xff] (!%p192_p3)   ;;  %v1640_v4 = vld [vmem:[%s1919_s1 + $0x50] sm:$0xff] (!%p192_p3)  }
   0x7   : > { %195 = sbr.rel (%p192_p3) target bundleno = 320 (0x140), region = 32  ;;  %v1637_v1 = vld [vmem:[%s1919_s1] sm:$0xff] (!%p192_p3)   ;;  %1484 = vmatprep.subr.bf16.mxu0 (!%p192_p3), %v1636_v0  ;;  %1596 = vmatprep.subr.bf16.mxu1 (!%p192_p3), %v1636_v0  ;;  %v1639_v3 = vld [vmem:[%s1919_s1 + $0x8] sm:$0xff] (!%p192_p3)   ;;  %p236_p4 = scmp.lt.s32.totalorder (!%p192_p3), %s1268_s18, 1023  ;;  %v1641_v5 = vld [vmem:[%s1919_s1 + $0x10] sm:$0xff] (!%p192_p3)  }
   0x8   : > { %1485 = vmatpush3.bf16.msra.mxu0 (!%p192_p3), %v1637_v1  ;;  %1604 = vmatpush3.bf16.msra.mxu1 (!%p192_p3), %v1637_v1  ;;  %v1642_v6 = vld [vmem:[%s1919_s1 + $0x58] sm:$0xff] (!%p192_p3)   ;;  %v1644_v8 = vld [vmem:[%s1919_s1 + $0x60] sm:$0xff] (!%p192_p3)   ;;  %v1646_v10 = vld [vmem:[%s1919_s1 + $0x68] sm:$0xff] (!%p192_p3)  }
   0x9   : > { %1486 = vmatprep.subr.bf16.mxu0 (!%p192_p3), %v1638_v2  ;;  %1597 = vmatprep.subr.bf16.mxu1 (!%p192_p3), %v1638_v2  ;;  %v1643_v7 = vld [vmem:[%s1919_s1 + $0x18] sm:$0xff] (!%p192_p3)   ;;  %v1645_v9 = vld [vmem:[%s1919_s1 + $0x20] sm:$0xff] (!%p192_p3)   ;;  %v1647_v13 = vld [vmem:[%s1919_s1 + $0x28] sm:$0xff] (!%p192_p3)  }
   0xa   : > { %v1648_v14 = vld [vmem:[%s1919_s1 + $0x70] sm:$0xff] (!%p192_p3)   ;;  %v1650_v16 = vld [vmem:[%s1919_s1 + $0x78] sm:$0xff] (!%p192_p3)   ;;  %v1853_v51 = vld [vmem:[%s1920_s2] ss:$0 sm:$0xff] (!%p192_p3) }
   0xb   : > { %v1649_v15 = vld [vmem:[%s1919_s1 + $0x30] sm:$0xff] (!%p192_p3)   ;;  %v1651_v17 = vld [vmem:[%s1919_s1 + $0x38] sm:$0xff] (!%p192_p3)  }
   0xc   : > { %1487 = vmatpush3.bf16.msra.mxu0 (!%p192_p3), %v1639_v3  ;;  %1605 = vmatpush3.bf16.msra.mxu1 (!%p192_p3), %v1639_v3 }
   0xd   : > { %1488 = vmatprep.subr.bf16.mxu0 (!%p192_p3), %v1640_v4  ;;  %1598 = vmatprep.subr.bf16.mxu1 (!%p192_p3), %v1640_v4 }
   0xe   : > { %s1927_s18 = smov (!%p236_p4, %s1268_s18), 1023 }
   0xf   : > { %s1356_s6 = sshll.u32 %s1927_s18, 3  ;;  %s1272_s5 = sshll.u32 %s1927_s18, 2 }
  0x10   : > { %1489 = vmatpush3.bf16.msra.mxu0 %v1641_v5  ;;  %1606 = vmatpush3.bf16.msra.mxu1 %v1641_v5  ;;  %s1795_s11 = scalar_lea.vmem %s1918_s0, %s1356_s6  ;;  %s1863_s8 = scalar_lea.vmem %s1921_s3, %s1272_s5 }
  0x11   : > { %1490 = vmatprep.subr.bf16.mxu0 %v1642_v6  ;;  %1599 = vmatprep.subr.bf16.mxu1 %v1642_v6  ;;  %v1654_v11 = vld [vmem:[%s1795_s11 + $0x4] ss:$8 sps:$4 sm:$0xff]   ;;  %v1652_v18 = vld [vmem:[%s1795_s11] ss:$8 sps:$4 sm:$0xff]   ;;  %v1658_v20 = vld [vmem:[%s1795_s11 + $0x14] ss:$8 sps:$4 sm:$0xff]  }
  0x12   : > { %v1657_v12 = vld [vmem:[%s1795_s11 + $0x84] ss:$8 sps:$4 sm:$0xff]   ;;  %688 = vmatprep.mubr.bf16.mxu0 %v1654_v11  ;;  %v1655_v19 = vld [vmem:[%s1795_s11 + $0x80] ss:$8 sps:$4 sm:$0xff]   ;;  %v1660_v21 = vld [vmem:[%s1795_s11 + $0x94] ss:$8 sps:$4 sm:$0xff]  }
  0x13   : > { %752 = vmatprep.mubr.bf16.mxu1 %v1657_v12  ;;  %v1662_v22 = vld [vmem:[%s1795_s11 + $0x10] ss:$8 sps:$4 sm:$0xff]   ;;  %v1664_v24 = vld [vmem:[%s1795_s11 + $0x24] ss:$8 sps:$4 sm:$0xff]   ;;  %v1668_v26 = vld [vmem:[%s1795_s11 + $0x20] ss:$8 sps:$4 sm:$0xff]  }
  0x14   : > { %1491 = vmatpush3.bf16.msra.mxu0 %v1643_v7  ;;  %1607 = vmatpush3.bf16.msra.mxu1 %v1643_v7  ;;  %v1663_v23 = vld [vmem:[%s1795_s11 + $0x90] ss:$8 sps:$4 sm:$0xff]   ;;  %v1666_v25 = vld [vmem:[%s1795_s11 + $0xa4] ss:$8 sps:$4 sm:$0xff]   ;;  %v1669_v27 = vld [vmem:[%s1795_s11 + $0xa0] ss:$8 sps:$4 sm:$0xff]  }
  0x15   : > { %1492 = vmatprep.subr.bf16.mxu0 %v1644_v8  ;;  %1600 = vmatprep.subr.bf16.mxu1 %v1644_v8  ;;  %v1670_v28 = vld [vmem:[%s1795_s11 + $0x34] ss:$8 sps:$4 sm:$0xff]   ;;  %v1674_v30 = vld [vmem:[%s1795_s11 + $0x30] ss:$8 sps:$4 sm:$0xff]   ;;  %v1676_v32 = vld [vmem:[%s1795_s11 + $0x44] ss:$8 sps:$4 sm:$0xff]  }
  0x16   : > { %v1672_v29 = vld [vmem:[%s1795_s11 + $0xb4] ss:$8 sps:$4 sm:$0xff]   ;;  %v1675_v31 = vld [vmem:[%s1795_s11 + $0xb0] ss:$8 sps:$4 sm:$0xff]   ;;  %v1678_v33 = vld [vmem:[%s1795_s11 + $0xc4] ss:$8 sps:$4 sm:$0xff]  }
  0x17   : > { %v1680_v34 = vld [vmem:[%s1795_s11 + $0x40] ss:$8 sps:$4 sm:$0xff]   ;;  %v1682_v36 = vld [vmem:[%s1795_s11 + $0x54] ss:$8 sps:$4 sm:$0xff]   ;;  %v1686_v38 = vld [vmem:[%s1795_s11 + $0x50] ss:$8 sps:$4 sm:$0xff]  }
  0x18   : > { %1493 = vmatpush3.bf16.msra.mxu0 %v1645_v9  ;;  %1608 = vmatpush3.bf16.msra.mxu1 %v1645_v9  ;;  %v1681_v35 = vld [vmem:[%s1795_s11 + $0xc0] ss:$8 sps:$4 sm:$0xff]   ;;  %v1684_v37 = vld [vmem:[%s1795_s11 + $0xd4] ss:$8 sps:$4 sm:$0xff]   ;;  %v1687_v39 = vld [vmem:[%s1795_s11 + $0xd0] ss:$8 sps:$4 sm:$0xff]  }
  0x19   : > { %1494 = vmatprep.subr.bf16.mxu0 %v1646_v10  ;;  %1601 = vmatprep.subr.bf16.mxu1 %v1646_v10  ;;  %v1688_v40 = vld [vmem:[%s1795_s11 + $0x64] ss:$8 sps:$4 sm:$0xff]   ;;  %v1692_v42 = vld [vmem:[%s1795_s11 + $0x60] ss:$8 sps:$4 sm:$0xff]   ;;  %v1694_v44 = vld [vmem:[%s1795_s11 + $0x74] ss:$8 sps:$4 sm:$0xff]  }
  0x1a   : > { %v1690_v41 = vld [vmem:[%s1795_s11 + $0xe4] ss:$8 sps:$4 sm:$0xff]   ;;  %v1693_v43 = vld [vmem:[%s1795_s11 + $0xe0] ss:$8 sps:$4 sm:$0xff]   ;;  %v1696_v45 = vld [vmem:[%s1795_s11 + $0xf4] ss:$8 sps:$4 sm:$0xff]  }
  0x1b   : > { %v1698_v46 = vld [vmem:[%s1795_s11 + $0x70] ss:$8 sps:$4 sm:$0xff]  }
  0x1c   : > { %1495 = vmatpush3.bf16.msra.mxu0 %v1647_v13  ;;  %1609 = vmatpush3.bf16.msra.mxu1 %v1647_v13  ;;  %v1699_v47 = vld [vmem:[%s1795_s11 + $0xf0] ss:$8 sps:$4 sm:$0xff]  }
  0x1d   : > { %1496 = vmatprep.subr.bf16.mxu0 %v1648_v14  ;;  %1602 = vmatprep.subr.bf16.mxu1 %v1648_v14 }
  0x20   : > { %1497 = vmatpush3.bf16.msra.mxu0 %v1649_v15  ;;  %1610 = vmatpush3.bf16.msra.mxu1 %v1649_v15 }
  0x21   : > { %1498 = vmatprep.subr.bf16.mxu0 %v1650_v16  ;;  %1603 = vmatprep.subr.bf16.mxu1 %v1650_v16 }
  0x24   : > { %1499 = vmatpush3.bf16.msra.mxu0 %v1651_v17  ;;  %1611 = vmatpush3.bf16.msra.mxu1 %v1651_v17 }
  0x27   : > { %689 = vmatmul.mubr.bf16.vlgmr.msra.gmra.mrb[0].mxu0 %v1652_v18  ;;  %753 = vmatmul.mubr.bf16.vlgmr.msra.gmra.mrb[0].mxu1 %v1655_v19 }
  0x28   : > { %696 = vmatprep.mubr.bf16.mxu0 %v1658_v20  ;;  %760 = vmatprep.mubr.bf16.mxu1 %v1660_v21 }
  0x2f   : > { %697 = vmatmul.mubr.bf16.gmra.mrb[4].mxu0 %v1662_v22  ;;  %761 = vmatmul.mubr.bf16.gmra.mrb[4].mxu1 %v1663_v23 }
  0x30   : > { %704 = vmatprep.mubr.bf16.mxu0 %v1664_v24  ;;  %768 = vmatprep.mubr.bf16.mxu1 %v1666_v25 }
  0x37   : > { %705 = vmatmul.mubr.bf16.gmra.mrb[8].mxu0 %v1668_v26  ;;  %769 = vmatmul.mubr.bf16.gmra.mrb[8].mxu1 %v1669_v27 }
  0x38   : > { %712 = vmatprep.mubr.bf16.mxu0 %v1670_v28  ;;  %776 = vmatprep.mubr.bf16.mxu1 %v1672_v29 }
  0x3f   : > { %713 = vmatmul.mubr.bf16.gmra.mrb[12].mxu0 %v1674_v30  ;;  %777 = vmatmul.mubr.bf16.gmra.mrb[12].mxu1 %v1675_v31 }
  0x40   : > { %720 = vmatprep.mubr.bf16.mxu0 %v1676_v32  ;;  %784 = vmatprep.mubr.bf16.mxu1 %v1678_v33 }
  0x47   : > { %721 = vmatmul.mubr.bf16.gmra.mrb[16].mxu0 %v1680_v34  ;;  %785 = vmatmul.mubr.bf16.gmra.mrb[16].mxu1 %v1681_v35 }
  0x48   : > { %728 = vmatprep.mubr.bf16.mxu0 %v1682_v36  ;;  %792 = vmatprep.mubr.bf16.mxu1 %v1684_v37 }
  0x4f   : > { %729 = vmatmul.mubr.bf16.gmra.mrb[20].mxu0 %v1686_v38  ;;  %793 = vmatmul.mubr.bf16.gmra.mrb[20].mxu1 %v1687_v39 }
  0x50   : > { %736 = vmatprep.mubr.bf16.mxu0 %v1688_v40  ;;  %800 = vmatprep.mubr.bf16.mxu1 %v1690_v41 }
  0x57   : > { %737 = vmatmul.mubr.bf16.gmra.mrb[24].mxu0 %v1692_v42  ;;  %801 = vmatmul.mubr.bf16.gmra.mrb[24].mxu1 %v1693_v43 }
  0x58   : > { %744 = vmatprep.mubr.bf16.mxu0 %v1694_v44  ;;  %808 = vmatprep.mubr.bf16.mxu1 %v1696_v45 }
  0x5f   : > { %745 = vmatmul.mubr.bf16.gmra.mrb[28].mxu0 %v1698_v46  ;;  %809 = vmatmul.mubr.bf16.gmra.mrb[28].mxu1 %v1699_v47 }
  0xfa   : > { %v1500_v48 = vpop.f32.mrb[0].mxu0  ;;  %v1548_v49 = vpop.f32.mrb[0].mxu1 }
  0xfb   : > { %v1501_v50 = vpop.f32.mrb[1].mxu0  ;;  %v1549_v52 = vpop.f32.mrb[1].mxu1 }
  0xfc   : > { %v1502_v53 = vadd.f32 %v1501_v50, %v1500_v48  ;;  %v1550_v54 = vadd.f32 %v1549_v52, %v1548_v49  ;;  %v1503_v55 = vpop.f32.mrb[2].mxu0  ;;  %v1551_v56 = vpop.f32.mrb[2].mxu1 }
  0xfd   : > { %v1504_v57 = vpop.f32.mrb[3].mxu0  ;;  %v1552_v58 = vpop.f32.mrb[3].mxu1 }
  0xfe   : > { %v923_v59 = vadd.f32 %v1502_v53, %v1853_v51  ;;  %v939_v60 = vadd.f32 %v1550_v54, %v1853_v51  ;;  %v1505_v61 = vadd.f32 %v1504_v57, %v1503_v55  ;;  %v1553_v62 = vadd.f32 %v1552_v58, %v1551_v56 }
 0x100   : > { %v924_v63 = vadd.f32 %v1505_v61, %v1853_v51  ;;  %v940_v0 = vadd.f32 %v1553_v62, %v1853_v51  ;;  %v955_v1 = vmax.f32 %v923_v59, 0.0  ;;  %v971_v2 = vmax.f32 %v939_v60, 0.0 }
 0x102   : > { %v956_v3 = vmax.f32 %v924_v63, 0.0  ;;  %v972_v4 = vmax.f32 %v940_v0, 0.0  ;;  %v1506_v5 = vpop.f32.mrb[4].mxu0  ;;  %v1554_v6 = vpop.f32.mrb[4].mxu1 }
 0x103   : > { %v1507_v7 = vpop.f32.mrb[5].mxu0  ;;  %v1555_v8 = vpop.f32.mrb[5].mxu1 }
 0x104   : > { %v1392_v9 = vpack.c.bf16 %v956_v3, %v955_v1  ;;  %v1432_v10 = vpack.c.bf16 %v972_v4, %v971_v2  ;;  %v1508_v11 = vadd.f32 %v1507_v7, %v1506_v5  ;;  %v1556_v12 = vadd.f32 %v1555_v8, %v1554_v6  ;;  %v1509_v13 = vpop.f32.mrb[6].mxu0  ;;  %v1557_v14 = vpop.f32.mrb[6].mxu1 }
 0x105   : > { %v1510_v15 = vpop.f32.mrb[7].mxu0  ;;  %v1558_v16 = vpop.f32.mrb[7].mxu1 }
 0x106   : > { %1393 = vst [vmem:[%s1863_s8] sm:$0xff] %v1392_v9   ;;  %1476 = vst [vmem:[%s1863_s8 + $0x40] sm:$0xff] %v1432_v10   ;;  %v925_v17 = vadd.f32 %v1508_v11, %v1853_v51  ;;  %v941_v18 = vadd.f32 %v1556_v12, %v1853_v51  ;;  %v1511_v19 = vadd.f32 %v1510_v15, %v1509_v13 }
 0x107   : > { %v1559_v20 = vadd.f32 %v1558_v16, %v1557_v14 }
 0x108   : > { %v926_v21 = vadd.f32 %v1511_v19, %v1853_v51  ;;  %v957_v23 = vmax.f32 %v925_v17, 0.0  ;;  %v973_v24 = vmax.f32 %v941_v18, 0.0 }
 0x109   : > { %v942_v22 = vadd.f32 %v1559_v20, %v1853_v51 }
 0x10a   : > { %v958_v25 = vmax.f32 %v926_v21, 0.0  ;;  %v1512_v27 = vpop.f32.mrb[8].mxu0  ;;  %v1560_v28 = vpop.f32.mrb[8].mxu1 }
 0x10b   : > { %v974_v26 = vmax.f32 %v942_v22, 0.0  ;;  %v1513_v29 = vpop.f32.mrb[9].mxu0  ;;  %v1561_v30 = vpop.f32.mrb[9].mxu1 }
 0x10c   : > { %v1397_v31 = vpack.c.bf16 %v958_v25, %v957_v23  ;;  %v1514_v33 = vadd.f32 %v1513_v29, %v1512_v27  ;;  %v1562_v34 = vadd.f32 %v1561_v30, %v1560_v28  ;;  %v1515_v35 = vpop.f32.mrb[10].mxu0  ;;  %v1563_v36 = vpop.f32.mrb[10].mxu1 }
 0x10d   : > { %v1437_v32 = vpack.c.bf16 %v974_v26, %v973_v24  ;;  %v1516_v37 = vpop.f32.mrb[11].mxu0  ;;  %v1564_v38 = vpop.f32.mrb[11].mxu1 }
 0x10e   : > { %1469 = vst [vmem:[%s1863_s8 + $0x8] sm:$0xff] %v1397_v31   ;;  %v927_v39 = vadd.f32 %v1514_v33, %v1853_v51  ;;  %v943_v40 = vadd.f32 %v1562_v34, %v1853_v51  ;;  %v1517_v41 = vadd.f32 %v1516_v37, %v1515_v35  ;;  %v1565_v42 = vadd.f32 %v1564_v38, %v1563_v36 }
 0x10f   : > { %1477 = vst [vmem:[%s1863_s8 + $0x48] sm:$0xff] %v1437_v32  }
 0x110   : > { %v928_v43 = vadd.f32 %v1517_v41, %v1853_v51  ;;  %v944_v44 = vadd.f32 %v1565_v42, %v1853_v51  ;;  %v959_v45 = vmax.f32 %v927_v39, 0.0  ;;  %v975_v46 = vmax.f32 %v943_v40, 0.0 }
 0x112   : > { %v960_v47 = vmax.f32 %v928_v43, 0.0  ;;  %v976_v48 = vmax.f32 %v944_v44, 0.0  ;;  %v1518_v49 = vpop.f32.mrb[12].mxu0  ;;  %v1566_v50 = vpop.f32.mrb[12].mxu1 }
 0x113   : > { %v1519_v52 = vpop.f32.mrb[13].mxu0  ;;  %v1567_v53 = vpop.f32.mrb[13].mxu1 }
 0x114   : > { %v1402_v54 = vpack.c.bf16 %v960_v47, %v959_v45  ;;  %v1442_v55 = vpack.c.bf16 %v976_v48, %v975_v46  ;;  %v1520_v56 = vadd.f32 %v1519_v52, %v1518_v49  ;;  %v1568_v57 = vadd.f32 %v1567_v53, %v1566_v50  ;;  %v1521_v58 = vpop.f32.mrb[14].mxu0  ;;  %v1569_v59 = vpop.f32.mrb[14].mxu1 }
 0x115   : > { %v1522_v60 = vpop.f32.mrb[15].mxu0  ;;  %v1570_v61 = vpop.f32.mrb[15].mxu1 }
 0x116   : > { %1470 = vst [vmem:[%s1863_s8 + $0x10] sm:$0xff] %v1402_v54   ;;  %1478 = vst [vmem:[%s1863_s8 + $0x50] sm:$0xff] %v1442_v55   ;;  %v929_v62 = vadd.f32 %v1520_v56, %v1853_v51  ;;  %v945_v63 = vadd.f32 %v1568_v57, %v1853_v51  ;;  %v1523_v0 = vadd.f32 %v1522_v60, %v1521_v58 }
 0x117   : > { %v1571_v1 = vadd.f32 %v1570_v61, %v1569_v59 }
 0x118   : > { %v930_v2 = vadd.f32 %v1523_v0, %v1853_v51  ;;  %v961_v4 = vmax.f32 %v929_v62, 0.0  ;;  %v977_v5 = vmax.f32 %v945_v63, 0.0 }
 0x119   : > { %v946_v3 = vadd.f32 %v1571_v1, %v1853_v51 }
 0x11a   : > { %v962_v6 = vmax.f32 %v930_v2, 0.0  ;;  %v1524_v8 = vpop.f32.mrb[16].mxu0  ;;  %v1572_v9 = vpop.f32.mrb[16].mxu1 }
 0x11b   : > { %v978_v7 = vmax.f32 %v946_v3, 0.0  ;;  %v1525_v10 = vpop.f32.mrb[17].mxu0  ;;  %v1573_v11 = vpop.f32.mrb[17].mxu1 }
 0x11c   : > { %v1407_v12 = vpack.c.bf16 %v962_v6, %v961_v4  ;;  %v1526_v14 = vadd.f32 %v1525_v10, %v1524_v8  ;;  %v1574_v15 = vadd.f32 %v1573_v11, %v1572_v9  ;;  %v1527_v16 = vpop.f32.mrb[18].mxu0  ;;  %v1575_v17 = vpop.f32.mrb[18].mxu1 }
 0x11d   : > { %v1447_v13 = vpack.c.bf16 %v978_v7, %v977_v5  ;;  %v1528_v18 = vpop.f32.mrb[19].mxu0  ;;  %v1576_v19 = vpop.f32.mrb[19].mxu1 }
 0x11e   : > { %1471 = vst [vmem:[%s1863_s8 + $0x18] sm:$0xff] %v1407_v12   ;;  %v931_v20 = vadd.f32 %v1526_v14, %v1853_v51  ;;  %v947_v21 = vadd.f32 %v1574_v15, %v1853_v51  ;;  %v1529_v22 = vadd.f32 %v1528_v18, %v1527_v16  ;;  %v1577_v23 = vadd.f32 %v1576_v19, %v1575_v17 }
 0x11f   : > { %1479 = vst [vmem:[%s1863_s8 + $0x58] sm:$0xff] %v1447_v13  }
 0x120   : > { %v932_v24 = vadd.f32 %v1529_v22, %v1853_v51  ;;  %v948_v25 = vadd.f32 %v1577_v23, %v1853_v51  ;;  %v963_v26 = vmax.f32 %v931_v20, 0.0  ;;  %v979_v27 = vmax.f32 %v947_v21, 0.0 }
 0x122   : > { %v964_v28 = vmax.f32 %v932_v24, 0.0  ;;  %v980_v29 = vmax.f32 %v948_v25, 0.0  ;;  %v1530_v30 = vpop.f32.mrb[20].mxu0  ;;  %v1578_v31 = vpop.f32.mrb[20].mxu1 }
 0x123   : > { %v1531_v32 = vpop.f32.mrb[21].mxu0  ;;  %v1579_v33 = vpop.f32.mrb[21].mxu1 }
 0x124   : > { %v1412_v34 = vpack.c.bf16 %v964_v28, %v963_v26  ;;  %v1452_v35 = vpack.c.bf16 %v980_v29, %v979_v27  ;;  %v1532_v36 = vadd.f32 %v1531_v32, %v1530_v30  ;;  %v1580_v37 = vadd.f32 %v1579_v33, %v1578_v31  ;;  %v1533_v38 = vpop.f32.mrb[22].mxu0  ;;  %v1581_v39 = vpop.f32.mrb[22].mxu1 }
 0x125   : > { %v1534_v40 = vpop.f32.mrb[23].mxu0  ;;  %v1582_v41 = vpop.f32.mrb[23].mxu1 }
 0x126   : > { %1472 = vst [vmem:[%s1863_s8 + $0x20] sm:$0xff] %v1412_v34   ;;  %1480 = vst [vmem:[%s1863_s8 + $0x60] sm:$0xff] %v1452_v35   ;;  %v933_v42 = vadd.f32 %v1532_v36, %v1853_v51  ;;  %v949_v43 = vadd.f32 %v1580_v37, %v1853_v51  ;;  %v1535_v44 = vadd.f32 %v1534_v40, %v1533_v38 }
 0x127   : > { %v1583_v45 = vadd.f32 %v1582_v41, %v1581_v39 }
 0x128   : > { %v934_v46 = vadd.f32 %v1535_v44, %v1853_v51  ;;  %v965_v48 = vmax.f32 %v933_v42, 0.0  ;;  %v981_v49 = vmax.f32 %v949_v43, 0.0 }
 0x129   : > { %v950_v47 = vadd.f32 %v1583_v45, %v1853_v51 }
 0x12a   : > { %v966_v50 = vmax.f32 %v934_v46, 0.0  ;;  %v1536_v53 = vpop.f32.mrb[24].mxu0  ;;  %v1584_v54 = vpop.f32.mrb[24].mxu1 }
 0x12b   : > { %v982_v52 = vmax.f32 %v950_v47, 0.0  ;;  %v1537_v55 = vpop.f32.mrb[25].mxu0  ;;  %v1585_v56 = vpop.f32.mrb[25].mxu1 }
 0x12c   : > { %v1417_v57 = vpack.c.bf16 %v966_v50, %v965_v48  ;;  %v1538_v59 = vadd.f32 %v1537_v55, %v1536_v53  ;;  %v1586_v60 = vadd.f32 %v1585_v56, %v1584_v54  ;;  %v1539_v61 = vpop.f32.mrb[26].mxu0  ;;  %v1587_v62 = vpop.f32.mrb[26].mxu1 }
 0x12d   : > { %v1457_v58 = vpack.c.bf16 %v982_v52, %v981_v49  ;;  %v1540_v63 = vpop.f32.mrb[27].mxu0  ;;  %v1588_v0 = vpop.f32.mrb[27].mxu1 }
 0x12e   : > { %1473 = vst [vmem:[%s1863_s8 + $0x28] sm:$0xff] %v1417_v57   ;;  %v935_v1 = vadd.f32 %v1538_v59, %v1853_v51  ;;  %v951_v2 = vadd.f32 %v1586_v60, %v1853_v51  ;;  %v1541_v3 = vadd.f32 %v1540_v63, %v1539_v61  ;;  %v1589_v4 = vadd.f32 %v1588_v0, %v1587_v62 }
 0x12f   : > { %1481 = vst [vmem:[%s1863_s8 + $0x68] sm:$0xff] %v1457_v58  }
 0x130   : > { %v936_v5 = vadd.f32 %v1541_v3, %v1853_v51  ;;  %v952_v6 = vadd.f32 %v1589_v4, %v1853_v51  ;;  %v967_v7 = vmax.f32 %v935_v1, 0.0  ;;  %v983_v8 = vmax.f32 %v951_v2, 0.0 }
 0x132   : > { %v968_v9 = vmax.f32 %v936_v5, 0.0  ;;  %v984_v10 = vmax.f32 %v952_v6, 0.0  ;;  %v1542_v11 = vpop.f32.mrb[28].mxu0  ;;  %v1590_v12 = vpop.f32.mrb[28].mxu1 }
 0x133   : > { %v1543_v13 = vpop.f32.mrb[29].mxu0  ;;  %v1591_v14 = vpop.f32.mrb[29].mxu1 }
 0x134   : > { %v1422_v15 = vpack.c.bf16 %v968_v9, %v967_v7  ;;  %v1462_v16 = vpack.c.bf16 %v984_v10, %v983_v8  ;;  %v1544_v17 = vadd.f32 %v1543_v13, %v1542_v11  ;;  %v1592_v18 = vadd.f32 %v1591_v14, %v1590_v12  ;;  %v1545_v19 = vpop.f32.mrb[30].mxu0  ;;  %v1593_v20 = vpop.f32.mrb[30].mxu1 }
 0x135   : > { %v1546_v21 = vpop.f32.mrb[31].mxu0  ;;  %v1594_v22 = vpop.f32.mrb[31].mxu1 }
 0x136   : > { %1474 = vst [vmem:[%s1863_s8 + $0x30] sm:$0xff] %v1422_v15   ;;  %1482 = vst [vmem:[%s1863_s8 + $0x70] sm:$0xff] %v1462_v16   ;;  %v937_v23 = vadd.f32 %v1544_v17, %v1853_v51  ;;  %v953_v24 = vadd.f32 %v1592_v18, %v1853_v51  ;;  %v1547_v25 = vadd.f32 %v1546_v21, %v1545_v19 }
 0x137   : > { %v1595_v26 = vadd.f32 %v1594_v22, %v1593_v20 }
 0x138   : > { %v938_v27 = vadd.f32 %v1547_v25, %v1853_v51  ;;  %v969_v29 = vmax.f32 %v937_v23, 0.0  ;;  %v985_v30 = vmax.f32 %v953_v24, 0.0 }
 0x139   : > { %v954_v28 = vadd.f32 %v1595_v26, %v1853_v51 }
 0x13a   : > { %v970_v31 = vmax.f32 %v938_v27, 0.0 }
 0x13b   : > { %v986_v32 = vmax.f32 %v954_v28, 0.0 }
 0x13c   : > { %v1427_v33 = vpack.c.bf16 %v970_v31, %v969_v29 }
 0x13d   : > { %v1467_v34 = vpack.c.bf16 %v986_v32, %v985_v30 }
 0x13e   : > { %1475 = vst [vmem:[%s1863_s8 + $0x38] sm:$0xff] %v1427_v33  }
 0x13f   : > { %1483 = vst [vmem:[%s1863_s8 + $0x78] sm:$0xff] %v1467_v34  }
 0x140 PF: > { %s13_s14 = sadd.s32 1, %s1722_s14   ;;  %s1922_s12 = smov %s1718_s13 }
 0x141   : > { %p10_p5 = scmp.ge.s32.totalorder %s13_s14, 34   ;;  %s1923_s13 = smov %s1925_s15 }
 0x143   :  { %12 = sbr.rel (!%p10_p5) target bundleno = 2 (0x2), region = 76 }

// kernel: simple_video_generator.32
= control target key start
LH: loop header
LB: loop body
LE: loop exit
PB: predicated region body
PF: predicated region fallthrough
CT: control target
= control target key end

     0   :  { %s1180_s12 = smov 0   ;;  %s1182_s13 = smov 0   ;;  %s1330_s0 = inlined_call_operand.vmem [shape: bf16[8192,128], index: 0, kind: input, shape index: {}]   ;;  %s1331_s1 = inlined_call_operand.vmem [shape: bf16[128,128], index: 1, kind: input, shape index: {}]   ;;  %s1332_s2 = inlined_call_operand.vmem [shape: f32[1,128], index: 2, kind: input, shape index: {}]   ;;  %s1333_s3 = inlined_call_operand.vmem [shape: f32[8192,128], index: 3, kind: output, shape index: {}]  }
   0x1   :  { %s1184_s14 = smov 0  }
   0x2 LB: > { %s32_s15 = sadd.s32 1, %s1154_s13  ;;  %p968_p0 = scmp.ge.s32.totalorder %s1158_s14, 1  ;;  %s1158_s14 = sphi %s1184_s14, %s13_s14   ;;  %s1154_s13 = sphi %s1182_s13, %s1335_s13   ;;  %s1150_s12 = sphi %s1180_s12, %s1334_s12  }
   0x3   : > { %p34_p1 = scmp.ge.s32.totalorder %s32_s15, 32  ;;  %p188_p2 = scmp.lt.s32.totalorder %s1158_s14, 33 }
   0x5   : > { %s1337_s15 = smov (%p34_p1, %s32_s15), 0  ;;  %p189_p3 = pnand %p968_p0, %p188_p2 }
   0x6   : > { %v1112_v0 = vld [vmem:[%s1331_s1] sm:$0xff] (!%p189_p3)   ;;  %s969_s18 = sshll.u32 (!%p189_p3), %s1150_s12, 5  ;;  %v1113_v1 = vld [vmem:[%s1331_s1 + $0x8] sm:$0xff] (!%p189_p3)   ;;  %v1114_v2 = vld [vmem:[%s1331_s1 + $0x10] sm:$0xff] (!%p189_p3)  }
   0x7   : > { %192 = sbr.rel (%p189_p3) target bundleno = 281 (0x119), region = 32  ;;  %p230_p4 = scmp.lt.s32.totalorder (!%p189_p3), %s969_s18, 1023  ;;  %1024 = vmatprep.subr.bf16.mxu0 (!%p189_p3), %v1112_v0  ;;  %1072 = vmatprep.subr.bf16.mxu1 (!%p189_p3), %v1112_v0  ;;  %v1115_v3 = vld [vmem:[%s1331_s1 + $0x18] sm:$0xff] (!%p189_p3)   ;;  %v1116_v6 = vld [vmem:[%s1331_s1 + $0x20] sm:$0xff] (!%p189_p3)   ;;  %v1117_v7 = vld [vmem:[%s1331_s1 + $0x28] sm:$0xff] (!%p189_p3)  }
   0x8   : > { %1025 = vmatpush3.bf16.msra.mxu0 (!%p189_p3), %v1112_v0  ;;  %1080 = vmatpush3.bf16.msra.mxu1 (!%p189_p3), %v1112_v0  ;;  %v1118_v8 = vld [vmem:[%s1331_s1 + $0x30] sm:$0xff] (!%p189_p3)   ;;  %v1119_v9 = vld [vmem:[%s1331_s1 + $0x38] sm:$0xff] (!%p189_p3)   ;;  %v1250_v24 = vld [vmem:[%s1332_s2] ss:$0 sm:$0xff] (!%p189_p3) }
   0x9   : > { %1026 = vmatprep.subr.bf16.mxu0 (!%p189_p3), %v1113_v1  ;;  %1073 = vmatprep.subr.bf16.mxu1 (!%p189_p3), %v1113_v1 }
   0xc   : > { %1027 = vmatpush3.bf16.msra.mxu0 (!%p189_p3), %v1113_v1  ;;  %1081 = vmatpush3.bf16.msra.mxu1 (!%p189_p3), %v1113_v1 }
   0xd   : > { %1028 = vmatprep.subr.bf16.mxu0 (!%p189_p3), %v1114_v2  ;;  %1074 = vmatprep.subr.bf16.mxu1 (!%p189_p3), %v1114_v2 }
   0xe   : > { %s1339_s18 = smov (!%p230_p4, %s969_s18), 1023 }
   0xf   : > { %s970_s23 = sshll.u32 %s1339_s18, 2  ;;  %s972_s10 = sshll.u32 %s1339_s18, 3 }
  0x10   : > { %s1213_s26 = scalar_lea.vmem %s1330_s0, %s970_s23  ;;  %1029 = vmatpush3.bf16.msra.mxu0 %v1114_v2  ;;  %1082 = vmatpush3.bf16.msra.mxu1 %v1114_v2  ;;  %s1255_s19 = scalar_lea.vmem %s1333_s3, %s972_s10 }
  0x11   : > { %v1120_v4 = vld [vmem:[%s1213_s26] sm:$0xff]   ;;  %1030 = vmatprep.subr.bf16.mxu0 %v1115_v3  ;;  %1075 = vmatprep.subr.bf16.mxu1 %v1115_v3  ;;  %v1122_v10 = vld [vmem:[%s1213_s26 + $0x8] sm:$0xff]   ;;  %v1124_v12 = vld [vmem:[%s1213_s26 + $0x10] sm:$0xff]  }
  0x12   : > { %v1121_v5 = vld [vmem:[%s1213_s26 + $0x40] sm:$0xff]   ;;  %1040 = vmatprep.mubr.bf16.mxu0 %v1120_v4  ;;  %v1123_v11 = vld [vmem:[%s1213_s26 + $0x48] sm:$0xff]   ;;  %v1125_v13 = vld [vmem:[%s1213_s26 + $0x50] sm:$0xff]  }
  0x13   : > { %1056 = vmatprep.mubr.bf16.mxu1 %v1121_v5  ;;  %v1126_v14 = vld [vmem:[%s1213_s26 + $0x18] sm:$0xff]   ;;  %v1128_v16 = vld [vmem:[%s1213_s26 + $0x20] sm:$0xff]   ;;  %v1130_v18 = vld [vmem:[%s1213_s26 + $0x28] sm:$0xff]  }
  0x14   : > { %1031 = vmatpush3.bf16.msra.mxu0 %v1115_v3  ;;  %1083 = vmatpush3.bf16.msra.mxu1 %v1115_v3  ;;  %v1127_v15 = vld [vmem:[%s1213_s26 + $0x58] sm:$0xff]   ;;  %v1129_v17 = vld [vmem:[%s1213_s26 + $0x60] sm:$0xff]   ;;  %v1131_v19 = vld [vmem:[%s1213_s26 + $0x68] sm:$0xff]  }
  0x15   : > { %1032 = vmatprep.subr.bf16.mxu0 %v1116_v6  ;;  %1076 = vmatprep.subr.bf16.mxu1 %v1116_v6  ;;  %v1132_v20 = vld [vmem:[%s1213_s26 + $0x30] sm:$0xff]   ;;  %v1134_v22 = vld [vmem:[%s1213_s26 + $0x38] sm:$0xff]  }
  0x16   : > { %v1133_v21 = vld [vmem:[%s1213_s26 + $0x70] sm:$0xff]   ;;  %v1135_v23 = vld [vmem:[%s1213_s26 + $0x78] sm:$0xff]  }
  0x18   : > { %1033 = vmatpush3.bf16.msra.mxu0 %v1116_v6  ;;  %1084 = vmatpush3.bf16.msra.mxu1 %v1116_v6 }
  0x19   : > { %1034 = vmatprep.subr.bf16.mxu0 %v1117_v7  ;;  %1077 = vmatprep.subr.bf16.mxu1 %v1117_v7 }
  0x1c   : > { %1035 = vmatpush3.bf16.msra.mxu0 %v1117_v7  ;;  %1085 = vmatpush3.bf16.msra.mxu1 %v1117_v7 }
  0x1d   : > { %1036 = vmatprep.subr.bf16.mxu0 %v1118_v8  ;;  %1078 = vmatprep.subr.bf16.mxu1 %v1118_v8 }
  0x20   : > { %1037 = vmatpush3.bf16.msra.mxu0 %v1118_v8  ;;  %1086 = vmatpush3.bf16.msra.mxu1 %v1118_v8 }
  0x21   : > { %1038 = vmatprep.subr.bf16.mxu0 %v1119_v9  ;;  %1079 = vmatprep.subr.bf16.mxu1 %v1119_v9 }
  0x24   : > { %1039 = vmatpush3.bf16.msra.mxu0 %v1119_v9  ;;  %1087 = vmatpush3.bf16.msra.mxu1 %v1119_v9 }
  0x27   : > { %1041 = vmatmul.mubr.bf16.vlgmr.msra.gmra.mrb[0].mxu0 %v1122_v10  ;;  %1057 = vmatmul.mubr.bf16.vlgmr.msra.gmra.mrb[0].mxu1 %v1123_v11 }
  0x28   : > { %1044 = vmatprep.mubr.bf16.mxu0 %v1124_v12  ;;  %1060 = vmatprep.mubr.bf16.mxu1 %v1125_v13 }
  0x2f   : > { %1045 = vmatmul.mubr.bf16.gmra.mrb[4].mxu0 %v1126_v14  ;;  %1061 = vmatmul.mubr.bf16.gmra.mrb[4].mxu1 %v1127_v15 }
  0x30   : > { %1048 = vmatprep.mubr.bf16.mxu0 %v1128_v16  ;;  %1064 = vmatprep.mubr.bf16.mxu1 %v1129_v17 }
  0x37   : > { %1049 = vmatmul.mubr.bf16.gmra.mrb[8].mxu0 %v1130_v18  ;;  %1065 = vmatmul.mubr.bf16.gmra.mrb[8].mxu1 %v1131_v19 }
  0x38   : > { %1052 = vmatprep.mubr.bf16.mxu0 %v1132_v20  ;;  %1068 = vmatprep.mubr.bf16.mxu1 %v1133_v21 }
  0x3f   : > { %1053 = vmatmul.mubr.bf16.gmra.mrb[12].mxu0 %v1134_v22  ;;  %1069 = vmatmul.mubr.bf16.gmra.mrb[12].mxu1 %v1135_v23 }
  0xfa   : > { %v1042_v25 = vpop.f32.mrb[0].mxu0  ;;  %v1058_v26 = vpop.f32.mrb[0].mxu1 }
  0xfb   : > { %v789_v27 = vadd.f32 %v1042_v25, %v1250_v24  ;;  %v805_v28 = vadd.f32 %v1058_v26, %v1250_v24  ;;  %v554_v29 = vpop.f32.mrb[1].mxu0  ;;  %v618_v30 = vpop.f32.mrb[1].mxu1 }
  0xfc   : > { %v787_v31 = vadd.f32 %v1250_v24, %v554_v29  ;;  %v803_v32 = vadd.f32 %v1250_v24, %v618_v30  ;;  %v1043_v33 = vpop.f32.mrb[2].mxu0  ;;  %v1059_v34 = vpop.f32.mrb[2].mxu1 }
  0xfd   : > { %821 = vst [vmem:[%s1255_s19 + $0x10] sm:$0xff] %v789_v27  ;;  %837 = vst [vmem:[%s1255_s19 + $0x90] sm:$0xff] %v805_v28  ;;  %v790_v35 = vadd.f32 %v1043_v33, %v1250_v24  ;;  %v806_v36 = vadd.f32 %v1059_v34, %v1250_v24  ;;  %v557_v37 = vpop.f32.mrb[3].mxu0  ;;  %v621_v38 = vpop.f32.mrb[3].mxu1 }
  0xfe   : > { %819 = vst [vmem:[%s1255_s19] sm:$0xff] %v787_v31  ;;  %835 = vst [vmem:[%s1255_s19 + $0x80] sm:$0xff] %v803_v32  ;;  %v788_v39 = vadd.f32 %v1250_v24, %v557_v37  ;;  %v804_v40 = vadd.f32 %v1250_v24, %v621_v38 }
  0xff   : > { %822 = vst [vmem:[%s1255_s19 + $0x18] sm:$0xff] %v790_v35  ;;  %838 = vst [vmem:[%s1255_s19 + $0x98] sm:$0xff] %v806_v36 }
 0x100   : > { %820 = vst [vmem:[%s1255_s19 + $0x8] sm:$0xff] %v788_v39  ;;  %836 = vst [vmem:[%s1255_s19 + $0x88] sm:$0xff] %v804_v40 }
 0x102   : > { %v1046_v41 = vpop.f32.mrb[4].mxu0  ;;  %v1062_v42 = vpop.f32.mrb[4].mxu1 }
 0x103   : > { %v793_v43 = vadd.f32 %v1046_v41, %v1250_v24  ;;  %v809_v44 = vadd.f32 %v1062_v42, %v1250_v24  ;;  %v570_v45 = vpop.f32.mrb[5].mxu0  ;;  %v634_v46 = vpop.f32.mrb[5].mxu1 }
 0x104   : > { %v791_v47 = vadd.f32 %v1250_v24, %v570_v45  ;;  %v807_v48 = vadd.f32 %v1250_v24, %v634_v46  ;;  %v1047_v49 = vpop.f32.mrb[6].mxu0  ;;  %v1063_v50 = vpop.f32.mrb[6].mxu1 }
 0x105   : > { %825 = vst [vmem:[%s1255_s19 + $0x30] sm:$0xff] %v793_v43  ;;  %841 = vst [vmem:[%s1255_s19 + $0xb0] sm:$0xff] %v809_v44  ;;  %v794_v51 = vadd.f32 %v1047_v49, %v1250_v24  ;;  %v810_v52 = vadd.f32 %v1063_v50, %v1250_v24  ;;  %v573_v53 = vpop.f32.mrb[7].mxu0  ;;  %v637_v54 = vpop.f32.mrb[7].mxu1 }
 0x106   : > { %823 = vst [vmem:[%s1255_s19 + $0x20] sm:$0xff] %v791_v47  ;;  %839 = vst [vmem:[%s1255_s19 + $0xa0] sm:$0xff] %v807_v48  ;;  %v792_v55 = vadd.f32 %v1250_v24, %v573_v53  ;;  %v808_v56 = vadd.f32 %v1250_v24, %v637_v54 }
 0x107   : > { %826 = vst [vmem:[%s1255_s19 + $0x38] sm:$0xff] %v794_v51  ;;  %842 = vst [vmem:[%s1255_s19 + $0xb8] sm:$0xff] %v810_v52 }
 0x108   : > { %824 = vst [vmem:[%s1255_s19 + $0x28] sm:$0xff] %v792_v55  ;;  %840 = vst [vmem:[%s1255_s19 + $0xa8] sm:$0xff] %v808_v56 }
 0x10a   : > { %v1050_v57 = vpop.f32.mrb[8].mxu0  ;;  %v1066_v58 = vpop.f32.mrb[8].mxu1 }
 0x10b   : > { %v797_v59 = vadd.f32 %v1050_v57, %v1250_v24  ;;  %v813_v60 = vadd.f32 %v1066_v58, %v1250_v24  ;;  %v586_v61 = vpop.f32.mrb[9].mxu0  ;;  %v650_v62 = vpop.f32.mrb[9].mxu1 }
 0x10c   : > { %v795_v63 = vadd.f32 %v1250_v24, %v586_v61  ;;  %v811_v0 = vadd.f32 %v1250_v24, %v650_v62  ;;  %v1051_v1 = vpop.f32.mrb[10].mxu0  ;;  %v1067_v2 = vpop.f32.mrb[10].mxu1 }
 0x10d   : > { %829 = vst [vmem:[%s1255_s19 + $0x50] sm:$0xff] %v797_v59  ;;  %845 = vst [vmem:[%s1255_s19 + $0xd0] sm:$0xff] %v813_v60  ;;  %v798_v3 = vadd.f32 %v1051_v1, %v1250_v24  ;;  %v814_v4 = vadd.f32 %v1067_v2, %v1250_v24  ;;  %v589_v5 = vpop.f32.mrb[11].mxu0  ;;  %v653_v6 = vpop.f32.mrb[11].mxu1 }
 0x10e   : > { %827 = vst [vmem:[%s1255_s19 + $0x40] sm:$0xff] %v795_v63  ;;  %843 = vst [vmem:[%s1255_s19 + $0xc0] sm:$0xff] %v811_v0  ;;  %v796_v7 = vadd.f32 %v1250_v24, %v589_v5  ;;  %v812_v8 = vadd.f32 %v1250_v24, %v653_v6 }
 0x10f   : > { %830 = vst [vmem:[%s1255_s19 + $0x58] sm:$0xff] %v798_v3  ;;  %846 = vst [vmem:[%s1255_s19 + $0xd8] sm:$0xff] %v814_v4 }
 0x110   : > { %828 = vst [vmem:[%s1255_s19 + $0x48] sm:$0xff] %v796_v7  ;;  %844 = vst [vmem:[%s1255_s19 + $0xc8] sm:$0xff] %v812_v8 }
 0x112   : > { %v1054_v9 = vpop.f32.mrb[12].mxu0  ;;  %v1070_v10 = vpop.f32.mrb[12].mxu1 }
 0x113   : > { %v801_v11 = vadd.f32 %v1054_v9, %v1250_v24  ;;  %v817_v12 = vadd.f32 %v1070_v10, %v1250_v24  ;;  %v602_v13 = vpop.f32.mrb[13].mxu0  ;;  %v666_v14 = vpop.f32.mrb[13].mxu1 }
 0x114   : > { %v799_v15 = vadd.f32 %v1250_v24, %v602_v13  ;;  %v815_v16 = vadd.f32 %v1250_v24, %v666_v14  ;;  %v1055_v17 = vpop.f32.mrb[14].mxu0  ;;  %v1071_v18 = vpop.f32.mrb[14].mxu1 }
 0x115   : > { %833 = vst [vmem:[%s1255_s19 + $0x70] sm:$0xff] %v801_v11  ;;  %849 = vst [vmem:[%s1255_s19 + $0xf0] sm:$0xff] %v817_v12  ;;  %v802_v19 = vadd.f32 %v1055_v17, %v1250_v24  ;;  %v818_v20 = vadd.f32 %v1071_v18, %v1250_v24  ;;  %v605_v21 = vpop.f32.mrb[15].mxu0  ;;  %v669_v22 = vpop.f32.mrb[15].mxu1 }
 0x116   : > { %831 = vst [vmem:[%s1255_s19 + $0x60] sm:$0xff] %v799_v15  ;;  %847 = vst [vmem:[%s1255_s19 + $0xe0] sm:$0xff] %v815_v16  ;;  %v800_v23 = vadd.f32 %v1250_v24, %v605_v21  ;;  %v816_v25 = vadd.f32 %v1250_v24, %v669_v22 }
 0x117   : > { %834 = vst [vmem:[%s1255_s19 + $0x78] sm:$0xff] %v802_v19  ;;  %850 = vst [vmem:[%s1255_s19 + $0xf8] sm:$0xff] %v818_v20 }
 0x118   : > { %832 = vst [vmem:[%s1255_s19 + $0x68] sm:$0xff] %v800_v23  ;;  %848 = vst [vmem:[%s1255_s19 + $0xe8] sm:$0xff] %v816_v25 }
 0x119 PF: > { %s13_s14 = sadd.s32 1, %s1158_s14   ;;  %s1334_s12 = smov %s1154_s13 }
 0x11a   : > { %p10_p5 = scmp.ge.s32.totalorder %s13_s14, 34   ;;  %s1335_s13 = smov %s1337_s15 }
 0x11c   :  { %12 = sbr.rel (!%p10_p5) target bundleno = 2 (0x2), region = 76 }

// kernel: simple_video_generator.33
= control target key start
LH: loop header
LB: loop body
LE: loop exit
PB: predicated region body
PF: predicated region fallthrough
CT: control target
= control target key end

     0   :  { %s1422_s15 = smov 0   ;;  %s1424_s16 = smov 0   ;;  %s1613_s0 = inlined_call_operand.vmem [shape: bf16[8192,128], index: 0, kind: input, shape index: {}]   ;;  %s1614_s1 = inlined_call_operand.vmem [shape: bf16[128,128], index: 1, kind: input, shape index: {}]   ;;  %s1615_s2 = inlined_call_operand.vmem [shape: f32[1,128], index: 2, kind: input, shape index: {}]   ;;  %s1616_s3 = inlined_call_operand.vmem [shape: f32[8192,128], index: 3, kind: input, shape index: {}]   ;;  %s1617_s4 = inlined_call_operand.vmem [shape: f32[8192,128], index: 4, kind: output, shape index: {}]  }
   0x1   :  { %s1426_s17 = smov 0  }
   0x2 LB: > { %s33_s18 = sadd.s32 1, %s1391_s16  ;;  %p1139_p0 = scmp.ge.s32.totalorder %s1395_s17, 1  ;;  %s1395_s17 = sphi %s1426_s17, %s14_s17   ;;  %s1391_s16 = sphi %s1424_s16, %s1619_s16   ;;  %s1387_s15 = sphi %s1422_s15, %s1618_s15  }
   0x3   : > { %p35_p1 = scmp.ge.s32.totalorder %s33_s18, 32  ;;  %p229_p2 = scmp.lt.s32.totalorder %s1395_s17, 33 }
   0x5   : > { %s1621_s18 = smov (%p35_p1, %s33_s18), 0  ;;  %p230_p3 = pnand %p1139_p0, %p229_p2 }
   0x6   : > { %v1285_v0 = vld [vmem:[%s1614_s1] sm:$0xff] (!%p230_p3)   ;;  %s1140_s21 = sshll.u32 (!%p230_p3), %s1387_s15, 5  ;;  %v1286_v1 = vld [vmem:[%s1614_s1 + $0x8] sm:$0xff] (!%p230_p3)   ;;  %v1287_v2 = vld [vmem:[%s1614_s1 + $0x10] sm:$0xff] (!%p230_p3)  }
   0x7   : > { %233 = sbr.rel (%p230_p3) target bundleno = 301 (0x12d), region = 36  ;;  %p281_p4 = scmp.lt.s32.totalorder (!%p230_p3), %s1140_s21, 1023  ;;  %1197 = vmatprep.subr.bf16.mxu0 (!%p230_p3), %v1285_v0  ;;  %1245 = vmatprep.subr.bf16.mxu1 (!%p230_p3), %v1285_v0  ;;  %v1288_v3 = vld [vmem:[%s1614_s1 + $0x18] sm:$0xff] (!%p230_p3)   ;;  %v1289_v6 = vld [vmem:[%s1614_s1 + $0x20] sm:$0xff] (!%p230_p3)   ;;  %v1290_v7 = vld [vmem:[%s1614_s1 + $0x28] sm:$0xff] (!%p230_p3)  }
   0x8   : > { %1198 = vmatpush3.bf16.msra.mxu0 (!%p230_p3), %v1285_v0  ;;  %1253 = vmatpush3.bf16.msra.mxu1 (!%p230_p3), %v1285_v0  ;;  %v1291_v8 = vld [vmem:[%s1614_s1 + $0x30] sm:$0xff] (!%p230_p3)   ;;  %v1292_v9 = vld [vmem:[%s1614_s1 + $0x38] sm:$0xff] (!%p230_p3)   ;;  %v1499_v24 = vld [vmem:[%s1615_s2] ss:$0 sm:$0xff] (!%p230_p3) }
   0x9   : > { %1199 = vmatprep.subr.bf16.mxu0 (!%p230_p3), %v1286_v1  ;;  %1246 = vmatprep.subr.bf16.mxu1 (!%p230_p3), %v1286_v1 }
   0xc   : > { %1200 = vmatpush3.bf16.msra.mxu0 (!%p230_p3), %v1286_v1  ;;  %1254 = vmatpush3.bf16.msra.mxu1 (!%p230_p3), %v1286_v1 }
   0xd   : > { %1201 = vmatprep.subr.bf16.mxu0 (!%p230_p3), %v1287_v2  ;;  %1247 = vmatprep.subr.bf16.mxu1 (!%p230_p3), %v1287_v2 }
   0xe   : > { %s1623_s21 = smov (!%p281_p4, %s1140_s21), 1023 }
   0xf   : > { %s1141_s26 = sshll.u32 %s1623_s21, 2  ;;  %s1143_s14 = sshll.u32 %s1623_s21, 3 }
  0x10   : > { %s1455_s29 = scalar_lea.vmem %s1613_s0, %s1141_s26  ;;  %1202 = vmatpush3.bf16.msra.mxu0 %v1287_v2  ;;  %1255 = vmatpush3.bf16.msra.mxu1 %v1287_v2  ;;  %s1494_s20 = scalar_lea.vmem %s1616_s3, %s1143_s14 }
  0x11   : > { %v1293_v4 = vld [vmem:[%s1455_s29] sm:$0xff]   ;;  %1203 = vmatprep.subr.bf16.mxu0 %v1288_v3  ;;  %1248 = vmatprep.subr.bf16.mxu1 %v1288_v3  ;;  %v1295_v10 = vld [vmem:[%s1455_s29 + $0x8] sm:$0xff]   ;;  %v1297_v12 = vld [vmem:[%s1455_s29 + $0x10] sm:$0xff]   ;;  %s1536_s26 = scalar_lea.vmem %s1617_s4, %s1143_s14 }
  0x12   : > { %v1294_v5 = vld [vmem:[%s1455_s29 + $0x40] sm:$0xff]   ;;  %1213 = vmatprep.mubr.bf16.mxu0 %v1293_v4  ;;  %v1296_v11 = vld [vmem:[%s1455_s29 + $0x48] sm:$0xff]   ;;  %v1298_v13 = vld [vmem:[%s1455_s29 + $0x50] sm:$0xff]  }
  0x13   : > { %1229 = vmatprep.mubr.bf16.mxu1 %v1294_v5  ;;  %v1299_v14 = vld [vmem:[%s1455_s29 + $0x18] sm:$0xff]   ;;  %v1301_v16 = vld [vmem:[%s1455_s29 + $0x20] sm:$0xff]   ;;  %v1303_v18 = vld [vmem:[%s1455_s29 + $0x28] sm:$0xff]  }
  0x14   : > { %1204 = vmatpush3.bf16.msra.mxu0 %v1288_v3  ;;  %1256 = vmatpush3.bf16.msra.mxu1 %v1288_v3  ;;  %v1300_v15 = vld [vmem:[%s1455_s29 + $0x58] sm:$0xff]   ;;  %v1302_v17 = vld [vmem:[%s1455_s29 + $0x60] sm:$0xff]   ;;  %v1304_v19 = vld [vmem:[%s1455_s29 + $0x68] sm:$0xff]  }
  0x15   : > { %1205 = vmatprep.subr.bf16.mxu0 %v1289_v6  ;;  %1249 = vmatprep.subr.bf16.mxu1 %v1289_v6  ;;  %v1305_v20 = vld [vmem:[%s1455_s29 + $0x30] sm:$0xff]   ;;  %v1307_v22 = vld [vmem:[%s1455_s29 + $0x38] sm:$0xff]   ;;  %v879_v32 = vld [vmem:[%s1494_s20] sm:$0xff] }
  0x16   : > { %v1306_v21 = vld [vmem:[%s1455_s29 + $0x70] sm:$0xff]   ;;  %v1308_v23 = vld [vmem:[%s1455_s29 + $0x78] sm:$0xff]   ;;  %v895_v34 = vld [vmem:[%s1494_s20 + $0x80] sm:$0xff] }
  0x17   : > { %v881_v26 = vld [vmem:[%s1494_s20 + $0x10] sm:$0xff]  ;;  %v882_v38 = vld [vmem:[%s1494_s20 + $0x18] sm:$0xff]  ;;  %v880_v46 = vld [vmem:[%s1494_s20 + $0x8] sm:$0xff] }
  0x18   : > { %1206 = vmatpush3.bf16.msra.mxu0 %v1289_v6  ;;  %1257 = vmatpush3.bf16.msra.mxu1 %v1289_v6  ;;  %v897_v28 = vld [vmem:[%s1494_s20 + $0x90] sm:$0xff]  ;;  %v898_v40 = vld [vmem:[%s1494_s20 + $0x98] sm:$0xff]  ;;  %v896_v48 = vld [vmem:[%s1494_s20 + $0x88] sm:$0xff] }
  0x19   : > { %1207 = vmatprep.subr.bf16.mxu0 %v1290_v7  ;;  %1250 = vmatprep.subr.bf16.mxu1 %v1290_v7  ;;  %v885_v58 = vld [vmem:[%s1494_s20 + $0x30] sm:$0xff]  ;;  %v883_v0 = vld [vmem:[%s1494_s20 + $0x20] sm:$0xff]  ;;  %v886_v6 = vld [vmem:[%s1494_s20 + $0x38] sm:$0xff] }
  0x1a   : > { %v901_v60 = vld [vmem:[%s1494_s20 + $0xb0] sm:$0xff]  ;;  %v899_v2 = vld [vmem:[%s1494_s20 + $0xa0] sm:$0xff] }
  0x1c   : > { %1208 = vmatpush3.bf16.msra.mxu0 %v1290_v7  ;;  %1258 = vmatpush3.bf16.msra.mxu1 %v1290_v7 }
  0x1d   : > { %1209 = vmatprep.subr.bf16.mxu0 %v1291_v8  ;;  %1251 = vmatprep.subr.bf16.mxu1 %v1291_v8 }
  0x20   : > { %1210 = vmatpush3.bf16.msra.mxu0 %v1291_v8  ;;  %1259 = vmatpush3.bf16.msra.mxu1 %v1291_v8 }
  0x21   : > { %1211 = vmatprep.subr.bf16.mxu0 %v1292_v9  ;;  %1252 = vmatprep.subr.bf16.mxu1 %v1292_v9 }
  0x24   : > { %1212 = vmatpush3.bf16.msra.mxu0 %v1292_v9  ;;  %1260 = vmatpush3.bf16.msra.mxu1 %v1292_v9 }
  0x27   : > { %1214 = vmatmul.mubr.bf16.vlgmr.msra.gmra.mrb[0].mxu0 %v1295_v10  ;;  %1230 = vmatmul.mubr.bf16.vlgmr.msra.gmra.mrb[0].mxu1 %v1296_v11  ;;  %v902_v11 = vld [vmem:[%s1494_s20 + $0xb8] sm:$0xff] }
  0x28   : > { %1217 = vmatprep.mubr.bf16.mxu0 %v1297_v12  ;;  %1233 = vmatprep.mubr.bf16.mxu1 %v1298_v13 }
  0x2f   : > { %1218 = vmatmul.mubr.bf16.gmra.mrb[4].mxu0 %v1299_v14  ;;  %1234 = vmatmul.mubr.bf16.gmra.mrb[4].mxu1 %v1300_v15 }
  0x30   : > { %1221 = vmatprep.mubr.bf16.mxu0 %v1301_v16  ;;  %1237 = vmatprep.mubr.bf16.mxu1 %v1302_v17  ;;  %v884_v17 = vld [vmem:[%s1494_s20 + $0x28] sm:$0xff] }
  0x37   : > { %1222 = vmatmul.mubr.bf16.gmra.mrb[8].mxu0 %v1303_v18  ;;  %1238 = vmatmul.mubr.bf16.gmra.mrb[8].mxu1 %v1304_v19  ;;  %v900_v18 = vld [vmem:[%s1494_s20 + $0xa8] sm:$0xff] }
  0x38   : > { %1225 = vmatprep.mubr.bf16.mxu0 %v1305_v20  ;;  %1241 = vmatprep.mubr.bf16.mxu1 %v1306_v21 }
  0x3f   : > { %1226 = vmatmul.mubr.bf16.gmra.mrb[12].mxu0 %v1307_v22  ;;  %1242 = vmatmul.mubr.bf16.gmra.mrb[12].mxu1 %v1308_v23 }
  0xfa   : > { %v1215_v25 = vpop.f32.mrb[0].mxu0  ;;  %v1231_v27 = vpop.f32.mrb[0].mxu1 }
  0xfb   : > { %v849_v29 = vadd.f32 %v1215_v25, %v1499_v24  ;;  %v865_v30 = vadd.f32 %v1231_v27, %v1499_v24  ;;  %v614_v31 = vpop.f32.mrb[1].mxu0  ;;  %v678_v33 = vpop.f32.mrb[1].mxu1 }
  0xfc   : > { %v847_v35 = vadd.f32 %v1499_v24, %v614_v31  ;;  %v863_v36 = vadd.f32 %v1499_v24, %v678_v33  ;;  %v1216_v37 = vpop.f32.mrb[2].mxu0  ;;  %v1232_v39 = vpop.f32.mrb[2].mxu1  ;;  %v905_v31 = vld [vmem:[%s1494_s20 + $0xd0] sm:$0xff] }
  0xfd   : > { %v913_v41 = vadd.f32 %v881_v26, %v849_v29  ;;  %v929_v42 = vadd.f32 %v897_v28, %v865_v30  ;;  %v850_v43 = vadd.f32 %v1216_v37, %v1499_v24  ;;  %v866_v44 = vadd.f32 %v1232_v39, %v1499_v24  ;;  %v617_v45 = vpop.f32.mrb[3].mxu0  ;;  %v681_v47 = vpop.f32.mrb[3].mxu1  ;;  %v889_v29 = vld [vmem:[%s1494_s20 + $0x50] sm:$0xff] }
  0xfe   : > { %v911_v49 = vadd.f32 %v879_v32, %v847_v35  ;;  %v927_v50 = vadd.f32 %v895_v34, %v863_v36  ;;  %v848_v51 = vadd.f32 %v1499_v24, %v617_v45  ;;  %v864_v52 = vadd.f32 %v1499_v24, %v681_v47  ;;  %v887_v36 = vld [vmem:[%s1494_s20 + $0x40] sm:$0xff] }
  0xff   : > { %1309 = vtanh.f32 %v913_v41  ;;  %v914_v53 = vadd.f32 %v882_v38, %v850_v43  ;;  %v930_v54 = vadd.f32 %v898_v40, %v866_v44  ;;  %v903_v38 = vld [vmem:[%s1494_s20 + $0xc0] sm:$0xff]  ;;  %v890_v43 = vld [vmem:[%s1494_s20 + $0x58] sm:$0xff] }
 0x100   : > { %1311 = vtanh.f32 %v929_v42  ;;  %v912_v55 = vadd.f32 %v880_v46, %v848_v51  ;;  %v928_v56 = vadd.f32 %v896_v48, %v864_v52 }
 0x101   : > { %1313 = vtanh.f32 %v911_v49  ;;  %v906_v49 = vld [vmem:[%s1494_s20 + $0xd8] sm:$0xff] }
 0x102   : > { %1315 = vtanh.f32 %v927_v50  ;;  %v1219_v57 = vpop.f32.mrb[4].mxu0  ;;  %v1235_v59 = vpop.f32.mrb[4].mxu1 }
 0x103   : > { %1317 = vtanh.f32 %v914_v53  ;;  %v853_v61 = vadd.f32 %v1219_v57, %v1499_v24  ;;  %v869_v62 = vadd.f32 %v1235_v59, %v1499_v24  ;;  %v630_v63 = vpop.f32.mrb[5].mxu0  ;;  %v694_v1 = vpop.f32.mrb[5].mxu1  ;;  %v904_v57 = vld [vmem:[%s1494_s20 + $0xc8] sm:$0xff] }
 0x104   : > { %1319 = vtanh.f32 %v930_v54  ;;  %v851_v3 = vadd.f32 %v1499_v24, %v630_v63  ;;  %v867_v4 = vadd.f32 %v1499_v24, %v694_v1  ;;  %v1220_v5 = vpop.f32.mrb[6].mxu0  ;;  %v1236_v7 = vpop.f32.mrb[6].mxu1 }
 0x105   : > { %1321 = vtanh.f32 %v912_v55  ;;  %v917_v8 = vadd.f32 %v885_v58, %v853_v61  ;;  %v933_v9 = vadd.f32 %v901_v60, %v869_v62  ;;  %v854_v10 = vadd.f32 %v1220_v5, %v1499_v24  ;;  %v633_v12 = vpop.f32.mrb[7].mxu0  ;;  %v697_v13 = vpop.f32.mrb[7].mxu1  ;;  %v893_v5 = vld [vmem:[%s1494_s20 + $0x70] sm:$0xff] }
 0x106   : > { %1323 = vtanh.f32 %v928_v56  ;;  %v915_v14 = vadd.f32 %v883_v0, %v851_v3  ;;  %v931_v15 = vadd.f32 %v899_v2, %v867_v4  ;;  %v870_v16 = vadd.f32 %v1236_v7, %v1499_v24  ;;  %v888_v56 = vld [vmem:[%s1494_s20 + $0x48] sm:$0xff]  ;;  %v909_v7 = vld [vmem:[%s1494_s20 + $0xf0] sm:$0xff] }
 0x107   : > { %1325 = vtanh.f32 %v917_v8  ;;  %v918_v19 = vadd.f32 %v886_v6, %v854_v10  ;;  %v852_v20 = vadd.f32 %v1499_v24, %v633_v12  ;;  %v868_v21 = vadd.f32 %v1499_v24, %v697_v13  ;;  %v891_v12 = vld [vmem:[%s1494_s20 + $0x60] sm:$0xff] }
 0x108   : > { %1327 = vtanh.f32 %v933_v9  ;;  %v934_v22 = vadd.f32 %v902_v11, %v870_v16 }
 0x109   : > { %v1310_v23 = vpop.eup %1309  ;;  %1329 = vtanh.f32 %v915_v14  ;;  %v916_v25 = vadd.f32 %v884_v17, %v852_v20  ;;  %v932_v26 = vadd.f32 %v900_v18, %v868_v21  ;;  %v907_v14 = vld [vmem:[%s1494_s20 + $0xe0] sm:$0xff] }
 0x10a   : > { %v1312_v27 = vpop.eup %1311  ;;  %977 = vst [vmem:[%s1536_s26 + $0x10] sm:$0xff] %v1310_v23  ;;  %1331 = vtanh.f32 %v931_v15  ;;  %v1223_v28 = vpop.f32.mrb[8].mxu0 }
 0x10b   : > { %v1239_v30 = vpop.f32.mrb[8].mxu1  ;;  %v1314_v32 = vpop.eup %1313  ;;  %993 = vst [vmem:[%s1536_s26 + $0x90] sm:$0xff] %v1312_v27  ;;  %1333 = vtanh.f32 %v918_v19  ;;  %v857_v33 = vadd.f32 %v1223_v28, %v1499_v24  ;;  %v894_v19 = vld [vmem:[%s1494_s20 + $0x78] sm:$0xff] }
 0x10c   : > { %v873_v34 = vadd.f32 %v1239_v30, %v1499_v24  ;;  %v646_v35 = vpop.f32.mrb[9].mxu0  ;;  %v710_v37 = vpop.f32.mrb[9].mxu1  ;;  %975 = vst [vmem:[%s1536_s26] sm:$0xff] %v1314_v32  ;;  %1335 = vtanh.f32 %v934_v22 }
 0x10d   : > { %v1316_v39 = vpop.eup %1315  ;;  %v855_v40 = vadd.f32 %v1499_v24, %v646_v35  ;;  %v871_v41 = vadd.f32 %v1499_v24, %v710_v37  ;;  %v1224_v42 = vpop.f32.mrb[10].mxu0  ;;  %1337 = vtanh.f32 %v916_v25  ;;  %v921_v46 = vadd.f32 %v889_v29, %v857_v33  ;;  %v892_v33 = vld [vmem:[%s1494_s20 + $0x68] sm:$0xff] }
 0x10e   : > { %v1240_v44 = vpop.f32.mrb[10].mxu1  ;;  %v1318_v45 = vpop.eup %1317  ;;  %991 = vst [vmem:[%s1536_s26 + $0x80] sm:$0xff] %v1316_v39  ;;  %v937_v47 = vadd.f32 %v905_v31, %v873_v34  ;;  %v858_v48 = vadd.f32 %v1224_v42, %v1499_v24  ;;  %1339 = vtanh.f32 %v932_v26  ;;  %v910_v26 = vld [vmem:[%s1494_s20 + $0xf8] sm:$0xff]  ;;  %v908_v34 = vld [vmem:[%s1494_s20 + $0xe8] sm:$0xff] }
 0x10f   : > { %v649_v50 = vpop.f32.mrb[11].mxu0  ;;  %v713_v51 = vpop.f32.mrb[11].mxu1  ;;  %978 = vst [vmem:[%s1536_s26 + $0x18] sm:$0xff] %v1318_v45  ;;  %v919_v53 = vadd.f32 %v887_v36, %v855_v40  ;;  %v935_v54 = vadd.f32 %v903_v38, %v871_v41  ;;  %v874_v55 = vadd.f32 %v1240_v44, %v1499_v24  ;;  %1341 = vtanh.f32 %v921_v46 }
 0x110   : > { %v1320_v52 = vpop.eup %1319  ;;  %v922_v59 = vadd.f32 %v890_v43, %v858_v48  ;;  %v856_v60 = vadd.f32 %v1499_v24, %v649_v50  ;;  %v872_v61 = vadd.f32 %v1499_v24, %v713_v51  ;;  %1343 = vtanh.f32 %v937_v47 }
 0x111   : > { %v1322_v58 = vpop.eup %1321  ;;  %994 = vst [vmem:[%s1536_s26 + $0x98] sm:$0xff] %v1320_v52  ;;  %v938_v63 = vadd.f32 %v906_v49, %v874_v55  ;;  %1345 = vtanh.f32 %v919_v53 }
 0x112   : > { %v1324_v62 = vpop.eup %1323  ;;  %976 = vst [vmem:[%s1536_s26 + $0x8] sm:$0xff] %v1322_v58  ;;  %v920_v1 = vadd.f32 %v888_v56, %v856_v60  ;;  %v936_v2 = vadd.f32 %v904_v57, %v872_v61  ;;  %1347 = vtanh.f32 %v935_v54  ;;  %v1227_v4 = vpop.f32.mrb[12].mxu0 }
 0x113   : > { %v1326_v0 = vpop.eup %1325  ;;  %992 = vst [vmem:[%s1536_s26 + $0x88] sm:$0xff] %v1324_v62  ;;  %v1243_v6 = vpop.f32.mrb[12].mxu1  ;;  %1349 = vtanh.f32 %v922_v59  ;;  %v861_v9 = vadd.f32 %v1227_v4, %v1499_v24 }
 0x114   : > { %v1328_v3 = vpop.eup %1327  ;;  %981 = vst [vmem:[%s1536_s26 + $0x30] sm:$0xff] %v1326_v0  ;;  %v877_v10 = vadd.f32 %v1243_v6, %v1499_v24  ;;  %v662_v11 = vpop.f32.mrb[13].mxu0  ;;  %1351 = vtanh.f32 %v938_v63 }
 0x115   : > { %v1330_v8 = vpop.eup %1329  ;;  %997 = vst [vmem:[%s1536_s26 + $0xb0] sm:$0xff] %v1328_v3  ;;  %v726_v13 = vpop.f32.mrb[13].mxu1  ;;  %v859_v16 = vadd.f32 %v1499_v24, %v662_v11  ;;  %1353 = vtanh.f32 %v920_v1  ;;  %v925_v22 = vadd.f32 %v893_v5, %v861_v9 }
 0x116   : > { %v1332_v15 = vpop.eup %1331  ;;  %979 = vst [vmem:[%s1536_s26 + $0x20] sm:$0xff] %v1330_v8  ;;  %v875_v17 = vadd.f32 %v1499_v24, %v726_v13  ;;  %v1228_v18 = vpop.f32.mrb[14].mxu0  ;;  %v941_v23 = vadd.f32 %v909_v7, %v877_v10  ;;  %1355 = vtanh.f32 %v936_v2 }
 0x117   : > { %v1244_v20 = vpop.f32.mrb[14].mxu1  ;;  %v1334_v21 = vpop.eup %1333  ;;  %995 = vst [vmem:[%s1536_s26 + $0xa0] sm:$0xff] %v1332_v15  ;;  %v862_v25 = vadd.f32 %v1228_v18, %v1499_v24  ;;  %v923_v30 = vadd.f32 %v891_v12, %v859_v16  ;;  %1357 = vtanh.f32 %v925_v22 }
 0x118   : > { %v665_v27 = vpop.f32.mrb[15].mxu0  ;;  %v729_v28 = vpop.f32.mrb[15].mxu1  ;;  %982 = vst [vmem:[%s1536_s26 + $0x38] sm:$0xff] %v1334_v21  ;;  %v939_v31 = vadd.f32 %v907_v14, %v875_v17  ;;  %v878_v32 = vadd.f32 %v1244_v20, %v1499_v24  ;;  %1359 = vtanh.f32 %v941_v23 }
 0x119   : > { %v1336_v29 = vpop.eup %1335  ;;  %v926_v36 = vadd.f32 %v894_v19, %v862_v25  ;;  %v860_v37 = vadd.f32 %v1499_v24, %v665_v27  ;;  %v876_v38 = vadd.f32 %v1499_v24, %v729_v28  ;;  %1361 = vtanh.f32 %v923_v30 }
 0x11a   : > { %v1338_v35 = vpop.eup %1337  ;;  %998 = vst [vmem:[%s1536_s26 + $0xb8] sm:$0xff] %v1336_v29  ;;  %v942_v40 = vadd.f32 %v910_v26, %v878_v32  ;;  %1363 = vtanh.f32 %v939_v31 }
 0x11b   : > { %v1340_v39 = vpop.eup %1339  ;;  %980 = vst [vmem:[%s1536_s26 + $0x28] sm:$0xff] %v1338_v35  ;;  %v924_v42 = vadd.f32 %v892_v33, %v860_v37  ;;  %v940_v43 = vadd.f32 %v908_v34, %v876_v38  ;;  %1365 = vtanh.f32 %v926_v36 }
 0x11c   : > { %v1342_v41 = vpop.eup %1341  ;;  %996 = vst [vmem:[%s1536_s26 + $0xa8] sm:$0xff] %v1340_v39  ;;  %1367 = vtanh.f32 %v942_v40 }
 0x11d   : > { %v1344_v44 = vpop.eup %1343  ;;  %985 = vst [vmem:[%s1536_s26 + $0x50] sm:$0xff] %v1342_v41  ;;  %1369 = vtanh.f32 %v924_v42 }
 0x11e   : > { %v1346_v45 = vpop.eup %1345  ;;  %1001 = vst [vmem:[%s1536_s26 + $0xd0] sm:$0xff] %v1344_v44  ;;  %1371 = vtanh.f32 %v940_v43 }
 0x11f   : > { %v1348_v24 = vpop.eup %1347  ;;  %983 = vst [vmem:[%s1536_s26 + $0x40] sm:$0xff] %v1346_v45 }
 0x120   : > { %v1350_v46 = vpop.eup %1349  ;;  %999 = vst [vmem:[%s1536_s26 + $0xc0] sm:$0xff] %v1348_v24 }
 0x121   : > { %v1352_v47 = vpop.eup %1351  ;;  %986 = vst [vmem:[%s1536_s26 + $0x58] sm:$0xff] %v1350_v46 }
 0x122   : > { %v1354_v48 = vpop.eup %1353  ;;  %1002 = vst [vmem:[%s1536_s26 + $0xd8] sm:$0xff] %v1352_v47 }
 0x123   : > { %v1356_v49 = vpop.eup %1355  ;;  %984 = vst [vmem:[%s1536_s26 + $0x48] sm:$0xff] %v1354_v48 }
 0x124   : > { %v1358_v50 = vpop.eup %1357  ;;  %1000 = vst [vmem:[%s1536_s26 + $0xc8] sm:$0xff] %v1356_v49 }
 0x125   : > { %v1360_v51 = vpop.eup %1359  ;;  %989 = vst [vmem:[%s1536_s26 + $0x70] sm:$0xff] %v1358_v50 }
 0x126   : > { %v1362_v52 = vpop.eup %1361  ;;  %1005 = vst [vmem:[%s1536_s26 + $0xf0] sm:$0xff] %v1360_v51 }
 0x127   : > { %v1364_v53 = vpop.eup %1363  ;;  %987 = vst [vmem:[%s1536_s26 + $0x60] sm:$0xff] %v1362_v52 }
 0x128   : > { %v1366_v54 = vpop.eup %1365  ;;  %1003 = vst [vmem:[%s1536_s26 + $0xe0] sm:$0xff] %v1364_v53 }
 0x129   : > { %v1368_v55 = vpop.eup %1367  ;;  %990 = vst [vmem:[%s1536_s26 + $0x78] sm:$0xff] %v1366_v54 }
 0x12a   : > { %v1370_v56 = vpop.eup %1369  ;;  %1006 = vst [vmem:[%s1536_s26 + $0xf8] sm:$0xff] %v1368_v55 }
 0x12b   : > { %v1372_v57 = vpop.eup %1371  ;;  %988 = vst [vmem:[%s1536_s26 + $0x68] sm:$0xff] %v1370_v56 }
 0x12c   : > { %1004 = vst [vmem:[%s1536_s26 + $0xe8] sm:$0xff] %v1372_v57 }
 0x12d PF: > { %s14_s17 = sadd.s32 1, %s1395_s17   ;;  %s1618_s15 = smov %s1391_s16 }
 0x12e   : > { %p11_p5 = scmp.ge.s32.totalorder %s14_s17, 34   ;;  %s1619_s16 = smov %s1621_s18 }
 0x130   :  { %13 = sbr.rel (!%p11_p5) target bundleno = 2 (0x2), region = 83 }

</bundles_post_ra>
